<compile_context>
chip_gen: v7x
topology: tpu7x:2x2x1
jax: 0.10.0
libtpu: 0.0.40
codegen_flags: <defaults>
</compile_context>

<pallas_src>
import jax
import jax.numpy as jnp
import numpy as np
from jax import lax
from jax.experimental import pallas as pl
from jax.experimental.pallas import tpu as pltpu

GUARD = 128          # zero guard lanes on each side of every activation buffer
KH = 4               # conv kernel height of every conv_keep_W layer
N_STRIDED = 6        # six stride-(2,1) layers, then one stride-(1,1) layer


# --------------------------- static layer configuration ----------------------
def _layer_cfg(backbone_depth, h_in):
    """Static geometry for the 6 strided layers + the final stride-1 layer."""
    feats = [backbone_depth, 8, 16, 32, 64, 128, 256, 512]
    cfgs, h = [], h_in
    for l in range(N_STRIDED):                  # k=(4,1), s=(2,1), p=(1,0)
        cin, cout = feats[l], feats[l + 1]
        hout = (h + 2 - KH) // 2 + 1            # == h // 2
        hb = max(1, 64 // cin)                  # output H rows handled per group
        k128 = 2 * hb * cin                     # lane stride between consecutive group windows
        wcols = hb * cout                       # lanes written per group
        wr = GUARD + (2 * hb + 1) * cin         # window width actually needed
        wrp = -(-wr // 16) * 16                 # pad K to multiple of 16 (bf16 sublane tile)
        ng = hout // hb
        assert k128 % 128 == 0 and wcols % 128 == 0, "lane alignment"
        assert hout % hb == 0
        assert k128 * (ng - 1) + wrp <= 2 * GUARD + h * cin, "padded window read OOB"
        cfgs.append(dict(cin=cin, cout=cout, hin=h, hout=hout, hb=hb,
                         ng=ng, k128=k128, wr=wr, wrp=wrp, wcols=wcols))
        h = hout
    cin, cout = feats[N_STRIDED], feats[N_STRIDED + 1]   # k=(4,1), s=(1,1), p=(0,0)
    hout = h - (KH - 1)
    assert hout == 1, "final conv_keep_W layer expects H == 4 at its input"
    return cfgs, dict(cin=cin, cout=cout, hin=h, hout=hout)


# --------------------------- host-side parameter folding ---------------------
def prepare_params(params_list, backbone_depth, h_in):
    """Fold BN(eval)+bias into (bf16 banded group weight, f32 shift) per layer. One-time, host side."""
    cfgs, c7 = _layer_cfg(backbone_depth, h_in)
    eps = 1e-5
    mats, shifts = [], []
    for l, cfg in enumerate(cfgs):
        w, b, gamma, beta, rmean, rvar = [np.asarray(t, np.float32) for t in params_list[l]]
        scale = gamma / np.sqrt(rvar + eps)
        shift = (b - rmean) * scale + beta
        wf = w[:, :, :, 0] * scale[:, None, None]               # (cout, cin, KH), BN folded
        cin, cout, hb = cfg["cin"], cfg["cout"], cfg["hb"]
        wg = np.zeros((cfg["wrp"], cfg["wcols"]), np.float32)   # banded weight, zero-padded rows
        for j in range(hb):
            for dk in range(KH):
                q0 = (GUARD - cin) + (2 * j + dk) * cin
                wg[q0:q0 + cin, j * cout:(j + 1) * cout] = wf[:, :, dk].T
        mats.append(jnp.asarray(wg, jnp.bfloat16))
        shifts.append(jnp.asarray(np.tile(shift, hb)[None, :], np.float32))
    # final layer: plain im2col weight (KH*cin, cout)
    w, b, gamma, beta, rmean, rvar = [np.asarray(t, np.float32) for t in params_list[-1]]
    scale = gamma / np.sqrt(rvar + eps)
    shift = (b - rmean) * scale + beta
    wf = w[:, :, :, 0] * scale[:, None, None]
    cin, cout = c7["cin"], c7["cout"]
    w7 = np.zeros((KH * cin, cout), np.float32)
    for dk in range(KH):
        w7[dk * cin:(dk + 1) * cin, :] = wf[:, :, dk].T
    mats.append(jnp.asarray(w7, jnp.bfloat16))
    shifts.append(jnp.asarray(shift[None, :], np.float32))
    return mats, shifts


# ------------------------------- Pallas kernel --------------------------------
def _build_kernel(cfgs, c7, rows):
    assert len(cfgs) == N_STRIDED

    def kernel(x_ref, w0, w1, w2, w3, w4, w5_hbm, w6_hbm,
               s0, s1, s2, s3, s4, s5, s6,
               o_ref,
               a0, a1, a2, a3, a4, a5, stk, w5_v, w6_v, sem):
        # (1) Kick off the late-layer weight DMAs; they overlap layers 0-4 compute.
        cp5 = pltpu.make_async_copy(w5_hbm, w5_v, sem.at[0])
        cp6 = pltpu.make_async_copy(w6_hbm, w6_v, sem.at[1])
        cp5.start()
        cp6.start()

        w_early = (w0, w1, w2, w3, w4)
        s_all = (s0, s1, s2, s3, s4, s5, s6)
        acts = (a0, a1, a2, a3, a4, a5)

        zguard = jnp.zeros((rows, GUARD), jnp.float32)   # hoisted: no per-layer re-broadcast

        act = x_ref
        for l, cfg in enumerate(cfgs):                   # six strided conv+BN+LeakyReLU layers
            nxt = acts[l]
            ng, k128 = cfg["ng"], cfg["k128"]
            wrp, wcols = cfg["wrp"], cfg["wcols"]
            m_rows = rows * ng
            interior = cfg["hout"] * cfg["cout"]

            # (2) guard-only zeroing; interior lanes are fully overwritten by the scatter below.
            nxt[:, :GUARD] = zguard
            nxt[:, GUARD + interior:] = zguard

            # (3) gather: stack the ng overlapping stride-k128 windows along rows (cast to bf16).
            for m in range(ng):
                stk[rows * m:rows * (m + 1), :wrp] = (
                    act[:, k128 * m:k128 * m + wrp].astype(jnp.bfloat16))

            # (4) ONE MXU matmul per layer against the shared banded bf16 weight (f32 accumulate).
            if l == N_STRIDED - 1:
                cp5.wait()
                w_ref = w5_v
            else:
                w_ref = w_early[l]
            z = jnp.dot(stk[:m_rows, :wrp], w_ref[...],
                        preferred_element_type=jnp.float32)
            z = z + s_all[l][...]                        # folded BN/bias shift (f32)
            z = jnp.maximum(z, 0.2 * z)                  # LeakyReLU(0.2)

            # (5) scatter back to lane-major layout; 128-aligned full-tile stores.
            for m in range(ng):
                lo = GUARD + wcols * m
                nxt[:, lo:lo + wcols] = z[rows * m:rows * (m + 1), :]
            act = nxt

        # final layer: k=(4,1), s=1, p=0, Hout == 1 -> one dense lane-major matmul.
        k7 = c7["hin"] * c7["cin"]
        cp6.wait()
        z = jnp.dot(act[:, GUARD:GUARD + k7].astype(jnp.bfloat16), w6_v[...],
                    preferred_element_type=jnp.float32)
        z = z + s_all[N_STRIDED][...]
        o_ref[...] = jnp.maximum(z, 0.2 * z)

    return kernel


# ----------------------------- fused forward pass -----------------------------
def two_layer_scale1_forward(x, mats, shifts):
    n, c, h, w = x.shape
    cfgs, c7 = _layer_cfg(c, h)
    rows = n * w
    assert rows % 16 == 0, "row count must tile the bf16 (16,128) sublane layout"

    # Cheap one-time layout glue on the tiny network input:
    # (N, C, H, W) -> rows (n, w), lanes (h, c), plus GUARD zero lanes each side.
    x_lanes = jnp.transpose(x, (0, 3, 2, 1)).reshape(rows, h * c)
    x_in = jnp.pad(x_lanes, ((0, 0), (GUARD, GUARD)))

    max_wrp = max(cfg["wrp"] for cfg in cfgs)
    max_mrows = max(rows * cfg["ng"] for cfg in cfgs)

    vmem = pl.BlockSpec(memory_space=pltpu.MemorySpace.VMEM)
    hbm = pl.BlockSpec(memory_space=pl.ANY)              # prefetched inside the kernel

    scratch_shapes = (
        [pltpu.VMEM((rows, GUARD + cfg["hout"] * cfg["cout"] + GUARD), jnp.float32)
         for cfg in cfgs]                                                  # 6 act buffers
        + [pltpu.VMEM((max_mrows, max_wrp), jnp.bfloat16),                 # group-stacking scratch
           pltpu.VMEM(mats[N_STRIDED - 1].shape, jnp.bfloat16),            # prefetched L5 weight
           pltpu.VMEM(mats[N_STRIDED].shape, jnp.bfloat16),                # prefetched L6 weight
           pltpu.SemaphoreType.DMA((2,))]
    )

    out2d = pl.pallas_call(
        _build_kernel(cfgs, c7, rows),
        out_shape=jax.ShapeDtypeStruct((rows, c7["cout"]), jnp.float32),
        in_specs=[vmem] * 6 + [hbm, hbm] + [vmem] * 7,
        out_specs=vmem,
        scratch_shapes=scratch_shapes,
    )(x_in, *mats, *shifts)

    # rows are (n, w); back to NCHW = (N, Cout, 1, W)
    return jnp.transpose(out2d.reshape(n, w, c7["cout"]), (0, 2, 1))[:, :, None, :]


# ------------------------------- parameters -----------------------------------
def init_all_params(key, backbone_depth):
    feats = [backbone_depth, 8, 16, 32, 64, 128, 256, 512]
    params = []
    for i in range(7):
        cin, cout, kh = feats[i], feats[i + 1], KH
        key, kw, kb = jax.random.split(key, 3)
        std = (2.0 / (cin * kh)) ** 0.5
        w = jax.random.normal(kw, (cout, cin, kh, 1), jnp.float32) * std
        b = jax.random.normal(kb, (cout,), jnp.float32) * 0.01
        gamma = jnp.ones((cout,), jnp.float32)
        beta = jnp.zeros((cout,), jnp.float32)
        rmean = jnp.zeros((cout,), jnp.float32)
        rvar = jnp.ones((cout,), jnp.float32)
        params.append((w, b, gamma, beta, rmean, rvar))
    return params


# ----------------------------- pure-JAX reference ------------------------------
LAYER_CFG = [((4, 1), (2, 1), (1, 0))] * 6 + [((4, 1), (1, 1), (0, 0))]


def _ref_layer(x, params, k, s, p):
    w, b, gamma, beta, rmean, rvar = params
    y = lax.conv_general_dilated(
        x, w, window_strides=s, padding=[(p[0], p[0]), (p[1], p[1])],
        dimension_numbers=("NCHW", "OIHW", "NCHW"),
        precision=lax.Precision.HIGHEST)
    y = y + b[None, :, None, None]
    eps = 1e-5
    y = ((y - rmean[None, :, None, None])
         / jnp.sqrt(rvar[None, :, None, None] + eps)
         * gamma[None, :, None, None] + beta[None, :, None, None])
    return jnp.where(y >= 0.0, y, 0.2 * y)


def _ref_forward(x, params_list):
    out = x
    for prm, (k, s, p) in zip(params_list, LAYER_CFG):
        out = _ref_layer(out, prm, k, s, p)
    return out


# ------------------------------------ main --------------------------------------
if __name__ == "__main__":
    key = jax.random.PRNGKey(0)
    backbone_depth = 4
    # H must be 256 so the final (4,1)/s=1/p=0 layer sees H=4 and emits H=1.
    N, H, W = 2, 256, 8

    kx, kp = jax.random.split(key)
    x = jax.random.normal(kx, (N, backbone_depth, H, W), jnp.float32)
    params = init_all_params(kp, backbone_depth)
    mats, shifts = prepare_params(params, backbone_depth, H)

    fwd = jax.jit(two_layer_scale1_forward)
    out = jax.block_until_ready(fwd(x, mats, shifts))
    assert out.shape == (N, 512, 1, W), out.shape

    ref = jax.block_until_ready(_ref_forward(x, params))
    # Tolerance widened vs the f32-path kernel: matmul operands are bf16 (f32 accumulate),
    # so ~1-2% relative noise accumulates over the 7 layers.
    assert bool(jnp.allclose(out, ref, atol=5e-2, rtol=5e-2)), (
        float(jnp.max(jnp.abs(out - ref))))

    print("KERNEL_OK")
</pallas_src>

<mosaic_0001>
module attributes {stable_mosaic.version = 11 : i64} {
  func.func @kernel(%arg0: memref<16x1280xf32, #tpu.memory_space<vmem>>, %arg1: memref<272x128xbf16, #tpu.memory_space<vmem>>, %arg2: memref<272x128xbf16, #tpu.memory_space<vmem>>, %arg3: memref<272x128xbf16, #tpu.memory_space<vmem>>, %arg4: memref<288x128xbf16, #tpu.memory_space<vmem>>, %arg5: memref<320x128xbf16, #tpu.memory_space<vmem>>, %arg6: memref<512x256xbf16, #tpu.memory_space<any>>, %arg7: memref<1024x512xbf16, #tpu.memory_space<any>>, %arg8: memref<1x128xf32, #tpu.memory_space<vmem>>, %arg9: memref<1x128xf32, #tpu.memory_space<vmem>>, %arg10: memref<1x128xf32, #tpu.memory_space<vmem>>, %arg11: memref<1x128xf32, #tpu.memory_space<vmem>>, %arg12: memref<1x128xf32, #tpu.memory_space<vmem>>, %arg13: memref<1x256xf32, #tpu.memory_space<vmem>>, %arg14: memref<1x512xf32, #tpu.memory_space<vmem>>, %arg15: memref<16x512xf32, #tpu.memory_space<vmem>>, %arg16: memref<16x1280xf32, #tpu.memory_space<vmem>>, %arg17: memref<16x1280xf32, #tpu.memory_space<vmem>>, %arg18: memref<16x1280xf32, #tpu.memory_space<vmem>>, %arg19: memref<16x1280xf32, #tpu.memory_space<vmem>>, %arg20: memref<16x1280xf32, #tpu.memory_space<vmem>>, %arg21: memref<16x1280xf32, #tpu.memory_space<vmem>>, %arg22: memref<128x512xbf16, #tpu.memory_space<vmem>>, %arg23: memref<512x256xbf16, #tpu.memory_space<vmem>>, %arg24: memref<1024x512xbf16, #tpu.memory_space<vmem>>, %arg25: memref<2x!tpu.dma_semaphore, #tpu.memory_space<semaphore_mem>>) attributes {dimension_semantics = [], scalar_prefetch = 0 : i64, scratch_operands = 10 : i64, tpu.core_type = #tpu.core_type<tc>} {
    %c0_i32 = arith.constant 0 : i32
    %0 = tpu.memref_slice %arg25[%c0_i32] : memref<2x!tpu.dma_semaphore, #tpu.memory_space<semaphore_mem>> -> memref<1x!tpu.dma_semaphore, #tpu.memory_space<semaphore_mem>>
    %1 = tpu.memref_squeeze %0 : memref<1x!tpu.dma_semaphore, #tpu.memory_space<semaphore_mem>> -> memref<!tpu.dma_semaphore, #tpu.memory_space<semaphore_mem>>
    tpu.enqueue_dma source(%arg6 : memref<512x256xbf16, #tpu.memory_space<any>>) target(%arg23 : memref<512x256xbf16, #tpu.memory_space<vmem>>) target_semaphore(%1 : memref<!tpu.dma_semaphore, #tpu.memory_space<semaphore_mem>>)
    %c1_i32 = arith.constant 1 : i32
    %2 = tpu.memref_slice %arg25[%c1_i32] : memref<2x!tpu.dma_semaphore, #tpu.memory_space<semaphore_mem>> -> memref<1x!tpu.dma_semaphore, #tpu.memory_space<semaphore_mem>>
    %3 = tpu.memref_squeeze %2 : memref<1x!tpu.dma_semaphore, #tpu.memory_space<semaphore_mem>> -> memref<!tpu.dma_semaphore, #tpu.memory_space<semaphore_mem>>
    tpu.enqueue_dma source(%arg7 : memref<1024x512xbf16, #tpu.memory_space<any>>) target(%arg24 : memref<1024x512xbf16, #tpu.memory_space<vmem>>) target_semaphore(%3 : memref<!tpu.dma_semaphore, #tpu.memory_space<semaphore_mem>>)
    %cst = arith.constant 0.000000e+00 : f32
    %4 = vector.broadcast %cst : f32 to vector<16x128xf32>
    %c0 = arith.constant 0 : index
    %c0_0 = arith.constant 0 : index
    %5 = vector.load %arg16[%c0, %c0_0] : memref<16x1280xf32, #tpu.memory_space<vmem>>, vector<16x128xf32>
    tpu.vector_store %arg16[%c0, %c0_0], %4 {strides = array<i32>} : memref<16x1280xf32, #tpu.memory_space<vmem>>, vector<16x128xf32>,
    %c0_1 = arith.constant 0 : index
    %c1152 = arith.constant 1152 : index
    %6 = vector.load %arg16[%c0_1, %c1152] : memref<16x1280xf32, #tpu.memory_space<vmem>>, vector<16x128xf32>
    tpu.vector_store %arg16[%c0_1, %c1152], %4 {strides = array<i32>} : memref<16x1280xf32, #tpu.memory_space<vmem>>, vector<16x128xf32>,
    %c0_2 = arith.constant 0 : index
    %c0_3 = arith.constant 0 : index
    %7 = vector.load %arg0[%c0_2, %c0_3] : memref<16x1280xf32, #tpu.memory_space<vmem>>, vector<16x272xf32>
    %8 = arith.truncf %7 : vector<16x272xf32> to vector<16x272xbf16>
    %c0_4 = arith.constant 0 : index
    %c0_5 = arith.constant 0 : index
    %9 = vector.load %arg22[%c0_4, %c0_5] : memref<128x512xbf16, #tpu.memory_space<vmem>>, vector<16x272xbf16>
    tpu.vector_store %arg22[%c0_4, %c0_5], %8 {strides = array<i32>} : memref<128x512xbf16, #tpu.memory_space<vmem>>, vector<16x272xbf16>,
    %c0_6 = arith.constant 0 : index
    %c128 = arith.constant 128 : index
    %10 = vector.load %arg0[%c0_6, %c128] : memref<16x1280xf32, #tpu.memory_space<vmem>>, vector<16x272xf32>
    %11 = arith.truncf %10 : vector<16x272xf32> to vector<16x272xbf16>
    %c16 = arith.constant 16 : index
    %c0_7 = arith.constant 0 : index
    %12 = vector.load %arg22[%c16, %c0_7] : memref<128x512xbf16, #tpu.memory_space<vmem>>, vector<16x272xbf16>
    tpu.vector_store %arg22[%c16, %c0_7], %11 {strides = array<i32>} : memref<128x512xbf16, #tpu.memory_space<vmem>>, vector<16x272xbf16>,
    %c0_8 = arith.constant 0 : index
    %c256 = arith.constant 256 : index
    %13 = vector.load %arg0[%c0_8, %c256] : memref<16x1280xf32, #tpu.memory_space<vmem>>, vector<16x272xf32>
    %14 = arith.truncf %13 : vector<16x272xf32> to vector<16x272xbf16>
    %c32 = arith.constant 32 : index
    %c0_9 = arith.constant 0 : index
    %15 = vector.load %arg22[%c32, %c0_9] : memref<128x512xbf16, #tpu.memory_space<vmem>>, vector<16x272xbf16>
    tpu.vector_store %arg22[%c32, %c0_9], %14 {strides = array<i32>} : memref<128x512xbf16, #tpu.memory_space<vmem>>, vector<16x272xbf16>,
    %c0_10 = arith.constant 0 : index
    %c384 = arith.constant 384 : index
    %16 = vector.load %arg0[%c0_10, %c384] : memref<16x1280xf32, #tpu.memory_space<vmem>>, vector<16x272xf32>
    %17 = arith.truncf %16 : vector<16x272xf32> to vector<16x272xbf16>
    %c48 = arith.constant 48 : index
    %c0_11 = arith.constant 0 : index
    %18 = vector.load %arg22[%c48, %c0_11] : memref<128x512xbf16, #tpu.memory_space<vmem>>, vector<16x272xbf16>
    tpu.vector_store %arg22[%c48, %c0_11], %17 {strides = array<i32>} : memref<128x512xbf16, #tpu.memory_space<vmem>>, vector<16x272xbf16>,
    %c0_12 = arith.constant 0 : index
    %c512 = arith.constant 512 : index
    %19 = vector.load %arg0[%c0_12, %c512] : memref<16x1280xf32, #tpu.memory_space<vmem>>, vector<16x272xf32>
    %20 = arith.truncf %19 : vector<16x272xf32> to vector<16x272xbf16>
    %c64 = arith.constant 64 : index
    %c0_13 = arith.constant 0 : index
    %21 = vector.load %arg22[%c64, %c0_13] : memref<128x512xbf16, #tpu.memory_space<vmem>>, vector<16x272xbf16>
    tpu.vector_store %arg22[%c64, %c0_13], %20 {strides = array<i32>} : memref<128x512xbf16, #tpu.memory_space<vmem>>, vector<16x272xbf16>,
    %c0_14 = arith.constant 0 : index
    %c640 = arith.constant 640 : index
    %22 = vector.load %arg0[%c0_14, %c640] : memref<16x1280xf32, #tpu.memory_space<vmem>>, vector<16x272xf32>
    %23 = arith.truncf %22 : vector<16x272xf32> to vector<16x272xbf16>
    %c80 = arith.constant 80 : index
    %c0_15 = arith.constant 0 : index
    %24 = vector.load %arg22[%c80, %c0_15] : memref<128x512xbf16, #tpu.memory_space<vmem>>, vector<16x272xbf16>
    tpu.vector_store %arg22[%c80, %c0_15], %23 {strides = array<i32>} : memref<128x512xbf16, #tpu.memory_space<vmem>>, vector<16x272xbf16>,
    %c0_16 = arith.constant 0 : index
    %c768 = arith.constant 768 : index
    %25 = vector.load %arg0[%c0_16, %c768] : memref<16x1280xf32, #tpu.memory_space<vmem>>, vector<16x272xf32>
    %26 = arith.truncf %25 : vector<16x272xf32> to vector<16x272xbf16>
    %c96 = arith.constant 96 : index
    %c0_17 = arith.constant 0 : index
    %27 = vector.load %arg22[%c96, %c0_17] : memref<128x512xbf16, #tpu.memory_space<vmem>>, vector<16x272xbf16>
    tpu.vector_store %arg22[%c96, %c0_17], %26 {strides = array<i32>} : memref<128x512xbf16, #tpu.memory_space<vmem>>, vector<16x272xbf16>,
    %c0_18 = arith.constant 0 : index
    %c896 = arith.constant 896 : index
    %28 = vector.load %arg0[%c0_18, %c896] : memref<16x1280xf32, #tpu.memory_space<vmem>>, vector<16x272xf32>
    %29 = arith.truncf %28 : vector<16x272xf32> to vector<16x272xbf16>
    %c112 = arith.constant 112 : index
    %c0_19 = arith.constant 0 : index
    %30 = vector.load %arg22[%c112, %c0_19] : memref<128x512xbf16, #tpu.memory_space<vmem>>, vector<16x272xbf16>
    tpu.vector_store %arg22[%c112, %c0_19], %29 {strides = array<i32>} : memref<128x512xbf16, #tpu.memory_space<vmem>>, vector<16x272xbf16>,
    %c0_20 = arith.constant 0 : index
    %c0_21 = arith.constant 0 : index
    %31 = vector.load %arg22[%c0_20, %c0_21] : memref<128x512xbf16, #tpu.memory_space<vmem>>, vector<128x272xbf16>
    %c0_22 = arith.constant 0 : index
    %c0_23 = arith.constant 0 : index
    %32 = vector.load %arg1[%c0_22, %c0_23] : memref<272x128xbf16, #tpu.memory_space<vmem>>, vector<272x128xbf16>
    %cst_24 = arith.constant dense<0.000000e+00> : vector<128x128xf32>
    %33 = tpu.matmul %31, %32, %cst_24 {dimension_numbers = #tpu.dot_dimension_numbers<[1], [0], [0], [1], [0, 0, 1, 1], [], []>} : vector<128x272xbf16>, vector<272x128xbf16>, vector<128x128xf32> -> vector<128x128xf32>
    %c0_25 = arith.constant 0 : index
    %c0_26 = arith.constant 0 : index
    %34 = vector.load %arg8[%c0_25, %c0_26] : memref<1x128xf32, #tpu.memory_space<vmem>>, vector<1x128xf32>
    %35 = vector.broadcast %34 : vector<1x128xf32> to vector<128x128xf32>
    %36 = arith.addf %33, %35 : vector<128x128xf32>
    %cst_27 = arith.constant 2.000000e-01 : f32
    %37 = vector.broadcast %cst_27 : f32 to vector<128x128xf32>
    %38 = arith.mulf %37, %36 : vector<128x128xf32>
    %39 = arith.maximumf %36, %38 : vector<128x128xf32>
    %40 = vector.extract_strided_slice %39 {offsets = [0, 0], sizes = [16, 128], strides = [1, 1]} : vector<128x128xf32> to vector<16x128xf32>
    %c0_28 = arith.constant 0 : index
    %c128_29 = arith.constant 128 : index
    %41 = vector.load %arg16[%c0_28, %c128_29] : memref<16x1280xf32, #tpu.memory_space<vmem>>, vector<16x128xf32>
    tpu.vector_store %arg16[%c0_28, %c128_29], %40 {strides = array<i32>} : memref<16x1280xf32, #tpu.memory_space<vmem>>, vector<16x128xf32>,
    %42 = vector.extract_strided_slice %39 {offsets = [16, 0], sizes = [16, 128], strides = [1, 1]} : vector<128x128xf32> to vector<16x128xf32>
    %c0_30 = arith.constant 0 : index
    %c256_31 = arith.constant 256 : index
    %43 = vector.load %arg16[%c0_30, %c256_31] : memref<16x1280xf32, #tpu.memory_space<vmem>>, vector<16x128xf32>
    tpu.vector_store %arg16[%c0_30, %c256_31], %42 {strides = array<i32>} : memref<16x1280xf32, #tpu.memory_space<vmem>>, vector<16x128xf32>,
    %44 = vector.extract_strided_slice %39 {offsets = [32, 0], sizes = [16, 128], strides = [1, 1]} : vector<128x128xf32> to vector<16x128xf32>
    %c0_32 = arith.constant 0 : index
    %c384_33 = arith.constant 384 : index
    %45 = vector.load %arg16[%c0_32, %c384_33] : memref<16x1280xf32, #tpu.memory_space<vmem>>, vector<16x128xf32>
    tpu.vector_store %arg16[%c0_32, %c384_33], %44 {strides = array<i32>} : memref<16x1280xf32, #tpu.memory_space<vmem>>, vector<16x128xf32>,
    %46 = vector.extract_strided_slice %39 {offsets = [48, 0], sizes = [16, 128], strides = [1, 1]} : vector<128x128xf32> to vector<16x128xf32>
    %c0_34 = arith.constant 0 : index
    %c512_35 = arith.constant 512 : index
    %47 = vector.load %arg16[%c0_34, %c512_35] : memref<16x1280xf32, #tpu.memory_space<vmem>>, vector<16x128xf32>
    tpu.vector_store %arg16[%c0_34, %c512_35], %46 {strides = array<i32>} : memref<16x1280xf32, #tpu.memory_space<vmem>>, vector<16x128xf32>,
    %48 = vector.extract_strided_slice %39 {offsets = [64, 0], sizes = [16, 128], strides = [1, 1]} : vector<128x128xf32> to vector<16x128xf32>
    %c0_36 = arith.constant 0 : index
    %c640_37 = arith.constant 640 : index
    %49 = vector.load %arg16[%c0_36, %c640_37] : memref<16x1280xf32, #tpu.memory_space<vmem>>, vector<16x128xf32>
    tpu.vector_store %arg16[%c0_36, %c640_37], %48 {strides = array<i32>} : memref<16x1280xf32, #tpu.memory_space<vmem>>, vector<16x128xf32>,
    %50 = vector.extract_strided_slice %39 {offsets = [80, 0], sizes = [16, 128], strides = [1, 1]} : vector<128x128xf32> to vector<16x128xf32>
    %c0_38 = arith.constant 0 : index
    %c768_39 = arith.constant 768 : index
    %51 = vector.load %arg16[%c0_38, %c768_39] : memref<16x1280xf32, #tpu.memory_space<vmem>>, vector<16x128xf32>
    tpu.vector_store %arg16[%c0_38, %c768_39], %50 {strides = array<i32>} : memref<16x1280xf32, #tpu.memory_space<vmem>>, vector<16x128xf32>,
    %52 = vector.extract_strided_slice %39 {offsets = [96, 0], sizes = [16, 128], strides = [1, 1]} : vector<128x128xf32> to vector<16x128xf32>
    %c0_40 = arith.constant 0 : index
    %c896_41 = arith.constant 896 : index
    %53 = vector.load %arg16[%c0_40, %c896_41] : memref<16x1280xf32, #tpu.memory_space<vmem>>, vector<16x128xf32>
    tpu.vector_store %arg16[%c0_40, %c896_41], %52 {strides = array<i32>} : memref<16x1280xf32, #tpu.memory_space<vmem>>, vector<16x128xf32>,
    %54 = vector.extract_strided_slice %39 {offsets = [112, 0], sizes = [16, 128], strides = [1, 1]} : vector<128x128xf32> to vector<16x128xf32>
    %c0_42 = arith.constant 0 : index
    %c1024 = arith.constant 1024 : index
    %55 = vector.load %arg16[%c0_42, %c1024] : memref<16x1280xf32, #tpu.memory_space<vmem>>, vector<16x128xf32>
    tpu.vector_store %arg16[%c0_42, %c1024], %54 {strides = array<i32>} : memref<16x1280xf32, #tpu.memory_space<vmem>>, vector<16x128xf32>,
    %c0_43 = arith.constant 0 : index
    %c0_44 = arith.constant 0 : index
    %56 = vector.load %arg17[%c0_43, %c0_44] : memref<16x1280xf32, #tpu.memory_space<vmem>>, vector<16x128xf32>
    tpu.vector_store %arg17[%c0_43, %c0_44], %4 {strides = array<i32>} : memref<16x1280xf32, #tpu.memory_space<vmem>>, vector<16x128xf32>,
    %c0_45 = arith.constant 0 : index
    %c1152_46 = arith.constant 1152 : index
    %57 = vector.load %arg17[%c0_45, %c1152_46] : memref<16x1280xf32, #tpu.memory_space<vmem>>, vector<16x128xf32>
    tpu.vector_store %arg17[%c0_45, %c1152_46], %4 {strides = array<i32>} : memref<16x1280xf32, #tpu.memory_space<vmem>>, vector<16x128xf32>,
    %c0_47 = arith.constant 0 : index
    %c0_48 = arith.constant 0 : index
    %58 = vector.load %arg16[%c0_47, %c0_48] : memref<16x1280xf32, #tpu.memory_space<vmem>>, vector<16x272xf32>
    %59 = arith.truncf %58 : vector<16x272xf32> to vector<16x272xbf16>
    %c0_49 = arith.constant 0 : index
    %c0_50 = arith.constant 0 : index
    %60 = vector.load %arg22[%c0_49, %c0_50] : memref<128x512xbf16, #tpu.memory_space<vmem>>, vector<16x272xbf16>
    tpu.vector_store %arg22[%c0_49, %c0_50], %59 {strides = array<i32>} : memref<128x512xbf16, #tpu.memory_space<vmem>>, vector<16x272xbf16>,
    %c0_51 = arith.constant 0 : index
    %c128_52 = arith.constant 128 : index
    %61 = vector.load %arg16[%c0_51, %c128_52] : memref<16x1280xf32, #tpu.memory_space<vmem>>, vector<16x272xf32>
    %62 = arith.truncf %61 : vector<16x272xf32> to vector<16x272xbf16>
    %c16_53 = arith.constant 16 : index
    %c0_54 = arith.constant 0 : index
    %63 = vector.load %arg22[%c16_53, %c0_54] : memref<128x512xbf16, #tpu.memory_space<vmem>>, vector<16x272xbf16>
    tpu.vector_store %arg22[%c16_53, %c0_54], %62 {strides = array<i32>} : memref<128x512xbf16, #tpu.memory_space<vmem>>, vector<16x272xbf16>,
    %c0_55 = arith.constant 0 : index
    %c256_56 = arith.constant 256 : index
    %64 = vector.load %arg16[%c0_55, %c256_56] : memref<16x1280xf32, #tpu.memory_space<vmem>>, vector<16x272xf32>
    %65 = arith.truncf %64 : vector<16x272xf32> to vector<16x272xbf16>
    %c32_57 = arith.constant 32 : index
    %c0_58 = arith.constant 0 : index
    %66 = vector.load %arg22[%c32_57, %c0_58] : memref<128x512xbf16, #tpu.memory_space<vmem>>, vector<16x272xbf16>
    tpu.vector_store %arg22[%c32_57, %c0_58], %65 {strides = array<i32>} : memref<128x512xbf16, #tpu.memory_space<vmem>>, vector<16x272xbf16>,
    %c0_59 = arith.constant 0 : index
    %c384_60 = arith.constant 384 : index
    %67 = vector.load %arg16[%c0_59, %c384_60] : memref<16x1280xf32, #tpu.memory_space<vmem>>, vector<16x272xf32>
    %68 = arith.truncf %67 : vector<16x272xf32> to vector<16x272xbf16>
    %c48_61 = arith.constant 48 : index
    %c0_62 = arith.constant 0 : index
    %69 = vector.load %arg22[%c48_61, %c0_62] : memref<128x512xbf16, #tpu.memory_space<vmem>>, vector<16x272xbf16>
    tpu.vector_store %arg22[%c48_61, %c0_62], %68 {strides = array<i32>} : memref<128x512xbf16, #tpu.memory_space<vmem>>, vector<16x272xbf16>,
    %c0_63 = arith.constant 0 : index
    %c512_64 = arith.constant 512 : index
    %70 = vector.load %arg16[%c0_63, %c512_64] : memref<16x1280xf32, #tpu.memory_space<vmem>>, vector<16x272xf32>
    %71 = arith.truncf %70 : vector<16x272xf32> to vector<16x272xbf16>
    %c64_65 = arith.constant 64 : index
    %c0_66 = arith.constant 0 : index
    %72 = vector.load %arg22[%c64_65, %c0_66] : memref<128x512xbf16, #tpu.memory_space<vmem>>, vector<16x272xbf16>
    tpu.vector_store %arg22[%c64_65, %c0_66], %71 {strides = array<i32>} : memref<128x512xbf16, #tpu.memory_space<vmem>>, vector<16x272xbf16>,
    %c0_67 = arith.constant 0 : index
    %c640_68 = arith.constant 640 : index
    %73 = vector.load %arg16[%c0_67, %c640_68] : memref<16x1280xf32, #tpu.memory_space<vmem>>, vector<16x272xf32>
    %74 = arith.truncf %73 : vector<16x272xf32> to vector<16x272xbf16>
    %c80_69 = arith.constant 80 : index
    %c0_70 = arith.constant 0 : index
    %75 = vector.load %arg22[%c80_69, %c0_70] : memref<128x512xbf16, #tpu.memory_space<vmem>>, vector<16x272xbf16>
    tpu.vector_store %arg22[%c80_69, %c0_70], %74 {strides = array<i32>} : memref<128x512xbf16, #tpu.memory_space<vmem>>, vector<16x272xbf16>,
    %c0_71 = arith.constant 0 : index
    %c768_72 = arith.constant 768 : index
    %76 = vector.load %arg16[%c0_71, %c768_72] : memref<16x1280xf32, #tpu.memory_space<vmem>>, vector<16x272xf32>
    %77 = arith.truncf %76 : vector<16x272xf32> to vector<16x272xbf16>
    %c96_73 = arith.constant 96 : index
    %c0_74 = arith.constant 0 : index
    %78 = vector.load %arg22[%c96_73, %c0_74] : memref<128x512xbf16, #tpu.memory_space<vmem>>, vector<16x272xbf16>
    tpu.vector_store %arg22[%c96_73, %c0_74], %77 {strides = array<i32>} : memref<128x512xbf16, #tpu.memory_space<vmem>>, vector<16x272xbf16>,
    %c0_75 = arith.constant 0 : index
    %c896_76 = arith.constant 896 : index
    %79 = vector.load %arg16[%c0_75, %c896_76] : memref<16x1280xf32, #tpu.memory_space<vmem>>, vector<16x272xf32>
    %80 = arith.truncf %79 : vector<16x272xf32> to vector<16x272xbf16>
    %c112_77 = arith.constant 112 : index
    %c0_78 = arith.constant 0 : index
    %81 = vector.load %arg22[%c112_77, %c0_78] : memref<128x512xbf16, #tpu.memory_space<vmem>>, vector<16x272xbf16>
    tpu.vector_store %arg22[%c112_77, %c0_78], %80 {strides = array<i32>} : memref<128x512xbf16, #tpu.memory_space<vmem>>, vector<16x272xbf16>,
    %c0_79 = arith.constant 0 : index
    %c0_80 = arith.constant 0 : index
    %82 = vector.load %arg22[%c0_79, %c0_80] : memref<128x512xbf16, #tpu.memory_space<vmem>>, vector<128x272xbf16>
    %c0_81 = arith.constant 0 : index
    %c0_82 = arith.constant 0 : index
    %83 = vector.load %arg2[%c0_81, %c0_82] : memref<272x128xbf16, #tpu.memory_space<vmem>>, vector<272x128xbf16>
    %cst_83 = arith.constant dense<0.000000e+00> : vector<128x128xf32>
    %84 = tpu.matmul %82, %83, %cst_83 {dimension_numbers = #tpu.dot_dimension_numbers<[1], [0], [0], [1], [0, 0, 1, 1], [], []>} : vector<128x272xbf16>, vector<272x128xbf16>, vector<128x128xf32> -> vector<128x128xf32>
    %c0_84 = arith.constant 0 : index
    %c0_85 = arith.constant 0 : index
    %85 = vector.load %arg9[%c0_84, %c0_85] : memref<1x128xf32, #tpu.memory_space<vmem>>, vector<1x128xf32>
    %86 = vector.broadcast %85 : vector<1x128xf32> to vector<128x128xf32>
    %87 = arith.addf %84, %86 : vector<128x128xf32>
    %cst_86 = arith.constant 2.000000e-01 : f32
    %88 = vector.broadcast %cst_86 : f32 to vector<128x128xf32>
    %89 = arith.mulf %88, %87 : vector<128x128xf32>
    %90 = arith.maximumf %87, %89 : vector<128x128xf32>
    %91 = vector.extract_strided_slice %90 {offsets = [0, 0], sizes = [16, 128], strides = [1, 1]} : vector<128x128xf32> to vector<16x128xf32>
    %c0_87 = arith.constant 0 : index
    %c128_88 = arith.constant 128 : index
    %92 = vector.load %arg17[%c0_87, %c128_88] : memref<16x1280xf32, #tpu.memory_space<vmem>>, vector<16x128xf32>
    tpu.vector_store %arg17[%c0_87, %c128_88], %91 {strides = array<i32>} : memref<16x1280xf32, #tpu.memory_space<vmem>>, vector<16x128xf32>,
    %93 = vector.extract_strided_slice %90 {offsets = [16, 0], sizes = [16, 128], strides = [1, 1]} : vector<128x128xf32> to vector<16x128xf32>
    %c0_89 = arith.constant 0 : index
    %c256_90 = arith.constant 256 : index
    %94 = vector.load %arg17[%c0_89, %c256_90] : memref<16x1280xf32, #tpu.memory_space<vmem>>, vector<16x128xf32>
    tpu.vector_store %arg17[%c0_89, %c256_90], %93 {strides = array<i32>} : memref<16x1280xf32, #tpu.memory_space<vmem>>, vector<16x128xf32>,
    %95 = vector.extract_strided_slice %90 {offsets = [32, 0], sizes = [16, 128], strides = [1, 1]} : vector<128x128xf32> to vector<16x128xf32>
    %c0_91 = arith.constant 0 : index
    %c384_92 = arith.constant 384 : index
    %96 = vector.load %arg17[%c0_91, %c384_92] : memref<16x1280xf32, #tpu.memory_space<vmem>>, vector<16x128xf32>
    tpu.vector_store %arg17[%c0_91, %c384_92], %95 {strides = array<i32>} : memref<16x1280xf32, #tpu.memory_space<vmem>>, vector<16x128xf32>,
    %97 = vector.extract_strided_slice %90 {offsets = [48, 0], sizes = [16, 128], strides = [1, 1]} : vector<128x128xf32> to vector<16x128xf32>
    %c0_93 = arith.constant 0 : index
    %c512_94 = arith.constant 512 : index
    %98 = vector.load %arg17[%c0_93, %c512_94] : memref<16x1280xf32, #tpu.memory_space<vmem>>, vector<16x128xf32>
    tpu.vector_store %arg17[%c0_93, %c512_94], %97 {strides = array<i32>} : memref<16x1280xf32, #tpu.memory_space<vmem>>, vector<16x128xf32>,
    %99 = vector.extract_strided_slice %90 {offsets = [64, 0], sizes = [16, 128], strides = [1, 1]} : vector<128x128xf32> to vector<16x128xf32>
    %c0_95 = arith.constant 0 : index
    %c640_96 = arith.constant 640 : index
    %100 = vector.load %arg17[%c0_95, %c640_96] : memref<16x1280xf32, #tpu.memory_space<vmem>>, vector<16x128xf32>
    tpu.vector_store %arg17[%c0_95, %c640_96], %99 {strides = array<i32>} : memref<16x1280xf32, #tpu.memory_space<vmem>>, vector<16x128xf32>,
    %101 = vector.extract_strided_slice %90 {offsets = [80, 0], sizes = [16, 128], strides = [1, 1]} : vector<128x128xf32> to vector<16x128xf32>
    %c0_97 = arith.constant 0 : index
    %c768_98 = arith.constant 768 : index
    %102 = vector.load %arg17[%c0_97, %c768_98] : memref<16x1280xf32, #tpu.memory_space<vmem>>, vector<16x128xf32>
    tpu.vector_store %arg17[%c0_97, %c768_98], %101 {strides = array<i32>} : memref<16x1280xf32, #tpu.memory_space<vmem>>, vector<16x128xf32>,
    %103 = vector.extract_strided_slice %90 {offsets = [96, 0], sizes = [16, 128], strides = [1, 1]} : vector<128x128xf32> to vector<16x128xf32>
    %c0_99 = arith.constant 0 : index
    %c896_100 = arith.constant 896 : index
    %104 = vector.load %arg17[%c0_99, %c896_100] : memref<16x1280xf32, #tpu.memory_space<vmem>>, vector<16x128xf32>
    tpu.vector_store %arg17[%c0_99, %c896_100], %103 {strides = array<i32>} : memref<16x1280xf32, #tpu.memory_space<vmem>>, vector<16x128xf32>,
    %105 = vector.extract_strided_slice %90 {offsets = [112, 0], sizes = [16, 128], strides = [1, 1]} : vector<128x128xf32> to vector<16x128xf32>
    %c0_101 = arith.constant 0 : index
    %c1024_102 = arith.constant 1024 : index
    %106 = vector.load %arg17[%c0_101, %c1024_102] : memref<16x1280xf32, #tpu.memory_space<vmem>>, vector<16x128xf32>
    tpu.vector_store %arg17[%c0_101, %c1024_102], %105 {strides = array<i32>} : memref<16x1280xf32, #tpu.memory_space<vmem>>, vector<16x128xf32>,
    %c0_103 = arith.constant 0 : index
    %c0_104 = arith.constant 0 : index
    %107 = vector.load %arg18[%c0_103, %c0_104] : memref<16x1280xf32, #tpu.memory_space<vmem>>, vector<16x128xf32>
    tpu.vector_store %arg18[%c0_103, %c0_104], %4 {strides = array<i32>} : memref<16x1280xf32, #tpu.memory_space<vmem>>, vector<16x128xf32>,
    %c0_105 = arith.constant 0 : index
    %c1152_106 = arith.constant 1152 : index
    %108 = vector.load %arg18[%c0_105, %c1152_106] : memref<16x1280xf32, #tpu.memory_space<vmem>>, vector<16x128xf32>
    tpu.vector_store %arg18[%c0_105, %c1152_106], %4 {strides = array<i32>} : memref<16x1280xf32, #tpu.memory_space<vmem>>, vector<16x128xf32>,
    %c0_107 = arith.constant 0 : index
    %c0_108 = arith.constant 0 : index
    %109 = vector.load %arg17[%c0_107, %c0_108] : memref<16x1280xf32, #tpu.memory_space<vmem>>, vector<16x272xf32>
    %110 = arith.truncf %109 : vector<16x272xf32> to vector<16x272xbf16>
    %c0_109 = arith.constant 0 : index
    %c0_110 = arith.constant 0 : index
    %111 = vector.load %arg22[%c0_109, %c0_110] : memref<128x512xbf16, #tpu.memory_space<vmem>>, vector<16x272xbf16>
    tpu.vector_store %arg22[%c0_109, %c0_110], %110 {strides = array<i32>} : memref<128x512xbf16, #tpu.memory_space<vmem>>, vector<16x272xbf16>,
    %c0_111 = arith.constant 0 : index
    %c128_112 = arith.constant 128 : index
    %112 = vector.load %arg17[%c0_111, %c128_112] : memref<16x1280xf32, #tpu.memory_space<vmem>>, vector<16x272xf32>
    %113 = arith.truncf %112 : vector<16x272xf32> to vector<16x272xbf16>
    %c16_113 = arith.constant 16 : index
    %c0_114 = arith.constant 0 : index
    %114 = vector.load %arg22[%c16_113, %c0_114] : memref<128x512xbf16, #tpu.memory_space<vmem>>, vector<16x272xbf16>
    tpu.vector_store %arg22[%c16_113, %c0_114], %113 {strides = array<i32>} : memref<128x512xbf16, #tpu.memory_space<vmem>>, vector<16x272xbf16>,
    %c0_115 = arith.constant 0 : index
    %c256_116 = arith.constant 256 : index
    %115 = vector.load %arg17[%c0_115, %c256_116] : memref<16x1280xf32, #tpu.memory_space<vmem>>, vector<16x272xf32>
    %116 = arith.truncf %115 : vector<16x272xf32> to vector<16x272xbf16>
    %c32_117 = arith.constant 32 : index
    %c0_118 = arith.constant 0 : index
    %117 = vector.load %arg22[%c32_117, %c0_118] : memref<128x512xbf16, #tpu.memory_space<vmem>>, vector<16x272xbf16>
    tpu.vector_store %arg22[%c32_117, %c0_118], %116 {strides = array<i32>} : memref<128x512xbf16, #tpu.memory_space<vmem>>, vector<16x272xbf16>,
    %c0_119 = arith.constant 0 : index
    %c384_120 = arith.constant 384 : index
    %118 = vector.load %arg17[%c0_119, %c384_120] : memref<16x1280xf32, #tpu.memory_space<vmem>>, vector<16x272xf32>
    %119 = arith.truncf %118 : vector<16x272xf32> to vector<16x272xbf16>
    %c48_121 = arith.constant 48 : index
    %c0_122 = arith.constant 0 : index
    %120 = vector.load %arg22[%c48_121, %c0_122] : memref<128x512xbf16, #tpu.memory_space<vmem>>, vector<16x272xbf16>
    tpu.vector_store %arg22[%c48_121, %c0_122], %119 {strides = array<i32>} : memref<128x512xbf16, #tpu.memory_space<vmem>>, vector<16x272xbf16>,
    %c0_123 = arith.constant 0 : index
    %c512_124 = arith.constant 512 : index
    %121 = vector.load %arg17[%c0_123, %c512_124] : memref<16x1280xf32, #tpu.memory_space<vmem>>, vector<16x272xf32>
    %122 = arith.truncf %121 : vector<16x272xf32> to vector<16x272xbf16>
    %c64_125 = arith.constant 64 : index
    %c0_126 = arith.constant 0 : index
    %123 = vector.load %arg22[%c64_125, %c0_126] : memref<128x512xbf16, #tpu.memory_space<vmem>>, vector<16x272xbf16>
    tpu.vector_store %arg22[%c64_125, %c0_126], %122 {strides = array<i32>} : memref<128x512xbf16, #tpu.memory_space<vmem>>, vector<16x272xbf16>,
    %c0_127 = arith.constant 0 : index
    %c640_128 = arith.constant 640 : index
    %124 = vector.load %arg17[%c0_127, %c640_128] : memref<16x1280xf32, #tpu.memory_space<vmem>>, vector<16x272xf32>
    %125 = arith.truncf %124 : vector<16x272xf32> to vector<16x272xbf16>
    %c80_129 = arith.constant 80 : index
    %c0_130 = arith.constant 0 : index
    %126 = vector.load %arg22[%c80_129, %c0_130] : memref<128x512xbf16, #tpu.memory_space<vmem>>, vector<16x272xbf16>
    tpu.vector_store %arg22[%c80_129, %c0_130], %125 {strides = array<i32>} : memref<128x512xbf16, #tpu.memory_space<vmem>>, vector<16x272xbf16>,
    %c0_131 = arith.constant 0 : index
    %c768_132 = arith.constant 768 : index
    %127 = vector.load %arg17[%c0_131, %c768_132] : memref<16x1280xf32, #tpu.memory_space<vmem>>, vector<16x272xf32>
    %128 = arith.truncf %127 : vector<16x272xf32> to vector<16x272xbf16>
    %c96_133 = arith.constant 96 : index
    %c0_134 = arith.constant 0 : index
    %129 = vector.load %arg22[%c96_133, %c0_134] : memref<128x512xbf16, #tpu.memory_space<vmem>>, vector<16x272xbf16>
    tpu.vector_store %arg22[%c96_133, %c0_134], %128 {strides = array<i32>} : memref<128x512xbf16, #tpu.memory_space<vmem>>, vector<16x272xbf16>,
    %c0_135 = arith.constant 0 : index
    %c896_136 = arith.constant 896 : index
    %130 = vector.load %arg17[%c0_135, %c896_136] : memref<16x1280xf32, #tpu.memory_space<vmem>>, vector<16x272xf32>
    %131 = arith.truncf %130 : vector<16x272xf32> to vector<16x272xbf16>
    %c112_137 = arith.constant 112 : index
    %c0_138 = arith.constant 0 : index
    %132 = vector.load %arg22[%c112_137, %c0_138] : memref<128x512xbf16, #tpu.memory_space<vmem>>, vector<16x272xbf16>
    tpu.vector_store %arg22[%c112_137, %c0_138], %131 {strides = array<i32>} : memref<128x512xbf16, #tpu.memory_space<vmem>>, vector<16x272xbf16>,
    %c0_139 = arith.constant 0 : index
    %c0_140 = arith.constant 0 : index
    %133 = vector.load %arg22[%c0_139, %c0_140] : memref<128x512xbf16, #tpu.memory_space<vmem>>, vector<128x272xbf16>
    %c0_141 = arith.constant 0 : index
    %c0_142 = arith.constant 0 : index
    %134 = vector.load %arg3[%c0_141, %c0_142] : memref<272x128xbf16, #tpu.memory_space<vmem>>, vector<272x128xbf16>
    %cst_143 = arith.constant dense<0.000000e+00> : vector<128x128xf32>
    %135 = tpu.matmul %133, %134, %cst_143 {dimension_numbers = #tpu.dot_dimension_numbers<[1], [0], [0], [1], [0, 0, 1, 1], [], []>} : vector<128x272xbf16>, vector<272x128xbf16>, vector<128x128xf32> -> vector<128x128xf32>
    %c0_144 = arith.constant 0 : index
    %c0_145 = arith.constant 0 : index
    %136 = vector.load %arg10[%c0_144, %c0_145] : memref<1x128xf32, #tpu.memory_space<vmem>>, vector<1x128xf32>
    %137 = vector.broadcast %136 : vector<1x128xf32> to vector<128x128xf32>
    %138 = arith.addf %135, %137 : vector<128x128xf32>
    %cst_146 = arith.constant 2.000000e-01 : f32
    %139 = vector.broadcast %cst_146 : f32 to vector<128x128xf32>
    %140 = arith.mulf %139, %138 : vector<128x128xf32>
    %141 = arith.maximumf %138, %140 : vector<128x128xf32>
    %142 = vector.extract_strided_slice %141 {offsets = [0, 0], sizes = [16, 128], strides = [1, 1]} : vector<128x128xf32> to vector<16x128xf32>
    %c0_147 = arith.constant 0 : index
    %c128_148 = arith.constant 128 : index
    %143 = vector.load %arg18[%c0_147, %c128_148] : memref<16x1280xf32, #tpu.memory_space<vmem>>, vector<16x128xf32>
    tpu.vector_store %arg18[%c0_147, %c128_148], %142 {strides = array<i32>} : memref<16x1280xf32, #tpu.memory_space<vmem>>, vector<16x128xf32>,
    %144 = vector.extract_strided_slice %141 {offsets = [16, 0], sizes = [16, 128], strides = [1, 1]} : vector<128x128xf32> to vector<16x128xf32>
    %c0_149 = arith.constant 0 : index
    %c256_150 = arith.constant 256 : index
    %145 = vector.load %arg18[%c0_149, %c256_150] : memref<16x1280xf32, #tpu.memory_space<vmem>>, vector<16x128xf32>
    tpu.vector_store %arg18[%c0_149, %c256_150], %144 {strides = array<i32>} : memref<16x1280xf32, #tpu.memory_space<vmem>>, vector<16x128xf32>,
    %146 = vector.extract_strided_slice %141 {offsets = [32, 0], sizes = [16, 128], strides = [1, 1]} : vector<128x128xf32> to vector<16x128xf32>
    %c0_151 = arith.constant 0 : index
    %c384_152 = arith.constant 384 : index
    %147 = vector.load %arg18[%c0_151, %c384_152] : memref<16x1280xf32, #tpu.memory_space<vmem>>, vector<16x128xf32>
    tpu.vector_store %arg18[%c0_151, %c384_152], %146 {strides = array<i32>} : memref<16x1280xf32, #tpu.memory_space<vmem>>, vector<16x128xf32>,
    %148 = vector.extract_strided_slice %141 {offsets = [48, 0], sizes = [16, 128], strides = [1, 1]} : vector<128x128xf32> to vector<16x128xf32>
    %c0_153 = arith.constant 0 : index
    %c512_154 = arith.constant 512 : index
    %149 = vector.load %arg18[%c0_153, %c512_154] : memref<16x1280xf32, #tpu.memory_space<vmem>>, vector<16x128xf32>
    tpu.vector_store %arg18[%c0_153, %c512_154], %148 {strides = array<i32>} : memref<16x1280xf32, #tpu.memory_space<vmem>>, vector<16x128xf32>,
    %150 = vector.extract_strided_slice %141 {offsets = [64, 0], sizes = [16, 128], strides = [1, 1]} : vector<128x128xf32> to vector<16x128xf32>
    %c0_155 = arith.constant 0 : index
    %c640_156 = arith.constant 640 : index
    %151 = vector.load %arg18[%c0_155, %c640_156] : memref<16x1280xf32, #tpu.memory_space<vmem>>, vector<16x128xf32>
    tpu.vector_store %arg18[%c0_155, %c640_156], %150 {strides = array<i32>} : memref<16x1280xf32, #tpu.memory_space<vmem>>, vector<16x128xf32>,
    %152 = vector.extract_strided_slice %141 {offsets = [80, 0], sizes = [16, 128], strides = [1, 1]} : vector<128x128xf32> to vector<16x128xf32>
    %c0_157 = arith.constant 0 : index
    %c768_158 = arith.constant 768 : index
    %153 = vector.load %arg18[%c0_157, %c768_158] : memref<16x1280xf32, #tpu.memory_space<vmem>>, vector<16x128xf32>
    tpu.vector_store %arg18[%c0_157, %c768_158], %152 {strides = array<i32>} : memref<16x1280xf32, #tpu.memory_space<vmem>>, vector<16x128xf32>,
    %154 = vector.extract_strided_slice %141 {offsets = [96, 0], sizes = [16, 128], strides = [1, 1]} : vector<128x128xf32> to vector<16x128xf32>
    %c0_159 = arith.constant 0 : index
    %c896_160 = arith.constant 896 : index
    %155 = vector.load %arg18[%c0_159, %c896_160] : memref<16x1280xf32, #tpu.memory_space<vmem>>, vector<16x128xf32>
    tpu.vector_store %arg18[%c0_159, %c896_160], %154 {strides = array<i32>} : memref<16x1280xf32, #tpu.memory_space<vmem>>, vector<16x128xf32>,
    %156 = vector.extract_strided_slice %141 {offsets = [112, 0], sizes = [16, 128], strides = [1, 1]} : vector<128x128xf32> to vector<16x128xf32>
    %c0_161 = arith.constant 0 : index
    %c1024_162 = arith.constant 1024 : index
    %157 = vector.load %arg18[%c0_161, %c1024_162] : memref<16x1280xf32, #tpu.memory_space<vmem>>, vector<16x128xf32>
    tpu.vector_store %arg18[%c0_161, %c1024_162], %156 {strides = array<i32>} : memref<16x1280xf32, #tpu.memory_space<vmem>>, vector<16x128xf32>,
    %c0_163 = arith.constant 0 : index
    %c0_164 = arith.constant 0 : index
    %158 = vector.load %arg19[%c0_163, %c0_164] : memref<16x1280xf32, #tpu.memory_space<vmem>>, vector<16x128xf32>
    tpu.vector_store %arg19[%c0_163, %c0_164], %4 {strides = array<i32>} : memref<16x1280xf32, #tpu.memory_space<vmem>>, vector<16x128xf32>,
    %c0_165 = arith.constant 0 : index
    %c1152_166 = arith.constant 1152 : index
    %159 = vector.load %arg19[%c0_165, %c1152_166] : memref<16x1280xf32, #tpu.memory_space<vmem>>, vector<16x128xf32>
    tpu.vector_store %arg19[%c0_165, %c1152_166], %4 {strides = array<i32>} : memref<16x1280xf32, #tpu.memory_space<vmem>>, vector<16x128xf32>,
    %c0_167 = arith.constant 0 : index
    %c0_168 = arith.constant 0 : index
    %160 = vector.load %arg18[%c0_167, %c0_168] : memref<16x1280xf32, #tpu.memory_space<vmem>>, vector<16x288xf32>
    %161 = arith.truncf %160 : vector<16x288xf32> to vector<16x288xbf16>
    %c0_169 = arith.constant 0 : index
    %c0_170 = arith.constant 0 : index
    %162 = vector.load %arg22[%c0_169, %c0_170] : memref<128x512xbf16, #tpu.memory_space<vmem>>, vector<16x288xbf16>
    tpu.vector_store %arg22[%c0_169, %c0_170], %161 {strides = array<i32>} : memref<128x512xbf16, #tpu.memory_space<vmem>>, vector<16x288xbf16>,
    %c0_171 = arith.constant 0 : index
    %c128_172 = arith.constant 128 : index
    %163 = vector.load %arg18[%c0_171, %c128_172] : memref<16x1280xf32, #tpu.memory_space<vmem>>, vector<16x288xf32>
    %164 = arith.truncf %163 : vector<16x288xf32> to vector<16x288xbf16>
    %c16_173 = arith.constant 16 : index
    %c0_174 = arith.constant 0 : index
    %165 = vector.load %arg22[%c16_173, %c0_174] : memref<128x512xbf16, #tpu.memory_space<vmem>>, vector<16x288xbf16>
    tpu.vector_store %arg22[%c16_173, %c0_174], %164 {strides = array<i32>} : memref<128x512xbf16, #tpu.memory_space<vmem>>, vector<16x288xbf16>,
    %c0_175 = arith.constant 0 : index
    %c256_176 = arith.constant 256 : index
    %166 = vector.load %arg18[%c0_175, %c256_176] : memref<16x1280xf32, #tpu.memory_space<vmem>>, vector<16x288xf32>
    %167 = arith.truncf %166 : vector<16x288xf32> to vector<16x288xbf16>
    %c32_177 = arith.constant 32 : index
    %c0_178 = arith.constant 0 : index
    %168 = vector.load %arg22[%c32_177, %c0_178] : memref<128x512xbf16, #tpu.memory_space<vmem>>, vector<16x288xbf16>
    tpu.vector_store %arg22[%c32_177, %c0_178], %167 {strides = array<i32>} : memref<128x512xbf16, #tpu.memory_space<vmem>>, vector<16x288xbf16>,
    %c0_179 = arith.constant 0 : index
    %c384_180 = arith.constant 384 : index
    %169 = vector.load %arg18[%c0_179, %c384_180] : memref<16x1280xf32, #tpu.memory_space<vmem>>, vector<16x288xf32>
    %170 = arith.truncf %169 : vector<16x288xf32> to vector<16x288xbf16>
    %c48_181 = arith.constant 48 : index
    %c0_182 = arith.constant 0 : index
    %171 = vector.load %arg22[%c48_181, %c0_182] : memref<128x512xbf16, #tpu.memory_space<vmem>>, vector<16x288xbf16>
    tpu.vector_store %arg22[%c48_181, %c0_182], %170 {strides = array<i32>} : memref<128x512xbf16, #tpu.memory_space<vmem>>, vector<16x288xbf16>,
    %c0_183 = arith.constant 0 : index
    %c512_184 = arith.constant 512 : index
    %172 = vector.load %arg18[%c0_183, %c512_184] : memref<16x1280xf32, #tpu.memory_space<vmem>>, vector<16x288xf32>
    %173 = arith.truncf %172 : vector<16x288xf32> to vector<16x288xbf16>
    %c64_185 = arith.constant 64 : index
    %c0_186 = arith.constant 0 : index
    %174 = vector.load %arg22[%c64_185, %c0_186] : memref<128x512xbf16, #tpu.memory_space<vmem>>, vector<16x288xbf16>
    tpu.vector_store %arg22[%c64_185, %c0_186], %173 {strides = array<i32>} : memref<128x512xbf16, #tpu.memory_space<vmem>>, vector<16x288xbf16>,
    %c0_187 = arith.constant 0 : index
    %c640_188 = arith.constant 640 : index
    %175 = vector.load %arg18[%c0_187, %c640_188] : memref<16x1280xf32, #tpu.memory_space<vmem>>, vector<16x288xf32>
    %176 = arith.truncf %175 : vector<16x288xf32> to vector<16x288xbf16>
    %c80_189 = arith.constant 80 : index
    %c0_190 = arith.constant 0 : index
    %177 = vector.load %arg22[%c80_189, %c0_190] : memref<128x512xbf16, #tpu.memory_space<vmem>>, vector<16x288xbf16>
    tpu.vector_store %arg22[%c80_189, %c0_190], %176 {strides = array<i32>} : memref<128x512xbf16, #tpu.memory_space<vmem>>, vector<16x288xbf16>,
    %c0_191 = arith.constant 0 : index
    %c768_192 = arith.constant 768 : index
    %178 = vector.load %arg18[%c0_191, %c768_192] : memref<16x1280xf32, #tpu.memory_space<vmem>>, vector<16x288xf32>
    %179 = arith.truncf %178 : vector<16x288xf32> to vector<16x288xbf16>
    %c96_193 = arith.constant 96 : index
    %c0_194 = arith.constant 0 : index
    %180 = vector.load %arg22[%c96_193, %c0_194] : memref<128x512xbf16, #tpu.memory_space<vmem>>, vector<16x288xbf16>
    tpu.vector_store %arg22[%c96_193, %c0_194], %179 {strides = array<i32>} : memref<128x512xbf16, #tpu.memory_space<vmem>>, vector<16x288xbf16>,
    %c0_195 = arith.constant 0 : index
    %c896_196 = arith.constant 896 : index
    %181 = vector.load %arg18[%c0_195, %c896_196] : memref<16x1280xf32, #tpu.memory_space<vmem>>, vector<16x288xf32>
    %182 = arith.truncf %181 : vector<16x288xf32> to vector<16x288xbf16>
    %c112_197 = arith.constant 112 : index
    %c0_198 = arith.constant 0 : index
    %183 = vector.load %arg22[%c112_197, %c0_198] : memref<128x512xbf16, #tpu.memory_space<vmem>>, vector<16x288xbf16>
    tpu.vector_store %arg22[%c112_197, %c0_198], %182 {strides = array<i32>} : memref<128x512xbf16, #tpu.memory_space<vmem>>, vector<16x288xbf16>,
    %c0_199 = arith.constant 0 : index
    %c0_200 = arith.constant 0 : index
    %184 = vector.load %arg22[%c0_199, %c0_200] : memref<128x512xbf16, #tpu.memory_space<vmem>>, vector<128x288xbf16>
    %c0_201 = arith.constant 0 : index
    %c0_202 = arith.constant 0 : index
    %185 = vector.load %arg4[%c0_201, %c0_202] : memref<288x128xbf16, #tpu.memory_space<vmem>>, vector<288x128xbf16>
    %cst_203 = arith.constant dense<0.000000e+00> : vector<128x128xf32>
    %186 = tpu.matmul %184, %185, %cst_203 {dimension_numbers = #tpu.dot_dimension_numbers<[1], [0], [0], [1], [0, 0, 1, 1], [], []>} : vector<128x288xbf16>, vector<288x128xbf16>, vector<128x128xf32> -> vector<128x128xf32>
    %c0_204 = arith.constant 0 : index
    %c0_205 = arith.constant 0 : index
    %187 = vector.load %arg11[%c0_204, %c0_205] : memref<1x128xf32, #tpu.memory_space<vmem>>, vector<1x128xf32>
    %188 = vector.broadcast %187 : vector<1x128xf32> to vector<128x128xf32>
    %189 = arith.addf %186, %188 : vector<128x128xf32>
    %cst_206 = arith.constant 2.000000e-01 : f32
    %190 = vector.broadcast %cst_206 : f32 to vector<128x128xf32>
    %191 = arith.mulf %190, %189 : vector<128x128xf32>
    %192 = arith.maximumf %189, %191 : vector<128x128xf32>
    %193 = vector.extract_strided_slice %192 {offsets = [0, 0], sizes = [16, 128], strides = [1, 1]} : vector<128x128xf32> to vector<16x128xf32>
    %c0_207 = arith.constant 0 : index
    %c128_208 = arith.constant 128 : index
    %194 = vector.load %arg19[%c0_207, %c128_208] : memref<16x1280xf32, #tpu.memory_space<vmem>>, vector<16x128xf32>
    tpu.vector_store %arg19[%c0_207, %c128_208], %193 {strides = array<i32>} : memref<16x1280xf32, #tpu.memory_space<vmem>>, vector<16x128xf32>,
    %195 = vector.extract_strided_slice %192 {offsets = [16, 0], sizes = [16, 128], strides = [1, 1]} : vector<128x128xf32> to vector<16x128xf32>
    %c0_209 = arith.constant 0 : index
    %c256_210 = arith.constant 256 : index
    %196 = vector.load %arg19[%c0_209, %c256_210] : memref<16x1280xf32, #tpu.memory_space<vmem>>, vector<16x128xf32>
    tpu.vector_store %arg19[%c0_209, %c256_210], %195 {strides = array<i32>} : memref<16x1280xf32, #tpu.memory_space<vmem>>, vector<16x128xf32>,
    %197 = vector.extract_strided_slice %192 {offsets = [32, 0], sizes = [16, 128], strides = [1, 1]} : vector<128x128xf32> to vector<16x128xf32>
    %c0_211 = arith.constant 0 : index
    %c384_212 = arith.constant 384 : index
    %198 = vector.load %arg19[%c0_211, %c384_212] : memref<16x1280xf32, #tpu.memory_space<vmem>>, vector<16x128xf32>
    tpu.vector_store %arg19[%c0_211, %c384_212], %197 {strides = array<i32>} : memref<16x1280xf32, #tpu.memory_space<vmem>>, vector<16x128xf32>,
    %199 = vector.extract_strided_slice %192 {offsets = [48, 0], sizes = [16, 128], strides = [1, 1]} : vector<128x128xf32> to vector<16x128xf32>
    %c0_213 = arith.constant 0 : index
    %c512_214 = arith.constant 512 : index
    %200 = vector.load %arg19[%c0_213, %c512_214] : memref<16x1280xf32, #tpu.memory_space<vmem>>, vector<16x128xf32>
    tpu.vector_store %arg19[%c0_213, %c512_214], %199 {strides = array<i32>} : memref<16x1280xf32, #tpu.memory_space<vmem>>, vector<16x128xf32>,
    %201 = vector.extract_strided_slice %192 {offsets = [64, 0], sizes = [16, 128], strides = [1, 1]} : vector<128x128xf32> to vector<16x128xf32>
    %c0_215 = arith.constant 0 : index
    %c640_216 = arith.constant 640 : index
    %202 = vector.load %arg19[%c0_215, %c640_216] : memref<16x1280xf32, #tpu.memory_space<vmem>>, vector<16x128xf32>
    tpu.vector_store %arg19[%c0_215, %c640_216], %201 {strides = array<i32>} : memref<16x1280xf32, #tpu.memory_space<vmem>>, vector<16x128xf32>,
    %203 = vector.extract_strided_slice %192 {offsets = [80, 0], sizes = [16, 128], strides = [1, 1]} : vector<128x128xf32> to vector<16x128xf32>
    %c0_217 = arith.constant 0 : index
    %c768_218 = arith.constant 768 : index
    %204 = vector.load %arg19[%c0_217, %c768_218] : memref<16x1280xf32, #tpu.memory_space<vmem>>, vector<16x128xf32>
    tpu.vector_store %arg19[%c0_217, %c768_218], %203 {strides = array<i32>} : memref<16x1280xf32, #tpu.memory_space<vmem>>, vector<16x128xf32>,
    %205 = vector.extract_strided_slice %192 {offsets = [96, 0], sizes = [16, 128], strides = [1, 1]} : vector<128x128xf32> to vector<16x128xf32>
    %c0_219 = arith.constant 0 : index
    %c896_220 = arith.constant 896 : index
    %206 = vector.load %arg19[%c0_219, %c896_220] : memref<16x1280xf32, #tpu.memory_space<vmem>>, vector<16x128xf32>
    tpu.vector_store %arg19[%c0_219, %c896_220], %205 {strides = array<i32>} : memref<16x1280xf32, #tpu.memory_space<vmem>>, vector<16x128xf32>,
    %207 = vector.extract_strided_slice %192 {offsets = [112, 0], sizes = [16, 128], strides = [1, 1]} : vector<128x128xf32> to vector<16x128xf32>
    %c0_221 = arith.constant 0 : index
    %c1024_222 = arith.constant 1024 : index
    %208 = vector.load %arg19[%c0_221, %c1024_222] : memref<16x1280xf32, #tpu.memory_space<vmem>>, vector<16x128xf32>
    tpu.vector_store %arg19[%c0_221, %c1024_222], %207 {strides = array<i32>} : memref<16x1280xf32, #tpu.memory_space<vmem>>, vector<16x128xf32>,
    %c0_223 = arith.constant 0 : index
    %c0_224 = arith.constant 0 : index
    %209 = vector.load %arg20[%c0_223, %c0_224] : memref<16x1280xf32, #tpu.memory_space<vmem>>, vector<16x128xf32>
    tpu.vector_store %arg20[%c0_223, %c0_224], %4 {strides = array<i32>} : memref<16x1280xf32, #tpu.memory_space<vmem>>, vector<16x128xf32>,
    %c0_225 = arith.constant 0 : index
    %c1152_226 = arith.constant 1152 : index
    %210 = vector.load %arg20[%c0_225, %c1152_226] : memref<16x1280xf32, #tpu.memory_space<vmem>>, vector<16x128xf32>
    tpu.vector_store %arg20[%c0_225, %c1152_226], %4 {strides = array<i32>} : memref<16x1280xf32, #tpu.memory_space<vmem>>, vector<16x128xf32>,
    %c0_227 = arith.constant 0 : index
    %c0_228 = arith.constant 0 : index
    %211 = vector.load %arg19[%c0_227, %c0_228] : memref<16x1280xf32, #tpu.memory_space<vmem>>, vector<16x320xf32>
    %212 = arith.truncf %211 : vector<16x320xf32> to vector<16x320xbf16>
    %c0_229 = arith.constant 0 : index
    %c0_230 = arith.constant 0 : index
    %213 = vector.load %arg22[%c0_229, %c0_230] : memref<128x512xbf16, #tpu.memory_space<vmem>>, vector<16x320xbf16>
    tpu.vector_store %arg22[%c0_229, %c0_230], %212 {strides = array<i32>} : memref<128x512xbf16, #tpu.memory_space<vmem>>, vector<16x320xbf16>,
    %c0_231 = arith.constant 0 : index
    %c128_232 = arith.constant 128 : index
    %214 = vector.load %arg19[%c0_231, %c128_232] : memref<16x1280xf32, #tpu.memory_space<vmem>>, vector<16x320xf32>
    %215 = arith.truncf %214 : vector<16x320xf32> to vector<16x320xbf16>
    %c16_233 = arith.constant 16 : index
    %c0_234 = arith.constant 0 : index
    %216 = vector.load %arg22[%c16_233, %c0_234] : memref<128x512xbf16, #tpu.memory_space<vmem>>, vector<16x320xbf16>
    tpu.vector_store %arg22[%c16_233, %c0_234], %215 {strides = array<i32>} : memref<128x512xbf16, #tpu.memory_space<vmem>>, vector<16x320xbf16>,
    %c0_235 = arith.constant 0 : index
    %c256_236 = arith.constant 256 : index
    %217 = vector.load %arg19[%c0_235, %c256_236] : memref<16x1280xf32, #tpu.memory_space<vmem>>, vector<16x320xf32>
    %218 = arith.truncf %217 : vector<16x320xf32> to vector<16x320xbf16>
    %c32_237 = arith.constant 32 : index
    %c0_238 = arith.constant 0 : index
    %219 = vector.load %arg22[%c32_237, %c0_238] : memref<128x512xbf16, #tpu.memory_space<vmem>>, vector<16x320xbf16>
    tpu.vector_store %arg22[%c32_237, %c0_238], %218 {strides = array<i32>} : memref<128x512xbf16, #tpu.memory_space<vmem>>, vector<16x320xbf16>,
    %c0_239 = arith.constant 0 : index
    %c384_240 = arith.constant 384 : index
    %220 = vector.load %arg19[%c0_239, %c384_240] : memref<16x1280xf32, #tpu.memory_space<vmem>>, vector<16x320xf32>
    %221 = arith.truncf %220 : vector<16x320xf32> to vector<16x320xbf16>
    %c48_241 = arith.constant 48 : index
    %c0_242 = arith.constant 0 : index
    %222 = vector.load %arg22[%c48_241, %c0_242] : memref<128x512xbf16, #tpu.memory_space<vmem>>, vector<16x320xbf16>
    tpu.vector_store %arg22[%c48_241, %c0_242], %221 {strides = array<i32>} : memref<128x512xbf16, #tpu.memory_space<vmem>>, vector<16x320xbf16>,
    %c0_243 = arith.constant 0 : index
    %c512_244 = arith.constant 512 : index
    %223 = vector.load %arg19[%c0_243, %c512_244] : memref<16x1280xf32, #tpu.memory_space<vmem>>, vector<16x320xf32>
    %224 = arith.truncf %223 : vector<16x320xf32> to vector<16x320xbf16>
    %c64_245 = arith.constant 64 : index
    %c0_246 = arith.constant 0 : index
    %225 = vector.load %arg22[%c64_245, %c0_246] : memref<128x512xbf16, #tpu.memory_space<vmem>>, vector<16x320xbf16>
    tpu.vector_store %arg22[%c64_245, %c0_246], %224 {strides = array<i32>} : memref<128x512xbf16, #tpu.memory_space<vmem>>, vector<16x320xbf16>,
    %c0_247 = arith.constant 0 : index
    %c640_248 = arith.constant 640 : index
    %226 = vector.load %arg19[%c0_247, %c640_248] : memref<16x1280xf32, #tpu.memory_space<vmem>>, vector<16x320xf32>
    %227 = arith.truncf %226 : vector<16x320xf32> to vector<16x320xbf16>
    %c80_249 = arith.constant 80 : index
    %c0_250 = arith.constant 0 : index
    %228 = vector.load %arg22[%c80_249, %c0_250] : memref<128x512xbf16, #tpu.memory_space<vmem>>, vector<16x320xbf16>
    tpu.vector_store %arg22[%c80_249, %c0_250], %227 {strides = array<i32>} : memref<128x512xbf16, #tpu.memory_space<vmem>>, vector<16x320xbf16>,
    %c0_251 = arith.constant 0 : index
    %c768_252 = arith.constant 768 : index
    %229 = vector.load %arg19[%c0_251, %c768_252] : memref<16x1280xf32, #tpu.memory_space<vmem>>, vector<16x320xf32>
    %230 = arith.truncf %229 : vector<16x320xf32> to vector<16x320xbf16>
    %c96_253 = arith.constant 96 : index
    %c0_254 = arith.constant 0 : index
    %231 = vector.load %arg22[%c96_253, %c0_254] : memref<128x512xbf16, #tpu.memory_space<vmem>>, vector<16x320xbf16>
    tpu.vector_store %arg22[%c96_253, %c0_254], %230 {strides = array<i32>} : memref<128x512xbf16, #tpu.memory_space<vmem>>, vector<16x320xbf16>,
    %c0_255 = arith.constant 0 : index
    %c896_256 = arith.constant 896 : index
    %232 = vector.load %arg19[%c0_255, %c896_256] : memref<16x1280xf32, #tpu.memory_space<vmem>>, vector<16x320xf32>
    %233 = arith.truncf %232 : vector<16x320xf32> to vector<16x320xbf16>
    %c112_257 = arith.constant 112 : index
    %c0_258 = arith.constant 0 : index
    %234 = vector.load %arg22[%c112_257, %c0_258] : memref<128x512xbf16, #tpu.memory_space<vmem>>, vector<16x320xbf16>
    tpu.vector_store %arg22[%c112_257, %c0_258], %233 {strides = array<i32>} : memref<128x512xbf16, #tpu.memory_space<vmem>>, vector<16x320xbf16>,
    %c0_259 = arith.constant 0 : index
    %c0_260 = arith.constant 0 : index
    %235 = vector.load %arg22[%c0_259, %c0_260] : memref<128x512xbf16, #tpu.memory_space<vmem>>, vector<128x320xbf16>
    %c0_261 = arith.constant 0 : index
    %c0_262 = arith.constant 0 : index
    %236 = vector.load %arg5[%c0_261, %c0_262] : memref<320x128xbf16, #tpu.memory_space<vmem>>, vector<320x128xbf16>
    %cst_263 = arith.constant dense<0.000000e+00> : vector<128x128xf32>
    %237 = tpu.matmul %235, %236, %cst_263 {dimension_numbers = #tpu.dot_dimension_numbers<[1], [0], [0], [1], [0, 0, 1, 1], [], []>} : vector<128x320xbf16>, vector<320x128xbf16>, vector<128x128xf32> -> vector<128x128xf32>
    %c0_264 = arith.constant 0 : index
    %c0_265 = arith.constant 0 : index
    %238 = vector.load %arg12[%c0_264, %c0_265] : memref<1x128xf32, #tpu.memory_space<vmem>>, vector<1x128xf32>
    %239 = vector.broadcast %238 : vector<1x128xf32> to vector<128x128xf32>
    %240 = arith.addf %237, %239 : vector<128x128xf32>
    %cst_266 = arith.constant 2.000000e-01 : f32
    %241 = vector.broadcast %cst_266 : f32 to vector<128x128xf32>
    %242 = arith.mulf %241, %240 : vector<128x128xf32>
    %243 = arith.maximumf %240, %242 : vector<128x128xf32>
    %244 = vector.extract_strided_slice %243 {offsets = [0, 0], sizes = [16, 128], strides = [1, 1]} : vector<128x128xf32> to vector<16x128xf32>
    %c0_267 = arith.constant 0 : index
    %c128_268 = arith.constant 128 : index
    %245 = vector.load %arg20[%c0_267, %c128_268] : memref<16x1280xf32, #tpu.memory_space<vmem>>, vector<16x128xf32>
    tpu.vector_store %arg20[%c0_267, %c128_268], %244 {strides = array<i32>} : memref<16x1280xf32, #tpu.memory_space<vmem>>, vector<16x128xf32>,
    %246 = vector.extract_strided_slice %243 {offsets = [16, 0], sizes = [16, 128], strides = [1, 1]} : vector<128x128xf32> to vector<16x128xf32>
    %c0_269 = arith.constant 0 : index
    %c256_270 = arith.constant 256 : index
    %247 = vector.load %arg20[%c0_269, %c256_270] : memref<16x1280xf32, #tpu.memory_space<vmem>>, vector<16x128xf32>
    tpu.vector_store %arg20[%c0_269, %c256_270], %246 {strides = array<i32>} : memref<16x1280xf32, #tpu.memory_space<vmem>>, vector<16x128xf32>,
    %248 = vector.extract_strided_slice %243 {offsets = [32, 0], sizes = [16, 128], strides = [1, 1]} : vector<128x128xf32> to vector<16x128xf32>
    %c0_271 = arith.constant 0 : index
    %c384_272 = arith.constant 384 : index
    %249 = vector.load %arg20[%c0_271, %c384_272] : memref<16x1280xf32, #tpu.memory_space<vmem>>, vector<16x128xf32>
    tpu.vector_store %arg20[%c0_271, %c384_272], %248 {strides = array<i32>} : memref<16x1280xf32, #tpu.memory_space<vmem>>, vector<16x128xf32>,
    %250 = vector.extract_strided_slice %243 {offsets = [48, 0], sizes = [16, 128], strides = [1, 1]} : vector<128x128xf32> to vector<16x128xf32>
    %c0_273 = arith.constant 0 : index
    %c512_274 = arith.constant 512 : index
    %251 = vector.load %arg20[%c0_273, %c512_274] : memref<16x1280xf32, #tpu.memory_space<vmem>>, vector<16x128xf32>
    tpu.vector_store %arg20[%c0_273, %c512_274], %250 {strides = array<i32>} : memref<16x1280xf32, #tpu.memory_space<vmem>>, vector<16x128xf32>,
    %252 = vector.extract_strided_slice %243 {offsets = [64, 0], sizes = [16, 128], strides = [1, 1]} : vector<128x128xf32> to vector<16x128xf32>
    %c0_275 = arith.constant 0 : index
    %c640_276 = arith.constant 640 : index
    %253 = vector.load %arg20[%c0_275, %c640_276] : memref<16x1280xf32, #tpu.memory_space<vmem>>, vector<16x128xf32>
    tpu.vector_store %arg20[%c0_275, %c640_276], %252 {strides = array<i32>} : memref<16x1280xf32, #tpu.memory_space<vmem>>, vector<16x128xf32>,
    %254 = vector.extract_strided_slice %243 {offsets = [80, 0], sizes = [16, 128], strides = [1, 1]} : vector<128x128xf32> to vector<16x128xf32>
    %c0_277 = arith.constant 0 : index
    %c768_278 = arith.constant 768 : index
    %255 = vector.load %arg20[%c0_277, %c768_278] : memref<16x1280xf32, #tpu.memory_space<vmem>>, vector<16x128xf32>
    tpu.vector_store %arg20[%c0_277, %c768_278], %254 {strides = array<i32>} : memref<16x1280xf32, #tpu.memory_space<vmem>>, vector<16x128xf32>,
    %256 = vector.extract_strided_slice %243 {offsets = [96, 0], sizes = [16, 128], strides = [1, 1]} : vector<128x128xf32> to vector<16x128xf32>
    %c0_279 = arith.constant 0 : index
    %c896_280 = arith.constant 896 : index
    %257 = vector.load %arg20[%c0_279, %c896_280] : memref<16x1280xf32, #tpu.memory_space<vmem>>, vector<16x128xf32>
    tpu.vector_store %arg20[%c0_279, %c896_280], %256 {strides = array<i32>} : memref<16x1280xf32, #tpu.memory_space<vmem>>, vector<16x128xf32>,
    %258 = vector.extract_strided_slice %243 {offsets = [112, 0], sizes = [16, 128], strides = [1, 1]} : vector<128x128xf32> to vector<16x128xf32>
    %c0_281 = arith.constant 0 : index
    %c1024_282 = arith.constant 1024 : index
    %259 = vector.load %arg20[%c0_281, %c1024_282] : memref<16x1280xf32, #tpu.memory_space<vmem>>, vector<16x128xf32>
    tpu.vector_store %arg20[%c0_281, %c1024_282], %258 {strides = array<i32>} : memref<16x1280xf32, #tpu.memory_space<vmem>>, vector<16x128xf32>,
    %c0_283 = arith.constant 0 : index
    %c0_284 = arith.constant 0 : index
    %260 = vector.load %arg21[%c0_283, %c0_284] : memref<16x1280xf32, #tpu.memory_space<vmem>>, vector<16x128xf32>
    tpu.vector_store %arg21[%c0_283, %c0_284], %4 {strides = array<i32>} : memref<16x1280xf32, #tpu.memory_space<vmem>>, vector<16x128xf32>,
    %c0_285 = arith.constant 0 : index
    %c1152_286 = arith.constant 1152 : index
    %261 = vector.load %arg21[%c0_285, %c1152_286] : memref<16x1280xf32, #tpu.memory_space<vmem>>, vector<16x128xf32>
    tpu.vector_store %arg21[%c0_285, %c1152_286], %4 {strides = array<i32>} : memref<16x1280xf32, #tpu.memory_space<vmem>>, vector<16x128xf32>,
    %c0_287 = arith.constant 0 : index
    %c0_288 = arith.constant 0 : index
    %262 = vector.load %arg20[%c0_287, %c0_288] : memref<16x1280xf32, #tpu.memory_space<vmem>>, vector<16x512xf32>
    %263 = arith.truncf %262 : vector<16x512xf32> to vector<16x512xbf16>
    %c0_289 = arith.constant 0 : index
    %c0_290 = arith.constant 0 : index
    %264 = vector.load %arg22[%c0_289, %c0_290] : memref<128x512xbf16, #tpu.memory_space<vmem>>, vector<16x512xbf16>
    tpu.vector_store %arg22[%c0_289, %c0_290], %263 {strides = array<i32>} : memref<128x512xbf16, #tpu.memory_space<vmem>>, vector<16x512xbf16>,
    %c0_291 = arith.constant 0 : index
    %c256_292 = arith.constant 256 : index
    %265 = vector.load %arg20[%c0_291, %c256_292] : memref<16x1280xf32, #tpu.memory_space<vmem>>, vector<16x512xf32>
    %266 = arith.truncf %265 : vector<16x512xf32> to vector<16x512xbf16>
    %c16_293 = arith.constant 16 : index
    %c0_294 = arith.constant 0 : index
    %267 = vector.load %arg22[%c16_293, %c0_294] : memref<128x512xbf16, #tpu.memory_space<vmem>>, vector<16x512xbf16>
    tpu.vector_store %arg22[%c16_293, %c0_294], %266 {strides = array<i32>} : memref<128x512xbf16, #tpu.memory_space<vmem>>, vector<16x512xbf16>,
    %c0_295 = arith.constant 0 : index
    %c512_296 = arith.constant 512 : index
    %268 = vector.load %arg20[%c0_295, %c512_296] : memref<16x1280xf32, #tpu.memory_space<vmem>>, vector<16x512xf32>
    %269 = arith.truncf %268 : vector<16x512xf32> to vector<16x512xbf16>
    %c32_297 = arith.constant 32 : index
    %c0_298 = arith.constant 0 : index
    %270 = vector.load %arg22[%c32_297, %c0_298] : memref<128x512xbf16, #tpu.memory_space<vmem>>, vector<16x512xbf16>
    tpu.vector_store %arg22[%c32_297, %c0_298], %269 {strides = array<i32>} : memref<128x512xbf16, #tpu.memory_space<vmem>>, vector<16x512xbf16>,
    %c0_299 = arith.constant 0 : index
    %c768_300 = arith.constant 768 : index
    %271 = vector.load %arg20[%c0_299, %c768_300] : memref<16x1280xf32, #tpu.memory_space<vmem>>, vector<16x512xf32>
    %272 = arith.truncf %271 : vector<16x512xf32> to vector<16x512xbf16>
    %c48_301 = arith.constant 48 : index
    %c0_302 = arith.constant 0 : index
    %273 = vector.load %arg22[%c48_301, %c0_302] : memref<128x512xbf16, #tpu.memory_space<vmem>>, vector<16x512xbf16>
    tpu.vector_store %arg22[%c48_301, %c0_302], %272 {strides = array<i32>} : memref<128x512xbf16, #tpu.memory_space<vmem>>, vector<16x512xbf16>,
    %c0_i32_303 = arith.constant 0 : i32
    %274 = tpu.memref_slice %arg25[%c0_i32_303] : memref<2x!tpu.dma_semaphore, #tpu.memory_space<semaphore_mem>> -> memref<1x!tpu.dma_semaphore, #tpu.memory_space<semaphore_mem>>
    %275 = tpu.memref_squeeze %274 : memref<1x!tpu.dma_semaphore, #tpu.memory_space<semaphore_mem>> -> memref<!tpu.dma_semaphore, #tpu.memory_space<semaphore_mem>>
    tpu.wait_dma2 semaphore(%275 : memref<!tpu.dma_semaphore, #tpu.memory_space<semaphore_mem>>) src(%arg6 : memref<512x256xbf16, #tpu.memory_space<any>>) dst(%arg23 : memref<512x256xbf16, #tpu.memory_space<vmem>>)
    %c0_304 = arith.constant 0 : index
    %c0_305 = arith.constant 0 : index
    %276 = vector.load %arg22[%c0_304, %c0_305] : memref<128x512xbf16, #tpu.memory_space<vmem>>, vector<64x512xbf16>
    %c0_306 = arith.constant 0 : index
    %c0_307 = arith.constant 0 : index
    %277 = vector.load %arg23[%c0_306, %c0_307] : memref<512x256xbf16, #tpu.memory_space<vmem>>, vector<512x256xbf16>
    %cst_308 = arith.constant dense<0.000000e+00> : vector<64x256xf32>
    %278 = tpu.matmul %276, %277, %cst_308 {dimension_numbers = #tpu.dot_dimension_numbers<[1], [0], [0], [1], [0, 0, 1, 1], [], []>} : vector<64x512xbf16>, vector<512x256xbf16>, vector<64x256xf32> -> vector<64x256xf32>
    %c0_309 = arith.constant 0 : index
    %c0_310 = arith.constant 0 : index
    %279 = vector.load %arg13[%c0_309, %c0_310] : memref<1x256xf32, #tpu.memory_space<vmem>>, vector<1x256xf32>
    %280 = vector.broadcast %279 : vector<1x256xf32> to vector<64x256xf32>
    %281 = arith.addf %278, %280 : vector<64x256xf32>
    %cst_311 = arith.constant 2.000000e-01 : f32
    %282 = vector.broadcast %cst_311 : f32 to vector<64x256xf32>
    %283 = arith.mulf %282, %281 : vector<64x256xf32>
    %284 = arith.maximumf %281, %283 : vector<64x256xf32>
    %285 = vector.extract_strided_slice %284 {offsets = [0, 0], sizes = [16, 256], strides = [1, 1]} : vector<64x256xf32> to vector<16x256xf32>
    %c0_312 = arith.constant 0 : index
    %c128_313 = arith.constant 128 : index
    %286 = vector.load %arg21[%c0_312, %c128_313] : memref<16x1280xf32, #tpu.memory_space<vmem>>, vector<16x256xf32>
    tpu.vector_store %arg21[%c0_312, %c128_313], %285 {strides = array<i32>} : memref<16x1280xf32, #tpu.memory_space<vmem>>, vector<16x256xf32>,
    %287 = vector.extract_strided_slice %284 {offsets = [16, 0], sizes = [16, 256], strides = [1, 1]} : vector<64x256xf32> to vector<16x256xf32>
    %c0_314 = arith.constant 0 : index
    %c384_315 = arith.constant 384 : index
    %288 = vector.load %arg21[%c0_314, %c384_315] : memref<16x1280xf32, #tpu.memory_space<vmem>>, vector<16x256xf32>
    tpu.vector_store %arg21[%c0_314, %c384_315], %287 {strides = array<i32>} : memref<16x1280xf32, #tpu.memory_space<vmem>>, vector<16x256xf32>,
    %289 = vector.extract_strided_slice %284 {offsets = [32, 0], sizes = [16, 256], strides = [1, 1]} : vector<64x256xf32> to vector<16x256xf32>
    %c0_316 = arith.constant 0 : index
    %c640_317 = arith.constant 640 : index
    %290 = vector.load %arg21[%c0_316, %c640_317] : memref<16x1280xf32, #tpu.memory_space<vmem>>, vector<16x256xf32>
    tpu.vector_store %arg21[%c0_316, %c640_317], %289 {strides = array<i32>} : memref<16x1280xf32, #tpu.memory_space<vmem>>, vector<16x256xf32>,
    %291 = vector.extract_strided_slice %284 {offsets = [48, 0], sizes = [16, 256], strides = [1, 1]} : vector<64x256xf32> to vector<16x256xf32>
    %c0_318 = arith.constant 0 : index
    %c896_319 = arith.constant 896 : index
    %292 = vector.load %arg21[%c0_318, %c896_319] : memref<16x1280xf32, #tpu.memory_space<vmem>>, vector<16x256xf32>
    tpu.vector_store %arg21[%c0_318, %c896_319], %291 {strides = array<i32>} : memref<16x1280xf32, #tpu.memory_space<vmem>>, vector<16x256xf32>,
    %c1_i32_320 = arith.constant 1 : i32
    %293 = tpu.memref_slice %arg25[%c1_i32_320] : memref<2x!tpu.dma_semaphore, #tpu.memory_space<semaphore_mem>> -> memref<1x!tpu.dma_semaphore, #tpu.memory_space<semaphore_mem>>
    %294 = tpu.memref_squeeze %293 : memref<1x!tpu.dma_semaphore, #tpu.memory_space<semaphore_mem>> -> memref<!tpu.dma_semaphore, #tpu.memory_space<semaphore_mem>>
    tpu.wait_dma2 semaphore(%294 : memref<!tpu.dma_semaphore, #tpu.memory_space<semaphore_mem>>) src(%arg7 : memref<1024x512xbf16, #tpu.memory_space<any>>) dst(%arg24 : memref<1024x512xbf16, #tpu.memory_space<vmem>>)
    %c0_321 = arith.constant 0 : index
    %c128_322 = arith.constant 128 : index
    %295 = vector.load %arg21[%c0_321, %c128_322] : memref<16x1280xf32, #tpu.memory_space<vmem>>, vector<16x1024xf32>
    %296 = arith.truncf %295 : vector<16x1024xf32> to vector<16x1024xbf16>
    %c0_323 = arith.constant 0 : index
    %c0_324 = arith.constant 0 : index
    %297 = vector.load %arg24[%c0_323, %c0_324] : memref<1024x512xbf16, #tpu.memory_space<vmem>>, vector<1024x512xbf16>
    %cst_325 = arith.constant dense<0.000000e+00> : vector<16x512xf32>
    %298 = tpu.matmul %296, %297, %cst_325 {dimension_numbers = #tpu.dot_dimension_numbers<[1], [0], [0], [1], [0, 0, 1, 1], [], []>} : vector<16x1024xbf16>, vector<1024x512xbf16>, vector<16x512xf32> -> vector<16x512xf32>
    %c0_326 = arith.constant 0 : index
    %c0_327 = arith.constant 0 : index
    %299 = vector.load %arg14[%c0_326, %c0_327] : memref<1x512xf32, #tpu.memory_space<vmem>>, vector<1x512xf32>
    %300 = vector.broadcast %299 : vector<1x512xf32> to vector<16x512xf32>
    %301 = arith.addf %298, %300 : vector<16x512xf32>
    %cst_328 = arith.constant 2.000000e-01 : f32
    %302 = vector.broadcast %cst_328 : f32 to vector<16x512xf32>
    %303 = arith.mulf %302, %301 : vector<16x512xf32>
    %304 = arith.maximumf %301, %303 : vector<16x512xf32>
    %c0_329 = arith.constant 0 : index
    %c0_330 = arith.constant 0 : index
    %305 = vector.load %arg15[%c0_329, %c0_330] : memref<16x512xf32, #tpu.memory_space<vmem>>, vector<16x512xf32>
    tpu.vector_store %arg15[%c0_329, %c0_330], %304 {strides = array<i32>} : memref<16x512xf32, #tpu.memory_space<vmem>>, vector<16x512xf32>,
    return
  }
}

</mosaic_0001>

<bundles_post_ra>
// kernel: two_layer_scale1_forward.1
= control target key start
LH: loop header
LB: loop body
LE: loop exit
PB: predicated region body
PF: predicated region fallthrough
CT: control target
= control target key end

     0   :  { %20 = vsyncpa [#allocation13], 0  ;;  %s11948_s0 = inlined_call_operand.vmem [shape: f32[16,1280], index: 0, kind: input, shape index: {}]   ;;  %s11949_s1 = inlined_call_operand.vmem [shape: bf16[272,128], index: 1, kind: input, shape index: {}]   ;;  %s11950_s2 = inlined_call_operand.vmem [shape: bf16[272,128], index: 2, kind: input, shape index: {}]   ;;  %s11951_s3 = inlined_call_operand.vmem [shape: bf16[272,128], index: 3, kind: input, shape index: {}]   ;;  %s11952_s4 = inlined_call_operand.vmem [shape: bf16[288,128], index: 4, kind: input, shape index: {}]   ;;  %s11953_s5 = inlined_call_operand.vmem [shape: bf16[320,128], index: 5, kind: input, shape index: {}]   ;;  %s11954_s6 = inlined_call_operand.vmem [shape: bf16[512,256], index: 6, kind: input, shape index: {}]   ;;  %s11955_s7 = inlined_call_operand.vmem [shape: bf16[1024,512], index: 7, kind: input, shape index: {}]   ;;  %s11956_s8 = inlined_call_operand.vmem [shape: f32[1,128], index: 8, kind: input, shape index: {}]   ;;  %s11957_s9 = inlined_call_operand.vmem [shape: f32[1,128], index: 9, kind: input, shape index: {}]   ;;  %s11958_s10 = inlined_call_operand.vmem [shape: f32[1,128], index: 10, kind: input, shape index: {}]   ;;  %s11959_s11 = inlined_call_operand.vmem [shape: f32[1,128], index: 11, kind: input, shape index: {}]   ;;  %s11960_s12 = inlined_call_operand.vmem [shape: f32[1,128], index: 12, kind: input, shape index: {}]   ;;  %s11961_s13 = inlined_call_operand.vmem [shape: f32[1,256], index: 13, kind: input, shape index: {}]   ;;  %s11962_s14 = inlined_call_operand.vmem [shape: f32[1,512], index: 14, kind: input, shape index: {}]   ;;  %s11963_s15 = inlined_call_operand.hbm [shape: f32[16,512], index: 15, kind: output, shape index: {}]  }
   0x1   :  { %v65_v0 = vld [vmem:[%s11954_s6] sm:$0xf]  ;;  %v67_v1 = vld [vmem:[%s11954_s6 + $0x8] sm:$0xf]  ;;  %v69_v2 = vld [vmem:[%s11954_s6 + $0x4] sm:$0xf] }
   0x2   :  { %66 = vst [vmem:[#allocation9] sm:$0xf] %v65_v0  ;;  %68 = vst [vmem:[#allocation9 + $0x4] sm:$0xf] %v67_v1  ;;  %v71_v3 = vld [vmem:[%s11954_s6 + $0xc] sm:$0xff]   ;;  %v79_v6 = vld [vmem:[%s11954_s6 + $0x1c] sm:$0xff]  }
   0x3   :  { %v75_v4 = vld [vmem:[%s11954_s6 + $0x18] sm:$0xf]  ;;  %70 = vst [vmem:[#allocation9 + $0x8] sm:$0xf] %v69_v2  ;;  %72 = vst [vmem:[#allocation9 + $0xc] sm:$0xff] %v71_v3   ;;  %v87_v9 = vld [vmem:[%s11954_s6 + $0x2c] sm:$0xff]  }
   0x4   :  { %76 = vst [vmem:[#allocation9 + $0x14] sm:$0xf] %v75_v4  ;;  %v77_v5 = vld [vmem:[%s11954_s6 + $0x14] sm:$0xf]  ;;  %v83_v7 = vld [vmem:[%s11954_s6 + $0x28] sm:$0xf] }
   0x5   :  { %78 = vst [vmem:[#allocation9 + $0x18] sm:$0xf] %v77_v5  ;;  %80 = vst [vmem:[#allocation9 + $0x1c] sm:$0xff] %v79_v6   ;;  %v85_v8 = vld [vmem:[%s11954_s6 + $0x24] sm:$0xf]  ;;  %v95_v12 = vld [vmem:[%s11954_s6 + $0x3c] sm:$0xff]  }
   0x6   :  { %84 = vst [vmem:[#allocation9 + $0x24] sm:$0xf] %v83_v7  ;;  %v91_v10 = vld [vmem:[%s11954_s6 + $0x38] sm:$0xf]  ;;  %86 = vst [vmem:[#allocation9 + $0x28] sm:$0xf] %v85_v8 }
   0x7   :  { %88 = vst [vmem:[#allocation9 + $0x2c] sm:$0xff] %v87_v9   ;;  %92 = vst [vmem:[#allocation9 + $0x34] sm:$0xf] %v91_v10  ;;  %v93_v11 = vld [vmem:[%s11954_s6 + $0x34] sm:$0xf]  ;;  %v103_v15 = vld [vmem:[%s11954_s6 + $0x4c] sm:$0xff]  }
   0x8   :  { %v99_v13 = vld [vmem:[%s11954_s6 + $0x48] sm:$0xf]  ;;  %94 = vst [vmem:[#allocation9 + $0x38] sm:$0xf] %v93_v11  ;;  %96 = vst [vmem:[#allocation9 + $0x3c] sm:$0xff] %v95_v12   ;;  %v111_v18 = vld [vmem:[%s11954_s6 + $0x5c] sm:$0xff]  }
   0x9   :  { %100 = vst [vmem:[#allocation9 + $0x44] sm:$0xf] %v99_v13  ;;  %v101_v14 = vld [vmem:[%s11954_s6 + $0x44] sm:$0xf]  ;;  %v107_v16 = vld [vmem:[%s11954_s6 + $0x58] sm:$0xf] }
   0xa   :  { %102 = vst [vmem:[#allocation9 + $0x48] sm:$0xf] %v101_v14  ;;  %104 = vst [vmem:[#allocation9 + $0x4c] sm:$0xff] %v103_v15   ;;  %v109_v17 = vld [vmem:[%s11954_s6 + $0x54] sm:$0xf]  ;;  %v119_v21 = vld [vmem:[%s11954_s6 + $0x6c] sm:$0xff]  }
   0xb   :  { %108 = vst [vmem:[#allocation9 + $0x54] sm:$0xf] %v107_v16  ;;  %v115_v19 = vld [vmem:[%s11954_s6 + $0x68] sm:$0xf]  ;;  %110 = vst [vmem:[#allocation9 + $0x58] sm:$0xf] %v109_v17 }
   0xc   :  { %112 = vst [vmem:[#allocation9 + $0x5c] sm:$0xff] %v111_v18   ;;  %116 = vst [vmem:[#allocation9 + $0x64] sm:$0xf] %v115_v19  ;;  %v117_v20 = vld [vmem:[%s11954_s6 + $0x64] sm:$0xf]  ;;  %v127_v24 = vld [vmem:[%s11954_s6 + $0x7c] sm:$0xff]  }
   0xd   :  { %v123_v22 = vld [vmem:[%s11954_s6 + $0x78] sm:$0xf]  ;;  %118 = vst [vmem:[#allocation9 + $0x68] sm:$0xf] %v117_v20  ;;  %120 = vst [vmem:[#allocation9 + $0x6c] sm:$0xff] %v119_v21   ;;  %v135_v27 = vld [vmem:[%s11954_s6 + $0x8c] sm:$0xff]  }
   0xe   :  { %124 = vst [vmem:[#allocation9 + $0x74] sm:$0xf] %v123_v22  ;;  %v125_v23 = vld [vmem:[%s11954_s6 + $0x74] sm:$0xf]  ;;  %v131_v25 = vld [vmem:[%s11954_s6 + $0x88] sm:$0xf] }
   0xf   :  { %126 = vst [vmem:[#allocation9 + $0x78] sm:$0xf] %v125_v23  ;;  %128 = vst [vmem:[#allocation9 + $0x7c] sm:$0xff] %v127_v24   ;;  %v133_v26 = vld [vmem:[%s11954_s6 + $0x84] sm:$0xf]  ;;  %v143_v30 = vld [vmem:[%s11954_s6 + $0x9c] sm:$0xff]  }
  0x10   :  { %132 = vst [vmem:[#allocation9 + $0x84] sm:$0xf] %v131_v25  ;;  %v139_v28 = vld [vmem:[%s11954_s6 + $0x98] sm:$0xf]  ;;  %134 = vst [vmem:[#allocation9 + $0x88] sm:$0xf] %v133_v26 }
  0x11   :  { %136 = vst [vmem:[#allocation9 + $0x8c] sm:$0xff] %v135_v27   ;;  %140 = vst [vmem:[#allocation9 + $0x94] sm:$0xf] %v139_v28  ;;  %v141_v29 = vld [vmem:[%s11954_s6 + $0x94] sm:$0xf]  ;;  %v151_v33 = vld [vmem:[%s11954_s6 + $0xac] sm:$0xff]  }
  0x12   :  { %v147_v31 = vld [vmem:[%s11954_s6 + $0xa8] sm:$0xf]  ;;  %142 = vst [vmem:[#allocation9 + $0x98] sm:$0xf] %v141_v29  ;;  %144 = vst [vmem:[#allocation9 + $0x9c] sm:$0xff] %v143_v30   ;;  %v159_v36 = vld [vmem:[%s11954_s6 + $0xbc] sm:$0xff]  }
  0x13   :  { %148 = vst [vmem:[#allocation9 + $0xa4] sm:$0xf] %v147_v31  ;;  %v149_v32 = vld [vmem:[%s11954_s6 + $0xa4] sm:$0xf]  ;;  %v155_v34 = vld [vmem:[%s11954_s6 + $0xb8] sm:$0xf] }
  0x14   :  { %150 = vst [vmem:[#allocation9 + $0xa8] sm:$0xf] %v149_v32  ;;  %152 = vst [vmem:[#allocation9 + $0xac] sm:$0xff] %v151_v33   ;;  %v157_v35 = vld [vmem:[%s11954_s6 + $0xb4] sm:$0xf]  ;;  %v167_v39 = vld [vmem:[%s11954_s6 + $0xcc] sm:$0xff]  }
  0x15   :  { %156 = vst [vmem:[#allocation9 + $0xb4] sm:$0xf] %v155_v34  ;;  %v163_v37 = vld [vmem:[%s11954_s6 + $0xc8] sm:$0xf]  ;;  %158 = vst [vmem:[#allocation9 + $0xb8] sm:$0xf] %v157_v35 }
  0x16   :  { %160 = vst [vmem:[#allocation9 + $0xbc] sm:$0xff] %v159_v36   ;;  %164 = vst [vmem:[#allocation9 + $0xc4] sm:$0xf] %v163_v37  ;;  %v165_v38 = vld [vmem:[%s11954_s6 + $0xc4] sm:$0xf]  ;;  %v175_v42 = vld [vmem:[%s11954_s6 + $0xdc] sm:$0xff]  }
  0x17   :  { %v171_v40 = vld [vmem:[%s11954_s6 + $0xd8] sm:$0xf]  ;;  %166 = vst [vmem:[#allocation9 + $0xc8] sm:$0xf] %v165_v38  ;;  %168 = vst [vmem:[#allocation9 + $0xcc] sm:$0xff] %v167_v39   ;;  %v183_v45 = vld [vmem:[%s11954_s6 + $0xec] sm:$0xff]  }
  0x18   :  { %172 = vst [vmem:[#allocation9 + $0xd4] sm:$0xf] %v171_v40  ;;  %v173_v41 = vld [vmem:[%s11954_s6 + $0xd4] sm:$0xf]  ;;  %v179_v43 = vld [vmem:[%s11954_s6 + $0xe8] sm:$0xf] }
  0x19   :  { %174 = vst [vmem:[#allocation9 + $0xd8] sm:$0xf] %v173_v41  ;;  %176 = vst [vmem:[#allocation9 + $0xdc] sm:$0xff] %v175_v42   ;;  %v181_v44 = vld [vmem:[%s11954_s6 + $0xe4] sm:$0xf]  ;;  %v191_v48 = vld [vmem:[%s11954_s6 + $0xfc] sm:$0xff]  }
  0x1a   :  { %180 = vst [vmem:[#allocation9 + $0xe4] sm:$0xf] %v179_v43  ;;  %v187_v46 = vld [vmem:[%s11954_s6 + $0xf8] sm:$0xf]  ;;  %182 = vst [vmem:[#allocation9 + $0xe8] sm:$0xf] %v181_v44 }
  0x1b   :  { %184 = vst [vmem:[#allocation9 + $0xec] sm:$0xff] %v183_v45   ;;  %188 = vst [vmem:[#allocation9 + $0xf4] sm:$0xf] %v187_v46  ;;  %v189_v47 = vld [vmem:[%s11954_s6 + $0xf4] sm:$0xf]  ;;  %v199_v51 = vld [vmem:[%s11954_s6 + $0x10c] sm:$0xff]  }
  0x1c   :  { %v195_v49 = vld [vmem:[%s11954_s6 + $0x108] sm:$0xf]  ;;  %190 = vst [vmem:[#allocation9 + $0xf8] sm:$0xf] %v189_v47  ;;  %192 = vst [vmem:[#allocation9 + $0xfc] sm:$0xff] %v191_v48   ;;  %v207_v54 = vld [vmem:[%s11954_s6 + $0x11c] sm:$0xff]  }
  0x1d   :  { %196 = vst [vmem:[#allocation9 + $0x104] sm:$0xf] %v195_v49  ;;  %v197_v50 = vld [vmem:[%s11954_s6 + $0x104] sm:$0xf]  ;;  %v203_v52 = vld [vmem:[%s11954_s6 + $0x118] sm:$0xf] }
  0x1e   :  { %198 = vst [vmem:[#allocation9 + $0x108] sm:$0xf] %v197_v50  ;;  %200 = vst [vmem:[#allocation9 + $0x10c] sm:$0xff] %v199_v51   ;;  %v205_v53 = vld [vmem:[%s11954_s6 + $0x114] sm:$0xf]  ;;  %v215_v57 = vld [vmem:[%s11954_s6 + $0x12c] sm:$0xff]  }
  0x1f   :  { %204 = vst [vmem:[#allocation9 + $0x114] sm:$0xf] %v203_v52  ;;  %v211_v55 = vld [vmem:[%s11954_s6 + $0x128] sm:$0xf]  ;;  %206 = vst [vmem:[#allocation9 + $0x118] sm:$0xf] %v205_v53 }
  0x20   :  { %208 = vst [vmem:[#allocation9 + $0x11c] sm:$0xff] %v207_v54   ;;  %212 = vst [vmem:[#allocation9 + $0x124] sm:$0xf] %v211_v55  ;;  %v213_v56 = vld [vmem:[%s11954_s6 + $0x124] sm:$0xf]  ;;  %v223_v60 = vld [vmem:[%s11954_s6 + $0x13c] sm:$0xff]  }
  0x21   :  { %v219_v58 = vld [vmem:[%s11954_s6 + $0x138] sm:$0xf]  ;;  %214 = vst [vmem:[#allocation9 + $0x128] sm:$0xf] %v213_v56  ;;  %216 = vst [vmem:[#allocation9 + $0x12c] sm:$0xff] %v215_v57   ;;  %v231_v63 = vld [vmem:[%s11954_s6 + $0x14c] sm:$0xff]  }
  0x22   :  { %220 = vst [vmem:[#allocation9 + $0x134] sm:$0xf] %v219_v58  ;;  %v221_v59 = vld [vmem:[%s11954_s6 + $0x134] sm:$0xf]  ;;  %v227_v61 = vld [vmem:[%s11954_s6 + $0x148] sm:$0xf] }
  0x23   :  { %222 = vst [vmem:[#allocation9 + $0x138] sm:$0xf] %v221_v59  ;;  %224 = vst [vmem:[#allocation9 + $0x13c] sm:$0xff] %v223_v60   ;;  %v229_v62 = vld [vmem:[%s11954_s6 + $0x144] sm:$0xf]  ;;  %v239_v2 = vld [vmem:[%s11954_s6 + $0x15c] sm:$0xff]  }
  0x24   :  { %228 = vst [vmem:[#allocation9 + $0x144] sm:$0xf] %v227_v61  ;;  %v235_v0 = vld [vmem:[%s11954_s6 + $0x158] sm:$0xf]  ;;  %230 = vst [vmem:[#allocation9 + $0x148] sm:$0xf] %v229_v62 }
  0x25   :  { %232 = vst [vmem:[#allocation9 + $0x14c] sm:$0xff] %v231_v63   ;;  %236 = vst [vmem:[#allocation9 + $0x154] sm:$0xf] %v235_v0  ;;  %v237_v1 = vld [vmem:[%s11954_s6 + $0x154] sm:$0xf]  ;;  %v247_v5 = vld [vmem:[%s11954_s6 + $0x16c] sm:$0xff]  }
  0x26   :  { %v243_v3 = vld [vmem:[%s11954_s6 + $0x168] sm:$0xf]  ;;  %238 = vst [vmem:[#allocation9 + $0x158] sm:$0xf] %v237_v1  ;;  %240 = vst [vmem:[#allocation9 + $0x15c] sm:$0xff] %v239_v2   ;;  %v255_v8 = vld [vmem:[%s11954_s6 + $0x17c] sm:$0xff]  }
  0x27   :  { %244 = vst [vmem:[#allocation9 + $0x164] sm:$0xf] %v243_v3  ;;  %v245_v4 = vld [vmem:[%s11954_s6 + $0x164] sm:$0xf]  ;;  %v251_v6 = vld [vmem:[%s11954_s6 + $0x178] sm:$0xf] }
  0x28   :  { %246 = vst [vmem:[#allocation9 + $0x168] sm:$0xf] %v245_v4  ;;  %248 = vst [vmem:[#allocation9 + $0x16c] sm:$0xff] %v247_v5   ;;  %v253_v7 = vld [vmem:[%s11954_s6 + $0x174] sm:$0xf]  ;;  %v263_v11 = vld [vmem:[%s11954_s6 + $0x18c] sm:$0xff]  }
  0x29   :  { %252 = vst [vmem:[#allocation9 + $0x174] sm:$0xf] %v251_v6  ;;  %v259_v9 = vld [vmem:[%s11954_s6 + $0x188] sm:$0xf]  ;;  %254 = vst [vmem:[#allocation9 + $0x178] sm:$0xf] %v253_v7 }
  0x2a   :  { %256 = vst [vmem:[#allocation9 + $0x17c] sm:$0xff] %v255_v8   ;;  %260 = vst [vmem:[#allocation9 + $0x184] sm:$0xf] %v259_v9  ;;  %v261_v10 = vld [vmem:[%s11954_s6 + $0x184] sm:$0xf]  ;;  %v271_v14 = vld [vmem:[%s11954_s6 + $0x19c] sm:$0xff]  }
  0x2b   :  { %v267_v12 = vld [vmem:[%s11954_s6 + $0x198] sm:$0xf]  ;;  %262 = vst [vmem:[#allocation9 + $0x188] sm:$0xf] %v261_v10  ;;  %264 = vst [vmem:[#allocation9 + $0x18c] sm:$0xff] %v263_v11   ;;  %v279_v17 = vld [vmem:[%s11954_s6 + $0x1ac] sm:$0xff]  }
  0x2c   :  { %268 = vst [vmem:[#allocation9 + $0x194] sm:$0xf] %v267_v12  ;;  %v269_v13 = vld [vmem:[%s11954_s6 + $0x194] sm:$0xf]  ;;  %v275_v15 = vld [vmem:[%s11954_s6 + $0x1a8] sm:$0xf] }
  0x2d   :  { %270 = vst [vmem:[#allocation9 + $0x198] sm:$0xf] %v269_v13  ;;  %272 = vst [vmem:[#allocation9 + $0x19c] sm:$0xff] %v271_v14   ;;  %v277_v16 = vld [vmem:[%s11954_s6 + $0x1a4] sm:$0xf]  ;;  %v287_v20 = vld [vmem:[%s11954_s6 + $0x1bc] sm:$0xff]  }
  0x2e   :  { %276 = vst [vmem:[#allocation9 + $0x1a4] sm:$0xf] %v275_v15  ;;  %v283_v18 = vld [vmem:[%s11954_s6 + $0x1b8] sm:$0xf]  ;;  %278 = vst [vmem:[#allocation9 + $0x1a8] sm:$0xf] %v277_v16 }
  0x2f   :  { %280 = vst [vmem:[#allocation9 + $0x1ac] sm:$0xff] %v279_v17   ;;  %284 = vst [vmem:[#allocation9 + $0x1b4] sm:$0xf] %v283_v18  ;;  %v285_v19 = vld [vmem:[%s11954_s6 + $0x1b4] sm:$0xf]  ;;  %v295_v23 = vld [vmem:[%s11954_s6 + $0x1cc] sm:$0xff]  }
  0x30   :  { %v291_v21 = vld [vmem:[%s11954_s6 + $0x1c8] sm:$0xf]  ;;  %286 = vst [vmem:[#allocation9 + $0x1b8] sm:$0xf] %v285_v19  ;;  %288 = vst [vmem:[#allocation9 + $0x1bc] sm:$0xff] %v287_v20   ;;  %v303_v26 = vld [vmem:[%s11954_s6 + $0x1dc] sm:$0xff]  }
  0x31   :  { %292 = vst [vmem:[#allocation9 + $0x1c4] sm:$0xf] %v291_v21  ;;  %v293_v22 = vld [vmem:[%s11954_s6 + $0x1c4] sm:$0xf]  ;;  %v299_v24 = vld [vmem:[%s11954_s6 + $0x1d8] sm:$0xf] }
  0x32   :  { %294 = vst [vmem:[#allocation9 + $0x1c8] sm:$0xf] %v293_v22  ;;  %296 = vst [vmem:[#allocation9 + $0x1cc] sm:$0xff] %v295_v23   ;;  %v301_v25 = vld [vmem:[%s11954_s6 + $0x1d4] sm:$0xf]  ;;  %v311_v29 = vld [vmem:[%s11954_s6 + $0x1ec] sm:$0xff]  }
  0x33   :  { %300 = vst [vmem:[#allocation9 + $0x1d4] sm:$0xf] %v299_v24  ;;  %v307_v27 = vld [vmem:[%s11954_s6 + $0x1e8] sm:$0xf]  ;;  %302 = vst [vmem:[#allocation9 + $0x1d8] sm:$0xf] %v301_v25 }
  0x34   :  { %304 = vst [vmem:[#allocation9 + $0x1dc] sm:$0xff] %v303_v26   ;;  %308 = vst [vmem:[#allocation9 + $0x1e4] sm:$0xf] %v307_v27  ;;  %v309_v28 = vld [vmem:[%s11954_s6 + $0x1e4] sm:$0xf] }
  0x35   :  { %v315_v30 = vld [vmem:[%s11954_s6 + $0x1f8] sm:$0xf]  ;;  %310 = vst [vmem:[#allocation9 + $0x1e8] sm:$0xf] %v309_v28  ;;  %312 = vst [vmem:[#allocation9 + $0x1ec] sm:$0xff] %v311_v29  }
  0x36   :  { %316 = vst [vmem:[#allocation9 + $0x1f4] sm:$0xf] %v315_v30  ;;  %v317_v31 = vld [vmem:[%s11954_s6 + $0x1f4] sm:$0xf]  ;;  %v319_v32 = vld [vmem:[%s11954_s6 + $0x1fc] sm:$0xf] }
  0x37   :  { %318 = vst [vmem:[#allocation9 + $0x1f8] sm:$0xf] %v317_v31  ;;  %320 = vst [vmem:[#allocation9 + $0x1fc] sm:$0xf] %v319_v32 }
  0x38   :  { %607 = vsyncadd [#allocation11], 8192  ;;  %v626_v33 = vld [vmem:[%s11955_s7] sm:$0xf]  ;;  %v628_v34 = vld [vmem:[%s11955_s7 + $0x10] sm:$0xf] }
  0x39   :  { %627 = vst [vmem:[#allocation10] sm:$0xf] %v626_v33  ;;  %629 = vst [vmem:[#allocation10 + $0x4] sm:$0xf] %v628_v34  ;;  %v630_v35 = vld [vmem:[%s11955_s7 + $0x4] sm:$0xf] }
  0x3a   :  { %v632_v36 = vld [vmem:[%s11955_s7 + $0x14] sm:$0xf]  ;;  %v634_v37 = vld [vmem:[%s11955_s7 + $0x8] sm:$0xf]  ;;  %631 = vst [vmem:[#allocation10 + $0x8] sm:$0xf] %v630_v35 }
  0x3b   :  { %633 = vst [vmem:[#allocation10 + $0xc] sm:$0xf] %v632_v36  ;;  %635 = vst [vmem:[#allocation10 + $0x10] sm:$0xf] %v634_v37  ;;  %v636_v38 = vld [vmem:[%s11955_s7 + $0x18] sm:$0xf] }
  0x3c   :  { %v638_v39 = vld [vmem:[%s11955_s7 + $0xc] sm:$0xf]  ;;  %v640_v40 = vld [vmem:[%s11955_s7 + $0x1c] sm:$0xff]   ;;  %637 = vst [vmem:[#allocation10 + $0x14] sm:$0xf] %v636_v38 }
  0x3d   :  { %639 = vst [vmem:[#allocation10 + $0x18] sm:$0xf] %v638_v39  ;;  %641 = vst [vmem:[#allocation10 + $0x1c] sm:$0xff] %v640_v40   ;;  %v644_v41 = vld [vmem:[%s11955_s7 + $0x30] sm:$0xf]  ;;  %v656_v47 = vld [vmem:[%s11955_s7 + $0x3c] sm:$0xff]  }
  0x3e   :  { %v646_v42 = vld [vmem:[%s11955_s7 + $0x24] sm:$0xf]  ;;  %v648_v43 = vld [vmem:[%s11955_s7 + $0x34] sm:$0xf]  ;;  %645 = vst [vmem:[#allocation10 + $0x24] sm:$0xf] %v644_v41 }
  0x3f   :  { %647 = vst [vmem:[#allocation10 + $0x28] sm:$0xf] %v646_v42  ;;  %649 = vst [vmem:[#allocation10 + $0x2c] sm:$0xf] %v648_v43  ;;  %v650_v44 = vld [vmem:[%s11955_s7 + $0x28] sm:$0xf] }
  0x40   :  { %v652_v45 = vld [vmem:[%s11955_s7 + $0x38] sm:$0xf]  ;;  %v654_v46 = vld [vmem:[%s11955_s7 + $0x2c] sm:$0xf]  ;;  %651 = vst [vmem:[#allocation10 + $0x30] sm:$0xf] %v650_v44 }
  0x41   :  { %653 = vst [vmem:[#allocation10 + $0x34] sm:$0xf] %v652_v45  ;;  %655 = vst [vmem:[#allocation10 + $0x38] sm:$0xf] %v654_v46  ;;  %v660_v48 = vld [vmem:[%s11955_s7 + $0x50] sm:$0xf] }
  0x42   :  { %v662_v49 = vld [vmem:[%s11955_s7 + $0x44] sm:$0xf]  ;;  %657 = vst [vmem:[#allocation10 + $0x3c] sm:$0xff] %v656_v47   ;;  %661 = vst [vmem:[#allocation10 + $0x44] sm:$0xf] %v660_v48  ;;  %v672_v54 = vld [vmem:[%s11955_s7 + $0x5c] sm:$0xff]  }
  0x43   :  { %663 = vst [vmem:[#allocation10 + $0x48] sm:$0xf] %v662_v49  ;;  %v664_v50 = vld [vmem:[%s11955_s7 + $0x54] sm:$0xf]  ;;  %v666_v51 = vld [vmem:[%s11955_s7 + $0x48] sm:$0xf] }
  0x44   :  { %v668_v52 = vld [vmem:[%s11955_s7 + $0x58] sm:$0xf]  ;;  %665 = vst [vmem:[#allocation10 + $0x4c] sm:$0xf] %v664_v50  ;;  %667 = vst [vmem:[#allocation10 + $0x50] sm:$0xf] %v666_v51 }
  0x45   :  { %669 = vst [vmem:[#allocation10 + $0x54] sm:$0xf] %v668_v52  ;;  %v670_v53 = vld [vmem:[%s11955_s7 + $0x4c] sm:$0xf]  ;;  %v676_v55 = vld [vmem:[%s11955_s7 + $0x70] sm:$0xf] }
  0x46   :  { %671 = vst [vmem:[#allocation10 + $0x58] sm:$0xf] %v670_v53  ;;  %673 = vst [vmem:[#allocation10 + $0x5c] sm:$0xff] %v672_v54   ;;  %v678_v56 = vld [vmem:[%s11955_s7 + $0x64] sm:$0xf]  ;;  %v688_v61 = vld [vmem:[%s11955_s7 + $0x7c] sm:$0xff]  }
  0x47   :  { %677 = vst [vmem:[#allocation10 + $0x64] sm:$0xf] %v676_v55  ;;  %v680_v57 = vld [vmem:[%s11955_s7 + $0x74] sm:$0xf]  ;;  %v682_v58 = vld [vmem:[%s11955_s7 + $0x68] sm:$0xf] }
  0x48   :  { %679 = vst [vmem:[#allocation10 + $0x68] sm:$0xf] %v678_v56  ;;  %681 = vst [vmem:[#allocation10 + $0x6c] sm:$0xf] %v680_v57  ;;  %v684_v59 = vld [vmem:[%s11955_s7 + $0x78] sm:$0xf] }
  0x49   :  { %683 = vst [vmem:[#allocation10 + $0x70] sm:$0xf] %v682_v58  ;;  %v686_v60 = vld [vmem:[%s11955_s7 + $0x6c] sm:$0xf]  ;;  %685 = vst [vmem:[#allocation10 + $0x74] sm:$0xf] %v684_v59 }
  0x4a   :  { %687 = vst [vmem:[#allocation10 + $0x78] sm:$0xf] %v686_v60  ;;  %689 = vst [vmem:[#allocation10 + $0x7c] sm:$0xff] %v688_v61   ;;  %v692_v62 = vld [vmem:[%s11955_s7 + $0x90] sm:$0xf]  ;;  %v704_v4 = vld [vmem:[%s11955_s7 + $0x9c] sm:$0xff]  }
  0x4b   :  { %v694_v63 = vld [vmem:[%s11955_s7 + $0x84] sm:$0xf]  ;;  %v696_v0 = vld [vmem:[%s11955_s7 + $0x94] sm:$0xf]  ;;  %693 = vst [vmem:[#allocation10 + $0x84] sm:$0xf] %v692_v62 }
  0x4c   :  { %695 = vst [vmem:[#allocation10 + $0x88] sm:$0xf] %v694_v63  ;;  %697 = vst [vmem:[#allocation10 + $0x8c] sm:$0xf] %v696_v0  ;;  %v698_v1 = vld [vmem:[%s11955_s7 + $0x88] sm:$0xf] }
  0x4d   :  { %v700_v2 = vld [vmem:[%s11955_s7 + $0x98] sm:$0xf]  ;;  %v702_v3 = vld [vmem:[%s11955_s7 + $0x8c] sm:$0xf]  ;;  %699 = vst [vmem:[#allocation10 + $0x90] sm:$0xf] %v698_v1 }
  0x4e   :  { %701 = vst [vmem:[#allocation10 + $0x94] sm:$0xf] %v700_v2  ;;  %703 = vst [vmem:[#allocation10 + $0x98] sm:$0xf] %v702_v3  ;;  %v708_v5 = vld [vmem:[%s11955_s7 + $0xb0] sm:$0xf] }
  0x4f   :  { %v710_v6 = vld [vmem:[%s11955_s7 + $0xa4] sm:$0xf]  ;;  %705 = vst [vmem:[#allocation10 + $0x9c] sm:$0xff] %v704_v4   ;;  %709 = vst [vmem:[#allocation10 + $0xa4] sm:$0xf] %v708_v5  ;;  %v720_v11 = vld [vmem:[%s11955_s7 + $0xbc] sm:$0xff]  }
  0x50   :  { %711 = vst [vmem:[#allocation10 + $0xa8] sm:$0xf] %v710_v6  ;;  %v712_v7 = vld [vmem:[%s11955_s7 + $0xb4] sm:$0xf]  ;;  %v714_v8 = vld [vmem:[%s11955_s7 + $0xa8] sm:$0xf] }
  0x51   :  { %v716_v9 = vld [vmem:[%s11955_s7 + $0xb8] sm:$0xf]  ;;  %713 = vst [vmem:[#allocation10 + $0xac] sm:$0xf] %v712_v7  ;;  %715 = vst [vmem:[#allocation10 + $0xb0] sm:$0xf] %v714_v8 }
  0x52   :  { %717 = vst [vmem:[#allocation10 + $0xb4] sm:$0xf] %v716_v9  ;;  %v718_v10 = vld [vmem:[%s11955_s7 + $0xac] sm:$0xf]  ;;  %v724_v12 = vld [vmem:[%s11955_s7 + $0xd0] sm:$0xf] }
  0x53   :  { %719 = vst [vmem:[#allocation10 + $0xb8] sm:$0xf] %v718_v10  ;;  %721 = vst [vmem:[#allocation10 + $0xbc] sm:$0xff] %v720_v11   ;;  %v726_v13 = vld [vmem:[%s11955_s7 + $0xc4] sm:$0xf]  ;;  %v736_v18 = vld [vmem:[%s11955_s7 + $0xdc] sm:$0xff]  }
  0x54   :  { %725 = vst [vmem:[#allocation10 + $0xc4] sm:$0xf] %v724_v12  ;;  %v728_v14 = vld [vmem:[%s11955_s7 + $0xd4] sm:$0xf]  ;;  %v730_v15 = vld [vmem:[%s11955_s7 + $0xc8] sm:$0xf] }
  0x55   :  { %727 = vst [vmem:[#allocation10 + $0xc8] sm:$0xf] %v726_v13  ;;  %729 = vst [vmem:[#allocation10 + $0xcc] sm:$0xf] %v728_v14  ;;  %v732_v16 = vld [vmem:[%s11955_s7 + $0xd8] sm:$0xf] }
  0x56   :  { %731 = vst [vmem:[#allocation10 + $0xd0] sm:$0xf] %v730_v15  ;;  %v734_v17 = vld [vmem:[%s11955_s7 + $0xcc] sm:$0xf]  ;;  %733 = vst [vmem:[#allocation10 + $0xd4] sm:$0xf] %v732_v16 }
  0x57   :  { %735 = vst [vmem:[#allocation10 + $0xd8] sm:$0xf] %v734_v17  ;;  %737 = vst [vmem:[#allocation10 + $0xdc] sm:$0xff] %v736_v18   ;;  %v740_v19 = vld [vmem:[%s11955_s7 + $0xf0] sm:$0xf]  ;;  %v752_v25 = vld [vmem:[%s11955_s7 + $0xfc] sm:$0xff]  }
  0x58   :  { %v742_v20 = vld [vmem:[%s11955_s7 + $0xe4] sm:$0xf]  ;;  %v744_v21 = vld [vmem:[%s11955_s7 + $0xf4] sm:$0xf]  ;;  %741 = vst [vmem:[#allocation10 + $0xe4] sm:$0xf] %v740_v19 }
  0x59   :  { %743 = vst [vmem:[#allocation10 + $0xe8] sm:$0xf] %v742_v20  ;;  %745 = vst [vmem:[#allocation10 + $0xec] sm:$0xf] %v744_v21  ;;  %v746_v22 = vld [vmem:[%s11955_s7 + $0xe8] sm:$0xf] }
  0x5a   :  { %v748_v23 = vld [vmem:[%s11955_s7 + $0xf8] sm:$0xf]  ;;  %v750_v24 = vld [vmem:[%s11955_s7 + $0xec] sm:$0xf]  ;;  %747 = vst [vmem:[#allocation10 + $0xf0] sm:$0xf] %v746_v22 }
  0x5b   :  { %749 = vst [vmem:[#allocation10 + $0xf4] sm:$0xf] %v748_v23  ;;  %751 = vst [vmem:[#allocation10 + $0xf8] sm:$0xf] %v750_v24  ;;  %v756_v26 = vld [vmem:[%s11955_s7 + $0x110] sm:$0xf] }
  0x5c   :  { %v758_v27 = vld [vmem:[%s11955_s7 + $0x104] sm:$0xf]  ;;  %753 = vst [vmem:[#allocation10 + $0xfc] sm:$0xff] %v752_v25   ;;  %757 = vst [vmem:[#allocation10 + $0x104] sm:$0xf] %v756_v26  ;;  %v768_v32 = vld [vmem:[%s11955_s7 + $0x11c] sm:$0xff]  }
  0x5d   :  { %759 = vst [vmem:[#allocation10 + $0x108] sm:$0xf] %v758_v27  ;;  %v760_v28 = vld [vmem:[%s11955_s7 + $0x114] sm:$0xf]  ;;  %v762_v29 = vld [vmem:[%s11955_s7 + $0x108] sm:$0xf] }
  0x5e   :  { %v764_v30 = vld [vmem:[%s11955_s7 + $0x118] sm:$0xf]  ;;  %761 = vst [vmem:[#allocation10 + $0x10c] sm:$0xf] %v760_v28  ;;  %763 = vst [vmem:[#allocation10 + $0x110] sm:$0xf] %v762_v29 }
  0x5f   :  { %765 = vst [vmem:[#allocation10 + $0x114] sm:$0xf] %v764_v30  ;;  %v766_v31 = vld [vmem:[%s11955_s7 + $0x10c] sm:$0xf]  ;;  %v772_v33 = vld [vmem:[%s11955_s7 + $0x130] sm:$0xf] }
  0x60   :  { %767 = vst [vmem:[#allocation10 + $0x118] sm:$0xf] %v766_v31  ;;  %769 = vst [vmem:[#allocation10 + $0x11c] sm:$0xff] %v768_v32   ;;  %v774_v34 = vld [vmem:[%s11955_s7 + $0x124] sm:$0xf]  ;;  %v784_v39 = vld [vmem:[%s11955_s7 + $0x13c] sm:$0xff]  }
  0x61   :  { %773 = vst [vmem:[#allocation10 + $0x124] sm:$0xf] %v772_v33  ;;  %v776_v35 = vld [vmem:[%s11955_s7 + $0x134] sm:$0xf]  ;;  %v778_v36 = vld [vmem:[%s11955_s7 + $0x128] sm:$0xf] }
  0x62   :  { %775 = vst [vmem:[#allocation10 + $0x128] sm:$0xf] %v774_v34  ;;  %777 = vst [vmem:[#allocation10 + $0x12c] sm:$0xf] %v776_v35  ;;  %v780_v37 = vld [vmem:[%s11955_s7 + $0x138] sm:$0xf] }
  0x63   :  { %779 = vst [vmem:[#allocation10 + $0x130] sm:$0xf] %v778_v36  ;;  %v782_v38 = vld [vmem:[%s11955_s7 + $0x12c] sm:$0xf]  ;;  %781 = vst [vmem:[#allocation10 + $0x134] sm:$0xf] %v780_v37 }
  0x64   :  { %783 = vst [vmem:[#allocation10 + $0x138] sm:$0xf] %v782_v38  ;;  %785 = vst [vmem:[#allocation10 + $0x13c] sm:$0xff] %v784_v39   ;;  %v788_v40 = vld [vmem:[%s11955_s7 + $0x150] sm:$0xf]  ;;  %v800_v46 = vld [vmem:[%s11955_s7 + $0x15c] sm:$0xff]  }
  0x65   :  { %v790_v41 = vld [vmem:[%s11955_s7 + $0x144] sm:$0xf]  ;;  %v792_v42 = vld [vmem:[%s11955_s7 + $0x154] sm:$0xf]  ;;  %789 = vst [vmem:[#allocation10 + $0x144] sm:$0xf] %v788_v40 }
  0x66   :  { %791 = vst [vmem:[#allocation10 + $0x148] sm:$0xf] %v790_v41  ;;  %793 = vst [vmem:[#allocation10 + $0x14c] sm:$0xf] %v792_v42  ;;  %v794_v43 = vld [vmem:[%s11955_s7 + $0x148] sm:$0xf] }
  0x67   :  { %v796_v44 = vld [vmem:[%s11955_s7 + $0x158] sm:$0xf]  ;;  %v798_v45 = vld [vmem:[%s11955_s7 + $0x14c] sm:$0xf]  ;;  %795 = vst [vmem:[#allocation10 + $0x150] sm:$0xf] %v794_v43 }
  0x68   :  { %797 = vst [vmem:[#allocation10 + $0x154] sm:$0xf] %v796_v44  ;;  %799 = vst [vmem:[#allocation10 + $0x158] sm:$0xf] %v798_v45  ;;  %v804_v47 = vld [vmem:[%s11955_s7 + $0x170] sm:$0xf] }
  0x69   :  { %v806_v48 = vld [vmem:[%s11955_s7 + $0x164] sm:$0xf]  ;;  %801 = vst [vmem:[#allocation10 + $0x15c] sm:$0xff] %v800_v46   ;;  %805 = vst [vmem:[#allocation10 + $0x164] sm:$0xf] %v804_v47  ;;  %v816_v53 = vld [vmem:[%s11955_s7 + $0x17c] sm:$0xff]  }
  0x6a   :  { %807 = vst [vmem:[#allocation10 + $0x168] sm:$0xf] %v806_v48  ;;  %v808_v49 = vld [vmem:[%s11955_s7 + $0x174] sm:$0xf]  ;;  %v810_v50 = vld [vmem:[%s11955_s7 + $0x168] sm:$0xf] }
  0x6b   :  { %v812_v51 = vld [vmem:[%s11955_s7 + $0x178] sm:$0xf]  ;;  %809 = vst [vmem:[#allocation10 + $0x16c] sm:$0xf] %v808_v49  ;;  %811 = vst [vmem:[#allocation10 + $0x170] sm:$0xf] %v810_v50 }
  0x6c   :  { %813 = vst [vmem:[#allocation10 + $0x174] sm:$0xf] %v812_v51  ;;  %v814_v52 = vld [vmem:[%s11955_s7 + $0x16c] sm:$0xf]  ;;  %v820_v54 = vld [vmem:[%s11955_s7 + $0x190] sm:$0xf] }
  0x6d   :  { %815 = vst [vmem:[#allocation10 + $0x178] sm:$0xf] %v814_v52  ;;  %817 = vst [vmem:[#allocation10 + $0x17c] sm:$0xff] %v816_v53   ;;  %v822_v55 = vld [vmem:[%s11955_s7 + $0x184] sm:$0xf]  ;;  %v832_v60 = vld [vmem:[%s11955_s7 + $0x19c] sm:$0xff]  }
  0x6e   :  { %821 = vst [vmem:[#allocation10 + $0x184] sm:$0xf] %v820_v54  ;;  %v824_v56 = vld [vmem:[%s11955_s7 + $0x194] sm:$0xf]  ;;  %v826_v57 = vld [vmem:[%s11955_s7 + $0x188] sm:$0xf] }
  0x6f   :  { %823 = vst [vmem:[#allocation10 + $0x188] sm:$0xf] %v822_v55  ;;  %825 = vst [vmem:[#allocation10 + $0x18c] sm:$0xf] %v824_v56  ;;  %v828_v58 = vld [vmem:[%s11955_s7 + $0x198] sm:$0xf] }
  0x70   :  { %827 = vst [vmem:[#allocation10 + $0x190] sm:$0xf] %v826_v57  ;;  %v830_v59 = vld [vmem:[%s11955_s7 + $0x18c] sm:$0xf]  ;;  %829 = vst [vmem:[#allocation10 + $0x194] sm:$0xf] %v828_v58 }
  0x71   :  { %831 = vst [vmem:[#allocation10 + $0x198] sm:$0xf] %v830_v59  ;;  %833 = vst [vmem:[#allocation10 + $0x19c] sm:$0xff] %v832_v60   ;;  %v836_v61 = vld [vmem:[%s11955_s7 + $0x1b0] sm:$0xf]  ;;  %v848_v3 = vld [vmem:[%s11955_s7 + $0x1bc] sm:$0xff]  }
  0x72   :  { %v838_v62 = vld [vmem:[%s11955_s7 + $0x1a4] sm:$0xf]  ;;  %v840_v63 = vld [vmem:[%s11955_s7 + $0x1b4] sm:$0xf]  ;;  %837 = vst [vmem:[#allocation10 + $0x1a4] sm:$0xf] %v836_v61 }
  0x73   :  { %839 = vst [vmem:[#allocation10 + $0x1a8] sm:$0xf] %v838_v62  ;;  %841 = vst [vmem:[#allocation10 + $0x1ac] sm:$0xf] %v840_v63  ;;  %v842_v0 = vld [vmem:[%s11955_s7 + $0x1a8] sm:$0xf] }
  0x74   :  { %v844_v1 = vld [vmem:[%s11955_s7 + $0x1b8] sm:$0xf]  ;;  %v846_v2 = vld [vmem:[%s11955_s7 + $0x1ac] sm:$0xf]  ;;  %843 = vst [vmem:[#allocation10 + $0x1b0] sm:$0xf] %v842_v0 }
  0x75   :  { %845 = vst [vmem:[#allocation10 + $0x1b4] sm:$0xf] %v844_v1  ;;  %847 = vst [vmem:[#allocation10 + $0x1b8] sm:$0xf] %v846_v2  ;;  %v852_v4 = vld [vmem:[%s11955_s7 + $0x1d0] sm:$0xf] }
  0x76   :  { %v854_v5 = vld [vmem:[%s11955_s7 + $0x1c4] sm:$0xf]  ;;  %849 = vst [vmem:[#allocation10 + $0x1bc] sm:$0xff] %v848_v3   ;;  %853 = vst [vmem:[#allocation10 + $0x1c4] sm:$0xf] %v852_v4  ;;  %v864_v10 = vld [vmem:[%s11955_s7 + $0x1dc] sm:$0xff]  }
  0x77   :  { %855 = vst [vmem:[#allocation10 + $0x1c8] sm:$0xf] %v854_v5  ;;  %v856_v6 = vld [vmem:[%s11955_s7 + $0x1d4] sm:$0xf]  ;;  %v858_v7 = vld [vmem:[%s11955_s7 + $0x1c8] sm:$0xf] }
  0x78   :  { %v860_v8 = vld [vmem:[%s11955_s7 + $0x1d8] sm:$0xf]  ;;  %857 = vst [vmem:[#allocation10 + $0x1cc] sm:$0xf] %v856_v6  ;;  %859 = vst [vmem:[#allocation10 + $0x1d0] sm:$0xf] %v858_v7 }
  0x79   :  { %861 = vst [vmem:[#allocation10 + $0x1d4] sm:$0xf] %v860_v8  ;;  %v862_v9 = vld [vmem:[%s11955_s7 + $0x1cc] sm:$0xf]  ;;  %v868_v11 = vld [vmem:[%s11955_s7 + $0x1f0] sm:$0xf] }
  0x7a   :  { %863 = vst [vmem:[#allocation10 + $0x1d8] sm:$0xf] %v862_v9  ;;  %865 = vst [vmem:[#allocation10 + $0x1dc] sm:$0xff] %v864_v10   ;;  %v870_v12 = vld [vmem:[%s11955_s7 + $0x1e4] sm:$0xf]  ;;  %v880_v17 = vld [vmem:[%s11955_s7 + $0x1fc] sm:$0xff]  }
  0x7b   :  { %869 = vst [vmem:[#allocation10 + $0x1e4] sm:$0xf] %v868_v11  ;;  %v872_v13 = vld [vmem:[%s11955_s7 + $0x1f4] sm:$0xf]  ;;  %v874_v14 = vld [vmem:[%s11955_s7 + $0x1e8] sm:$0xf] }
  0x7c   :  { %871 = vst [vmem:[#allocation10 + $0x1e8] sm:$0xf] %v870_v12  ;;  %873 = vst [vmem:[#allocation10 + $0x1ec] sm:$0xf] %v872_v13  ;;  %v876_v15 = vld [vmem:[%s11955_s7 + $0x1f8] sm:$0xf] }
  0x7d   :  { %875 = vst [vmem:[#allocation10 + $0x1f0] sm:$0xf] %v874_v14  ;;  %v878_v16 = vld [vmem:[%s11955_s7 + $0x1ec] sm:$0xf]  ;;  %877 = vst [vmem:[#allocation10 + $0x1f4] sm:$0xf] %v876_v15 }
  0x7e   :  { %879 = vst [vmem:[#allocation10 + $0x1f8] sm:$0xf] %v878_v16  ;;  %881 = vst [vmem:[#allocation10 + $0x1fc] sm:$0xff] %v880_v17   ;;  %v884_v18 = vld [vmem:[%s11955_s7 + $0x210] sm:$0xf]  ;;  %v896_v24 = vld [vmem:[%s11955_s7 + $0x21c] sm:$0xff]  }
  0x7f   :  { %v886_v19 = vld [vmem:[%s11955_s7 + $0x204] sm:$0xf]  ;;  %v888_v20 = vld [vmem:[%s11955_s7 + $0x214] sm:$0xf]  ;;  %885 = vst [vmem:[#allocation10 + $0x204] sm:$0xf] %v884_v18 }
  0x80   :  { %887 = vst [vmem:[#allocation10 + $0x208] sm:$0xf] %v886_v19  ;;  %889 = vst [vmem:[#allocation10 + $0x20c] sm:$0xf] %v888_v20  ;;  %v890_v21 = vld [vmem:[%s11955_s7 + $0x208] sm:$0xf] }
  0x81   :  { %v892_v22 = vld [vmem:[%s11955_s7 + $0x218] sm:$0xf]  ;;  %v894_v23 = vld [vmem:[%s11955_s7 + $0x20c] sm:$0xf]  ;;  %891 = vst [vmem:[#allocation10 + $0x210] sm:$0xf] %v890_v21 }
  0x82   :  { %893 = vst [vmem:[#allocation10 + $0x214] sm:$0xf] %v892_v22  ;;  %895 = vst [vmem:[#allocation10 + $0x218] sm:$0xf] %v894_v23  ;;  %v900_v25 = vld [vmem:[%s11955_s7 + $0x230] sm:$0xf] }
  0x83   :  { %v902_v26 = vld [vmem:[%s11955_s7 + $0x224] sm:$0xf]  ;;  %897 = vst [vmem:[#allocation10 + $0x21c] sm:$0xff] %v896_v24   ;;  %901 = vst [vmem:[#allocation10 + $0x224] sm:$0xf] %v900_v25  ;;  %v912_v31 = vld [vmem:[%s11955_s7 + $0x23c] sm:$0xff]  }
  0x84   :  { %903 = vst [vmem:[#allocation10 + $0x228] sm:$0xf] %v902_v26  ;;  %v904_v27 = vld [vmem:[%s11955_s7 + $0x234] sm:$0xf]  ;;  %v906_v28 = vld [vmem:[%s11955_s7 + $0x228] sm:$0xf] }
  0x85   :  { %v908_v29 = vld [vmem:[%s11955_s7 + $0x238] sm:$0xf]  ;;  %905 = vst [vmem:[#allocation10 + $0x22c] sm:$0xf] %v904_v27  ;;  %907 = vst [vmem:[#allocation10 + $0x230] sm:$0xf] %v906_v28 }
  0x86   :  { %909 = vst [vmem:[#allocation10 + $0x234] sm:$0xf] %v908_v29  ;;  %v910_v30 = vld [vmem:[%s11955_s7 + $0x22c] sm:$0xf]  ;;  %v916_v32 = vld [vmem:[%s11955_s7 + $0x250] sm:$0xf] }
  0x87   :  { %911 = vst [vmem:[#allocation10 + $0x238] sm:$0xf] %v910_v30  ;;  %913 = vst [vmem:[#allocation10 + $0x23c] sm:$0xff] %v912_v31   ;;  %v918_v33 = vld [vmem:[%s11955_s7 + $0x244] sm:$0xf]  ;;  %v928_v38 = vld [vmem:[%s11955_s7 + $0x25c] sm:$0xff]  }
  0x88   :  { %917 = vst [vmem:[#allocation10 + $0x244] sm:$0xf] %v916_v32  ;;  %v920_v34 = vld [vmem:[%s11955_s7 + $0x254] sm:$0xf]  ;;  %v922_v35 = vld [vmem:[%s11955_s7 + $0x248] sm:$0xf] }
  0x89   :  { %919 = vst [vmem:[#allocation10 + $0x248] sm:$0xf] %v918_v33  ;;  %921 = vst [vmem:[#allocation10 + $0x24c] sm:$0xf] %v920_v34  ;;  %v924_v36 = vld [vmem:[%s11955_s7 + $0x258] sm:$0xf] }
  0x8a   :  { %923 = vst [vmem:[#allocation10 + $0x250] sm:$0xf] %v922_v35  ;;  %v926_v37 = vld [vmem:[%s11955_s7 + $0x24c] sm:$0xf]  ;;  %925 = vst [vmem:[#allocation10 + $0x254] sm:$0xf] %v924_v36 }
  0x8b   :  { %927 = vst [vmem:[#allocation10 + $0x258] sm:$0xf] %v926_v37  ;;  %929 = vst [vmem:[#allocation10 + $0x25c] sm:$0xff] %v928_v38   ;;  %v932_v39 = vld [vmem:[%s11955_s7 + $0x270] sm:$0xf]  ;;  %v944_v45 = vld [vmem:[%s11955_s7 + $0x27c] sm:$0xff]  }
  0x8c   :  { %v934_v40 = vld [vmem:[%s11955_s7 + $0x264] sm:$0xf]  ;;  %v936_v41 = vld [vmem:[%s11955_s7 + $0x274] sm:$0xf]  ;;  %933 = vst [vmem:[#allocation10 + $0x264] sm:$0xf] %v932_v39 }
  0x8d   :  { %935 = vst [vmem:[#allocation10 + $0x268] sm:$0xf] %v934_v40  ;;  %937 = vst [vmem:[#allocation10 + $0x26c] sm:$0xf] %v936_v41  ;;  %v938_v42 = vld [vmem:[%s11955_s7 + $0x268] sm:$0xf] }
  0x8e   :  { %v940_v43 = vld [vmem:[%s11955_s7 + $0x278] sm:$0xf]  ;;  %v942_v44 = vld [vmem:[%s11955_s7 + $0x26c] sm:$0xf]  ;;  %939 = vst [vmem:[#allocation10 + $0x270] sm:$0xf] %v938_v42 }
  0x8f   :  { %941 = vst [vmem:[#allocation10 + $0x274] sm:$0xf] %v940_v43  ;;  %943 = vst [vmem:[#allocation10 + $0x278] sm:$0xf] %v942_v44  ;;  %v948_v46 = vld [vmem:[%s11955_s7 + $0x290] sm:$0xf] }
  0x90   :  { %v950_v47 = vld [vmem:[%s11955_s7 + $0x284] sm:$0xf]  ;;  %945 = vst [vmem:[#allocation10 + $0x27c] sm:$0xff] %v944_v45   ;;  %949 = vst [vmem:[#allocation10 + $0x284] sm:$0xf] %v948_v46  ;;  %v960_v52 = vld [vmem:[%s11955_s7 + $0x29c] sm:$0xff]  }
  0x91   :  { %951 = vst [vmem:[#allocation10 + $0x288] sm:$0xf] %v950_v47  ;;  %v952_v48 = vld [vmem:[%s11955_s7 + $0x294] sm:$0xf]  ;;  %v954_v49 = vld [vmem:[%s11955_s7 + $0x288] sm:$0xf] }
  0x92   :  { %v956_v50 = vld [vmem:[%s11955_s7 + $0x298] sm:$0xf]  ;;  %953 = vst [vmem:[#allocation10 + $0x28c] sm:$0xf] %v952_v48  ;;  %955 = vst [vmem:[#allocation10 + $0x290] sm:$0xf] %v954_v49 }
  0x93   :  { %957 = vst [vmem:[#allocation10 + $0x294] sm:$0xf] %v956_v50  ;;  %v958_v51 = vld [vmem:[%s11955_s7 + $0x28c] sm:$0xf]  ;;  %v964_v53 = vld [vmem:[%s11955_s7 + $0x2b0] sm:$0xf] }
  0x94   :  { %959 = vst [vmem:[#allocation10 + $0x298] sm:$0xf] %v958_v51  ;;  %961 = vst [vmem:[#allocation10 + $0x29c] sm:$0xff] %v960_v52   ;;  %v966_v54 = vld [vmem:[%s11955_s7 + $0x2a4] sm:$0xf]  ;;  %v976_v59 = vld [vmem:[%s11955_s7 + $0x2bc] sm:$0xff]  }
  0x95   :  { %965 = vst [vmem:[#allocation10 + $0x2a4] sm:$0xf] %v964_v53  ;;  %v968_v55 = vld [vmem:[%s11955_s7 + $0x2b4] sm:$0xf]  ;;  %v970_v56 = vld [vmem:[%s11955_s7 + $0x2a8] sm:$0xf] }
  0x96   :  { %967 = vst [vmem:[#allocation10 + $0x2a8] sm:$0xf] %v966_v54  ;;  %969 = vst [vmem:[#allocation10 + $0x2ac] sm:$0xf] %v968_v55  ;;  %v972_v57 = vld [vmem:[%s11955_s7 + $0x2b8] sm:$0xf] }
  0x97   :  { %971 = vst [vmem:[#allocation10 + $0x2b0] sm:$0xf] %v970_v56  ;;  %v974_v58 = vld [vmem:[%s11955_s7 + $0x2ac] sm:$0xf]  ;;  %973 = vst [vmem:[#allocation10 + $0x2b4] sm:$0xf] %v972_v57 }
  0x98   :  { %975 = vst [vmem:[#allocation10 + $0x2b8] sm:$0xf] %v974_v58  ;;  %977 = vst [vmem:[#allocation10 + $0x2bc] sm:$0xff] %v976_v59   ;;  %v980_v60 = vld [vmem:[%s11955_s7 + $0x2d0] sm:$0xf]  ;;  %v992_v2 = vld [vmem:[%s11955_s7 + $0x2dc] sm:$0xff]  }
  0x99   :  { %v982_v61 = vld [vmem:[%s11955_s7 + $0x2c4] sm:$0xf]  ;;  %v984_v62 = vld [vmem:[%s11955_s7 + $0x2d4] sm:$0xf]  ;;  %981 = vst [vmem:[#allocation10 + $0x2c4] sm:$0xf] %v980_v60 }
  0x9a   :  { %983 = vst [vmem:[#allocation10 + $0x2c8] sm:$0xf] %v982_v61  ;;  %985 = vst [vmem:[#allocation10 + $0x2cc] sm:$0xf] %v984_v62  ;;  %v986_v63 = vld [vmem:[%s11955_s7 + $0x2c8] sm:$0xf] }
  0x9b   :  { %v988_v0 = vld [vmem:[%s11955_s7 + $0x2d8] sm:$0xf]  ;;  %v990_v1 = vld [vmem:[%s11955_s7 + $0x2cc] sm:$0xf]  ;;  %987 = vst [vmem:[#allocation10 + $0x2d0] sm:$0xf] %v986_v63 }
  0x9c   :  { %989 = vst [vmem:[#allocation10 + $0x2d4] sm:$0xf] %v988_v0  ;;  %991 = vst [vmem:[#allocation10 + $0x2d8] sm:$0xf] %v990_v1  ;;  %v996_v3 = vld [vmem:[%s11955_s7 + $0x2f0] sm:$0xf] }
  0x9d   :  { %v998_v4 = vld [vmem:[%s11955_s7 + $0x2e4] sm:$0xf]  ;;  %993 = vst [vmem:[#allocation10 + $0x2dc] sm:$0xff] %v992_v2   ;;  %997 = vst [vmem:[#allocation10 + $0x2e4] sm:$0xf] %v996_v3  ;;  %v1008_v9 = vld [vmem:[%s11955_s7 + $0x2fc] sm:$0xff]  }
  0x9e   :  { %999 = vst [vmem:[#allocation10 + $0x2e8] sm:$0xf] %v998_v4  ;;  %v1000_v5 = vld [vmem:[%s11955_s7 + $0x2f4] sm:$0xf]  ;;  %v1002_v6 = vld [vmem:[%s11955_s7 + $0x2e8] sm:$0xf] }
  0x9f   :  { %v1004_v7 = vld [vmem:[%s11955_s7 + $0x2f8] sm:$0xf]  ;;  %1001 = vst [vmem:[#allocation10 + $0x2ec] sm:$0xf] %v1000_v5  ;;  %1003 = vst [vmem:[#allocation10 + $0x2f0] sm:$0xf] %v1002_v6 }
  0xa0   :  { %1005 = vst [vmem:[#allocation10 + $0x2f4] sm:$0xf] %v1004_v7  ;;  %v1006_v8 = vld [vmem:[%s11955_s7 + $0x2ec] sm:$0xf]  ;;  %v1012_v10 = vld [vmem:[%s11955_s7 + $0x310] sm:$0xf] }
  0xa1   :  { %1007 = vst [vmem:[#allocation10 + $0x2f8] sm:$0xf] %v1006_v8  ;;  %1009 = vst [vmem:[#allocation10 + $0x2fc] sm:$0xff] %v1008_v9   ;;  %v1014_v11 = vld [vmem:[%s11955_s7 + $0x304] sm:$0xf]  ;;  %v1024_v16 = vld [vmem:[%s11955_s7 + $0x31c] sm:$0xff]  }
  0xa2   :  { %1013 = vst [vmem:[#allocation10 + $0x304] sm:$0xf] %v1012_v10  ;;  %v1016_v12 = vld [vmem:[%s11955_s7 + $0x314] sm:$0xf]  ;;  %v1018_v13 = vld [vmem:[%s11955_s7 + $0x308] sm:$0xf] }
  0xa3   :  { %1015 = vst [vmem:[#allocation10 + $0x308] sm:$0xf] %v1014_v11  ;;  %1017 = vst [vmem:[#allocation10 + $0x30c] sm:$0xf] %v1016_v12  ;;  %v1020_v14 = vld [vmem:[%s11955_s7 + $0x318] sm:$0xf] }
  0xa4   :  { %1019 = vst [vmem:[#allocation10 + $0x310] sm:$0xf] %v1018_v13  ;;  %v1022_v15 = vld [vmem:[%s11955_s7 + $0x30c] sm:$0xf]  ;;  %1021 = vst [vmem:[#allocation10 + $0x314] sm:$0xf] %v1020_v14 }
  0xa5   :  { %1023 = vst [vmem:[#allocation10 + $0x318] sm:$0xf] %v1022_v15  ;;  %1025 = vst [vmem:[#allocation10 + $0x31c] sm:$0xff] %v1024_v16   ;;  %v1028_v17 = vld [vmem:[%s11955_s7 + $0x330] sm:$0xf]  ;;  %v1040_v23 = vld [vmem:[%s11955_s7 + $0x33c] sm:$0xff]  }
  0xa6   :  { %v1030_v18 = vld [vmem:[%s11955_s7 + $0x324] sm:$0xf]  ;;  %v1032_v19 = vld [vmem:[%s11955_s7 + $0x334] sm:$0xf]  ;;  %1029 = vst [vmem:[#allocation10 + $0x324] sm:$0xf] %v1028_v17 }
  0xa7   :  { %1031 = vst [vmem:[#allocation10 + $0x328] sm:$0xf] %v1030_v18  ;;  %1033 = vst [vmem:[#allocation10 + $0x32c] sm:$0xf] %v1032_v19  ;;  %v1034_v20 = vld [vmem:[%s11955_s7 + $0x328] sm:$0xf] }
  0xa8   :  { %v1036_v21 = vld [vmem:[%s11955_s7 + $0x338] sm:$0xf]  ;;  %v1038_v22 = vld [vmem:[%s11955_s7 + $0x32c] sm:$0xf]  ;;  %1035 = vst [vmem:[#allocation10 + $0x330] sm:$0xf] %v1034_v20 }
  0xa9   :  { %1037 = vst [vmem:[#allocation10 + $0x334] sm:$0xf] %v1036_v21  ;;  %1039 = vst [vmem:[#allocation10 + $0x338] sm:$0xf] %v1038_v22  ;;  %v1044_v24 = vld [vmem:[%s11955_s7 + $0x350] sm:$0xf] }
  0xaa   :  { %v1046_v25 = vld [vmem:[%s11955_s7 + $0x344] sm:$0xf]  ;;  %1041 = vst [vmem:[#allocation10 + $0x33c] sm:$0xff] %v1040_v23   ;;  %1045 = vst [vmem:[#allocation10 + $0x344] sm:$0xf] %v1044_v24  ;;  %v1056_v30 = vld [vmem:[%s11955_s7 + $0x35c] sm:$0xff]  }
  0xab   :  { %1047 = vst [vmem:[#allocation10 + $0x348] sm:$0xf] %v1046_v25  ;;  %v1048_v26 = vld [vmem:[%s11955_s7 + $0x354] sm:$0xf]  ;;  %v1050_v27 = vld [vmem:[%s11955_s7 + $0x348] sm:$0xf] }
  0xac   :  { %v1052_v28 = vld [vmem:[%s11955_s7 + $0x358] sm:$0xf]  ;;  %1049 = vst [vmem:[#allocation10 + $0x34c] sm:$0xf] %v1048_v26  ;;  %1051 = vst [vmem:[#allocation10 + $0x350] sm:$0xf] %v1050_v27 }
  0xad   :  { %1053 = vst [vmem:[#allocation10 + $0x354] sm:$0xf] %v1052_v28  ;;  %v1054_v29 = vld [vmem:[%s11955_s7 + $0x34c] sm:$0xf]  ;;  %v1060_v31 = vld [vmem:[%s11955_s7 + $0x370] sm:$0xf] }
  0xae   :  { %1055 = vst [vmem:[#allocation10 + $0x358] sm:$0xf] %v1054_v29  ;;  %1057 = vst [vmem:[#allocation10 + $0x35c] sm:$0xff] %v1056_v30   ;;  %v1062_v32 = vld [vmem:[%s11955_s7 + $0x364] sm:$0xf]  ;;  %v1072_v37 = vld [vmem:[%s11955_s7 + $0x37c] sm:$0xff]  }
  0xaf   :  { %1061 = vst [vmem:[#allocation10 + $0x364] sm:$0xf] %v1060_v31  ;;  %v1064_v33 = vld [vmem:[%s11955_s7 + $0x374] sm:$0xf]  ;;  %v1066_v34 = vld [vmem:[%s11955_s7 + $0x368] sm:$0xf] }
  0xb0   :  { %1063 = vst [vmem:[#allocation10 + $0x368] sm:$0xf] %v1062_v32  ;;  %1065 = vst [vmem:[#allocation10 + $0x36c] sm:$0xf] %v1064_v33  ;;  %v1068_v35 = vld [vmem:[%s11955_s7 + $0x378] sm:$0xf] }
  0xb1   :  { %1067 = vst [vmem:[#allocation10 + $0x370] sm:$0xf] %v1066_v34  ;;  %v1070_v36 = vld [vmem:[%s11955_s7 + $0x36c] sm:$0xf]  ;;  %1069 = vst [vmem:[#allocation10 + $0x374] sm:$0xf] %v1068_v35 }
  0xb2   :  { %1071 = vst [vmem:[#allocation10 + $0x378] sm:$0xf] %v1070_v36  ;;  %1073 = vst [vmem:[#allocation10 + $0x37c] sm:$0xff] %v1072_v37   ;;  %v1076_v38 = vld [vmem:[%s11955_s7 + $0x390] sm:$0xf]  ;;  %v1088_v44 = vld [vmem:[%s11955_s7 + $0x39c] sm:$0xff]  }
  0xb3   :  { %v1078_v39 = vld [vmem:[%s11955_s7 + $0x384] sm:$0xf]  ;;  %v1080_v40 = vld [vmem:[%s11955_s7 + $0x394] sm:$0xf]  ;;  %1077 = vst [vmem:[#allocation10 + $0x384] sm:$0xf] %v1076_v38 }
  0xb4   :  { %1079 = vst [vmem:[#allocation10 + $0x388] sm:$0xf] %v1078_v39  ;;  %1081 = vst [vmem:[#allocation10 + $0x38c] sm:$0xf] %v1080_v40  ;;  %v1082_v41 = vld [vmem:[%s11955_s7 + $0x388] sm:$0xf] }
  0xb5   :  { %v1084_v42 = vld [vmem:[%s11955_s7 + $0x398] sm:$0xf]  ;;  %v1086_v43 = vld [vmem:[%s11955_s7 + $0x38c] sm:$0xf]  ;;  %1083 = vst [vmem:[#allocation10 + $0x390] sm:$0xf] %v1082_v41 }
  0xb6   :  { %1085 = vst [vmem:[#allocation10 + $0x394] sm:$0xf] %v1084_v42  ;;  %1087 = vst [vmem:[#allocation10 + $0x398] sm:$0xf] %v1086_v43  ;;  %v1092_v45 = vld [vmem:[%s11955_s7 + $0x3b0] sm:$0xf] }
  0xb7   :  { %v1094_v46 = vld [vmem:[%s11955_s7 + $0x3a4] sm:$0xf]  ;;  %1089 = vst [vmem:[#allocation10 + $0x39c] sm:$0xff] %v1088_v44   ;;  %1093 = vst [vmem:[#allocation10 + $0x3a4] sm:$0xf] %v1092_v45  ;;  %v1104_v51 = vld [vmem:[%s11955_s7 + $0x3bc] sm:$0xff]  }
  0xb8   :  { %1095 = vst [vmem:[#allocation10 + $0x3a8] sm:$0xf] %v1094_v46  ;;  %v1096_v47 = vld [vmem:[%s11955_s7 + $0x3b4] sm:$0xf]  ;;  %v1098_v48 = vld [vmem:[%s11955_s7 + $0x3a8] sm:$0xf] }
  0xb9   :  { %v1100_v49 = vld [vmem:[%s11955_s7 + $0x3b8] sm:$0xf]  ;;  %1097 = vst [vmem:[#allocation10 + $0x3ac] sm:$0xf] %v1096_v47  ;;  %1099 = vst [vmem:[#allocation10 + $0x3b0] sm:$0xf] %v1098_v48 }
  0xba   :  { %1101 = vst [vmem:[#allocation10 + $0x3b4] sm:$0xf] %v1100_v49  ;;  %v1102_v50 = vld [vmem:[%s11955_s7 + $0x3ac] sm:$0xf]  ;;  %v1108_v52 = vld [vmem:[%s11955_s7 + $0x3d0] sm:$0xf] }
  0xbb   :  { %1103 = vst [vmem:[#allocation10 + $0x3b8] sm:$0xf] %v1102_v50  ;;  %1105 = vst [vmem:[#allocation10 + $0x3bc] sm:$0xff] %v1104_v51   ;;  %v1110_v53 = vld [vmem:[%s11955_s7 + $0x3c4] sm:$0xf]  ;;  %v1120_v58 = vld [vmem:[%s11955_s7 + $0x3dc] sm:$0xff]  }
  0xbc   :  { %1109 = vst [vmem:[#allocation10 + $0x3c4] sm:$0xf] %v1108_v52  ;;  %v1112_v54 = vld [vmem:[%s11955_s7 + $0x3d4] sm:$0xf]  ;;  %v1114_v55 = vld [vmem:[%s11955_s7 + $0x3c8] sm:$0xf] }
  0xbd   :  { %1111 = vst [vmem:[#allocation10 + $0x3c8] sm:$0xf] %v1110_v53  ;;  %1113 = vst [vmem:[#allocation10 + $0x3cc] sm:$0xf] %v1112_v54  ;;  %v1116_v56 = vld [vmem:[%s11955_s7 + $0x3d8] sm:$0xf] }
  0xbe   :  { %1115 = vst [vmem:[#allocation10 + $0x3d0] sm:$0xf] %v1114_v55  ;;  %v1118_v57 = vld [vmem:[%s11955_s7 + $0x3cc] sm:$0xf]  ;;  %1117 = vst [vmem:[#allocation10 + $0x3d4] sm:$0xf] %v1116_v56 }
  0xbf   :  { %1119 = vst [vmem:[#allocation10 + $0x3d8] sm:$0xf] %v1118_v57  ;;  %1121 = vst [vmem:[#allocation10 + $0x3dc] sm:$0xff] %v1120_v58   ;;  %v1124_v59 = vld [vmem:[%s11955_s7 + $0x3f0] sm:$0xf]  ;;  %v1136_v1 = vld [vmem:[%s11955_s7 + $0x3fc] sm:$0xff]  }
  0xc0   :  { %v1126_v60 = vld [vmem:[%s11955_s7 + $0x3e4] sm:$0xf]  ;;  %v1128_v61 = vld [vmem:[%s11955_s7 + $0x3f4] sm:$0xf]  ;;  %1125 = vst [vmem:[#allocation10 + $0x3e4] sm:$0xf] %v1124_v59 }
  0xc1   :  { %1127 = vst [vmem:[#allocation10 + $0x3e8] sm:$0xf] %v1126_v60  ;;  %1129 = vst [vmem:[#allocation10 + $0x3ec] sm:$0xf] %v1128_v61  ;;  %v1130_v62 = vld [vmem:[%s11955_s7 + $0x3e8] sm:$0xf] }
  0xc2   :  { %v1132_v63 = vld [vmem:[%s11955_s7 + $0x3f8] sm:$0xf]  ;;  %v1134_v0 = vld [vmem:[%s11955_s7 + $0x3ec] sm:$0xf]  ;;  %1131 = vst [vmem:[#allocation10 + $0x3f0] sm:$0xf] %v1130_v62 }
  0xc3   :  { %1133 = vst [vmem:[#allocation10 + $0x3f4] sm:$0xf] %v1132_v63  ;;  %1135 = vst [vmem:[#allocation10 + $0x3f8] sm:$0xf] %v1134_v0  ;;  %v1140_v2 = vld [vmem:[%s11955_s7 + $0x410] sm:$0xf] }
  0xc4   :  { %v1142_v3 = vld [vmem:[%s11955_s7 + $0x404] sm:$0xf]  ;;  %1137 = vst [vmem:[#allocation10 + $0x3fc] sm:$0xff] %v1136_v1   ;;  %1141 = vst [vmem:[#allocation10 + $0x404] sm:$0xf] %v1140_v2  ;;  %v1152_v8 = vld [vmem:[%s11955_s7 + $0x41c] sm:$0xff]  }
  0xc5   :  { %1143 = vst [vmem:[#allocation10 + $0x408] sm:$0xf] %v1142_v3  ;;  %v1144_v4 = vld [vmem:[%s11955_s7 + $0x414] sm:$0xf]  ;;  %v1146_v5 = vld [vmem:[%s11955_s7 + $0x408] sm:$0xf] }
  0xc6   :  { %v1148_v6 = vld [vmem:[%s11955_s7 + $0x418] sm:$0xf]  ;;  %1145 = vst [vmem:[#allocation10 + $0x40c] sm:$0xf] %v1144_v4  ;;  %1147 = vst [vmem:[#allocation10 + $0x410] sm:$0xf] %v1146_v5 }
  0xc7   :  { %1149 = vst [vmem:[#allocation10 + $0x414] sm:$0xf] %v1148_v6  ;;  %v1150_v7 = vld [vmem:[%s11955_s7 + $0x40c] sm:$0xf]  ;;  %v1156_v9 = vld [vmem:[%s11955_s7 + $0x430] sm:$0xf] }
  0xc8   :  { %1151 = vst [vmem:[#allocation10 + $0x418] sm:$0xf] %v1150_v7  ;;  %1153 = vst [vmem:[#allocation10 + $0x41c] sm:$0xff] %v1152_v8   ;;  %v1158_v10 = vld [vmem:[%s11955_s7 + $0x424] sm:$0xf]  ;;  %v1168_v15 = vld [vmem:[%s11955_s7 + $0x43c] sm:$0xff]  }
  0xc9   :  { %1157 = vst [vmem:[#allocation10 + $0x424] sm:$0xf] %v1156_v9  ;;  %v1160_v11 = vld [vmem:[%s11955_s7 + $0x434] sm:$0xf]  ;;  %v1162_v12 = vld [vmem:[%s11955_s7 + $0x428] sm:$0xf] }
  0xca   :  { %1159 = vst [vmem:[#allocation10 + $0x428] sm:$0xf] %v1158_v10  ;;  %1161 = vst [vmem:[#allocation10 + $0x42c] sm:$0xf] %v1160_v11  ;;  %v1164_v13 = vld [vmem:[%s11955_s7 + $0x438] sm:$0xf] }
  0xcb   :  { %1163 = vst [vmem:[#allocation10 + $0x430] sm:$0xf] %v1162_v12  ;;  %v1166_v14 = vld [vmem:[%s11955_s7 + $0x42c] sm:$0xf]  ;;  %1165 = vst [vmem:[#allocation10 + $0x434] sm:$0xf] %v1164_v13 }
  0xcc   :  { %1167 = vst [vmem:[#allocation10 + $0x438] sm:$0xf] %v1166_v14  ;;  %1169 = vst [vmem:[#allocation10 + $0x43c] sm:$0xff] %v1168_v15   ;;  %v1172_v16 = vld [vmem:[%s11955_s7 + $0x450] sm:$0xf]  ;;  %v1184_v22 = vld [vmem:[%s11955_s7 + $0x45c] sm:$0xff]  }
  0xcd   :  { %v1174_v17 = vld [vmem:[%s11955_s7 + $0x444] sm:$0xf]  ;;  %v1176_v18 = vld [vmem:[%s11955_s7 + $0x454] sm:$0xf]  ;;  %1173 = vst [vmem:[#allocation10 + $0x444] sm:$0xf] %v1172_v16 }
  0xce   :  { %1175 = vst [vmem:[#allocation10 + $0x448] sm:$0xf] %v1174_v17  ;;  %1177 = vst [vmem:[#allocation10 + $0x44c] sm:$0xf] %v1176_v18  ;;  %v1178_v19 = vld [vmem:[%s11955_s7 + $0x448] sm:$0xf] }
  0xcf   :  { %v1180_v20 = vld [vmem:[%s11955_s7 + $0x458] sm:$0xf]  ;;  %v1182_v21 = vld [vmem:[%s11955_s7 + $0x44c] sm:$0xf]  ;;  %1179 = vst [vmem:[#allocation10 + $0x450] sm:$0xf] %v1178_v19 }
  0xd0   :  { %1181 = vst [vmem:[#allocation10 + $0x454] sm:$0xf] %v1180_v20  ;;  %1183 = vst [vmem:[#allocation10 + $0x458] sm:$0xf] %v1182_v21  ;;  %v1188_v23 = vld [vmem:[%s11955_s7 + $0x470] sm:$0xf] }
  0xd1   :  { %v1190_v24 = vld [vmem:[%s11955_s7 + $0x464] sm:$0xf]  ;;  %1185 = vst [vmem:[#allocation10 + $0x45c] sm:$0xff] %v1184_v22   ;;  %1189 = vst [vmem:[#allocation10 + $0x464] sm:$0xf] %v1188_v23  ;;  %v1200_v29 = vld [vmem:[%s11955_s7 + $0x47c] sm:$0xff]  }
  0xd2   :  { %1191 = vst [vmem:[#allocation10 + $0x468] sm:$0xf] %v1190_v24  ;;  %v1192_v25 = vld [vmem:[%s11955_s7 + $0x474] sm:$0xf]  ;;  %v1194_v26 = vld [vmem:[%s11955_s7 + $0x468] sm:$0xf] }
  0xd3   :  { %v1196_v27 = vld [vmem:[%s11955_s7 + $0x478] sm:$0xf]  ;;  %1193 = vst [vmem:[#allocation10 + $0x46c] sm:$0xf] %v1192_v25  ;;  %1195 = vst [vmem:[#allocation10 + $0x470] sm:$0xf] %v1194_v26 }
  0xd4   :  { %1197 = vst [vmem:[#allocation10 + $0x474] sm:$0xf] %v1196_v27  ;;  %v1198_v28 = vld [vmem:[%s11955_s7 + $0x46c] sm:$0xf]  ;;  %v1204_v30 = vld [vmem:[%s11955_s7 + $0x490] sm:$0xf] }
  0xd5   :  { %1199 = vst [vmem:[#allocation10 + $0x478] sm:$0xf] %v1198_v28  ;;  %1201 = vst [vmem:[#allocation10 + $0x47c] sm:$0xff] %v1200_v29   ;;  %v1206_v31 = vld [vmem:[%s11955_s7 + $0x484] sm:$0xf]  ;;  %v1216_v36 = vld [vmem:[%s11955_s7 + $0x49c] sm:$0xff]  }
  0xd6   :  { %1205 = vst [vmem:[#allocation10 + $0x484] sm:$0xf] %v1204_v30  ;;  %v1208_v32 = vld [vmem:[%s11955_s7 + $0x494] sm:$0xf]  ;;  %v1210_v33 = vld [vmem:[%s11955_s7 + $0x488] sm:$0xf] }
  0xd7   :  { %1207 = vst [vmem:[#allocation10 + $0x488] sm:$0xf] %v1206_v31  ;;  %1209 = vst [vmem:[#allocation10 + $0x48c] sm:$0xf] %v1208_v32  ;;  %v1212_v34 = vld [vmem:[%s11955_s7 + $0x498] sm:$0xf] }
  0xd8   :  { %1211 = vst [vmem:[#allocation10 + $0x490] sm:$0xf] %v1210_v33  ;;  %v1214_v35 = vld [vmem:[%s11955_s7 + $0x48c] sm:$0xf]  ;;  %1213 = vst [vmem:[#allocation10 + $0x494] sm:$0xf] %v1212_v34 }
  0xd9   :  { %1215 = vst [vmem:[#allocation10 + $0x498] sm:$0xf] %v1214_v35  ;;  %1217 = vst [vmem:[#allocation10 + $0x49c] sm:$0xff] %v1216_v36   ;;  %v1220_v37 = vld [vmem:[%s11955_s7 + $0x4b0] sm:$0xf]  ;;  %v1232_v43 = vld [vmem:[%s11955_s7 + $0x4bc] sm:$0xff]  }
  0xda   :  { %v1222_v38 = vld [vmem:[%s11955_s7 + $0x4a4] sm:$0xf]  ;;  %v1224_v39 = vld [vmem:[%s11955_s7 + $0x4b4] sm:$0xf]  ;;  %1221 = vst [vmem:[#allocation10 + $0x4a4] sm:$0xf] %v1220_v37 }
  0xdb   :  { %1223 = vst [vmem:[#allocation10 + $0x4a8] sm:$0xf] %v1222_v38  ;;  %1225 = vst [vmem:[#allocation10 + $0x4ac] sm:$0xf] %v1224_v39  ;;  %v1226_v40 = vld [vmem:[%s11955_s7 + $0x4a8] sm:$0xf] }
  0xdc   :  { %v1228_v41 = vld [vmem:[%s11955_s7 + $0x4b8] sm:$0xf]  ;;  %v1230_v42 = vld [vmem:[%s11955_s7 + $0x4ac] sm:$0xf]  ;;  %1227 = vst [vmem:[#allocation10 + $0x4b0] sm:$0xf] %v1226_v40 }
  0xdd   :  { %1229 = vst [vmem:[#allocation10 + $0x4b4] sm:$0xf] %v1228_v41  ;;  %1231 = vst [vmem:[#allocation10 + $0x4b8] sm:$0xf] %v1230_v42  ;;  %v1236_v44 = vld [vmem:[%s11955_s7 + $0x4d0] sm:$0xf] }
  0xde   :  { %v1238_v45 = vld [vmem:[%s11955_s7 + $0x4c4] sm:$0xf]  ;;  %1233 = vst [vmem:[#allocation10 + $0x4bc] sm:$0xff] %v1232_v43   ;;  %1237 = vst [vmem:[#allocation10 + $0x4c4] sm:$0xf] %v1236_v44  ;;  %v1248_v50 = vld [vmem:[%s11955_s7 + $0x4dc] sm:$0xff]  }
  0xdf   :  { %1239 = vst [vmem:[#allocation10 + $0x4c8] sm:$0xf] %v1238_v45  ;;  %v1240_v46 = vld [vmem:[%s11955_s7 + $0x4d4] sm:$0xf]  ;;  %v1242_v47 = vld [vmem:[%s11955_s7 + $0x4c8] sm:$0xf] }
  0xe0   :  { %v1244_v48 = vld [vmem:[%s11955_s7 + $0x4d8] sm:$0xf]  ;;  %1241 = vst [vmem:[#allocation10 + $0x4cc] sm:$0xf] %v1240_v46  ;;  %1243 = vst [vmem:[#allocation10 + $0x4d0] sm:$0xf] %v1242_v47 }
  0xe1   :  { %1245 = vst [vmem:[#allocation10 + $0x4d4] sm:$0xf] %v1244_v48  ;;  %v1246_v49 = vld [vmem:[%s11955_s7 + $0x4cc] sm:$0xf]  ;;  %v1252_v51 = vld [vmem:[%s11955_s7 + $0x4f0] sm:$0xf] }
  0xe2   :  { %1247 = vst [vmem:[#allocation10 + $0x4d8] sm:$0xf] %v1246_v49  ;;  %1249 = vst [vmem:[#allocation10 + $0x4dc] sm:$0xff] %v1248_v50   ;;  %v1254_v52 = vld [vmem:[%s11955_s7 + $0x4e4] sm:$0xf]  ;;  %v1264_v57 = vld [vmem:[%s11955_s7 + $0x4fc] sm:$0xff]  }
  0xe3   :  { %1253 = vst [vmem:[#allocation10 + $0x4e4] sm:$0xf] %v1252_v51  ;;  %v1256_v53 = vld [vmem:[%s11955_s7 + $0x4f4] sm:$0xf]  ;;  %v1258_v54 = vld [vmem:[%s11955_s7 + $0x4e8] sm:$0xf] }
  0xe4   :  { %1255 = vst [vmem:[#allocation10 + $0x4e8] sm:$0xf] %v1254_v52  ;;  %1257 = vst [vmem:[#allocation10 + $0x4ec] sm:$0xf] %v1256_v53  ;;  %v1260_v55 = vld [vmem:[%s11955_s7 + $0x4f8] sm:$0xf] }
  0xe5   :  { %1259 = vst [vmem:[#allocation10 + $0x4f0] sm:$0xf] %v1258_v54  ;;  %v1262_v56 = vld [vmem:[%s11955_s7 + $0x4ec] sm:$0xf]  ;;  %1261 = vst [vmem:[#allocation10 + $0x4f4] sm:$0xf] %v1260_v55 }
  0xe6   :  { %1263 = vst [vmem:[#allocation10 + $0x4f8] sm:$0xf] %v1262_v56  ;;  %1265 = vst [vmem:[#allocation10 + $0x4fc] sm:$0xff] %v1264_v57   ;;  %v1268_v58 = vld [vmem:[%s11955_s7 + $0x510] sm:$0xf]  ;;  %v1280_v0 = vld [vmem:[%s11955_s7 + $0x51c] sm:$0xff]  }
  0xe7   :  { %v1270_v59 = vld [vmem:[%s11955_s7 + $0x504] sm:$0xf]  ;;  %v1272_v60 = vld [vmem:[%s11955_s7 + $0x514] sm:$0xf]  ;;  %1269 = vst [vmem:[#allocation10 + $0x504] sm:$0xf] %v1268_v58 }
  0xe8   :  { %1271 = vst [vmem:[#allocation10 + $0x508] sm:$0xf] %v1270_v59  ;;  %1273 = vst [vmem:[#allocation10 + $0x50c] sm:$0xf] %v1272_v60  ;;  %v1274_v61 = vld [vmem:[%s11955_s7 + $0x508] sm:$0xf] }
  0xe9   :  { %v1276_v62 = vld [vmem:[%s11955_s7 + $0x518] sm:$0xf]  ;;  %v1278_v63 = vld [vmem:[%s11955_s7 + $0x50c] sm:$0xf]  ;;  %1275 = vst [vmem:[#allocation10 + $0x510] sm:$0xf] %v1274_v61 }
  0xea   :  { %1277 = vst [vmem:[#allocation10 + $0x514] sm:$0xf] %v1276_v62  ;;  %1279 = vst [vmem:[#allocation10 + $0x518] sm:$0xf] %v1278_v63  ;;  %v1284_v1 = vld [vmem:[%s11955_s7 + $0x530] sm:$0xf] }
  0xeb   :  { %v1286_v2 = vld [vmem:[%s11955_s7 + $0x524] sm:$0xf]  ;;  %1281 = vst [vmem:[#allocation10 + $0x51c] sm:$0xff] %v1280_v0   ;;  %1285 = vst [vmem:[#allocation10 + $0x524] sm:$0xf] %v1284_v1  ;;  %v1296_v7 = vld [vmem:[%s11955_s7 + $0x53c] sm:$0xff]  }
  0xec   :  { %1287 = vst [vmem:[#allocation10 + $0x528] sm:$0xf] %v1286_v2  ;;  %v1288_v3 = vld [vmem:[%s11955_s7 + $0x534] sm:$0xf]  ;;  %v1290_v4 = vld [vmem:[%s11955_s7 + $0x528] sm:$0xf] }
  0xed   :  { %v1292_v5 = vld [vmem:[%s11955_s7 + $0x538] sm:$0xf]  ;;  %1289 = vst [vmem:[#allocation10 + $0x52c] sm:$0xf] %v1288_v3  ;;  %1291 = vst [vmem:[#allocation10 + $0x530] sm:$0xf] %v1290_v4 }
  0xee   :  { %1293 = vst [vmem:[#allocation10 + $0x534] sm:$0xf] %v1292_v5  ;;  %v1294_v6 = vld [vmem:[%s11955_s7 + $0x52c] sm:$0xf]  ;;  %v1300_v8 = vld [vmem:[%s11955_s7 + $0x550] sm:$0xf] }
  0xef   :  { %1295 = vst [vmem:[#allocation10 + $0x538] sm:$0xf] %v1294_v6  ;;  %1297 = vst [vmem:[#allocation10 + $0x53c] sm:$0xff] %v1296_v7   ;;  %v1302_v9 = vld [vmem:[%s11955_s7 + $0x544] sm:$0xf]  ;;  %v1312_v14 = vld [vmem:[%s11955_s7 + $0x55c] sm:$0xff]  }
  0xf0   :  { %1301 = vst [vmem:[#allocation10 + $0x544] sm:$0xf] %v1300_v8  ;;  %v1304_v10 = vld [vmem:[%s11955_s7 + $0x554] sm:$0xf]  ;;  %v1306_v11 = vld [vmem:[%s11955_s7 + $0x548] sm:$0xf] }
  0xf1   :  { %1303 = vst [vmem:[#allocation10 + $0x548] sm:$0xf] %v1302_v9  ;;  %1305 = vst [vmem:[#allocation10 + $0x54c] sm:$0xf] %v1304_v10  ;;  %v1308_v12 = vld [vmem:[%s11955_s7 + $0x558] sm:$0xf] }
  0xf2   :  { %1307 = vst [vmem:[#allocation10 + $0x550] sm:$0xf] %v1306_v11  ;;  %v1310_v13 = vld [vmem:[%s11955_s7 + $0x54c] sm:$0xf]  ;;  %1309 = vst [vmem:[#allocation10 + $0x554] sm:$0xf] %v1308_v12 }
  0xf3   :  { %1311 = vst [vmem:[#allocation10 + $0x558] sm:$0xf] %v1310_v13  ;;  %1313 = vst [vmem:[#allocation10 + $0x55c] sm:$0xff] %v1312_v14   ;;  %v1316_v15 = vld [vmem:[%s11955_s7 + $0x570] sm:$0xf]  ;;  %v1328_v21 = vld [vmem:[%s11955_s7 + $0x57c] sm:$0xff]  }
  0xf4   :  { %v1318_v16 = vld [vmem:[%s11955_s7 + $0x564] sm:$0xf]  ;;  %v1320_v17 = vld [vmem:[%s11955_s7 + $0x574] sm:$0xf]  ;;  %1317 = vst [vmem:[#allocation10 + $0x564] sm:$0xf] %v1316_v15 }
  0xf5   :  { %1319 = vst [vmem:[#allocation10 + $0x568] sm:$0xf] %v1318_v16  ;;  %1321 = vst [vmem:[#allocation10 + $0x56c] sm:$0xf] %v1320_v17  ;;  %v1322_v18 = vld [vmem:[%s11955_s7 + $0x568] sm:$0xf] }
  0xf6   :  { %v1324_v19 = vld [vmem:[%s11955_s7 + $0x578] sm:$0xf]  ;;  %v1326_v20 = vld [vmem:[%s11955_s7 + $0x56c] sm:$0xf]  ;;  %1323 = vst [vmem:[#allocation10 + $0x570] sm:$0xf] %v1322_v18 }
  0xf7   :  { %1325 = vst [vmem:[#allocation10 + $0x574] sm:$0xf] %v1324_v19  ;;  %1327 = vst [vmem:[#allocation10 + $0x578] sm:$0xf] %v1326_v20  ;;  %v1332_v22 = vld [vmem:[%s11955_s7 + $0x590] sm:$0xf] }
  0xf8   :  { %v1334_v23 = vld [vmem:[%s11955_s7 + $0x584] sm:$0xf]  ;;  %1329 = vst [vmem:[#allocation10 + $0x57c] sm:$0xff] %v1328_v21   ;;  %1333 = vst [vmem:[#allocation10 + $0x584] sm:$0xf] %v1332_v22  ;;  %v1344_v28 = vld [vmem:[%s11955_s7 + $0x59c] sm:$0xff]  }
  0xf9   :  { %1335 = vst [vmem:[#allocation10 + $0x588] sm:$0xf] %v1334_v23  ;;  %v1336_v24 = vld [vmem:[%s11955_s7 + $0x594] sm:$0xf]  ;;  %v1338_v25 = vld [vmem:[%s11955_s7 + $0x588] sm:$0xf] }
  0xfa   :  { %v1340_v26 = vld [vmem:[%s11955_s7 + $0x598] sm:$0xf]  ;;  %1337 = vst [vmem:[#allocation10 + $0x58c] sm:$0xf] %v1336_v24  ;;  %1339 = vst [vmem:[#allocation10 + $0x590] sm:$0xf] %v1338_v25 }
  0xfb   :  { %1341 = vst [vmem:[#allocation10 + $0x594] sm:$0xf] %v1340_v26  ;;  %v1342_v27 = vld [vmem:[%s11955_s7 + $0x58c] sm:$0xf]  ;;  %v1348_v29 = vld [vmem:[%s11955_s7 + $0x5b0] sm:$0xf] }
  0xfc   :  { %1343 = vst [vmem:[#allocation10 + $0x598] sm:$0xf] %v1342_v27  ;;  %1345 = vst [vmem:[#allocation10 + $0x59c] sm:$0xff] %v1344_v28   ;;  %v1350_v30 = vld [vmem:[%s11955_s7 + $0x5a4] sm:$0xf]  ;;  %v1360_v35 = vld [vmem:[%s11955_s7 + $0x5bc] sm:$0xff]  }
  0xfd   :  { %1349 = vst [vmem:[#allocation10 + $0x5a4] sm:$0xf] %v1348_v29  ;;  %v1352_v31 = vld [vmem:[%s11955_s7 + $0x5b4] sm:$0xf]  ;;  %v1354_v32 = vld [vmem:[%s11955_s7 + $0x5a8] sm:$0xf] }
  0xfe   :  { %1351 = vst [vmem:[#allocation10 + $0x5a8] sm:$0xf] %v1350_v30  ;;  %1353 = vst [vmem:[#allocation10 + $0x5ac] sm:$0xf] %v1352_v31  ;;  %v1356_v33 = vld [vmem:[%s11955_s7 + $0x5b8] sm:$0xf] }
  0xff   :  { %1355 = vst [vmem:[#allocation10 + $0x5b0] sm:$0xf] %v1354_v32  ;;  %v1358_v34 = vld [vmem:[%s11955_s7 + $0x5ac] sm:$0xf]  ;;  %1357 = vst [vmem:[#allocation10 + $0x5b4] sm:$0xf] %v1356_v33 }
 0x100   :  { %1359 = vst [vmem:[#allocation10 + $0x5b8] sm:$0xf] %v1358_v34  ;;  %1361 = vst [vmem:[#allocation10 + $0x5bc] sm:$0xff] %v1360_v35   ;;  %v1364_v36 = vld [vmem:[%s11955_s7 + $0x5d0] sm:$0xf]  ;;  %v1376_v42 = vld [vmem:[%s11955_s7 + $0x5dc] sm:$0xff]  }
 0x101   :  { %v1366_v37 = vld [vmem:[%s11955_s7 + $0x5c4] sm:$0xf]  ;;  %v1368_v38 = vld [vmem:[%s11955_s7 + $0x5d4] sm:$0xf]  ;;  %1365 = vst [vmem:[#allocation10 + $0x5c4] sm:$0xf] %v1364_v36 }
 0x102   :  { %1367 = vst [vmem:[#allocation10 + $0x5c8] sm:$0xf] %v1366_v37  ;;  %1369 = vst [vmem:[#allocation10 + $0x5cc] sm:$0xf] %v1368_v38  ;;  %v1370_v39 = vld [vmem:[%s11955_s7 + $0x5c8] sm:$0xf] }
 0x103   :  { %v1372_v40 = vld [vmem:[%s11955_s7 + $0x5d8] sm:$0xf]  ;;  %v1374_v41 = vld [vmem:[%s11955_s7 + $0x5cc] sm:$0xf]  ;;  %1371 = vst [vmem:[#allocation10 + $0x5d0] sm:$0xf] %v1370_v39 }
 0x104   :  { %1373 = vst [vmem:[#allocation10 + $0x5d4] sm:$0xf] %v1372_v40  ;;  %1375 = vst [vmem:[#allocation10 + $0x5d8] sm:$0xf] %v1374_v41  ;;  %v1380_v43 = vld [vmem:[%s11955_s7 + $0x5f0] sm:$0xf] }
 0x105   :  { %v1382_v44 = vld [vmem:[%s11955_s7 + $0x5e4] sm:$0xf]  ;;  %1377 = vst [vmem:[#allocation10 + $0x5dc] sm:$0xff] %v1376_v42   ;;  %1381 = vst [vmem:[#allocation10 + $0x5e4] sm:$0xf] %v1380_v43  ;;  %v1392_v49 = vld [vmem:[%s11955_s7 + $0x5fc] sm:$0xff]  }
 0x106   :  { %1383 = vst [vmem:[#allocation10 + $0x5e8] sm:$0xf] %v1382_v44  ;;  %v1384_v45 = vld [vmem:[%s11955_s7 + $0x5f4] sm:$0xf]  ;;  %v1386_v46 = vld [vmem:[%s11955_s7 + $0x5e8] sm:$0xf] }
 0x107   :  { %v1388_v47 = vld [vmem:[%s11955_s7 + $0x5f8] sm:$0xf]  ;;  %1385 = vst [vmem:[#allocation10 + $0x5ec] sm:$0xf] %v1384_v45  ;;  %1387 = vst [vmem:[#allocation10 + $0x5f0] sm:$0xf] %v1386_v46 }
 0x108   :  { %1389 = vst [vmem:[#allocation10 + $0x5f4] sm:$0xf] %v1388_v47  ;;  %v1390_v48 = vld [vmem:[%s11955_s7 + $0x5ec] sm:$0xf]  ;;  %v1396_v50 = vld [vmem:[%s11955_s7 + $0x610] sm:$0xf] }
 0x109   :  { %1391 = vst [vmem:[#allocation10 + $0x5f8] sm:$0xf] %v1390_v48  ;;  %1393 = vst [vmem:[#allocation10 + $0x5fc] sm:$0xff] %v1392_v49   ;;  %v1398_v51 = vld [vmem:[%s11955_s7 + $0x604] sm:$0xf]  ;;  %v1408_v56 = vld [vmem:[%s11955_s7 + $0x61c] sm:$0xff]  }
 0x10a   :  { %1397 = vst [vmem:[#allocation10 + $0x604] sm:$0xf] %v1396_v50  ;;  %v1400_v52 = vld [vmem:[%s11955_s7 + $0x614] sm:$0xf]  ;;  %v1402_v53 = vld [vmem:[%s11955_s7 + $0x608] sm:$0xf] }
 0x10b   :  { %1399 = vst [vmem:[#allocation10 + $0x608] sm:$0xf] %v1398_v51  ;;  %1401 = vst [vmem:[#allocation10 + $0x60c] sm:$0xf] %v1400_v52  ;;  %v1404_v54 = vld [vmem:[%s11955_s7 + $0x618] sm:$0xf] }
 0x10c   :  { %1403 = vst [vmem:[#allocation10 + $0x610] sm:$0xf] %v1402_v53  ;;  %v1406_v55 = vld [vmem:[%s11955_s7 + $0x60c] sm:$0xf]  ;;  %1405 = vst [vmem:[#allocation10 + $0x614] sm:$0xf] %v1404_v54 }
 0x10d   :  { %1407 = vst [vmem:[#allocation10 + $0x618] sm:$0xf] %v1406_v55  ;;  %1409 = vst [vmem:[#allocation10 + $0x61c] sm:$0xff] %v1408_v56   ;;  %v1412_v57 = vld [vmem:[%s11955_s7 + $0x630] sm:$0xf]  ;;  %v1424_v63 = vld [vmem:[%s11955_s7 + $0x63c] sm:$0xff]  }
 0x10e   :  { %v1414_v58 = vld [vmem:[%s11955_s7 + $0x624] sm:$0xf]  ;;  %v1416_v59 = vld [vmem:[%s11955_s7 + $0x634] sm:$0xf]  ;;  %1413 = vst [vmem:[#allocation10 + $0x624] sm:$0xf] %v1412_v57 }
 0x10f   :  { %1415 = vst [vmem:[#allocation10 + $0x628] sm:$0xf] %v1414_v58  ;;  %1417 = vst [vmem:[#allocation10 + $0x62c] sm:$0xf] %v1416_v59  ;;  %v1418_v60 = vld [vmem:[%s11955_s7 + $0x628] sm:$0xf] }
 0x110   :  { %v1420_v61 = vld [vmem:[%s11955_s7 + $0x638] sm:$0xf]  ;;  %v1422_v62 = vld [vmem:[%s11955_s7 + $0x62c] sm:$0xf]  ;;  %1419 = vst [vmem:[#allocation10 + $0x630] sm:$0xf] %v1418_v60 }
 0x111   :  { %1421 = vst [vmem:[#allocation10 + $0x634] sm:$0xf] %v1420_v61  ;;  %1423 = vst [vmem:[#allocation10 + $0x638] sm:$0xf] %v1422_v62  ;;  %v1428_v0 = vld [vmem:[%s11955_s7 + $0x650] sm:$0xf] }
 0x112   :  { %v1430_v1 = vld [vmem:[%s11955_s7 + $0x644] sm:$0xf]  ;;  %1425 = vst [vmem:[#allocation10 + $0x63c] sm:$0xff] %v1424_v63   ;;  %1429 = vst [vmem:[#allocation10 + $0x644] sm:$0xf] %v1428_v0  ;;  %v1440_v6 = vld [vmem:[%s11955_s7 + $0x65c] sm:$0xff]  }
 0x113   :  { %1431 = vst [vmem:[#allocation10 + $0x648] sm:$0xf] %v1430_v1  ;;  %v1432_v2 = vld [vmem:[%s11955_s7 + $0x654] sm:$0xf]  ;;  %v1434_v3 = vld [vmem:[%s11955_s7 + $0x648] sm:$0xf] }
 0x114   :  { %v1436_v4 = vld [vmem:[%s11955_s7 + $0x658] sm:$0xf]  ;;  %1433 = vst [vmem:[#allocation10 + $0x64c] sm:$0xf] %v1432_v2  ;;  %1435 = vst [vmem:[#allocation10 + $0x650] sm:$0xf] %v1434_v3 }
 0x115   :  { %1437 = vst [vmem:[#allocation10 + $0x654] sm:$0xf] %v1436_v4  ;;  %v1438_v5 = vld [vmem:[%s11955_s7 + $0x64c] sm:$0xf]  ;;  %v1444_v7 = vld [vmem:[%s11955_s7 + $0x670] sm:$0xf] }
 0x116   :  { %1439 = vst [vmem:[#allocation10 + $0x658] sm:$0xf] %v1438_v5  ;;  %1441 = vst [vmem:[#allocation10 + $0x65c] sm:$0xff] %v1440_v6   ;;  %v1446_v8 = vld [vmem:[%s11955_s7 + $0x664] sm:$0xf]  ;;  %v1456_v13 = vld [vmem:[%s11955_s7 + $0x67c] sm:$0xff]  }
 0x117   :  { %1445 = vst [vmem:[#allocation10 + $0x664] sm:$0xf] %v1444_v7  ;;  %v1448_v9 = vld [vmem:[%s11955_s7 + $0x674] sm:$0xf]  ;;  %v1450_v10 = vld [vmem:[%s11955_s7 + $0x668] sm:$0xf] }
 0x118   :  { %1447 = vst [vmem:[#allocation10 + $0x668] sm:$0xf] %v1446_v8  ;;  %1449 = vst [vmem:[#allocation10 + $0x66c] sm:$0xf] %v1448_v9  ;;  %v1452_v11 = vld [vmem:[%s11955_s7 + $0x678] sm:$0xf] }
 0x119   :  { %1451 = vst [vmem:[#allocation10 + $0x670] sm:$0xf] %v1450_v10  ;;  %v1454_v12 = vld [vmem:[%s11955_s7 + $0x66c] sm:$0xf]  ;;  %1453 = vst [vmem:[#allocation10 + $0x674] sm:$0xf] %v1452_v11 }
 0x11a   :  { %1455 = vst [vmem:[#allocation10 + $0x678] sm:$0xf] %v1454_v12  ;;  %1457 = vst [vmem:[#allocation10 + $0x67c] sm:$0xff] %v1456_v13   ;;  %v1460_v14 = vld [vmem:[%s11955_s7 + $0x690] sm:$0xf]  ;;  %v1472_v20 = vld [vmem:[%s11955_s7 + $0x69c] sm:$0xff]  }
 0x11b   :  { %v1462_v15 = vld [vmem:[%s11955_s7 + $0x684] sm:$0xf]  ;;  %v1464_v16 = vld [vmem:[%s11955_s7 + $0x694] sm:$0xf]  ;;  %1461 = vst [vmem:[#allocation10 + $0x684] sm:$0xf] %v1460_v14 }
 0x11c   :  { %1463 = vst [vmem:[#allocation10 + $0x688] sm:$0xf] %v1462_v15  ;;  %1465 = vst [vmem:[#allocation10 + $0x68c] sm:$0xf] %v1464_v16  ;;  %v1466_v17 = vld [vmem:[%s11955_s7 + $0x688] sm:$0xf] }
 0x11d   :  { %v1468_v18 = vld [vmem:[%s11955_s7 + $0x698] sm:$0xf]  ;;  %v1470_v19 = vld [vmem:[%s11955_s7 + $0x68c] sm:$0xf]  ;;  %1467 = vst [vmem:[#allocation10 + $0x690] sm:$0xf] %v1466_v17 }
 0x11e   :  { %1469 = vst [vmem:[#allocation10 + $0x694] sm:$0xf] %v1468_v18  ;;  %1471 = vst [vmem:[#allocation10 + $0x698] sm:$0xf] %v1470_v19  ;;  %v1476_v21 = vld [vmem:[%s11955_s7 + $0x6b0] sm:$0xf] }
 0x11f   :  { %v1478_v22 = vld [vmem:[%s11955_s7 + $0x6a4] sm:$0xf]  ;;  %1473 = vst [vmem:[#allocation10 + $0x69c] sm:$0xff] %v1472_v20   ;;  %1477 = vst [vmem:[#allocation10 + $0x6a4] sm:$0xf] %v1476_v21  ;;  %v1488_v27 = vld [vmem:[%s11955_s7 + $0x6bc] sm:$0xff]  }
 0x120   :  { %1479 = vst [vmem:[#allocation10 + $0x6a8] sm:$0xf] %v1478_v22  ;;  %v1480_v23 = vld [vmem:[%s11955_s7 + $0x6b4] sm:$0xf]  ;;  %v1482_v24 = vld [vmem:[%s11955_s7 + $0x6a8] sm:$0xf] }
 0x121   :  { %v1484_v25 = vld [vmem:[%s11955_s7 + $0x6b8] sm:$0xf]  ;;  %1481 = vst [vmem:[#allocation10 + $0x6ac] sm:$0xf] %v1480_v23  ;;  %1483 = vst [vmem:[#allocation10 + $0x6b0] sm:$0xf] %v1482_v24 }
 0x122   :  { %1485 = vst [vmem:[#allocation10 + $0x6b4] sm:$0xf] %v1484_v25  ;;  %v1486_v26 = vld [vmem:[%s11955_s7 + $0x6ac] sm:$0xf]  ;;  %v1492_v28 = vld [vmem:[%s11955_s7 + $0x6d0] sm:$0xf] }
 0x123   :  { %1487 = vst [vmem:[#allocation10 + $0x6b8] sm:$0xf] %v1486_v26  ;;  %1489 = vst [vmem:[#allocation10 + $0x6bc] sm:$0xff] %v1488_v27   ;;  %v1494_v29 = vld [vmem:[%s11955_s7 + $0x6c4] sm:$0xf]  ;;  %v1504_v34 = vld [vmem:[%s11955_s7 + $0x6dc] sm:$0xff]  }
 0x124   :  { %1493 = vst [vmem:[#allocation10 + $0x6c4] sm:$0xf] %v1492_v28  ;;  %v1496_v30 = vld [vmem:[%s11955_s7 + $0x6d4] sm:$0xf]  ;;  %v1498_v31 = vld [vmem:[%s11955_s7 + $0x6c8] sm:$0xf] }
 0x125   :  { %1495 = vst [vmem:[#allocation10 + $0x6c8] sm:$0xf] %v1494_v29  ;;  %1497 = vst [vmem:[#allocation10 + $0x6cc] sm:$0xf] %v1496_v30  ;;  %v1500_v32 = vld [vmem:[%s11955_s7 + $0x6d8] sm:$0xf] }
 0x126   :  { %1499 = vst [vmem:[#allocation10 + $0x6d0] sm:$0xf] %v1498_v31  ;;  %v1502_v33 = vld [vmem:[%s11955_s7 + $0x6cc] sm:$0xf]  ;;  %1501 = vst [vmem:[#allocation10 + $0x6d4] sm:$0xf] %v1500_v32 }
 0x127   :  { %1503 = vst [vmem:[#allocation10 + $0x6d8] sm:$0xf] %v1502_v33  ;;  %1505 = vst [vmem:[#allocation10 + $0x6dc] sm:$0xff] %v1504_v34   ;;  %v1508_v35 = vld [vmem:[%s11955_s7 + $0x6f0] sm:$0xf]  ;;  %v1520_v41 = vld [vmem:[%s11955_s7 + $0x6fc] sm:$0xff]  }
 0x128   :  { %v1510_v36 = vld [vmem:[%s11955_s7 + $0x6e4] sm:$0xf]  ;;  %v1512_v37 = vld [vmem:[%s11955_s7 + $0x6f4] sm:$0xf]  ;;  %1509 = vst [vmem:[#allocation10 + $0x6e4] sm:$0xf] %v1508_v35 }
 0x129   :  { %1511 = vst [vmem:[#allocation10 + $0x6e8] sm:$0xf] %v1510_v36  ;;  %1513 = vst [vmem:[#allocation10 + $0x6ec] sm:$0xf] %v1512_v37  ;;  %v1514_v38 = vld [vmem:[%s11955_s7 + $0x6e8] sm:$0xf] }
 0x12a   :  { %v1516_v39 = vld [vmem:[%s11955_s7 + $0x6f8] sm:$0xf]  ;;  %v1518_v40 = vld [vmem:[%s11955_s7 + $0x6ec] sm:$0xf]  ;;  %1515 = vst [vmem:[#allocation10 + $0x6f0] sm:$0xf] %v1514_v38 }
 0x12b   :  { %1517 = vst [vmem:[#allocation10 + $0x6f4] sm:$0xf] %v1516_v39  ;;  %1519 = vst [vmem:[#allocation10 + $0x6f8] sm:$0xf] %v1518_v40  ;;  %v1524_v42 = vld [vmem:[%s11955_s7 + $0x710] sm:$0xf] }
 0x12c   :  { %v1526_v43 = vld [vmem:[%s11955_s7 + $0x704] sm:$0xf]  ;;  %1521 = vst [vmem:[#allocation10 + $0x6fc] sm:$0xff] %v1520_v41   ;;  %1525 = vst [vmem:[#allocation10 + $0x704] sm:$0xf] %v1524_v42  ;;  %v1536_v48 = vld [vmem:[%s11955_s7 + $0x71c] sm:$0xff]  }
 0x12d   :  { %1527 = vst [vmem:[#allocation10 + $0x708] sm:$0xf] %v1526_v43  ;;  %v1528_v44 = vld [vmem:[%s11955_s7 + $0x714] sm:$0xf]  ;;  %v1530_v45 = vld [vmem:[%s11955_s7 + $0x708] sm:$0xf] }
 0x12e   :  { %v1532_v46 = vld [vmem:[%s11955_s7 + $0x718] sm:$0xf]  ;;  %1529 = vst [vmem:[#allocation10 + $0x70c] sm:$0xf] %v1528_v44  ;;  %1531 = vst [vmem:[#allocation10 + $0x710] sm:$0xf] %v1530_v45 }
 0x12f   :  { %1533 = vst [vmem:[#allocation10 + $0x714] sm:$0xf] %v1532_v46  ;;  %v1534_v47 = vld [vmem:[%s11955_s7 + $0x70c] sm:$0xf]  ;;  %v1540_v49 = vld [vmem:[%s11955_s7 + $0x730] sm:$0xf] }
 0x130   :  { %1535 = vst [vmem:[#allocation10 + $0x718] sm:$0xf] %v1534_v47  ;;  %1537 = vst [vmem:[#allocation10 + $0x71c] sm:$0xff] %v1536_v48   ;;  %v1542_v50 = vld [vmem:[%s11955_s7 + $0x724] sm:$0xf]  ;;  %v1552_v55 = vld [vmem:[%s11955_s7 + $0x73c] sm:$0xff]  }
 0x131   :  { %1541 = vst [vmem:[#allocation10 + $0x724] sm:$0xf] %v1540_v49  ;;  %v1544_v51 = vld [vmem:[%s11955_s7 + $0x734] sm:$0xf]  ;;  %v1546_v52 = vld [vmem:[%s11955_s7 + $0x728] sm:$0xf] }
 0x132   :  { %1543 = vst [vmem:[#allocation10 + $0x728] sm:$0xf] %v1542_v50  ;;  %1545 = vst [vmem:[#allocation10 + $0x72c] sm:$0xf] %v1544_v51  ;;  %v1548_v53 = vld [vmem:[%s11955_s7 + $0x738] sm:$0xf] }
 0x133   :  { %1547 = vst [vmem:[#allocation10 + $0x730] sm:$0xf] %v1546_v52  ;;  %v1550_v54 = vld [vmem:[%s11955_s7 + $0x72c] sm:$0xf]  ;;  %1549 = vst [vmem:[#allocation10 + $0x734] sm:$0xf] %v1548_v53 }
 0x134   :  { %1551 = vst [vmem:[#allocation10 + $0x738] sm:$0xf] %v1550_v54  ;;  %1553 = vst [vmem:[#allocation10 + $0x73c] sm:$0xff] %v1552_v55   ;;  %v1556_v56 = vld [vmem:[%s11955_s7 + $0x750] sm:$0xf]  ;;  %v1568_v62 = vld [vmem:[%s11955_s7 + $0x75c] sm:$0xff]  }
 0x135   :  { %v1558_v57 = vld [vmem:[%s11955_s7 + $0x744] sm:$0xf]  ;;  %v1560_v58 = vld [vmem:[%s11955_s7 + $0x754] sm:$0xf]  ;;  %1557 = vst [vmem:[#allocation10 + $0x744] sm:$0xf] %v1556_v56 }
 0x136   :  { %1559 = vst [vmem:[#allocation10 + $0x748] sm:$0xf] %v1558_v57  ;;  %1561 = vst [vmem:[#allocation10 + $0x74c] sm:$0xf] %v1560_v58  ;;  %v1562_v59 = vld [vmem:[%s11955_s7 + $0x748] sm:$0xf] }
 0x137   :  { %v1564_v60 = vld [vmem:[%s11955_s7 + $0x758] sm:$0xf]  ;;  %v1566_v61 = vld [vmem:[%s11955_s7 + $0x74c] sm:$0xf]  ;;  %1563 = vst [vmem:[#allocation10 + $0x750] sm:$0xf] %v1562_v59 }
 0x138   :  { %1565 = vst [vmem:[#allocation10 + $0x754] sm:$0xf] %v1564_v60  ;;  %1567 = vst [vmem:[#allocation10 + $0x758] sm:$0xf] %v1566_v61  ;;  %v1572_v63 = vld [vmem:[%s11955_s7 + $0x770] sm:$0xf] }
 0x139   :  { %v1574_v0 = vld [vmem:[%s11955_s7 + $0x764] sm:$0xf]  ;;  %1569 = vst [vmem:[#allocation10 + $0x75c] sm:$0xff] %v1568_v62   ;;  %1573 = vst [vmem:[#allocation10 + $0x764] sm:$0xf] %v1572_v63  ;;  %v1584_v5 = vld [vmem:[%s11955_s7 + $0x77c] sm:$0xff]  }
 0x13a   :  { %1575 = vst [vmem:[#allocation10 + $0x768] sm:$0xf] %v1574_v0  ;;  %v1576_v1 = vld [vmem:[%s11955_s7 + $0x774] sm:$0xf]  ;;  %v1578_v2 = vld [vmem:[%s11955_s7 + $0x768] sm:$0xf] }
 0x13b   :  { %v1580_v3 = vld [vmem:[%s11955_s7 + $0x778] sm:$0xf]  ;;  %1577 = vst [vmem:[#allocation10 + $0x76c] sm:$0xf] %v1576_v1  ;;  %1579 = vst [vmem:[#allocation10 + $0x770] sm:$0xf] %v1578_v2 }
 0x13c   :  { %1581 = vst [vmem:[#allocation10 + $0x774] sm:$0xf] %v1580_v3  ;;  %v1582_v4 = vld [vmem:[%s11955_s7 + $0x76c] sm:$0xf]  ;;  %v1588_v6 = vld [vmem:[%s11955_s7 + $0x790] sm:$0xf] }
 0x13d   :  { %1583 = vst [vmem:[#allocation10 + $0x778] sm:$0xf] %v1582_v4  ;;  %1585 = vst [vmem:[#allocation10 + $0x77c] sm:$0xff] %v1584_v5   ;;  %v1590_v7 = vld [vmem:[%s11955_s7 + $0x784] sm:$0xf]  ;;  %v1600_v12 = vld [vmem:[%s11955_s7 + $0x79c] sm:$0xff]  }
 0x13e   :  { %1589 = vst [vmem:[#allocation10 + $0x784] sm:$0xf] %v1588_v6  ;;  %v1592_v8 = vld [vmem:[%s11955_s7 + $0x794] sm:$0xf]  ;;  %v1594_v9 = vld [vmem:[%s11955_s7 + $0x788] sm:$0xf] }
 0x13f   :  { %1591 = vst [vmem:[#allocation10 + $0x788] sm:$0xf] %v1590_v7  ;;  %1593 = vst [vmem:[#allocation10 + $0x78c] sm:$0xf] %v1592_v8  ;;  %v1596_v10 = vld [vmem:[%s11955_s7 + $0x798] sm:$0xf] }
 0x140   :  { %1595 = vst [vmem:[#allocation10 + $0x790] sm:$0xf] %v1594_v9  ;;  %v1598_v11 = vld [vmem:[%s11955_s7 + $0x78c] sm:$0xf]  ;;  %1597 = vst [vmem:[#allocation10 + $0x794] sm:$0xf] %v1596_v10 }
 0x141   :  { %1599 = vst [vmem:[#allocation10 + $0x798] sm:$0xf] %v1598_v11  ;;  %1601 = vst [vmem:[#allocation10 + $0x79c] sm:$0xff] %v1600_v12   ;;  %v1604_v13 = vld [vmem:[%s11955_s7 + $0x7b0] sm:$0xf]  ;;  %v1616_v19 = vld [vmem:[%s11955_s7 + $0x7bc] sm:$0xff]  }
 0x142   :  { %v1606_v14 = vld [vmem:[%s11955_s7 + $0x7a4] sm:$0xf]  ;;  %v1608_v15 = vld [vmem:[%s11955_s7 + $0x7b4] sm:$0xf]  ;;  %1605 = vst [vmem:[#allocation10 + $0x7a4] sm:$0xf] %v1604_v13 }
 0x143   :  { %1607 = vst [vmem:[#allocation10 + $0x7a8] sm:$0xf] %v1606_v14  ;;  %1609 = vst [vmem:[#allocation10 + $0x7ac] sm:$0xf] %v1608_v15  ;;  %v1610_v16 = vld [vmem:[%s11955_s7 + $0x7a8] sm:$0xf] }
 0x144   :  { %v1612_v17 = vld [vmem:[%s11955_s7 + $0x7b8] sm:$0xf]  ;;  %v1614_v18 = vld [vmem:[%s11955_s7 + $0x7ac] sm:$0xf]  ;;  %1611 = vst [vmem:[#allocation10 + $0x7b0] sm:$0xf] %v1610_v16 }
 0x145   :  { %1613 = vst [vmem:[#allocation10 + $0x7b4] sm:$0xf] %v1612_v17  ;;  %1615 = vst [vmem:[#allocation10 + $0x7b8] sm:$0xf] %v1614_v18  ;;  %v1620_v20 = vld [vmem:[%s11955_s7 + $0x7d0] sm:$0xf] }
 0x146   :  { %v1622_v21 = vld [vmem:[%s11955_s7 + $0x7c4] sm:$0xf]  ;;  %1617 = vst [vmem:[#allocation10 + $0x7bc] sm:$0xff] %v1616_v19   ;;  %1621 = vst [vmem:[#allocation10 + $0x7c4] sm:$0xf] %v1620_v20  ;;  %v1632_v26 = vld [vmem:[%s11955_s7 + $0x7dc] sm:$0xff]  }
 0x147   :  { %1623 = vst [vmem:[#allocation10 + $0x7c8] sm:$0xf] %v1622_v21  ;;  %v1624_v22 = vld [vmem:[%s11955_s7 + $0x7d4] sm:$0xf]  ;;  %v1626_v23 = vld [vmem:[%s11955_s7 + $0x7c8] sm:$0xf] }
 0x148   :  { %v1628_v24 = vld [vmem:[%s11955_s7 + $0x7d8] sm:$0xf]  ;;  %1625 = vst [vmem:[#allocation10 + $0x7cc] sm:$0xf] %v1624_v22  ;;  %1627 = vst [vmem:[#allocation10 + $0x7d0] sm:$0xf] %v1626_v23 }
 0x149   :  { %1629 = vst [vmem:[#allocation10 + $0x7d4] sm:$0xf] %v1628_v24  ;;  %v1630_v25 = vld [vmem:[%s11955_s7 + $0x7cc] sm:$0xf]  ;;  %v1636_v27 = vld [vmem:[%s11955_s7 + $0x7f0] sm:$0xf] }
 0x14a   :  { %1631 = vst [vmem:[#allocation10 + $0x7d8] sm:$0xf] %v1630_v25  ;;  %1633 = vst [vmem:[#allocation10 + $0x7dc] sm:$0xff] %v1632_v26   ;;  %v1638_v28 = vld [vmem:[%s11955_s7 + $0x7e4] sm:$0xf] }
 0x14b   :  { %1637 = vst [vmem:[#allocation10 + $0x7e4] sm:$0xf] %v1636_v27  ;;  %v1640_v29 = vld [vmem:[%s11955_s7 + $0x7f4] sm:$0xf]  ;;  %v1642_v30 = vld [vmem:[%s11955_s7 + $0x7e8] sm:$0xf] }
 0x14c   :  { %1639 = vst [vmem:[#allocation10 + $0x7e8] sm:$0xf] %v1638_v28  ;;  %1641 = vst [vmem:[#allocation10 + $0x7ec] sm:$0xf] %v1640_v29  ;;  %v1644_v31 = vld [vmem:[%s11955_s7 + $0x7f8] sm:$0xf] }
 0x14d   :  { %1643 = vst [vmem:[#allocation10 + $0x7f0] sm:$0xf] %v1642_v30  ;;  %v1646_v32 = vld [vmem:[%s11955_s7 + $0x7ec] sm:$0xf]  ;;  %v1648_v33 = vld [vmem:[%s11955_s7 + $0x7fc] sm:$0xf] }
 0x14e   :  { %1645 = vst [vmem:[#allocation10 + $0x7f4] sm:$0xf] %v1644_v31  ;;  %1647 = vst [vmem:[#allocation10 + $0x7f8] sm:$0xf] %v1646_v32 }
 0x14f   :  { %1649 = vst [vmem:[#allocation10 + $0x7fc] sm:$0xf] %v1648_v33 }
 0x150   :  { %4785 = vsyncadd [#allocation11 + $0x1], 32768  ;;  %v9298_v34 = vld [vmem:[%s11949_s1 + $0x40] sm:$0xff]   ;;  %v9416_v36 = vmov 0.0|0.0   ;;  %v9300_v37 = vld [vmem:[%s11949_s1 + $0x48] sm:$0xff]   ;;  %vm4801_vm0 = vcmask 130048  }
 0x151   :  { %v9299_v35 = vld [vmem:[%s11949_s1] sm:$0xff]   ;;  %7553 = vst [vmem:[#allocation8 + $0x78] sm:$0xff] %v9416_v36  ;;  %7502 = vst [vmem:[#allocation8] sm:$0xff] %v9416_v36  ;;  %8747 = vmatprep.subr.bf16.mxu0 %v9298_v34  ;;  %v9301_v38 = vld [vmem:[%s11949_s1 + $0x8] sm:$0xff]   ;;  %vm6401_vm1 = vcmask 261120   ;;  %vm6943_vm2 = vcmask 523264  }
 0x152   :  { %8748 = vmatpush3.bf16.msra.mxu0 %v9299_v35  ;;  %v9302_v39 = vld [vmem:[%s11949_s1 + $0x50] sm:$0xff]   ;;  %v9304_v41 = vld [vmem:[%s11949_s1 + $0x58] sm:$0xff]   ;;  %v9306_v43 = vld [vmem:[%s11949_s1 + $0x60] sm:$0xff]  }
 0x153   :  { %8749 = vmatprep.subr.bf16.mxu0 %v9300_v37  ;;  %v9303_v40 = vld [vmem:[%s11949_s1 + $0x10] sm:$0xff]   ;;  %v9305_v42 = vld [vmem:[%s11949_s1 + $0x18] sm:$0xff]   ;;  %v9307_v44 = vld [vmem:[%s11949_s1 + $0x20] sm:$0xff]  }
 0x154   :  { %v4791_v45 = vld [vmem:[%s11948_s0 + $0x8] sm:$0xff]  ;;  %v4794_v46 = vld [vmem:[%s11948_s0 + $0x58] sm:$0xff]  ;;  %v9314_v50 = vld [vmem:[%s11949_s1 + $0x80] sm:$0xff]  }
 0x155   :  { %v9308_v47 = vld [vmem:[%s11949_s1 + $0x68] sm:$0xff]   ;;  %v11179_v48 = vpack.c.bf16 %v4794_v46, %v4791_v45  ;;  %v4792_v51 = vld [vmem:[%s11948_s0 + $0x10] sm:$0xff]  ;;  %v4795_v53 = vld [vmem:[%s11948_s0 + $0x60] sm:$0xff]  ;;  %9116 = vmatprep.subr.bf16.mxu1 %v9314_v50 }
 0x156   :  { %8750 = vmatpush3.bf16.msra.mxu0 %v9301_v38  ;;  %v9309_v49 = vld [vmem:[%s11949_s1 + $0x28] sm:$0xff]   ;;  %v9310_v52 = vld [vmem:[%s11949_s1 + $0x70] sm:$0xff]   ;;  %v4805_v54 = vld [vmem:[%s11948_s0 + $0x18] sm:$0xff]  ;;  %v11203_v56 = vpack.c.bf16 %v4795_v53, %v4792_v51  ;;  %9117 = vmatpush3.bf16.msra.mxu1 %v9314_v50 }
 0x157   :  { %8751 = vmatprep.subr.bf16.mxu0 %v9302_v39  ;;  %5110 = vmatprep.mubr.bf16.mxu0 %v11179_v48  ;;  %v4808_v55 = vld [vmem:[%s11948_s0 + $0x68] sm:$0xff]  ;;  %v4817_v58 = vld [vmem:[%s11948_s0 + $0x20] sm:$0xff]  ;;  %v4820_v59 = vld [vmem:[%s11948_s0 + $0x70] sm:$0xff] }
 0x158   :  { %v11205_v57 = vpack.c.bf16 %v4808_v55, %v4805_v54  ;;  %v4829_v60 = vld [vmem:[%s11948_s0 + $0x28] sm:$0xff]  ;;  %v11216_v61 = vpack.c.bf16 %v4820_v59, %v4817_v58  ;;  %v4832_v62 = vld [vmem:[%s11948_s0 + $0x78] sm:$0xff]  ;;  %v4841_v63 = vld [vmem:[%s11948_s0 + $0x30] sm:$0xff]  ;;  %4802 = vst.msk [vmem:[#allocation8 + $0x10] sm:$0xff] %vm4801_vm0, %v11203_v56 }
 0x159   :  { %v4844_v0 = vld [vmem:[%s11948_s0 + $0x80] sm:$0xff]  ;;  %v9311_v1 = vld [vmem:[%s11949_s1 + $0x30] sm:$0xff]   ;;  %v11234_v2 = vpack.c.bf16 %v4832_v62, %v4829_v60  ;;  %v4853_v4 = vld [vmem:[%s11948_s0 + $0x38] sm:$0xff] }
 0x15a   :  { %8752 = vmatpush3.bf16.msra.mxu0 %v9303_v40  ;;  %4814 = vst.msk [vmem:[#allocation8 + $0x30] sm:$0xff] %vm4801_vm0, %v11205_v57  ;;  %v11236_v3 = vpack.c.bf16 %v4844_v0, %v4841_v63  ;;  %v4856_v5 = vld [vmem:[%s11948_s0 + $0x88] sm:$0xff]  ;;  %v4865_v6 = vld [vmem:[%s11948_s0 + $0x40] sm:$0xff]  ;;  %4826 = vst.msk [vmem:[#allocation8 + $0x50] sm:$0xff] %vm4801_vm0, %v11216_v61 }
 0x15b   :  { %8753 = vmatprep.subr.bf16.mxu0 %v9304_v41  ;;  %v4859_v7 = vpack.c.bf16 %v4856_v5, %v4853_v4  ;;  %v4868_v8 = vld [vmem:[%s11948_s0 + $0x90] sm:$0xff]  ;;  %v4877_v9 = vld [vmem:[%s11948_s0 + $0x48] sm:$0xff]  ;;  %v4880_v10 = vld [vmem:[%s11948_s0 + $0x98] sm:$0xff]  ;;  %4838 = vst.msk [vmem:[#allocation8 + $0x70] sm:$0xff] %vm4801_vm0, %v11234_v2 }
 0x15c   :  { %v9312_v11 = vld [vmem:[%s11949_s1 + $0x78] sm:$0xff]   ;;  %4850 = vst.msk [vmem:[#allocation8 + $0x90] sm:$0xff] %vm4801_vm0, %v11236_v3  ;;  %v4871_v12 = vpack.c.bf16 %v4868_v8, %v4865_v6  ;;  %v4883_v13 = vpack.c.bf16 %v4880_v10, %v4877_v9  ;;  %v9316_v14 = vld [vmem:[%s11950_s2 + $0x40] sm:$0xff]   ;;  %v4793_v17 = vld [vmem:[%s11948_s0 + $0x50] sm:$0xff] }
 0x15d   :  { %4862 = vst.msk [vmem:[#allocation8 + $0xb0] sm:$0xff] %vm4801_vm0, %v4859_v7  ;;  %v9313_v15 = vld [vmem:[%s11949_s1 + $0x38] sm:$0xff]   ;;  %v4790_v16 = vld [vmem:[%s11948_s0] sm:$0xff]  ;;  %8820 = vmatprep.subr.bf16.mxu1 %v9316_v14  ;;  %v9318_v20 = vld [vmem:[%s11950_s2 + $0x48] sm:$0xff]  }
 0x15e   :  { %8754 = vmatpush3.bf16.msra.mxu0 %v9305_v42  ;;  %4874 = vst.msk [vmem:[#allocation8 + $0xd0] sm:$0xff] %vm4801_vm0, %v4871_v12  ;;  %4886 = vst.msk [vmem:[#allocation8 + $0xf0] sm:$0xff] %vm4801_vm0, %v4883_v13  ;;  %v9315_v18 = vld [vmem:[%s11950_s2 + $0x80] sm:$0xff]   ;;  %v4796_v24 = vpack.c.bf16 %v4793_v17, %v4790_v16  ;;  %v9319_v26 = vld [vmem:[%s11950_s2 + $0x8] sm:$0xff]  }
 0x15f   :  { %8755 = vmatprep.subr.bf16.mxu0 %v9306_v43  ;;  %v9317_v19 = vld [vmem:[%s11950_s2] sm:$0xff]   ;;  %v4889_v21 = vld [vmem:[#allocation8 + $0x10] sm:$0xff]  ;;  %v9322_v33 = vld [vmem:[%s11950_s2 + $0x58] sm:$0xff]  }
 0x160   :  { %9118 = vmatprep.mubr.msk.bf16.mxu1 %vm4801_vm0, %v4889_v21  ;;  %v9320_v31 = vld [vmem:[%s11950_s2 + $0x50] sm:$0xff]   ;;  %v9323_v34 = vld [vmem:[%s11950_s2 + $0x18] sm:$0xff]   ;;  %v9324_v35 = vld [vmem:[%s11950_s2 + $0x60] sm:$0xff]  }
 0x161   :  { %v4892_v22 = vld [vmem:[#allocation8 + $0x30] sm:$0xff]  ;;  %v9325_v37 = vld [vmem:[%s11950_s2 + $0x20] sm:$0xff]   ;;  %v9326_v38 = vld [vmem:[%s11950_s2 + $0x68] sm:$0xff]  }
 0x162   :  { %8756 = vmatpush3.bf16.msra.mxu0 %v9307_v44  ;;  %v4895_v23 = vld [vmem:[#allocation8 + $0x50] sm:$0xff]  ;;  %9119 = vmatmul.mubr.msk.bf16.vlgmr.msra.gmra.mrb[0].mxu1 %vm4801_vm0, %v4892_v22  ;;  %v9327_v39 = vld [vmem:[%s11950_s2 + $0x28] sm:$0xff]   ;;  %v9330_v42 = vld [vmem:[%s11950_s2 + $0x78] sm:$0xff]  }
 0x163   :  { %8757 = vmatprep.subr.bf16.mxu0 %v9308_v47  ;;  %9122 = vmatprep.mubr.msk.bf16.mxu1 %vm4801_vm0, %v4895_v23  ;;  %v4898_v27 = vld [vmem:[#allocation8 + $0x70] sm:$0xff]  ;;  %v9331_v43 = vld [vmem:[%s11950_s2 + $0x38] sm:$0xff]   ;;  %v9332_v45 = vld [vmem:[%s11951_s3 + $0x40] sm:$0xff]  }
 0x164   :  { %8821 = vmatpush3.bf16.msra.mxu1 %v9317_v19  ;;  %v4901_v28 = vld [vmem:[#allocation8 + $0x90] sm:$0xff] }
 0x165   :  { %v4910_v25 = vld [vmem:[#allocation8 + $0xf0] sm:$0xff]  ;;  %8822 = vmatprep.subr.bf16.mxu1 %v9318_v20 }
 0x166   :  { %8758 = vmatpush3.bf16.msra.mxu0 %v9309_v49  ;;  %5419 = vst.msk [vmem:[#allocation8 + $0xf0] sm:$0xff] %vm4801_vm0, %v9416_v36  ;;  %v4904_v29 = vld [vmem:[#allocation8 + $0xb0] sm:$0xff] }
 0x167   :  { %8759 = vmatprep.subr.bf16.mxu0 %v9310_v52  ;;  %v4907_v30 = vld [vmem:[#allocation8 + $0xd0] sm:$0xff]  ;;  %v11359_v52 = vld [vmem:[%s11956_s8] ss:$0 sm:$0xff] }
 0x168   :  { %8823 = vmatpush3.bf16.msra.mxu1 %v9319_v26  ;;  %v9321_v32 = vld [vmem:[%s11950_s2 + $0x10] sm:$0xff]  }
 0x169   :  { %8824 = vmatprep.subr.bf16.mxu1 %v9320_v31  ;;  %v9328_v40 = vld [vmem:[%s11950_s2 + $0x70] sm:$0xff]  }
 0x16a   :  { %8760 = vmatpush3.bf16.msra.mxu0 %v9311_v1  ;;  %9123 = vmatmul.mubr.msk.bf16.gmra.mrb[4].mxu1 %vm4801_vm0, %v4898_v27  ;;  %v9329_v41 = vld [vmem:[%s11950_s2 + $0x30] sm:$0xff]  }
 0x16b   :  { %8761 = vmatprep.subr.bf16.mxu0 %v9312_v11  ;;  %9126 = vmatprep.mubr.msk.bf16.mxu1 %vm4801_vm0, %v4901_v28 }
 0x16c   :  { %8825 = vmatpush3.bf16.msra.mxu1 %v9321_v32 }
 0x16d   :  { %8826 = vmatprep.subr.bf16.mxu1 %v9322_v33  ;;  %v11349_v44 = vld [vmem:[#allocation8 + $0xf0] sm:$0xff] }
 0x16e   :  { %8762 = vmatpush3.bf16.msra.mxu0 %v9313_v15  ;;  %5952 = vst.msk [vmem:[#allocation8 + $0xf0] sm:$0xff] %vm4801_vm0, %v9416_v36 }
 0x16f   :  { %9134 = vmatprep.subr.bf16.mxu0 %v9315_v18 }
 0x170   :  { %8827 = vmatpush3.bf16.msra.mxu1 %v9323_v34 }
 0x171   :  { %5111 = vmatmul.mubr.bf16.vlgmr.msra.gmra.mrb[0].mxu0 %v4796_v24  ;;  %8828 = vmatprep.subr.bf16.mxu1 %v9324_v35 }
 0x172   :  { %5118 = vmatprep.mubr.bf16.mxu0 %v11203_v56  ;;  %9135 = vmatpush3.bf16.msra.mxu0 %v9315_v18 }
 0x173   :  { %9127 = vmatmul.mubr.msk.bf16.gmra.mrb[8].mxu1 %vm4801_vm0, %v4904_v29  ;;  %8893 = vmatprep.subr.bf16.mxu0 %v9332_v45 }
 0x174   :  { %9130 = vmatprep.mubr.msk.bf16.mxu1 %vm4801_vm0, %v4907_v30  ;;  %8829 = vmatpush3.bf16.msra.mxu1 %v9325_v37 }
 0x175   :  { %8830 = vmatprep.subr.bf16.mxu1 %v9326_v38 }
 0x178   :  { %8831 = vmatpush3.bf16.msra.mxu1 %v9327_v39 }
 0x179   :  { %5119 = vmatmul.mubr.bf16.gmra.mrb[4].mxu0 %v11179_v48  ;;  %8832 = vmatprep.subr.bf16.mxu1 %v9328_v40 }
 0x17a   :  { %5126 = vmatprep.mubr.bf16.mxu0 %v11205_v57 }
 0x17b   :  { %9131 = vmatmul.mubr.msk.bf16.gmra.mrb[12].mxu1 %vm4801_vm0, %v4910_v25 }
 0x17c   :  { %8833 = vmatpush3.bf16.msra.mxu1 %v9329_v41 }
 0x17d   :  { %8834 = vmatprep.subr.bf16.mxu1 %v9330_v42 }
 0x180   :  { %8835 = vmatpush3.bf16.msra.mxu1 %v9331_v43 }
 0x181   :  { %5127 = vmatmul.mubr.bf16.gmra.mrb[8].mxu0 %v11203_v56  ;;  %9214 = vmatprep.subr.bf16.mxu1 %v9332_v45 }
 0x182   :  { %5134 = vmatprep.mubr.bf16.mxu0 %v11216_v61 }
 0x189   :  { %5135 = vmatmul.mubr.bf16.gmra.mrb[12].mxu0 %v11205_v57 }
 0x18a   :  { %5142 = vmatprep.mubr.bf16.mxu0 %v11234_v2 }
 0x191   :  { %5143 = vmatmul.mubr.bf16.gmra.mrb[16].mxu0 %v11216_v61 }
 0x192   :  { %5150 = vmatprep.mubr.bf16.mxu0 %v11236_v3 }
 0x199   :  { %5151 = vmatmul.mubr.bf16.gmra.mrb[20].mxu0 %v11234_v2 }
 0x19a   :  { %5158 = vmatprep.mubr.bf16.mxu0 %v4859_v7 }
 0x1a1   :  { %5159 = vmatmul.mubr.bf16.gmra.mrb[24].mxu0 %v11236_v3 }
 0x1a2   :  { %5166 = vmatprep.mubr.bf16.mxu0 %v4871_v12 }
 0x1a9   :  { %5167 = vmatmul.mubr.bf16.gmra.mrb[28].mxu0 %v4859_v7 }
 0x235   :  { %v9120_v46 = vpop.f32.mrb[0].mxu1 }
 0x236   :  { %v5209_v47 = vpop.f32.mrb[1].mxu1 }
 0x237   :  { %v9121_v48 = vpop.f32.mrb[2].mxu1 }
 0x238   :  { %v5212_v49 = vpop.f32.mrb[3].mxu1 }
 0x23d   :  { %v9124_v58 = vpop.f32.mrb[4].mxu1 }
 0x23e   :  { %v5225_v59 = vpop.f32.mrb[5].mxu1 }
 0x23f   :  { %v11363_v62 = vpop.f32.mrb[6].mxu1 }
 0x240   :  { %v5228_v63 = vpop.f32.mrb[7].mxu1 }
 0x244   :  { %v8763_v50 = vpop.f32.mrb[0].mxu0 }
 0x245   :  { %v8764_v51 = vpop.f32.mrb[1].mxu0 }
 0x246   :  { %v8765_v53 = vadd.f32 %v8764_v51, %v8763_v50  ;;  %v8766_v54 = vpop.f32.mrb[2].mxu0  ;;  %v11366_v12 = vpop.f32.mrb[8].mxu1 }
 0x247   :  { %v8767_v55 = vpop.f32.mrb[3].mxu0  ;;  %v11368_v13 = vpop.f32.mrb[9].mxu1 }
 0x248   :  { %v8768_v56 = vadd.f32 %v8767_v55, %v8766_v54  ;;  %v5113_v57 = vadd.f32 %v8765_v53, %v11359_v52  ;;  %v11371_v17 = vpop.f32.mrb[10].mxu1 }
 0x249   :  { %v11373_v18 = vpop.f32.mrb[11].mxu1 }
 0x24a   :  { %v5210_v60 = vadd.f32 %v5209_v47, %v5113_v57  ;;  %v5116_v61 = vadd.f32 %v8768_v56, %v11359_v52 }
 0x24c   :  { %v5272_v0 = vmul.f32 0.2, %v5210_v60  ;;  %v5213_v1 = vadd.f32 %v5212_v49, %v5116_v61  ;;  %v8769_v2 = vpop.f32.mrb[4].mxu0 }
 0x24d   :  { %v8770_v3 = vpop.f32.mrb[5].mxu0 }
 0x24e   :  { %v5273_v4 = vmul.f32 0.2, %v5213_v1  ;;  %v8771_v5 = vadd.f32 %v8770_v3, %v8769_v2  ;;  %v8772_v6 = vpop.f32.mrb[6].mxu0  ;;  %v5288_v8 = vmax.f32 %v5210_v60, %v5272_v0  ;;  %v11377_v31 = vpop.f32.mrb[12].mxu1 }
 0x24f   :  { %v8773_v7 = vpop.f32.mrb[7].mxu0  ;;  %v11379_v32 = vpop.f32.mrb[13].mxu1 }
 0x250   :  { %v5289_v9 = vmax.f32 %v5213_v1, %v5273_v4  ;;  %v5121_v10 = vadd.f32 %v8771_v5, %v11359_v52  ;;  %v8774_v11 = vadd.f32 %v8773_v7, %v8772_v6  ;;  %v11382_v37 = vpop.f32.mrb[14].mxu1 }
 0x252   :  { %v5331_v14 = vpack.c.bf16 %v5289_v9, %v5288_v8  ;;  %v5218_v15 = vadd.f32 %v9120_v46, %v5121_v10  ;;  %v5124_v16 = vadd.f32 %v8774_v11, %v11359_v52 }
 0x254   :  { %v5274_v19 = vmul.f32 0.2, %v5218_v15  ;;  %v5221_v20 = vadd.f32 %v9121_v48, %v5124_v16  ;;  %v8775_v21 = vpop.f32.mrb[8].mxu0  ;;  %5643 = vmatprep.mubr.bf16.mxu1 %v5331_v14 }
 0x255   :  { %v8776_v22 = vpop.f32.mrb[9].mxu0  ;;  %5644 = vmatmul.mubr.bf16.vlgmr.msra.gmra.mrb[16].mxu1 %v9416_v36  ;;  %v11384_v36 = vpop.f32.mrb[15].mxu1 }
 0x256   :  { %v5275_v23 = vmul.f32 0.2, %v5221_v20  ;;  %v8777_v24 = vadd.f32 %v8776_v22, %v8775_v21  ;;  %v8778_v25 = vpop.f32.mrb[10].mxu0  ;;  %v5290_v27 = vmax.f32 %v5218_v15, %v5274_v19 }
 0x257   :  { %v8779_v26 = vpop.f32.mrb[11].mxu0 }
 0x258   :  { %v5291_v28 = vmax.f32 %v5221_v20, %v5275_v23  ;;  %v5129_v29 = vadd.f32 %v8777_v24, %v11359_v52  ;;  %v8780_v30 = vadd.f32 %v8779_v26, %v8778_v25 }
 0x25a   :  { %v5332_v33 = vpack.c.bf16 %v5291_v28, %v5290_v27  ;;  %v5226_v34 = vadd.f32 %v5225_v59, %v5129_v29  ;;  %v5132_v35 = vadd.f32 %v8780_v30, %v11359_v52 }
 0x25c   :  { %5335 = vst.msk [vmem:[#allocation8 + $0x10] sm:$0xff] %vm4801_vm0, %v5332_v33  ;;  %v5276_v38 = vmul.f32 0.2, %v5226_v34  ;;  %v5229_v39 = vadd.f32 %v5228_v63, %v5132_v35  ;;  %v8781_v40 = vpop.f32.mrb[12].mxu0  ;;  %5651 = vmatprep.mubr.bf16.mxu1 %v5332_v33 }
 0x25d   :  { %v8782_v41 = vpop.f32.mrb[13].mxu0  ;;  %5652 = vmatmul.mubr.bf16.gmra.mrb[20].mxu1 %v5331_v14 }
 0x25e   :  { %v5277_v42 = vmul.f32 0.2, %v5229_v39  ;;  %v8783_v43 = vadd.f32 %v8782_v41, %v8781_v40  ;;  %v8784_v45 = vpop.f32.mrb[14].mxu0  ;;  %v5292_v47 = vmax.f32 %v5226_v34, %v5276_v38 }
 0x25f   :  { %v8785_v46 = vpop.f32.mrb[15].mxu0 }
 0x260   :  { %v5293_v48 = vmax.f32 %v5229_v39, %v5277_v42  ;;  %v5137_v49 = vadd.f32 %v8783_v43, %v11359_v52  ;;  %v8786_v50 = vadd.f32 %v8785_v46, %v8784_v45 }
 0x262   :  { %v5344_v51 = vpack.c.bf16 %v5293_v48, %v5292_v47  ;;  %v5234_v53 = vadd.f32 %v9124_v58, %v5137_v49  ;;  %v5140_v54 = vadd.f32 %v8786_v50, %v11359_v52 }
 0x263   :  { %v5422_v55 = vld [vmem:[#allocation8 + $0x10] sm:$0xff] }
 0x264   :  { %5347 = vst.msk [vmem:[#allocation8 + $0x30] sm:$0xff] %vm4801_vm0, %v5344_v51  ;;  %v5278_v56 = vmul.f32 0.2, %v5234_v53  ;;  %v5237_v57 = vadd.f32 %v11363_v62, %v5140_v54  ;;  %v8787_v59 = vpop.f32.mrb[16].mxu0  ;;  %9136 = vmatprep.mubr.msk.bf16.mxu0 %vm4801_vm0, %v5422_v55  ;;  %5659 = vmatprep.mubr.bf16.mxu1 %v5344_v51 }
 0x265   :  { %v8788_v60 = vpop.f32.mrb[17].mxu0  ;;  %5660 = vmatmul.mubr.bf16.gmra.mrb[24].mxu1 %v5332_v33 }
 0x266   :  { %v5279_v61 = vmul.f32 0.2, %v5237_v57  ;;  %v8789_v63 = vadd.f32 %v8788_v60, %v8787_v59  ;;  %v8790_v0 = vpop.f32.mrb[18].mxu0  ;;  %v5294_v2 = vmax.f32 %v5234_v53, %v5278_v56 }
 0x267   :  { %v8791_v1 = vpop.f32.mrb[19].mxu0 }
 0x268   :  { %v5295_v58 = vmax.f32 %v5237_v57, %v5279_v61  ;;  %v5145_v3 = vadd.f32 %v8789_v63, %v11359_v52  ;;  %v8792_v4 = vadd.f32 %v8791_v1, %v8790_v0 }
 0x26a   :  { %v5356_v5 = vpack.c.bf16 %v5295_v58, %v5294_v2  ;;  %v5242_v6 = vadd.f32 %v11368_v13, %v5145_v3  ;;  %v5148_v62 = vadd.f32 %v8792_v4, %v11359_v52  ;;  %v9335_v4 = vld [vmem:[%s11951_s3 + $0x8] sm:$0xff]  }
 0x26b   :  { %v5425_v7 = vld [vmem:[#allocation8 + $0x30] sm:$0xff] }
 0x26c   :  { %5359 = vst.msk [vmem:[#allocation8 + $0x50] sm:$0xff] %vm4801_vm0, %v5356_v5  ;;  %v5280_v8 = vmul.f32 0.2, %v5242_v6  ;;  %v5245_v9 = vadd.f32 %v11373_v18, %v5148_v62  ;;  %v8793_v10 = vpop.f32.mrb[20].mxu0  ;;  %9137 = vmatmul.mubr.msk.bf16.vlgmr.msra.gmra.mrb[32].mxu0 %vm4801_vm0, %v5425_v7  ;;  %5667 = vmatprep.mubr.bf16.mxu1 %v5356_v5  ;;  %v9339_v62 = vld [vmem:[%s11951_s3 + $0x18] sm:$0xff]   ;;  %v9340_v7 = vld [vmem:[%s11951_s3 + $0x60] sm:$0xff]  }
 0x26d   :  { %v8794_v11 = vpop.f32.mrb[21].mxu0  ;;  %5668 = vmatmul.mubr.bf16.gmra.mrb[28].mxu1 %v5344_v51 }
 0x26e   :  { %v5281_v14 = vmul.f32 0.2, %v5245_v9  ;;  %v8795_v15 = vadd.f32 %v8794_v11, %v8793_v10  ;;  %v8796_v16 = vpop.f32.mrb[22].mxu0  ;;  %v5296_v20 = vmax.f32 %v5242_v6, %v5280_v8  ;;  %v9338_v6 = vld [vmem:[%s11951_s3 + $0x58] sm:$0xff]   ;;  %v9341_v8 = vld [vmem:[%s11951_s3 + $0x20] sm:$0xff]   ;;  %v9343_v10 = vld [vmem:[%s11951_s3 + $0x28] sm:$0xff]  }
 0x26f   :  { %v8797_v19 = vpop.f32.mrb[23].mxu0  ;;  %v9344_v11 = vld [vmem:[%s11951_s3 + $0x70] sm:$0xff]  }
 0x270   :  { %v5297_v13 = vmax.f32 %v5245_v9, %v5281_v14  ;;  %v5153_v21 = vadd.f32 %v8795_v15, %v11359_v52  ;;  %v8798_v22 = vadd.f32 %v8797_v19, %v8796_v16  ;;  %v9342_v9 = vld [vmem:[%s11951_s3 + $0x68] sm:$0xff]   ;;  %v9345_v14 = vld [vmem:[%s11951_s3 + $0x30] sm:$0xff]   ;;  %v9346_v15 = vld [vmem:[%s11951_s3 + $0x78] sm:$0xff]  }
 0x271   :  { %v9347_v16 = vld [vmem:[%s11951_s3 + $0x38] sm:$0xff]   ;;  %v9348_v19 = vld [vmem:[%s11951_s3 + $0x80] sm:$0xff]  }
 0x272   :  { %v5368_v23 = vpack.c.bf16 %v5297_v13, %v5296_v20  ;;  %v5250_v24 = vadd.f32 %v11366_v12, %v5153_v21  ;;  %v5156_v18 = vadd.f32 %v8798_v22, %v11359_v52  ;;  %v11469_v20 = vld [vmem:[#allocation8 + $0xf0] sm:$0xff]  ;;  %v11471_v13 = vld [vmem:[#allocation8 + $0x78] sm:$0xff] }
 0x273   :  { %v5428_v25 = vld [vmem:[#allocation8 + $0x50] sm:$0xff]  ;;  %6486 = vst.msk [vmem:[#allocation8 + $0xf0] sm:$0xff] %vm6401_vm1, %v11471_v13 }
 0x274   :  { %5371 = vst.msk [vmem:[#allocation8 + $0x70] sm:$0xff] %vm4801_vm0, %v5368_v23  ;;  %v5282_v26 = vmul.f32 0.2, %v5250_v24  ;;  %v5253_v27 = vadd.f32 %v11371_v17, %v5156_v18  ;;  %v8799_v28 = vpop.f32.mrb[24].mxu0  ;;  %9140 = vmatprep.mubr.msk.bf16.mxu0 %vm4801_vm0, %v5428_v25  ;;  %5675 = vmatprep.mubr.bf16.mxu1 %v5368_v23 }
 0x275   :  { %v8800_v29 = vpop.f32.mrb[25].mxu0  ;;  %5676 = vmatmul.mubr.bf16.gmra.mrb[32].mxu1 %v5356_v5  ;;  %v9337_v5 = vld [vmem:[%s11951_s3 + $0x10] sm:$0xff]  }
 0x276   :  { %v5283_v30 = vmul.f32 0.2, %v5253_v27  ;;  %v8801_v33 = vadd.f32 %v8800_v29, %v8799_v28  ;;  %v8802_v34 = vpop.f32.mrb[26].mxu0  ;;  %v5298_v38 = vmax.f32 %v5250_v24, %v5282_v26 }
 0x277   :  { %v8803_v35 = vpop.f32.mrb[27].mxu0 }
 0x278   :  { %v5299_v12 = vmax.f32 %v5253_v27, %v5283_v30  ;;  %v5161_v39 = vadd.f32 %v8801_v33, %v11359_v52  ;;  %v8804_v40 = vadd.f32 %v8803_v35, %v8802_v34 }
 0x27a   :  { %v5380_v41 = vpack.c.bf16 %v5299_v12, %v5298_v38  ;;  %v5258_v42 = vadd.f32 %v11379_v32, %v5161_v39  ;;  %v5164_v17 = vadd.f32 %v8804_v40, %v11359_v52  ;;  %v11478_v39 = vld [vmem:[%s11957_s9] ss:$0 sm:$0xff] }
 0x27b   :  { %v5431_v43 = vld [vmem:[#allocation8 + $0x70] sm:$0xff] }
 0x27c   :  { %5383 = vst.msk [vmem:[#allocation8 + $0x90] sm:$0xff] %vm4801_vm0, %v5380_v41  ;;  %v5284_v45 = vmul.f32 0.2, %v5258_v42  ;;  %v5261_v46 = vadd.f32 %v11384_v36, %v5164_v17  ;;  %v8805_v47 = vpop.f32.mrb[28].mxu0  ;;  %9141 = vmatmul.mubr.msk.bf16.gmra.mrb[36].mxu0 %vm4801_vm0, %v5431_v43  ;;  %5683 = vmatprep.mubr.bf16.mxu1 %v5380_v41 }
 0x27d   :  { %v8806_v48 = vpop.f32.mrb[29].mxu0  ;;  %5684 = vmatmul.mubr.bf16.gmra.mrb[36].mxu1 %v5368_v23 }
 0x27e   :  { %v5285_v49 = vmul.f32 0.2, %v5261_v46  ;;  %v8807_v50 = vadd.f32 %v8806_v48, %v8805_v47  ;;  %v8808_v51 = vpop.f32.mrb[30].mxu0  ;;  %v5300_v54 = vmax.f32 %v5258_v42, %v5284_v45 }
 0x27f   :  { %v8809_v53 = vpop.f32.mrb[31].mxu0 }
 0x280   :  { %v5301_v32 = vmax.f32 %v5261_v46, %v5285_v49  ;;  %v5169_v55 = vadd.f32 %v8807_v50, %v11359_v52  ;;  %v8810_v56 = vadd.f32 %v8809_v53, %v8808_v51 }
 0x282   :  { %v5392_v57 = vpack.c.bf16 %v5301_v32, %v5300_v54  ;;  %v5266_v59 = vadd.f32 %v11377_v31, %v5169_v55  ;;  %v5172_v36 = vadd.f32 %v8810_v56, %v11359_v52  ;;  %v9333_v31 = vld [vmem:[%s11951_s3] sm:$0xff]  }
 0x283   :  { %v5434_v60 = vld [vmem:[#allocation8 + $0x90] sm:$0xff]  ;;  %8894 = vmatpush3.bf16.msra.mxu0 %v9333_v31  ;;  %9222 = vmatpush3.bf16.msra.mxu1 %v9333_v31 }
 0x284   :  { %5395 = vst.msk [vmem:[#allocation8 + $0xb0] sm:$0xff] %vm4801_vm0, %v5392_v57  ;;  %v5286_v61 = vmul.f32 0.2, %v5266_v59  ;;  %v5269_v63 = vadd.f32 %v11382_v37, %v5172_v36  ;;  %9144 = vmatprep.mubr.msk.bf16.mxu0 %vm4801_vm0, %v5434_v60  ;;  %5691 = vmatprep.mubr.bf16.mxu1 %v5392_v57  ;;  %v9334_v37 = vld [vmem:[%s11951_s3 + $0x48] sm:$0xff]  }
 0x285   :  { %5692 = vmatmul.mubr.bf16.gmra.mrb[40].mxu1 %v5380_v41  ;;  %8895 = vmatprep.subr.bf16.mxu0 %v9334_v37 }
 0x286   :  { %v5287_v0 = vmul.f32 0.2, %v5269_v63  ;;  %v5302_v1 = vmax.f32 %v5266_v59, %v5286_v61  ;;  %9215 = vmatprep.subr.bf16.mxu1 %v9334_v37 }
 0x287   :  { %8896 = vmatpush3.bf16.msra.mxu0 %v9335_v4  ;;  %9223 = vmatpush3.bf16.msra.mxu1 %v9335_v4 }
 0x288   :  { %v5303_v2 = vmax.f32 %v5269_v63, %v5287_v0 }
 0x28a   :  { %v5404_v58 = vpack.c.bf16 %v5303_v2, %v5302_v1 }
 0x28b   :  { %v5437_v3 = vld [vmem:[#allocation8 + $0xb0] sm:$0xff] }
 0x28c   :  { %5407 = vst.msk [vmem:[#allocation8 + $0xd0] sm:$0xff] %vm4801_vm0, %v5404_v58  ;;  %9145 = vmatmul.mubr.msk.bf16.gmra.mrb[40].mxu0 %vm4801_vm0, %v5437_v3  ;;  %5699 = vmatprep.mubr.bf16.mxu1 %v5404_v58 }
 0x28d   :  { %5700 = vmatmul.mubr.bf16.gmra.mrb[44].mxu1 %v5392_v57 }
 0x293   :  { %v5440_v52 = vld [vmem:[#allocation8 + $0xd0] sm:$0xff] }
 0x294   :  { %9148 = vmatprep.mubr.msk.bf16.mxu0 %vm4801_vm0, %v5440_v52 }
 0x295   :  { %9149 = vmatmul.mubr.msk.bf16.gmra.mrb[44].mxu0 %vm4801_vm0, %v11349_v44  ;;  %v9336_v44 = vld [vmem:[%s11951_s3 + $0x50] sm:$0xff]  }
 0x296   :  { %8897 = vmatprep.subr.bf16.mxu0 %v9336_v44  ;;  %9216 = vmatprep.subr.bf16.mxu1 %v9336_v44 }
 0x297   :  { %8898 = vmatpush3.bf16.msra.mxu0 %v9337_v5  ;;  %9224 = vmatpush3.bf16.msra.mxu1 %v9337_v5 }
 0x298   :  { %8899 = vmatprep.subr.bf16.mxu0 %v9338_v6  ;;  %9217 = vmatprep.subr.bf16.mxu1 %v9338_v6 }
 0x29b   :  { %8900 = vmatpush3.bf16.msra.mxu0 %v9339_v62  ;;  %9225 = vmatpush3.bf16.msra.mxu1 %v9339_v62 }
 0x29c   :  { %8901 = vmatprep.subr.bf16.mxu0 %v9340_v7  ;;  %9218 = vmatprep.subr.bf16.mxu1 %v9340_v7 }
 0x29f   :  { %8902 = vmatpush3.bf16.msra.mxu0 %v9341_v8  ;;  %9226 = vmatpush3.bf16.msra.mxu1 %v9341_v8 }
 0x2a0   :  { %8903 = vmatprep.subr.bf16.mxu0 %v9342_v9  ;;  %9219 = vmatprep.subr.bf16.mxu1 %v9342_v9 }
 0x2a3   :  { %8904 = vmatpush3.bf16.msra.mxu0 %v9343_v10  ;;  %9227 = vmatpush3.bf16.msra.mxu1 %v9343_v10 }
 0x2a4   :  { %8905 = vmatprep.subr.bf16.mxu0 %v9344_v11  ;;  %9220 = vmatprep.subr.bf16.mxu1 %v9344_v11 }
 0x2a7   :  { %8906 = vmatpush3.bf16.msra.mxu0 %v9345_v14  ;;  %9228 = vmatpush3.bf16.msra.mxu1 %v9345_v14 }
 0x2a8   :  { %8907 = vmatprep.subr.bf16.mxu0 %v9346_v15  ;;  %9221 = vmatprep.subr.bf16.mxu1 %v9346_v15 }
 0x2ab   :  { %8908 = vmatpush3.bf16.msra.mxu0 %v9347_v16  ;;  %9229 = vmatpush3.bf16.msra.mxu1 %v9347_v16 }
 0x2ac   :  { %9152 = vmatprep.subr.bf16.mxu0 %v9348_v19 }
 0x328   :  { %v8836_v21 = vpop.f32.mrb[16].mxu1 }
 0x329   :  { %v8837_v22 = vpop.f32.mrb[17].mxu1 }
 0x32a   :  { %v8838_v23 = vadd.f32 %v8837_v22, %v8836_v21  ;;  %v8839_v24 = vpop.f32.mrb[18].mxu1 }
 0x32b   :  { %v8840_v18 = vpop.f32.mrb[19].mxu1 }
 0x32c   :  { %v8841_v25 = vadd.f32 %v8840_v18, %v8839_v24  ;;  %v5646_v42 = vadd.f32 %v8838_v23, %v11478_v39 }
 0x32e   :  { %v5649_v51 = vadd.f32 %v8841_v25, %v11478_v39 }
 0x330   :  { %v8842_v26 = vpop.f32.mrb[20].mxu1 }
 0x331   :  { %v8843_v27 = vpop.f32.mrb[21].mxu1 }
 0x332   :  { %v8844_v28 = vadd.f32 %v8843_v27, %v8842_v26  ;;  %v8845_v29 = vpop.f32.mrb[22].mxu1 }
 0x333   :  { %v8846_v30 = vpop.f32.mrb[23].mxu1 }
 0x334   :  { %v8847_v33 = vadd.f32 %v8846_v30, %v8845_v29  ;;  %v5654_v17 = vadd.f32 %v8844_v28, %v11478_v39 }
 0x336   :  { %v5657_v47 = vadd.f32 %v8847_v33, %v11478_v39 }
 0x338   :  { %v8848_v34 = vpop.f32.mrb[24].mxu1 }
 0x339   :  { %v8849_v35 = vpop.f32.mrb[25].mxu1 }
 0x33a   :  { %v8850_v38 = vadd.f32 %v8849_v35, %v8848_v34  ;;  %v8851_v12 = vpop.f32.mrb[26].mxu1 }
 0x33b   :  { %v8852_v40 = vpop.f32.mrb[27].mxu1 }
 0x33c   :  { %v8853_v41 = vadd.f32 %v8852_v40, %v8851_v12  ;;  %v5662_v9 = vadd.f32 %v8850_v38, %v11478_v39 }
 0x33e   :  { %v5665_v22 = vadd.f32 %v8853_v41, %v11478_v39 }
 0x33f   :  { %v9138_v43 = vpop.f32.mrb[32].mxu0 }
 0x340   :  { %v5751_v45 = vadd.f32 %v9138_v43, %v5654_v17  ;;  %v5742_v46 = vpop.f32.mrb[33].mxu0  ;;  %v8854_v48 = vpop.f32.mrb[28].mxu1 }
 0x341   :  { %v5743_v49 = vadd.f32 %v5742_v46, %v5646_v42  ;;  %v9139_v50 = vpop.f32.mrb[34].mxu0  ;;  %v8855_v53 = vpop.f32.mrb[29].mxu1 }
 0x342   :  { %v5807_v54 = vmul.f32 0.2, %v5751_v45  ;;  %v5754_v32 = vadd.f32 %v9139_v50, %v5657_v47  ;;  %v5745_v55 = vpop.f32.mrb[35].mxu0  ;;  %v8856_v56 = vadd.f32 %v8855_v53, %v8854_v48  ;;  %v8857_v57 = vpop.f32.mrb[30].mxu1 }
 0x343   :  { %v5805_v59 = vmul.f32 0.2, %v5743_v49  ;;  %v5746_v36 = vadd.f32 %v5745_v55, %v5649_v51  ;;  %v8858_v60 = vpop.f32.mrb[31].mxu1 }
 0x344   :  { %v5808_v61 = vmul.f32 0.2, %v5754_v32  ;;  %v8859_v63 = vadd.f32 %v8858_v60, %v8857_v57  ;;  %v5823_v1 = vmax.f32 %v5751_v45, %v5807_v54  ;;  %v5670_v7 = vadd.f32 %v8856_v56, %v11478_v39 }
 0x345   :  { %v5806_v0 = vmul.f32 0.2, %v5746_v36  ;;  %v5821_v58 = vmax.f32 %v5743_v49, %v5805_v59 }
 0x346   :  { %v5824_v2 = vmax.f32 %v5754_v32, %v5808_v61  ;;  %v5673_v14 = vadd.f32 %v8859_v63, %v11478_v39 }
 0x347   :  { %v5822_v3 = vmax.f32 %v5746_v36, %v5806_v0 }
 0x348   :  { %v5865_v52 = vpack.c.bf16 %v5824_v2, %v5823_v1  ;;  %v8860_v31 = vpop.f32.mrb[32].mxu1 }
 0x349   :  { %v5864_v37 = vpack.c.bf16 %v5822_v3, %v5821_v58  ;;  %v8861_v4 = vpop.f32.mrb[33].mxu1 }
 0x34a   :  { %5868 = vst.msk [vmem:[#allocation8 + $0x10] sm:$0xff] %vm4801_vm0, %v5865_v52  ;;  %v8862_v44 = vadd.f32 %v8861_v4, %v8860_v31  ;;  %v8863_v5 = vpop.f32.mrb[34].mxu1 }
 0x34b   :  { %v8864_v6 = vpop.f32.mrb[35].mxu1  ;;  %6176 = vmatprep.mubr.bf16.mxu0 %v5864_v37 }
 0x34c   :  { %v8865_v62 = vadd.f32 %v8864_v6, %v8863_v5  ;;  %6177 = vmatmul.mubr.bf16.vlgmr.msra.gmra.mrb[48].mxu0 %v11471_v13  ;;  %v5678_v51 = vadd.f32 %v8862_v44, %v11478_v39 }
 0x34d   :  { %9153 = vmatpush3.bf16.msra.mxu0 %v9348_v19  ;;  %6184 = vmatprep.mubr.bf16.mxu0 %v5865_v52 }
 0x34e   :  { %v5681_v59 = vadd.f32 %v8865_v62, %v11478_v39 }
 0x34f   :  { %v9142_v8 = vpop.f32.mrb[36].mxu0 }
 0x350   :  { %v5767_v10 = vadd.f32 %v9142_v8, %v5670_v7  ;;  %v5758_v11 = vpop.f32.mrb[37].mxu0  ;;  %v8866_v15 = vpop.f32.mrb[36].mxu1 }
 0x351   :  { %v5759_v16 = vadd.f32 %v5758_v11, %v5662_v9  ;;  %v9143_v21 = vpop.f32.mrb[38].mxu0  ;;  %v8867_v23 = vpop.f32.mrb[37].mxu1 }
 0x352   :  { %v5811_v24 = vmul.f32 0.2, %v5767_v10  ;;  %v5770_v18 = vadd.f32 %v9143_v21, %v5673_v14  ;;  %v5761_v25 = vpop.f32.mrb[39].mxu0  ;;  %v8868_v19 = vadd.f32 %v8867_v23, %v8866_v15  ;;  %v8869_v26 = vpop.f32.mrb[38].mxu1 }
 0x353   :  { %v5809_v27 = vmul.f32 0.2, %v5759_v16  ;;  %v5762_v28 = vadd.f32 %v5761_v25, %v5665_v22  ;;  %v8870_v29 = vpop.f32.mrb[39].mxu1 }
 0x354   :  { %v5812_v30 = vmul.f32 0.2, %v5770_v18  ;;  %v8871_v33 = vadd.f32 %v8870_v29, %v8869_v26  ;;  %6185 = vmatmul.mubr.bf16.gmra.mrb[52].mxu0 %v5864_v37  ;;  %v5827_v35 = vmax.f32 %v5767_v10, %v5811_v24  ;;  %v5686_v49 = vadd.f32 %v8868_v19, %v11478_v39 }
 0x355   :  { %v5810_v34 = vmul.f32 0.2, %v5762_v28  ;;  %v5825_v12 = vmax.f32 %v5759_v16, %v5809_v27 }
 0x356   :  { %v5828_v38 = vmax.f32 %v5770_v18, %v5812_v30  ;;  %v5689_v32 = vadd.f32 %v8871_v33, %v11478_v39 }
 0x357   :  { %v5826_v40 = vmax.f32 %v5762_v28, %v5810_v34 }
 0x358   :  { %v5889_v42 = vpack.c.bf16 %v5828_v38, %v5827_v35  ;;  %v8872_v17 = vpop.f32.mrb[40].mxu1 }
 0x359   :  { %v5877_v41 = vpack.c.bf16 %v5826_v40, %v5825_v12  ;;  %v8873_v43 = vpop.f32.mrb[41].mxu1 }
 0x35a   :  { %5892 = vst.msk [vmem:[#allocation8 + $0x50] sm:$0xff] %vm4801_vm0, %v5889_v42  ;;  %v8874_v45 = vadd.f32 %v8873_v43, %v8872_v17  ;;  %v8875_v46 = vpop.f32.mrb[42].mxu1  ;;  %v9349_v43 = vld [vmem:[%s11952_s4 + $0x40] sm:$0xff]  }
 0x35b   :  { %5880 = vst.msk [vmem:[#allocation8 + $0x30] sm:$0xff] %vm4801_vm0, %v5877_v41  ;;  %v8876_v47 = vpop.f32.mrb[43].mxu1  ;;  %6192 = vmatprep.mubr.bf16.mxu0 %v5877_v41  ;;  %8966 = vmatprep.subr.bf16.mxu0 %v9349_v43  ;;  %v11593_v43 = vld [vmem:[%s11958_s10] ss:$0 sm:$0xff] }
 0x35c   :  { %v8877_v48 = vadd.f32 %v8876_v47, %v8875_v46  ;;  %6193 = vmatmul.mubr.bf16.gmra.mrb[56].mxu0 %v5865_v52  ;;  %v5694_v9 = vadd.f32 %v8874_v45, %v11478_v39  ;;  %v9350_v45 = vld [vmem:[%s11952_s4] sm:$0xff]   ;;  %v9351_v46 = vld [vmem:[%s11952_s4 + $0x48] sm:$0xff]  }
 0x35d   :  { %6200 = vmatprep.mubr.bf16.mxu0 %v5889_v42  ;;  %v9352_v47 = vld [vmem:[%s11952_s4 + $0x8] sm:$0xff]  }
 0x35e   :  { %v5697_v22 = vadd.f32 %v8877_v48, %v11478_v39  ;;  %v9354_v48 = vld [vmem:[%s11952_s4 + $0x10] sm:$0xff]  }
 0x35f   :  { %v9146_v50 = vpop.f32.mrb[40].mxu0 }
 0x360   :  { %v5783_v53 = vadd.f32 %v9146_v50, %v5686_v49  ;;  %v5774_v54 = vpop.f32.mrb[41].mxu0  ;;  %v8878_v55 = vpop.f32.mrb[44].mxu1  ;;  %v9355_v49 = vld [vmem:[%s11952_s4 + $0x58] sm:$0xff]  }
 0x361   :  { %v5775_v56 = vadd.f32 %v5774_v54, %v5678_v51  ;;  %v9147_v57 = vpop.f32.mrb[42].mxu0  ;;  %v8879_v36 = vpop.f32.mrb[45].mxu1  ;;  %v5961_v12 = vld [vmem:[#allocation8 + $0x50] sm:$0xff]  ;;  %v9356_v50 = vld [vmem:[%s11952_s4 + $0x18] sm:$0xff]   ;;  %v9357_v51 = vld [vmem:[%s11952_s4 + $0x60] sm:$0xff]  }
 0x362   :  { %v5815_v60 = vmul.f32 0.2, %v5783_v53  ;;  %v5786_v61 = vadd.f32 %v9147_v57, %v5689_v32  ;;  %v5777_v63 = vpop.f32.mrb[43].mxu0  ;;  %v8880_v0 = vadd.f32 %v8879_v36, %v8878_v55  ;;  %v8881_v1 = vpop.f32.mrb[46].mxu1  ;;  %v5958_v38 = vld [vmem:[#allocation8 + $0x30] sm:$0xff]  ;;  %v9359_v54 = vld [vmem:[%s11952_s4 + $0x68] sm:$0xff]  }
 0x363   :  { %v5813_v2 = vmul.f32 0.2, %v5775_v56  ;;  %v5778_v58 = vadd.f32 %v5777_v63, %v5681_v59  ;;  %v8882_v3 = vpop.f32.mrb[47].mxu1  ;;  %v9360_v32 = vld [vmem:[%s11952_s4 + $0x28] sm:$0xff]   ;;  %v9362_v55 = vld [vmem:[%s11952_s4 + $0x70] sm:$0xff]   ;;  %v9364_v57 = vld [vmem:[%s11952_s4 + $0x78] sm:$0xff]  }
 0x364   :  { %v5816_v52 = vmul.f32 0.2, %v5786_v61  ;;  %v8883_v31 = vadd.f32 %v8882_v3, %v8881_v1  ;;  %6201 = vmatmul.mubr.bf16.gmra.mrb[60].mxu0 %v5877_v41  ;;  %v5831_v4 = vmax.f32 %v5783_v53, %v5815_v60  ;;  %v5702_v7 = vadd.f32 %v8880_v0, %v11478_v39  ;;  %v9358_v53 = vld [vmem:[%s11952_s4 + $0x20] sm:$0xff]   ;;  %v9365_v59 = vld [vmem:[%s11952_s4 + $0x38] sm:$0xff]   ;;  %v9366_v60 = vld [vmem:[%s11952_s4 + $0x88] sm:$0xff]  }
 0x365   :  { %v5814_v37 = vmul.f32 0.2, %v5778_v58  ;;  %v5829_v5 = vmax.f32 %v5775_v56, %v5813_v2  ;;  %v9363_v56 = vld [vmem:[%s11952_s4 + $0x30] sm:$0xff]   ;;  %v9361_v36 = vld [vmem:[%s11952_s4 + $0x80] sm:$0xff]  }
 0x366   :  { %v5832_v44 = vmax.f32 %v5786_v61, %v5816_v52  ;;  %v5705_v15 = vadd.f32 %v8883_v31, %v11478_v39  ;;  %v5955_v39 = vld [vmem:[#allocation8 + $0x10] sm:$0xff]  ;;  %9170 = vmatprep.subr.bf16.mxu1 %v9361_v36  ;;  %v9367_v63 = vld [vmem:[%s11953_s5 + $0x40] sm:$0xff]  }
 0x367   :  { %v5830_v6 = vmax.f32 %v5778_v58, %v5814_v37  ;;  %v11567_v61 = vld [vmem:[#allocation8 + $0xf0] sm:$0xff]  ;;  %v11577_v0 = vld [vmem:[%s11953_s5 + $0x80] sm:$0xff]  }
 0x368   :  { %v5913_v62 = vpack.c.bf16 %v5832_v44, %v5831_v4  ;;  %v9150_v8 = vpop.f32.mrb[44].mxu0  ;;  %7028 = vst.msk [vmem:[#allocation8 + $0xf0] sm:$0xff] %vm6943_vm2, %v11471_v13 }
 0x369   :  { %v5901_v10 = vpack.c.bf16 %v5830_v6, %v5829_v5  ;;  %v5799_v11 = vadd.f32 %v9150_v8, %v5702_v7  ;;  %v5790_v14 = vpop.f32.mrb[45].mxu0 }
 0x36a   :  { %5916 = vst.msk [vmem:[#allocation8 + $0x90] sm:$0xff] %vm4801_vm0, %v5913_v62  ;;  %v5791_v16 = vadd.f32 %v5790_v14, %v5694_v9  ;;  %v9151_v21 = vpop.f32.mrb[46].mxu0 }
 0x36b   :  { %5904 = vst.msk [vmem:[#allocation8 + $0x70] sm:$0xff] %vm4801_vm0, %v5901_v10  ;;  %v5819_v23 = vmul.f32 0.2, %v5799_v11  ;;  %v5802_v24 = vadd.f32 %v9151_v21, %v5705_v15  ;;  %v5793_v18 = vpop.f32.mrb[47].mxu0  ;;  %6208 = vmatprep.mubr.bf16.mxu0 %v5901_v10 }
 0x36c   :  { %v5817_v25 = vmul.f32 0.2, %v5791_v16  ;;  %v5794_v19 = vadd.f32 %v5793_v18, %v5697_v22  ;;  %6209 = vmatmul.mubr.bf16.gmra.mrb[64].mxu0 %v5889_v42 }
 0x36d   :  { %v5820_v26 = vmul.f32 0.2, %v5802_v24  ;;  %6216 = vmatprep.mubr.bf16.mxu0 %v5913_v62  ;;  %v5835_v28 = vmax.f32 %v5799_v11, %v5819_v23 }
 0x36e   :  { %v5818_v27 = vmul.f32 0.2, %v5794_v19  ;;  %v5833_v30 = vmax.f32 %v5791_v16, %v5817_v25 }
 0x36f   :  { %v5836_v29 = vmax.f32 %v5802_v24, %v5820_v26 }
 0x370   :  { %v5834_v33 = vmax.f32 %v5794_v19, %v5818_v27 }
 0x371   :  { %v5937_v34 = vpack.c.bf16 %v5836_v29, %v5835_v28  ;;  %v5967_v42 = vld [vmem:[#allocation8 + $0x90] sm:$0xff] }
 0x372   :  { %v5925_v35 = vpack.c.bf16 %v5834_v33, %v5833_v30  ;;  %v5964_v40 = vld [vmem:[#allocation8 + $0x70] sm:$0xff] }
 0x373   :  { %5940 = vst.msk [vmem:[#allocation8 + $0xd0] sm:$0xff] %vm4801_vm0, %v5937_v34 }
 0x374   :  { %5928 = vst.msk [vmem:[#allocation8 + $0xb0] sm:$0xff] %vm4801_vm0, %v5925_v35  ;;  %6217 = vmatmul.mubr.bf16.gmra.mrb[68].mxu0 %v5901_v10  ;;  %6224 = vmatprep.mubr.bf16.mxu1 %v5925_v35 }
 0x375   :  { %6225 = vmatmul.mubr.bf16.vlgmr.msra.gmra.mrb[48].mxu1 %v5913_v62  ;;  %9154 = vmatprep.mubr.msk.bf16.mxu0 %vm4801_vm0, %v5955_v39 }
 0x376   :  { %6232 = vmatprep.mubr.bf16.mxu1 %v5937_v34  ;;  %9171 = vmatpush3.bf16.msra.mxu1 %v9361_v36 }
 0x377   :  { %9172 = vmatprep.subr.bf16.mxu1 %v9366_v60 }
 0x37a   :  { %v5973_v41 = vld [vmem:[#allocation8 + $0xd0] sm:$0xff]  ;;  %9173 = vmatpush3.bf16.msra.mxu1 %v9366_v60 }
 0x37b   :  { %v5970_v17 = vld [vmem:[#allocation8 + $0xb0] sm:$0xff]  ;;  %9040 = vmatprep.subr.bf16.mxu1 %v9367_v63 }
 0x37c   :  { %9155 = vmatmul.mubr.msk.bf16.vlgmr.msra.gmra.mrb[72].mxu0 %vm4801_vm0, %v5958_v38 }
 0x37d   :  { %6233 = vmatmul.mubr.bf16.gmra.mrb[52].mxu1 %v5925_v35  ;;  %9158 = vmatprep.mubr.msk.bf16.mxu0 %vm4801_vm0, %v5961_v12 }
 0x37e   :  { %8967 = vmatpush3.bf16.msra.mxu0 %v9350_v45 }
 0x37f   :  { %8968 = vmatprep.subr.bf16.mxu0 %v9351_v46 }
 0x382   :  { %8969 = vmatpush3.bf16.msra.mxu0 %v9352_v47 }
 0x384   :  { %9159 = vmatmul.mubr.msk.bf16.gmra.mrb[76].mxu0 %vm4801_vm0, %v5964_v40 }
 0x385   :  { %9162 = vmatprep.mubr.msk.bf16.mxu0 %vm4801_vm0, %v5967_v42 }
 0x38c   :  { %9163 = vmatmul.mubr.msk.bf16.gmra.mrb[80].mxu0 %vm4801_vm0, %v5970_v17 }
 0x38d   :  { %9166 = vmatprep.mubr.msk.bf16.mxu0 %vm4801_vm0, %v5973_v41 }
 0x394   :  { %9167 = vmatmul.mubr.msk.bf16.gmra.mrb[84].mxu0 %vm4801_vm0, %v11469_v20  ;;  %v9353_v20 = vld [vmem:[%s11952_s4 + $0x50] sm:$0xff]  }
 0x395   :  { %8970 = vmatprep.subr.bf16.mxu0 %v9353_v20 }
 0x396   :  { %8971 = vmatpush3.bf16.msra.mxu0 %v9354_v48 }
 0x397   :  { %8972 = vmatprep.subr.bf16.mxu0 %v9355_v49 }
 0x39a   :  { %8973 = vmatpush3.bf16.msra.mxu0 %v9356_v50 }
 0x39b   :  { %8974 = vmatprep.subr.bf16.mxu0 %v9357_v51 }
 0x39e   :  { %8975 = vmatpush3.bf16.msra.mxu0 %v9358_v53 }
 0x39f   :  { %8976 = vmatprep.subr.bf16.mxu0 %v9359_v54 }
 0x3a2   :  { %8977 = vmatpush3.bf16.msra.mxu0 %v9360_v32 }
 0x3a3   :  { %8978 = vmatprep.subr.bf16.mxu0 %v9362_v55 }
 0x3a6   :  { %8979 = vmatpush3.bf16.msra.mxu0 %v9363_v56 }
 0x3a7   :  { %8980 = vmatprep.subr.bf16.mxu0 %v9364_v57 }
 0x3aa   :  { %8981 = vmatpush3.bf16.msra.mxu0 %v9365_v59 }
 0x3ab   :  { %9190 = vmatprep.subr.bf16.mxu0 %v11577_v0 }
 0x41f   :  { %v8909_v1 = vpop.f32.mrb[48].mxu0 }
 0x420   :  { %v8910_v2 = vpop.f32.mrb[49].mxu0 }
 0x421   :  { %v8911_v58 = vadd.f32 %v8910_v2, %v8909_v1  ;;  %v8912_v3 = vpop.f32.mrb[50].mxu0 }
 0x422   :  { %v8913_v52 = vpop.f32.mrb[51].mxu0 }
 0x423   :  { %v8914_v31 = vadd.f32 %v8913_v52, %v8912_v3  ;;  %v6179_v47 = vadd.f32 %v8911_v58, %v11593_v43 }
 0x425   :  { %v6182_v32 = vadd.f32 %v8914_v31, %v11593_v43 }
 0x427   :  { %v8915_v37 = vpop.f32.mrb[52].mxu0 }
 0x428   :  { %v8916_v4 = vpop.f32.mrb[53].mxu0 }
 0x429   :  { %v8917_v44 = vadd.f32 %v8916_v4, %v8915_v37  ;;  %v8918_v5 = vpop.f32.mrb[54].mxu0 }
 0x42a   :  { %v8919_v6 = vpop.f32.mrb[55].mxu0 }
 0x42b   :  { %v8920_v7 = vadd.f32 %v8919_v6, %v8918_v5  ;;  %v6187_v45 = vadd.f32 %v8917_v44, %v11593_v43 }
 0x42d   :  { %v6190_v50 = vadd.f32 %v8920_v7, %v11593_v43 }
 0x42f   :  { %v8921_v62 = vpop.f32.mrb[56].mxu0 }
 0x430   :  { %v8922_v8 = vpop.f32.mrb[57].mxu0 }
 0x431   :  { %v8923_v9 = vadd.f32 %v8922_v8, %v8921_v62  ;;  %v8924_v10 = vpop.f32.mrb[58].mxu0 }
 0x432   :  { %v8925_v11 = vpop.f32.mrb[59].mxu0 }
 0x433   :  { %v8926_v14 = vadd.f32 %v8925_v11, %v8924_v10  ;;  %v6195_v6 = vadd.f32 %v8923_v9, %v11593_v43 }
 0x437   :  { %v8927_v15 = vpop.f32.mrb[60].mxu0 }
 0x438   :  { %v8928_v16 = vpop.f32.mrb[61].mxu0 }
 0x439   :  { %v8929_v21 = vadd.f32 %v8928_v16, %v8927_v15  ;;  %v8930_v22 = vpop.f32.mrb[62].mxu0 }
 0x43a   :  { %v8931_v23 = vpop.f32.mrb[63].mxu0 }
 0x43b   :  { %v8932_v24 = vadd.f32 %v8931_v23, %v8930_v22  ;;  %v6203_v4 = vadd.f32 %v8929_v21, %v11593_v43  ;;  %v6198_v22 = vadd.f32 %v8926_v14, %v11593_v43 }
 0x43d   :  { %v6206_v10 = vadd.f32 %v8932_v24, %v11593_v43 }
 0x43f   :  { %v8933_v18 = vpop.f32.mrb[64].mxu0 }
 0x440   :  { %v8934_v25 = vpop.f32.mrb[65].mxu0 }
 0x441   :  { %v11580_v19 = vadd.f32 %v8934_v25, %v8933_v18  ;;  %v8936_v26 = vpop.f32.mrb[66].mxu0 }
 0x442   :  { %v8937_v27 = vpop.f32.mrb[67].mxu0 }
 0x443   :  { %v11582_v28 = vadd.f32 %v8937_v27, %v8936_v26 }
 0x447   :  { %v8939_v29 = vpop.f32.mrb[68].mxu0 }
 0x448   :  { %v8940_v30 = vpop.f32.mrb[69].mxu0  ;;  %v8945_v33 = vpop.f32.mrb[48].mxu1 }
 0x449   :  { %v8941_v34 = vadd.f32 %v8940_v30, %v8939_v29  ;;  %v8942_v35 = vpop.f32.mrb[70].mxu0  ;;  %v8946_v39 = vpop.f32.mrb[49].mxu1 }
 0x44a   :  { %v11584_v38 = vadd.f32 %v8946_v39, %v8945_v33  ;;  %v8943_v12 = vpop.f32.mrb[71].mxu0  ;;  %v8948_v40 = vpop.f32.mrb[50].mxu1  ;;  %v6211_v39 = vadd.f32 %v11580_v19, %v11593_v43 }
 0x44b   :  { %v11586_v42 = vadd.f32 %v8943_v12, %v8942_v35  ;;  %v8949_v17 = vpop.f32.mrb[51].mxu1  ;;  %v6219_v14 = vadd.f32 %v8941_v34, %v11593_v43  ;;  %v6214_v34 = vadd.f32 %v11582_v28, %v11593_v43 }
 0x44c   :  { %v11588_v41 = vadd.f32 %v8949_v17, %v8948_v40 }
 0x44f   :  { %v9156_v46 = vpop.f32.mrb[72].mxu0 }
 0x450   :  { %v6284_v20 = vadd.f32 %v9156_v46, %v6187_v45  ;;  %v8951_v48 = vpop.f32.mrb[52].mxu1  ;;  %v6275_v49 = vpop.f32.mrb[73].mxu0  ;;  %v6222_v45 = vadd.f32 %v11586_v42, %v11593_v43 }
 0x451   :  { %v6276_v51 = vadd.f32 %v6275_v49, %v6179_v47  ;;  %v8952_v53 = vpop.f32.mrb[53].mxu1  ;;  %v9157_v54 = vpop.f32.mrb[74].mxu0 }
 0x452   :  { %v6340_v55 = vmul.f32 0.2, %v6284_v20  ;;  %v11599_v56 = vadd.f32 %v8952_v53, %v8951_v48  ;;  %v6287_v57 = vadd.f32 %v9157_v54, %v6190_v50  ;;  %v8954_v59 = vpop.f32.mrb[54].mxu1  ;;  %v6278_v36 = vpop.f32.mrb[75].mxu0 }
 0x453   :  { %v6338_v60 = vmul.f32 0.2, %v6276_v51  ;;  %v6279_v63 = vadd.f32 %v6278_v36, %v6182_v32  ;;  %v8955_v1 = vpop.f32.mrb[55].mxu1  ;;  %v6227_v36 = vadd.f32 %v11584_v38, %v11593_v43 }
 0x454   :  { %v6341_v2 = vmul.f32 0.2, %v6287_v57  ;;  %v11601_v58 = vadd.f32 %v8955_v1, %v8954_v59  ;;  %v6356_v52 = vmax.f32 %v6284_v20, %v6340_v55  ;;  %v6235_v32 = vadd.f32 %v11599_v56, %v11593_v43  ;;  %v9368_v56 = vld [vmem:[%s11953_s5] sm:$0xff]  }
 0x455   :  { %v6339_v3 = vmul.f32 0.2, %v6279_v63  ;;  %v6354_v44 = vmax.f32 %v6276_v51, %v6338_v60 }
 0x456   :  { %v6357_v37 = vmax.f32 %v6287_v57, %v6341_v2  ;;  %v6238_v2 = vadd.f32 %v11601_v58, %v11593_v43  ;;  %v9369_v58 = vld [vmem:[%s11953_s5 + $0x48] sm:$0xff]  }
 0x457   :  { %v6355_v5 = vmax.f32 %v6279_v63, %v6339_v3  ;;  %v9160_v31 = vpop.f32.mrb[76].mxu0 }
 0x458   :  { %v11605_v7 = vpack.c.bf16 %v6357_v37, %v6356_v52  ;;  %v6300_v62 = vadd.f32 %v9160_v31, %v6203_v4  ;;  %v6291_v8 = vpop.f32.mrb[77].mxu0  ;;  %v6230_v4 = vadd.f32 %v11588_v41, %v11593_v43 }
 0x459   :  { %v6397_v11 = vpack.c.bf16 %v6355_v5, %v6354_v44  ;;  %v6292_v15 = vadd.f32 %v6291_v8, %v6195_v6  ;;  %v9161_v16 = vpop.f32.mrb[78].mxu0 }
 0x45a   :  { %6402 = vst.msk [vmem:[#allocation8 + $0x10] sm:$0xff] %vm6401_vm1, %v11605_v7  ;;  %v6344_v21 = vmul.f32 0.2, %v6300_v62  ;;  %v6303_v23 = vadd.f32 %v9161_v16, %v6206_v10  ;;  %v6294_v18 = vpop.f32.mrb[79].mxu0 }
 0x45b   :  { %v6342_v25 = vmul.f32 0.2, %v6292_v15  ;;  %v6295_v26 = vadd.f32 %v6294_v18, %v6198_v22  ;;  %6718 = vmatprep.mubr.bf16.mxu0 %v6397_v11 }
 0x45c   :  { %v6345_v9 = vmul.f32 0.2, %v6303_v23  ;;  %6719 = vmatmul.mubr.bf16.vlgmr.msra.gmra.mrb[88].mxu0 %v11471_v13  ;;  %v6360_v24 = vmax.f32 %v6300_v62, %v6344_v21 }
 0x45d   :  { %v6343_v27 = vmul.f32 0.2, %v6295_v26  ;;  %6726 = vmatprep.mubr.bf16.mxu0 %v11605_v7  ;;  %9191 = vmatpush3.bf16.msra.mxu0 %v11577_v0  ;;  %v6358_v30 = vmax.f32 %v6292_v15, %v6342_v25 }
 0x45e   :  { %v6361_v29 = vmax.f32 %v6303_v23, %v6345_v9  ;;  %v9372_v9 = vld [vmem:[%s11953_s5 + $0x50] sm:$0xff]  }
 0x45f   :  { %v6359_v33 = vmax.f32 %v6295_v26, %v6343_v27  ;;  %v9164_v35 = vpop.f32.mrb[80].mxu0  ;;  %v9371_v26 = vld [vmem:[%s11953_s5 + $0x8] sm:$0xff]   ;;  %v9373_v27 = vld [vmem:[%s11953_s5 + $0x10] sm:$0xff]  }
 0x460   :  { %v11617_v12 = vpack.c.bf16 %v6361_v29, %v6360_v24  ;;  %v6316_v40 = vadd.f32 %v9164_v35, %v6219_v14  ;;  %v6307_v17 = vpop.f32.mrb[81].mxu0  ;;  %v9375_v24 = vld [vmem:[%s11953_s5 + $0x18] sm:$0xff]   ;;  %v9376_v29 = vld [vmem:[%s11953_s5 + $0x60] sm:$0xff]   ;;  %v9381_v35 = vld [vmem:[%s11953_s5 + $0x70] sm:$0xff]  }
 0x461   :  { %v11621_v46 = vpack.c.bf16 %v6359_v33, %v6358_v30  ;;  %v6308_v0 = vadd.f32 %v6307_v17, %v6211_v39  ;;  %v9165_v47 = vpop.f32.mrb[82].mxu0  ;;  %v6489_v20 = vld [vmem:[#allocation8 + $0x10] sm:$0xff]  ;;  %v9377_v14 = vld [vmem:[%s11953_s5 + $0x20] sm:$0xff]   ;;  %v9378_v30 = vld [vmem:[%s11953_s5 + $0x68] sm:$0xff]  }
 0x462   :  { %6426 = vst.msk [vmem:[#allocation8 + $0x50] sm:$0xff] %vm6401_vm1, %v11617_v12  ;;  %v6348_v48 = vmul.f32 0.2, %v6316_v40  ;;  %v6319_v19 = vadd.f32 %v9165_v47, %v6222_v45  ;;  %v6310_v49 = vpop.f32.mrb[83].mxu0  ;;  %9174 = vmatprep.mubr.msk.bf16.mxu1 %vm6401_vm1, %v6489_v20  ;;  %v9380_v33 = vld [vmem:[%s11953_s5 + $0x28] sm:$0xff]   ;;  %v9382_v39 = vld [vmem:[%s11953_s5 + $0x30] sm:$0xff]  }
 0x463   :  { %6414 = vst.msk [vmem:[#allocation8 + $0x30] sm:$0xff] %vm6401_vm1, %v11621_v46  ;;  %v6346_v42 = vmul.f32 0.2, %v6308_v0  ;;  %v6311_v50 = vadd.f32 %v6310_v49, %v6214_v34  ;;  %v9379_v17 = vld [vmem:[%s11953_s5 + $0x88] sm:$0xff]   ;;  %v9385_v45 = vld [vmem:[%s11953_s5 + $0x90] sm:$0xff]  }
 0x464   :  { %v6349_v51 = vmul.f32 0.2, %v6319_v19  ;;  %6727 = vmatmul.mubr.bf16.gmra.mrb[92].mxu0 %v6397_v11  ;;  %v6364_v28 = vmax.f32 %v6316_v40, %v6348_v48  ;;  %v9384_v40 = vld [vmem:[%s11953_s5 + $0x38] sm:$0xff]   ;;  %9192 = vmatprep.subr.bf16.mxu0 %v9379_v17 }
 0x465   :  { %v6347_v53 = vmul.f32 0.2, %v6311_v50  ;;  %6734 = vmatprep.mubr.bf16.mxu0 %v11621_v46  ;;  %v6362_v55 = vmax.f32 %v6308_v0, %v6346_v42  ;;  %9193 = vmatpush3.bf16.msra.mxu0 %v9379_v17 }
 0x466   :  { %v6365_v54 = vmax.f32 %v6319_v19, %v6349_v51  ;;  %9194 = vmatprep.subr.bf16.mxu0 %v9385_v45 }
 0x467   :  { %v6363_v57 = vmax.f32 %v6311_v50, %v6347_v53  ;;  %v9168_v59 = vpop.f32.mrb[84].mxu0 }
 0x468   :  { %v6447_v60 = vpack.c.bf16 %v6365_v54, %v6364_v28  ;;  %v6332_v63 = vadd.f32 %v9168_v59, %v6235_v32  ;;  %v6323_v1 = vpop.f32.mrb[85].mxu0  ;;  %v11712_v28 = vld [vmem:[%s11959_s11] ss:$0 sm:$0xff] }
 0x469   :  { %v6435_v3 = vpack.c.bf16 %v6363_v57, %v6362_v55  ;;  %v6324_v52 = vadd.f32 %v6323_v1, %v6227_v36  ;;  %v9169_v37 = vpop.f32.mrb[86].mxu0  ;;  %v6495_v41 = vld [vmem:[#allocation8 + $0x50] sm:$0xff]  ;;  %9195 = vmatpush3.bf16.msra.mxu0 %v9385_v45 }
 0x46a   :  { %6450 = vst.msk [vmem:[#allocation8 + $0x90] sm:$0xff] %vm6401_vm1, %v6447_v60  ;;  %v6352_v44 = vmul.f32 0.2, %v6332_v63  ;;  %v6335_v38 = vadd.f32 %v9169_v37, %v6238_v2  ;;  %v6326_v5 = vpop.f32.mrb[87].mxu0  ;;  %v6492_v31 = vld [vmem:[#allocation8 + $0x30] sm:$0xff] }
 0x46b   :  { %6438 = vst.msk [vmem:[#allocation8 + $0x70] sm:$0xff] %vm6401_vm1, %v6435_v3  ;;  %v6350_v6 = vmul.f32 0.2, %v6324_v52  ;;  %v6327_v62 = vadd.f32 %v6326_v5, %v6230_v4  ;;  %9175 = vmatmul.mubr.msk.bf16.vlgmr.msra.gmra.mrb[56].mxu1 %vm6401_vm1, %v6492_v31 }
 0x46c   :  { %v6353_v43 = vmul.f32 0.2, %v6335_v38  ;;  %9178 = vmatprep.mubr.msk.bf16.mxu1 %vm6401_vm1, %v6495_v41  ;;  %6735 = vmatmul.mubr.bf16.gmra.mrb[96].mxu0 %v11605_v7  ;;  %v6368_v10 = vmax.f32 %v6332_v63, %v6352_v44 }
 0x46d   :  { %v6351_v8 = vmul.f32 0.2, %v6327_v62  ;;  %6742 = vmatprep.mubr.bf16.mxu0 %v11617_v12  ;;  %9041 = vmatpush3.bf16.msra.mxu1 %v9368_v56  ;;  %v6366_v15 = vmax.f32 %v6324_v52, %v6350_v6 }
 0x46e   :  { %v6369_v11 = vmax.f32 %v6335_v38, %v6353_v43  ;;  %9042 = vmatprep.subr.bf16.mxu1 %v9369_v58 }
 0x46f   :  { %v6367_v16 = vmax.f32 %v6327_v62, %v6351_v8 }
 0x470   :  { %v6471_v22 = vpack.c.bf16 %v6369_v11, %v6368_v10 }
 0x471   :  { %v6459_v21 = vpack.c.bf16 %v6367_v16, %v6366_v15  ;;  %v6501_v18 = vld [vmem:[#allocation8 + $0x90] sm:$0xff]  ;;  %9043 = vmatpush3.bf16.msra.mxu1 %v9371_v26 }
 0x472   :  { %6474 = vst.msk [vmem:[#allocation8 + $0xd0] sm:$0xff] %vm6401_vm1, %v6471_v22  ;;  %v6498_v23 = vld [vmem:[#allocation8 + $0x70] sm:$0xff]  ;;  %9044 = vmatprep.subr.bf16.mxu1 %v9372_v9 }
 0x473   :  { %6462 = vst.msk [vmem:[#allocation8 + $0xb0] sm:$0xff] %vm6401_vm1, %v6459_v21  ;;  %9179 = vmatmul.mubr.msk.bf16.gmra.mrb[60].mxu1 %vm6401_vm1, %v6498_v23 }
 0x474   :  { %9182 = vmatprep.mubr.msk.bf16.mxu1 %vm6401_vm1, %v6501_v18  ;;  %6743 = vmatmul.mubr.bf16.gmra.mrb[100].mxu0 %v11621_v46  ;;  %v9386_v46 = vld [vmem:[%s11953_s5 + $0x98] sm:$0xff]  }
 0x475   :  { %6750 = vmatprep.mubr.bf16.mxu0 %v6435_v3  ;;  %9045 = vmatpush3.bf16.msra.mxu1 %v9373_v27 }
 0x476   :  { %9196 = vmatprep.subr.bf16.mxu0 %v9386_v46 }
 0x477   :  { %9197 = vmatpush3.bf16.msra.mxu0 %v9386_v46 }
 0x479   :  { %v6507_v25 = vld [vmem:[#allocation8 + $0xd0] sm:$0xff] }
 0x47a   :  { %v6504_v7 = vld [vmem:[#allocation8 + $0xb0] sm:$0xff] }
 0x47b   :  { %9183 = vmatmul.mubr.msk.bf16.gmra.mrb[64].mxu1 %vm6401_vm1, %v6504_v7 }
 0x47c   :  { %9186 = vmatprep.mubr.msk.bf16.mxu1 %vm6401_vm1, %v6507_v25  ;;  %6751 = vmatmul.mubr.bf16.gmra.mrb[104].mxu0 %v11617_v12  ;;  %v9383_v12 = vld [vmem:[%s11953_s5 + $0x78] sm:$0xff]  }
 0x47d   :  { %6758 = vmatprep.mubr.bf16.mxu0 %v6447_v60 }
 0x483   :  { %9187 = vmatmul.mubr.msk.bf16.gmra.mrb[68].mxu1 %vm6401_vm1, %v11567_v61  ;;  %v9374_v61 = vld [vmem:[%s11953_s5 + $0x58] sm:$0xff]  }
 0x484   :  { %6759 = vmatmul.mubr.bf16.gmra.mrb[108].mxu0 %v6435_v3  ;;  %9046 = vmatprep.subr.bf16.mxu1 %v9374_v61 }
 0x485   :  { %6766 = vmatprep.mubr.bf16.mxu0 %v6459_v21  ;;  %9047 = vmatpush3.bf16.msra.mxu1 %v9375_v24 }
 0x486   :  { %9048 = vmatprep.subr.bf16.mxu1 %v9376_v29 }
 0x489   :  { %9049 = vmatpush3.bf16.msra.mxu1 %v9377_v14 }
 0x48a   :  { %9050 = vmatprep.subr.bf16.mxu1 %v9378_v30 }
 0x48c   :  { %6767 = vmatmul.mubr.bf16.gmra.mrb[112].mxu0 %v6447_v60 }
 0x48d   :  { %6774 = vmatprep.mubr.bf16.mxu0 %v6471_v22  ;;  %9051 = vmatpush3.bf16.msra.mxu1 %v9380_v33 }
 0x48e   :  { %9052 = vmatprep.subr.bf16.mxu1 %v9381_v35 }
 0x491   :  { %9053 = vmatpush3.bf16.msra.mxu1 %v9382_v39 }
 0x492   :  { %9054 = vmatprep.subr.bf16.mxu1 %v9383_v12 }
 0x494   :  { %6775 = vmatmul.mubr.bf16.gmra.mrb[116].mxu0 %v6459_v21 }
 0x495   :  { %9055 = vmatpush3.bf16.msra.mxu1 %v9384_v40 }
 0x52f   :  { %v8982_v0 = vpop.f32.mrb[88].mxu0 }
 0x530   :  { %v8983_v47 = vpop.f32.mrb[89].mxu0 }
 0x531   :  { %v8984_v34 = vadd.f32 %v8983_v47, %v8982_v0  ;;  %v8985_v20 = vpop.f32.mrb[90].mxu0 }
 0x532   :  { %v8986_v48 = vpop.f32.mrb[91].mxu0 }
 0x533   :  { %v8987_v19 = vadd.f32 %v8986_v48, %v8985_v20  ;;  %v6721_v57 = vadd.f32 %v8984_v34, %v11712_v28 }
 0x535   :  { %v6724_v3 = vadd.f32 %v8987_v19, %v11712_v28 }
 0x537   :  { %v8988_v49 = vpop.f32.mrb[92].mxu0 }
 0x538   :  { %v8989_v42 = vpop.f32.mrb[93].mxu0 }
 0x539   :  { %v8990_v50 = vadd.f32 %v8989_v42, %v8988_v49  ;;  %v8991_v51 = vpop.f32.mrb[94].mxu0 }
 0x53a   :  { %v8992_v53 = vpop.f32.mrb[95].mxu0 }
 0x53b   :  { %v8993_v54 = vadd.f32 %v8992_v53, %v8991_v51  ;;  %v6729_v32 = vadd.f32 %v8990_v50, %v11712_v28 }
 0x53d   :  { %v6732_v60 = vadd.f32 %v8993_v54, %v11712_v28 }
 0x53e   :  { %v9176_v55 = vpop.f32.mrb[56].mxu1 }
 0x53f   :  { %v6817_v59 = vpop.f32.mrb[57].mxu1  ;;  %v6826_v36 = vadd.f32 %v9176_v55, %v6729_v32  ;;  %v8994_v63 = vpop.f32.mrb[96].mxu0 }
 0x540   :  { %v6818_v1 = vadd.f32 %v6817_v59, %v6721_v57  ;;  %v9177_v2 = vpop.f32.mrb[58].mxu1  ;;  %v8995_v52 = vpop.f32.mrb[97].mxu0 }
 0x541   :  { %v6882_v37 = vmul.f32 0.2, %v6826_v36  ;;  %v6820_v4 = vpop.f32.mrb[59].mxu1  ;;  %v6829_v56 = vadd.f32 %v9177_v2, %v6732_v60  ;;  %v8996_v44 = vadd.f32 %v8995_v52, %v8994_v63  ;;  %v8997_v38 = vpop.f32.mrb[98].mxu0 }
 0x542   :  { %v6880_v5 = vmul.f32 0.2, %v6818_v1  ;;  %v6821_v31 = vadd.f32 %v6820_v4, %v6724_v3  ;;  %v8998_v58 = vpop.f32.mrb[99].mxu0 }
 0x543   :  { %v6883_v6 = vmul.f32 0.2, %v6829_v56  ;;  %v8999_v62 = vadd.f32 %v8998_v58, %v8997_v38  ;;  %v6898_v43 = vmax.f32 %v6826_v36, %v6882_v37  ;;  %v6737_v16 = vadd.f32 %v8996_v44, %v11712_v28 }
 0x544   :  { %v6881_v41 = vmul.f32 0.2, %v6821_v31  ;;  %v6896_v10 = vmax.f32 %v6818_v1, %v6880_v5 }
 0x545   :  { %v6899_v8 = vmax.f32 %v6829_v56, %v6883_v6  ;;  %v6740_v26 = vadd.f32 %v8999_v62, %v11712_v28 }
 0x546   :  { %v6897_v11 = vmax.f32 %v6821_v31, %v6881_v41  ;;  %v9180_v15 = vpop.f32.mrb[60].mxu1 }
 0x547   :  { %v11719_v22 = vpack.c.bf16 %v6899_v8, %v6898_v43  ;;  %v6833_v21 = vpop.f32.mrb[61].mxu1  ;;  %v9000_v23 = vpop.f32.mrb[100].mxu0 }
 0x548   :  { %v6939_v18 = vpack.c.bf16 %v6897_v11, %v6896_v10  ;;  %v6834_v7 = vadd.f32 %v6833_v21, %v6737_v16  ;;  %v9181_v25 = vpop.f32.mrb[62].mxu1  ;;  %v9001_v9 = vpop.f32.mrb[101].mxu0 }
 0x549   :  { %6944 = vst.msk [vmem:[#allocation8 + $0x10] sm:$0xff] %vm6943_vm2, %v11719_v22  ;;  %v6836_v27 = vpop.f32.mrb[63].mxu1  ;;  %v9002_v61 = vadd.f32 %v9001_v9, %v9000_v23  ;;  %v9003_v24 = vpop.f32.mrb[102].mxu0 }
 0x54a   :  { %v6884_v29 = vmul.f32 0.2, %v6834_v7  ;;  %v6837_v14 = vadd.f32 %v6836_v27, %v6740_v26  ;;  %v9004_v30 = vpop.f32.mrb[103].mxu0  ;;  %7276 = vmatprep.mubr.bf16.mxu1 %v6939_v18 }
 0x54b   :  { %v6745_v33 = vadd.f32 %v9002_v61, %v11712_v28  ;;  %v9005_v35 = vadd.f32 %v9004_v30, %v9003_v24  ;;  %7277 = vmatmul.mubr.bf16.vlgmr.msra.gmra.mrb[72].mxu1 %v11471_v13 }
 0x54c   :  { %v6885_v39 = vmul.f32 0.2, %v6837_v14  ;;  %7284 = vmatprep.mubr.bf16.mxu1 %v11719_v22  ;;  %v6900_v17 = vmax.f32 %v6834_v7, %v6884_v29 }
 0x54d   :  { %v6842_v12 = vadd.f32 %v9180_v15, %v6745_v33  ;;  %v6748_v40 = vadd.f32 %v9005_v35, %v11712_v28 }
 0x54e   :  { %v6901_v45 = vmax.f32 %v6837_v14, %v6885_v39  ;;  %v9184_v46 = vpop.f32.mrb[64].mxu1 }
 0x54f   :  { %v6849_v0 = vpop.f32.mrb[65].mxu1  ;;  %v6886_v47 = vmul.f32 0.2, %v6842_v12  ;;  %v6845_v34 = vadd.f32 %v9181_v25, %v6748_v40  ;;  %v9006_v20 = vpop.f32.mrb[104].mxu0 }
 0x550   :  { %v6953_v48 = vpack.c.bf16 %v6901_v45, %v6900_v17  ;;  %v9185_v19 = vpop.f32.mrb[66].mxu1  ;;  %v7031_v49 = vld [vmem:[#allocation8 + $0x10] sm:$0xff]  ;;  %v9007_v42 = vpop.f32.mrb[105].mxu0 }
 0x551   :  { %v6852_v50 = vpop.f32.mrb[67].mxu1  ;;  %v6887_v51 = vmul.f32 0.2, %v6845_v34  ;;  %9198 = vmatprep.mubr.msk.bf16.mxu0 %vm6943_vm2, %v7031_v49  ;;  %v9008_v13 = vadd.f32 %v9007_v42, %v9006_v20  ;;  %v9009_v53 = vpop.f32.mrb[106].mxu0  ;;  %v6902_v32 = vmax.f32 %v6842_v12, %v6886_v47 }
 0x552   :  { %6956 = vst.msk [vmem:[#allocation8 + $0x30] sm:$0xff] %vm6943_vm2, %v6953_v48  ;;  %v9010_v54 = vpop.f32.mrb[107].mxu0 }
 0x553   :  { %v6903_v55 = vmax.f32 %v6845_v34, %v6887_v51  ;;  %v6753_v57 = vadd.f32 %v9008_v13, %v11712_v28  ;;  %v9011_v59 = vadd.f32 %v9010_v54, %v9009_v53  ;;  %7285 = vmatmul.mubr.bf16.gmra.mrb[76].mxu1 %v6939_v18 }
 0x554   :  { %7292 = vmatprep.mubr.bf16.mxu1 %v6953_v48 }
 0x555   :  { %v6965_v36 = vpack.c.bf16 %v6903_v55, %v6902_v32  ;;  %v6850_v60 = vadd.f32 %v6849_v0, %v6753_v57  ;;  %v6756_v63 = vadd.f32 %v9011_v59, %v11712_v28 }
 0x556   :  { %v9188_v1 = vpop.f32.mrb[68].mxu1 }
 0x557   :  { %6968 = vst.msk [vmem:[#allocation8 + $0x50] sm:$0xff] %vm6943_vm2, %v6965_v36  ;;  %v6888_v2 = vmul.f32 0.2, %v6850_v60  ;;  %v6853_v3 = vadd.f32 %v6852_v50, %v6756_v63  ;;  %v9012_v52 = vpop.f32.mrb[108].mxu0  ;;  %v6865_v37 = vpop.f32.mrb[69].mxu1 }
 0x558   :  { %v9013_v4 = vpop.f32.mrb[109].mxu0  ;;  %v9189_v56 = vpop.f32.mrb[70].mxu1 }
 0x559   :  { %v6889_v44 = vmul.f32 0.2, %v6853_v3  ;;  %v7034_v38 = vld [vmem:[#allocation8 + $0x30] sm:$0xff]  ;;  %v9014_v5 = vadd.f32 %v9013_v4, %v9012_v52  ;;  %v9015_v31 = vpop.f32.mrb[110].mxu0  ;;  %v6868_v58 = vpop.f32.mrb[71].mxu1  ;;  %v6904_v62 = vmax.f32 %v6850_v60, %v6888_v2 }
 0x55a   :  { %9199 = vmatmul.mubr.msk.bf16.vlgmr.msra.gmra.mrb[120].mxu0 %vm6943_vm2, %v7034_v38  ;;  %v9016_v6 = vpop.f32.mrb[111].mxu0 }
 0x55b   :  { %v6905_v41 = vmax.f32 %v6853_v3, %v6889_v44  ;;  %v6761_v43 = vadd.f32 %v9014_v5, %v11712_v28  ;;  %v9017_v8 = vadd.f32 %v9016_v6, %v9015_v31  ;;  %7293 = vmatmul.mubr.bf16.gmra.mrb[80].mxu1 %v11719_v22  ;;  %v11754_v31 = vld [vmem:[%s11960_s12] ss:$0 sm:$0xff] }
 0x55c   :  { %7300 = vmatprep.mubr.bf16.mxu1 %v6965_v36 }
 0x55d   :  { %v6977_v10 = vpack.c.bf16 %v6905_v41, %v6904_v62  ;;  %v6858_v11 = vadd.f32 %v9184_v46, %v6761_v43  ;;  %v6764_v15 = vadd.f32 %v9017_v8, %v11712_v28 }
 0x55e   :  { %v7037_v16 = vld [vmem:[#allocation8 + $0x50] sm:$0xff] }
 0x55f   :  { %6980 = vst.msk [vmem:[#allocation8 + $0x70] sm:$0xff] %vm6943_vm2, %v6977_v10  ;;  %v6890_v21 = vmul.f32 0.2, %v6858_v11  ;;  %v6861_v23 = vadd.f32 %v9185_v19, %v6764_v15  ;;  %v9018_v18 = vpop.f32.mrb[112].mxu0  ;;  %9202 = vmatprep.mubr.msk.bf16.mxu0 %vm6943_vm2, %v7037_v16 }
 0x560   :  { %v9019_v7 = vpop.f32.mrb[113].mxu0 }
 0x561   :  { %v6891_v25 = vmul.f32 0.2, %v6861_v23  ;;  %v9020_v26 = vadd.f32 %v9019_v7, %v9018_v18  ;;  %v9021_v9 = vpop.f32.mrb[114].mxu0  ;;  %v6906_v61 = vmax.f32 %v6858_v11, %v6890_v21 }
 0x562   :  { %v9022_v27 = vpop.f32.mrb[115].mxu0 }
 0x563   :  { %v6907_v22 = vmax.f32 %v6861_v23, %v6891_v25  ;;  %v9023_v24 = vadd.f32 %v9022_v27, %v9021_v9  ;;  %7301 = vmatmul.mubr.bf16.gmra.mrb[84].mxu1 %v6953_v48  ;;  %v6769_v29 = vadd.f32 %v9020_v26, %v11712_v28 }
 0x564   :  { %7308 = vmatprep.mubr.bf16.mxu1 %v6977_v10 }
 0x565   :  { %v6989_v14 = vpack.c.bf16 %v6907_v22, %v6906_v61  ;;  %v6866_v30 = vadd.f32 %v6865_v37, %v6769_v29  ;;  %v6772_v33 = vadd.f32 %v9023_v24, %v11712_v28 }
 0x566   :  { %v7040_v35 = vld [vmem:[#allocation8 + $0x70] sm:$0xff] }
 0x567   :  { %6992 = vst.msk [vmem:[#allocation8 + $0x90] sm:$0xff] %vm6943_vm2, %v6989_v14  ;;  %v6892_v39 = vmul.f32 0.2, %v6866_v30  ;;  %v6869_v12 = vadd.f32 %v6868_v58, %v6772_v33  ;;  %v9024_v40 = vpop.f32.mrb[116].mxu0  ;;  %9203 = vmatmul.mubr.msk.bf16.gmra.mrb[124].mxu0 %vm6943_vm2, %v7040_v35 }
 0x568   :  { %v9025_v17 = vpop.f32.mrb[117].mxu0 }
 0x569   :  { %v6893_v45 = vmul.f32 0.2, %v6869_v12  ;;  %v9026_v46 = vadd.f32 %v9025_v17, %v9024_v40  ;;  %v9027_v0 = vpop.f32.mrb[118].mxu0  ;;  %v6908_v34 = vmax.f32 %v6866_v30, %v6892_v39 }
 0x56a   :  { %v9028_v47 = vpop.f32.mrb[119].mxu0 }
 0x56b   :  { %v6909_v20 = vmax.f32 %v6869_v12, %v6893_v45  ;;  %v6777_v48 = vadd.f32 %v9026_v46, %v11712_v28  ;;  %v9029_v19 = vadd.f32 %v9028_v47, %v9027_v0  ;;  %7309 = vmatmul.mubr.bf16.gmra.mrb[88].mxu1 %v6965_v36 }
 0x56c   :  { %7316 = vmatprep.mubr.bf16.mxu1 %v6989_v14 }
 0x56d   :  { %v7001_v49 = vpack.c.bf16 %v6909_v20, %v6908_v34  ;;  %v6874_v42 = vadd.f32 %v9188_v1, %v6777_v48  ;;  %v6780_v50 = vadd.f32 %v9029_v19, %v11712_v28  ;;  %v7052_v28 = vld [vmem:[#allocation8 + $0xf0] sm:$0xff] }
 0x56e   :  { %v7043_v51 = vld [vmem:[#allocation8 + $0x90] sm:$0xff] }
 0x56f   :  { %7004 = vst.msk [vmem:[#allocation8 + $0xb0] sm:$0xff] %vm6943_vm2, %v7001_v49  ;;  %v6894_v13 = vmul.f32 0.2, %v6874_v42  ;;  %v6877_v53 = vadd.f32 %v9189_v56, %v6780_v50  ;;  %9206 = vmatprep.mubr.msk.bf16.mxu0 %vm6943_vm2, %v7043_v51 }
 0x571   :  { %v6895_v54 = vmul.f32 0.2, %v6877_v53  ;;  %v6910_v32 = vmax.f32 %v6874_v42, %v6894_v13 }
 0x573   :  { %v6911_v55 = vmax.f32 %v6877_v53, %v6895_v54  ;;  %7317 = vmatmul.mubr.bf16.gmra.mrb[92].mxu1 %v6977_v10 }
 0x574   :  { %7324 = vmatprep.mubr.bf16.mxu1 %v7001_v49 }
 0x575   :  { %v7013_v57 = vpack.c.bf16 %v6911_v55, %v6910_v32 }
 0x576   :  { %v7046_v59 = vld [vmem:[#allocation8 + $0xb0] sm:$0xff] }
 0x577   :  { %7016 = vst.msk [vmem:[#allocation8 + $0xd0] sm:$0xff] %vm6943_vm2, %v7013_v57  ;;  %9207 = vmatmul.mubr.msk.bf16.gmra.mrb[128].mxu0 %vm6943_vm2, %v7046_v59 }
 0x57b   :  { %7325 = vmatmul.mubr.bf16.gmra.mrb[96].mxu1 %v6989_v14 }
 0x57c   :  { %7332 = vmatprep.mubr.bf16.mxu1 %v7013_v57 }
 0x57e   :  { %v7049_v36 = vld [vmem:[#allocation8 + $0xd0] sm:$0xff] }
 0x57f   :  { %9210 = vmatprep.mubr.msk.bf16.mxu0 %vm6943_vm2, %v7049_v36 }
 0x580   :  { %9211 = vmatmul.mubr.msk.bf16.gmra.mrb[132].mxu0 %vm6943_vm2, %v7052_v28 }
 0x583   :  { %7333 = vmatmul.mubr.bf16.gmra.mrb[100].mxu1 %v7001_v49 }
 0x61e   :  { %v9056_v60 = vpop.f32.mrb[72].mxu1 }
 0x61f   :  { %v9057_v63 = vpop.f32.mrb[73].mxu1 }
 0x620   :  { %v9058_v1 = vadd.f32 %v9057_v63, %v9056_v60  ;;  %v9059_v2 = vpop.f32.mrb[74].mxu1 }
 0x621   :  { %v9060_v3 = vpop.f32.mrb[75].mxu1 }
 0x622   :  { %v9061_v52 = vadd.f32 %v9060_v3, %v9059_v2  ;;  %v7279_v62 = vadd.f32 %v9058_v1, %v11754_v31 }
 0x624   :  { %v7282_v16 = vadd.f32 %v9061_v52, %v11754_v31 }
 0x626   :  { %v9062_v37 = vpop.f32.mrb[76].mxu1 }
 0x627   :  { %v9063_v4 = vpop.f32.mrb[77].mxu1 }
 0x628   :  { %v9064_v56 = vadd.f32 %v9063_v4, %v9062_v37  ;;  %v9065_v44 = vpop.f32.mrb[78].mxu1 }
 0x629   :  { %v9066_v38 = vpop.f32.mrb[79].mxu1 }
 0x62a   :  { %v9067_v5 = vadd.f32 %v9066_v38, %v9065_v44  ;;  %v7287_v58 = vadd.f32 %v9064_v56, %v11754_v31 }
 0x62c   :  { %v7290_v8 = vadd.f32 %v9067_v5, %v11754_v31 }
 0x62d   :  { %v9200_v6 = vpop.f32.mrb[120].mxu0 }
 0x62e   :  { %v7384_v41 = vadd.f32 %v9200_v6, %v7287_v58  ;;  %v7375_v43 = vpop.f32.mrb[121].mxu0  ;;  %v9068_v10 = vpop.f32.mrb[80].mxu1 }
 0x62f   :  { %v7376_v11 = vadd.f32 %v7375_v43, %v7279_v62  ;;  %v9201_v15 = vpop.f32.mrb[122].mxu0  ;;  %v9069_v21 = vpop.f32.mrb[81].mxu1 }
 0x630   :  { %v7440_v23 = vmul.f32 0.2, %v7384_v41  ;;  %v7387_v18 = vadd.f32 %v9201_v15, %v7290_v8  ;;  %v7378_v7 = vpop.f32.mrb[123].mxu0  ;;  %v9070_v25 = vadd.f32 %v9069_v21, %v9068_v10  ;;  %v9071_v26 = vpop.f32.mrb[82].mxu1 }
 0x631   :  { %v7438_v9 = vmul.f32 0.2, %v7376_v11  ;;  %v7379_v27 = vadd.f32 %v7378_v7, %v7282_v16  ;;  %v9072_v61 = vpop.f32.mrb[83].mxu1 }
 0x632   :  { %v7441_v22 = vmul.f32 0.2, %v7387_v18  ;;  %v9073_v24 = vadd.f32 %v9072_v61, %v9071_v26  ;;  %v7456_v14 = vmax.f32 %v7384_v41, %v7440_v23  ;;  %v7295_v48 = vadd.f32 %v9070_v25, %v11754_v31 }
 0x633   :  { %v7439_v29 = vmul.f32 0.2, %v7379_v27  ;;  %v7454_v33 = vmax.f32 %v7376_v11, %v7438_v9 }
 0x634   :  { %v7457_v30 = vmax.f32 %v7387_v18, %v7441_v22  ;;  %v7298_v13 = vadd.f32 %v9073_v24, %v11754_v31 }
 0x635   :  { %v7455_v35 = vmax.f32 %v7379_v27, %v7439_v29 }
 0x636   :  { %v7500_v39 = vpack.c.bf16 %v7457_v30, %v7456_v14  ;;  %v9074_v12 = vpop.f32.mrb[84].mxu1 }
 0x637   :  { %v7499_v40 = vpack.c.bf16 %v7455_v35, %v7454_v33  ;;  %v9075_v17 = vpop.f32.mrb[85].mxu1 }
 0x638   :  { %7504 = vst [vmem:[#allocation8 + $0x10] sm:$0xff] %v7500_v39  ;;  %7518 = vst [vmem:[#allocation8 + $0x20] sm:$0xff] %v7500_v39  ;;  %v9076_v45 = vadd.f32 %v9075_v17, %v9074_v12  ;;  %v9077_v46 = vpop.f32.mrb[86].mxu1 }
 0x639   :  { %7503 = vst [vmem:[#allocation8 + $0x8] sm:$0xff] %v7499_v40  ;;  %v9078_v0 = vpop.f32.mrb[87].mxu1 }
 0x63a   :  { %v9079_v47 = vadd.f32 %v9078_v0, %v9077_v46  ;;  %v7303_v34 = vadd.f32 %v9076_v45, %v11754_v31  ;;  %v9204_v20 = vpop.f32.mrb[124].mxu0 }
 0x63b   :  { %v7391_v19 = vpop.f32.mrb[125].mxu0 }
 0x63c   :  { %v7400_v49 = vadd.f32 %v9204_v20, %v7303_v34  ;;  %v7392_v42 = vadd.f32 %v7391_v19, %v7295_v48  ;;  %v7306_v50 = vadd.f32 %v9079_v47, %v11754_v31  ;;  %v9205_v51 = vpop.f32.mrb[126].mxu0 }
 0x63d   :  { %v7394_v53 = vpop.f32.mrb[127].mxu0 }
 0x63e   :  { %v7444_v54 = vmul.f32 0.2, %v7400_v49  ;;  %v7442_v32 = vmul.f32 0.2, %v7392_v42  ;;  %v7403_v55 = vadd.f32 %v9205_v51, %v7306_v50  ;;  %v7395_v57 = vadd.f32 %v7394_v53, %v7298_v13  ;;  %v9080_v59 = vpop.f32.mrb[88].mxu1 }
 0x63f   :  { %v9081_v28 = vpop.f32.mrb[89].mxu1 }
 0x640   :  { %v7445_v36 = vmul.f32 0.2, %v7403_v55  ;;  %v7443_v60 = vmul.f32 0.2, %v7395_v57  ;;  %v9083_v63 = vpop.f32.mrb[90].mxu1  ;;  %v7460_v1 = vmax.f32 %v7400_v49, %v7444_v54  ;;  %v9082_v2 = vadd.f32 %v9081_v28, %v9080_v59 }
 0x641   :  { %v9084_v3 = vpop.f32.mrb[91].mxu1  ;;  %v7458_v52 = vmax.f32 %v7392_v42, %v7442_v32 }
 0x642   :  { %v7461_v37 = vmax.f32 %v7403_v55, %v7445_v36  ;;  %v7459_v4 = vmax.f32 %v7395_v57, %v7443_v60  ;;  %v9085_v56 = vadd.f32 %v9084_v3, %v9083_v63  ;;  %v7311_v11 = vadd.f32 %v9082_v2, %v11754_v31 }
 0x644   :  { %v7516_v44 = vpack.c.bf16 %v7461_v37, %v7460_v1  ;;  %v7501_v38 = vpack.c.bf16 %v7459_v4, %v7458_v52  ;;  %v7314_v7 = vadd.f32 %v9085_v56, %v11754_v31 }
 0x646   :  { %7520 = vst [vmem:[#allocation8 + $0x30] sm:$0xff] %v7516_v44  ;;  %7534 = vst [vmem:[#allocation8 + $0x40] sm:$0xff] %v7516_v44  ;;  %v9086_v5 = vpop.f32.mrb[92].mxu1 }
 0x647   :  { %7505 = vst [vmem:[#allocation8 + $0x18] sm:$0xff] %v7501_v38  ;;  %7519 = vst [vmem:[#allocation8 + $0x28] sm:$0xff] %v7501_v38  ;;  %v9087_v58 = vpop.f32.mrb[93].mxu1 }
 0x648   :  { %v9088_v6 = vadd.f32 %v9087_v58, %v9086_v5  ;;  %v9089_v62 = vpop.f32.mrb[94].mxu1 }
 0x649   :  { %v9090_v41 = vpop.f32.mrb[95].mxu1 }
 0x64a   :  { %v9091_v43 = vadd.f32 %v9090_v41, %v9089_v62  ;;  %v7319_v8 = vadd.f32 %v9088_v6, %v11754_v31  ;;  %v9208_v10 = vpop.f32.mrb[128].mxu0 }
 0x64b   :  { %v7407_v15 = vpop.f32.mrb[129].mxu0 }
 0x64c   :  { %v7416_v16 = vadd.f32 %v9208_v10, %v7319_v8  ;;  %v7408_v21 = vadd.f32 %v7407_v15, %v7311_v11  ;;  %v7322_v23 = vadd.f32 %v9091_v43, %v11754_v31  ;;  %v9209_v18 = vpop.f32.mrb[130].mxu0 }
 0x64d   :  { %v7410_v25 = vpop.f32.mrb[131].mxu0 }
 0x64e   :  { %v7448_v26 = vmul.f32 0.2, %v7416_v16  ;;  %v7446_v9 = vmul.f32 0.2, %v7408_v21  ;;  %v7419_v27 = vadd.f32 %v9209_v18, %v7322_v23  ;;  %v7411_v61 = vadd.f32 %v7410_v25, %v7314_v7  ;;  %v9092_v22 = vpop.f32.mrb[96].mxu1 }
 0x64f   :  { %v9093_v24 = vpop.f32.mrb[97].mxu1 }
 0x650   :  { %v7449_v29 = vmul.f32 0.2, %v7419_v27  ;;  %v7447_v14 = vmul.f32 0.2, %v7411_v61  ;;  %v9095_v30 = vpop.f32.mrb[98].mxu1  ;;  %v7464_v33 = vmax.f32 %v7416_v16, %v7448_v26  ;;  %v9094_v35 = vadd.f32 %v9093_v24, %v9092_v22 }
 0x651   :  { %v9096_v39 = vpop.f32.mrb[99].mxu1  ;;  %v7462_v12 = vmax.f32 %v7408_v21, %v7446_v9 }
 0x652   :  { %v7465_v40 = vmax.f32 %v7419_v27, %v7449_v29  ;;  %v7463_v17 = vmax.f32 %v7411_v61, %v7447_v14  ;;  %v9097_v45 = vadd.f32 %v9096_v39, %v9095_v30  ;;  %v7327_v0 = vadd.f32 %v9094_v35, %v11754_v31 }
 0x653   :  { %v9212_v46 = vpop.f32.mrb[132].mxu0 }
 0x654   :  { %v7532_v47 = vpack.c.bf16 %v7465_v40, %v7464_v33  ;;  %v7517_v34 = vpack.c.bf16 %v7463_v17, %v7462_v12  ;;  %v7423_v20 = vpop.f32.mrb[133].mxu0  ;;  %v7330_v48 = vadd.f32 %v9097_v45, %v11754_v31 }
 0x655   :  { %v7424_v19 = vadd.f32 %v7423_v20, %v7327_v0  ;;  %v9213_v49 = vpop.f32.mrb[134].mxu0 }
 0x656   :  { %7536 = vst [vmem:[#allocation8 + $0x50] sm:$0xff] %v7532_v47  ;;  %7550 = vst [vmem:[#allocation8 + $0x60] sm:$0xff] %v7532_v47  ;;  %v9098_v42 = vpop.f32.mrb[100].mxu1  ;;  %v7426_v50 = vpop.f32.mrb[135].mxu0 }
 0x657   :  { %7521 = vst [vmem:[#allocation8 + $0x38] sm:$0xff] %v7517_v34  ;;  %7535 = vst [vmem:[#allocation8 + $0x48] sm:$0xff] %v7517_v34  ;;  %v7450_v51 = vmul.f32 0.2, %v7424_v19  ;;  %v7427_v13 = vadd.f32 %v7426_v50, %v7330_v48  ;;  %v9099_v53 = vpop.f32.mrb[101].mxu1 }
 0x658   :  { %v9100_v54 = vadd.f32 %v9099_v53, %v9098_v42  ;;  %v9101_v32 = vpop.f32.mrb[102].mxu1 }
 0x659   :  { %v7451_v55 = vmul.f32 0.2, %v7427_v13  ;;  %v9102_v57 = vpop.f32.mrb[103].mxu1  ;;  %v7466_v36 = vmax.f32 %v7424_v19, %v7450_v51 }
 0x65a   :  { %v7335_v59 = vadd.f32 %v9100_v54, %v11754_v31  ;;  %v9103_v28 = vadd.f32 %v9102_v57, %v9101_v32 }
 0x65b   :  { %v7467_v60 = vmax.f32 %v7427_v13, %v7451_v55 }
 0x65c   :  { %v7432_v63 = vadd.f32 %v9212_v46, %v7335_v59  ;;  %v7338_v1 = vadd.f32 %v9103_v28, %v11754_v31 }
 0x65d   :  { %v7533_v2 = vpack.c.bf16 %v7467_v60, %v7466_v36 }
 0x65e   :  { %v7452_v3 = vmul.f32 0.2, %v7432_v63  ;;  %v7435_v52 = vadd.f32 %v9213_v49, %v7338_v1 }
 0x65f   :  { %7537 = vst [vmem:[#allocation8 + $0x58] sm:$0xff] %v7533_v2  ;;  %7551 = vst [vmem:[#allocation8 + $0x68] sm:$0xff] %v7533_v2 }
 0x660   :  { %v7453_v37 = vmul.f32 0.2, %v7435_v52  ;;  %v7468_v4 = vmax.f32 %v7432_v63, %v7452_v3 }
 0x662   :  { %v7469_v56 = vmax.f32 %v7435_v52, %v7453_v37 }
 0x664   :  { %v7548_v44 = vpack.c.bf16 %v7469_v56, %v7468_v4 }
 0x666   :  { %7552 = vst [vmem:[#allocation8 + $0x70] sm:$0xff] %v7548_v44 }
 0x667   :  { %9410 = dma.done.wait [#allocation11], 8192 }
 0x668   :  { %9411 = vsyncadd [#allocation11], 4294959104  ;;  %v7575_v38 = vld [vmem:[#allocation9 + $0x8] sm:$0xff]  ;;  %v7574_v5 = vld [vmem:[#allocation9] sm:$0xff] }
 0x669   :  { %v7577_v58 = vld [vmem:[#allocation9 + $0x18] sm:$0xff]  ;;  %7650 = vmatprep.subr.bf16.mxu1 %v7575_v38  ;;  %v7576_v6 = vld [vmem:[#allocation9 + $0x10] sm:$0xff]  ;;  %v7579_v31 = vld [vmem:[#allocation9 + $0x28] sm:$0xff] }
 0x66a   :  { %7651 = vmatpush1.bf16.msra.mxu1 %v7574_v5  ;;  %v7578_v62 = vld [vmem:[#allocation9 + $0x20] sm:$0xff]  ;;  %v7581_v41 = vld [vmem:[#allocation9 + $0x38] sm:$0xff]  ;;  %v7559_v43 = vld [vmem:[#allocation8 + $0x8] sm:$0xff] }
 0x66b   :  { %7652 = vmatprep.subr.bf16.mxu1 %v7577_v58  ;;  %v7580_v8 = vld [vmem:[#allocation9 + $0x30] sm:$0xff]  ;;  %7682 = vmatprep.mubr.bf16.mxu1 %v7559_v43  ;;  %v7583_v10 = vld [vmem:[#allocation9 + $0x48] sm:$0xff]  ;;  %v7582_v11 = vld [vmem:[#allocation9 + $0x40] sm:$0xff] }
 0x66c   :  { %v7585_v15 = vld [vmem:[#allocation9 + $0x58] sm:$0xff]  ;;  %v7584_v16 = vld [vmem:[#allocation9 + $0x50] sm:$0xff]  ;;  %v7587_v21 = vld [vmem:[#allocation9 + $0x68] sm:$0xff] }
 0x66d   :  { %v7586_v23 = vld [vmem:[#allocation9 + $0x60] sm:$0xff]  ;;  %v7589_v18 = vld [vmem:[#allocation9 + $0x78] sm:$0xff]  ;;  %v7588_v7 = vld [vmem:[#allocation9 + $0x70] sm:$0xff] }
 0x66e   :  { %7653 = vmatpush1.bf16.msra.mxu1 %v7576_v6  ;;  %v7591_v25 = vld [vmem:[#allocation9 + $0x88] sm:$0xff]  ;;  %v7590_v26 = vld [vmem:[#allocation9 + $0x80] sm:$0xff]  ;;  %v7593_v9 = vld [vmem:[#allocation9 + $0x98] sm:$0xff] }
 0x66f   :  { %7654 = vmatprep.subr.bf16.mxu1 %v7579_v31  ;;  %v7592_v27 = vld [vmem:[#allocation9 + $0x90] sm:$0xff]  ;;  %v7595_v61 = vld [vmem:[#allocation9 + $0xa8] sm:$0xff]  ;;  %v7594_v22 = vld [vmem:[#allocation9 + $0xa0] sm:$0xff] }
 0x670   :  { %v7597_v24 = vld [vmem:[#allocation9 + $0xb8] sm:$0xff]  ;;  %v7596_v29 = vld [vmem:[#allocation9 + $0xb0] sm:$0xff]  ;;  %v7599_v14 = vld [vmem:[#allocation9 + $0xc8] sm:$0xff] }
 0x671   :  { %v7598_v30 = vld [vmem:[#allocation9 + $0xc0] sm:$0xff]  ;;  %v7601_v33 = vld [vmem:[#allocation9 + $0xd8] sm:$0xff]  ;;  %v7600_v35 = vld [vmem:[#allocation9 + $0xd0] sm:$0xff] }
 0x672   :  { %7655 = vmatpush1.bf16.msra.mxu1 %v7578_v62  ;;  %v7603_v39 = vld [vmem:[#allocation9 + $0xe8] sm:$0xff]  ;;  %v7602_v12 = vld [vmem:[#allocation9 + $0xe0] sm:$0xff]  ;;  %v7605_v40 = vld [vmem:[#allocation9 + $0xf8] sm:$0xff] }
 0x673   :  { %7656 = vmatprep.subr.bf16.mxu1 %v7581_v41  ;;  %v7604_v17 = vld [vmem:[#allocation9 + $0xf0] sm:$0xff]  ;;  %v7607_v45 = vld [vmem:[#allocation9 + $0x108] sm:$0xff]  ;;  %v7558_v46 = vld [vmem:[#allocation8] sm:$0xff] }
 0x674   :  { %v7606_v0 = vld [vmem:[#allocation9 + $0x100] sm:$0xff]  ;;  %v7563_v47 = vld [vmem:[#allocation8 + $0x28] sm:$0xff]  ;;  %v7609_v34 = vld [vmem:[#allocation9 + $0x118] sm:$0xff] }
 0x675   :  { %v7608_v20 = vld [vmem:[#allocation9 + $0x110] sm:$0xff]  ;;  %v7611_v48 = vld [vmem:[#allocation9 + $0x128] sm:$0xff]  ;;  %v7562_v19 = vld [vmem:[#allocation8 + $0x20] sm:$0xff] }
 0x676   :  { %7657 = vmatpush1.bf16.msra.mxu1 %v7580_v8  ;;  %v7610_v49 = vld [vmem:[#allocation9 + $0x120] sm:$0xff]  ;;  %v7567_v42 = vld [vmem:[#allocation8 + $0x48] sm:$0xff]  ;;  %v7613_v50 = vld [vmem:[#allocation9 + $0x138] sm:$0xff] }
 0x677   :  { %7658 = vmatprep.subr.bf16.mxu1 %v7583_v10  ;;  %v7612_v51 = vld [vmem:[#allocation9 + $0x130] sm:$0xff]  ;;  %v7615_v13 = vld [vmem:[#allocation9 + $0x148] sm:$0xff]  ;;  %v7566_v53 = vld [vmem:[#allocation8 + $0x40] sm:$0xff] }
 0x678   :  { %v7614_v54 = vld [vmem:[#allocation9 + $0x140] sm:$0xff]  ;;  %v7571_v32 = vld [vmem:[#allocation8 + $0x68] sm:$0xff]  ;;  %v7617_v55 = vld [vmem:[#allocation9 + $0x158] sm:$0xff] }
 0x679   :  { %v7616_v57 = vld [vmem:[#allocation9 + $0x150] sm:$0xff]  ;;  %v7619_v59 = vld [vmem:[#allocation9 + $0x168] sm:$0xff]  ;;  %v7570_v28 = vld [vmem:[#allocation8 + $0x60] sm:$0xff] }
 0x67a   :  { %7659 = vmatpush1.bf16.msra.mxu1 %v7582_v11  ;;  %v7618_v36 = vld [vmem:[#allocation9 + $0x160] sm:$0xff]  ;;  %v7561_v60 = vld [vmem:[#allocation8 + $0x18] sm:$0xff]  ;;  %v7620_v1 = vld [vmem:[#allocation9 + $0x170] sm:$0xff] }
 0x67b   :  { %7660 = vmatprep.subr.bf16.mxu1 %v7585_v15  ;;  %v7621_v63 = vld [vmem:[#allocation9 + $0x178] sm:$0xff]  ;;  %v7623_v2 = vld [vmem:[#allocation9 + $0x188] sm:$0xff]  ;;  %v7622_v3 = vld [vmem:[#allocation9 + $0x180] sm:$0xff] }
 0x67c   :  { %v7625_v52 = vld [vmem:[#allocation9 + $0x198] sm:$0xff]  ;;  %v7624_v37 = vld [vmem:[#allocation9 + $0x190] sm:$0xff]  ;;  %v7627_v4 = vld [vmem:[#allocation9 + $0x1a8] sm:$0xff] }
 0x67d   :  { %v7626_v56 = vld [vmem:[#allocation9 + $0x1a0] sm:$0xff]  ;;  %v7629_v44 = vld [vmem:[#allocation9 + $0x1b8] sm:$0xff]  ;;  %v7628_v38 = vld [vmem:[#allocation9 + $0x1b0] sm:$0xff] }
 0x67e   :  { %7661 = vmatpush1.bf16.msra.mxu1 %v7584_v16  ;;  %v7631_v5 = vld [vmem:[#allocation9 + $0x1c8] sm:$0xff]  ;;  %v7630_v58 = vld [vmem:[#allocation9 + $0x1c0] sm:$0xff]  ;;  %v7633_v6 = vld [vmem:[#allocation9 + $0x1d8] sm:$0xff] }
 0x67f   :  { %7662 = vmatprep.subr.bf16.mxu1 %v7587_v21  ;;  %v7632_v31 = vld [vmem:[#allocation9 + $0x1d0] sm:$0xff]  ;;  %v7635_v62 = vld [vmem:[#allocation9 + $0x1e8] sm:$0xff]  ;;  %v7634_v41 = vld [vmem:[#allocation9 + $0x1e0] sm:$0xff] }
 0x680   :  { %v7637_v43 = vld [vmem:[#allocation9 + $0x1f8] sm:$0xff]  ;;  %v7636_v8 = vld [vmem:[#allocation9 + $0x1f0] sm:$0xff] }
 0x681   :  { %v7560_v10 = vld [vmem:[#allocation8 + $0x10] sm:$0xff]  ;;  %v7565_v11 = vld [vmem:[#allocation8 + $0x38] sm:$0xff] }
 0x682   :  { %7663 = vmatpush1.bf16.msra.mxu1 %v7586_v23  ;;  %v7564_v15 = vld [vmem:[#allocation8 + $0x30] sm:$0xff]  ;;  %v7569_v16 = vld [vmem:[#allocation8 + $0x58] sm:$0xff] }
 0x683   :  { %7664 = vmatprep.subr.bf16.mxu1 %v7589_v18  ;;  %v7568_v21 = vld [vmem:[#allocation8 + $0x50] sm:$0xff]  ;;  %v7573_v23 = vld [vmem:[#allocation8 + $0x78] sm:$0xff] }
 0x684   :  { %v7572_v18 = vld [vmem:[#allocation8 + $0x70] sm:$0xff] }
 0x686   :  { %7665 = vmatpush1.bf16.msra.mxu1 %v7588_v7  ;;  %v7640_v7 = vlaneseq }
 0x687   :  { %7666 = vmatprep.subr.bf16.mxu1 %v7591_v25 }
 0x688   :  { %v11772_v25 = vshrl.u32 %v7640_v7, 7 }
 0x68a   :  { %7667 = vmatpush1.bf16.msra.mxu1 %v7590_v26  ;;  %v7642_v26 = vsub.s32 0, %v11772_v25 }
 0x68b   :  { %7668 = vmatprep.subr.bf16.mxu1 %v7593_v9  ;;  %v7638_v9 = vld [vmem:[%s11961_s13] sm:$0x3] }
 0x68e   :  { %7669 = vmatpush1.bf16.msra.mxu1 %v7592_v27  ;;  %v7646_v27 = vsub.s32 1, %v11772_v25 }
 0x68f   :  { %7670 = vmatprep.subr.bf16.mxu1 %v7595_v61  ;;  %v7643_v61 = vrot.slane %v7638_v9, %v7642_v26 }
 0x692   :  { %7671 = vmatpush1.bf16.msra.mxu1 %v7594_v22  ;;  %v7647_v22 = vrot.slane %v7638_v9, %v7646_v27 }
 0x693   :  { %7672 = vmatprep.subr.bf16.mxu1 %v7597_v24 }
 0x696   :  { %7673 = vmatpush1.bf16.msra.mxu1 %v7596_v29 }
 0x697   :  { %7674 = vmatprep.subr.bf16.mxu1 %v7599_v14 }
 0x69a   :  { %7675 = vmatpush1.bf16.msra.mxu1 %v7598_v30 }
 0x69b   :  { %7676 = vmatprep.subr.bf16.mxu1 %v7601_v33 }
 0x69e   :  { %7677 = vmatpush1.bf16.msra.mxu1 %v7600_v35 }
 0x69f   :  { %7678 = vmatprep.subr.bf16.mxu1 %v7603_v39 }
 0x6a2   :  { %7679 = vmatpush1.bf16.msra.mxu1 %v7602_v12 }
 0x6a3   :  { %7680 = vmatprep.subr.bf16.mxu1 %v7605_v40 }
 0x6a6   :  { %7681 = vmatpush1.bf16.msra.mxu1 %v7604_v17 }
 0x6a7   :  { %7723 = vmatprep.subr.bf16.mxu1 %v7607_v45 }
 0x6a9   :  { %7683 = vmatmul.mubr.bf16.vlgmr.msra.gmra.mrb[104].mxu1 %v7558_v46 }
 0x6aa   :  { %7724 = vmatpush1.bf16.msra.mxu1 %v7606_v0  ;;  %7692 = vmatprep.mubr.bf16.mxu1 %v7563_v47 }
 0x6ab   :  { %7725 = vmatprep.subr.bf16.mxu1 %v7609_v34 }
 0x6ae   :  { %7726 = vmatpush1.bf16.msra.mxu1 %v7608_v20 }
 0x6af   :  { %7727 = vmatprep.subr.bf16.mxu1 %v7611_v48 }
 0x6b1   :  { %7693 = vmatmul.mubr.bf16.gmra.mrb[108].mxu1 %v7562_v19 }
 0x6b2   :  { %7728 = vmatpush1.bf16.msra.mxu1 %v7610_v49  ;;  %7702 = vmatprep.mubr.bf16.mxu1 %v7567_v42 }
 0x6b3   :  { %7729 = vmatprep.subr.bf16.mxu1 %v7613_v50 }
 0x6b6   :  { %7730 = vmatpush1.bf16.msra.mxu1 %v7612_v51 }
 0x6b7   :  { %7731 = vmatprep.subr.bf16.mxu1 %v7615_v13 }
 0x6b9   :  { %7703 = vmatmul.mubr.bf16.gmra.mrb[112].mxu1 %v7566_v53 }
 0x6ba   :  { %7732 = vmatpush1.bf16.msra.mxu1 %v7614_v54  ;;  %7712 = vmatprep.mubr.bf16.mxu1 %v7571_v32 }
 0x6bb   :  { %7733 = vmatprep.subr.bf16.mxu1 %v7617_v55 }
 0x6be   :  { %7734 = vmatpush1.bf16.msra.mxu1 %v7616_v57 }
 0x6bf   :  { %7735 = vmatprep.subr.bf16.mxu1 %v7619_v59 }
 0x6c1   :  { %7713 = vmatmul.mubr.bf16.gmra.mrb[116].mxu1 %v7570_v28 }
 0x6c2   :  { %7736 = vmatpush1.bf16.msra.mxu1 %v7618_v36  ;;  %7755 = vmatprep.mubr.bf16.mxu1 %v7561_v60 }
 0x6c3   :  { %7737 = vmatprep.subr.bf16.mxu1 %v7621_v63 }
 0x6c6   :  { %7738 = vmatpush1.bf16.msra.mxu1 %v7620_v1 }
 0x6c7   :  { %7739 = vmatprep.subr.bf16.mxu1 %v7623_v2 }
 0x6ca   :  { %7740 = vmatpush1.bf16.msra.mxu1 %v7622_v3 }
 0x6cb   :  { %7741 = vmatprep.subr.bf16.mxu1 %v7625_v52 }
 0x6ce   :  { %7742 = vmatpush1.bf16.msra.mxu1 %v7624_v37 }
 0x6cf   :  { %7743 = vmatprep.subr.bf16.mxu1 %v7627_v4 }
 0x6d2   :  { %7744 = vmatpush1.bf16.msra.mxu1 %v7626_v56 }
 0x6d3   :  { %7745 = vmatprep.subr.bf16.mxu1 %v7629_v44 }
 0x6d6   :  { %7746 = vmatpush1.bf16.msra.mxu1 %v7628_v38 }
 0x6d7   :  { %7747 = vmatprep.subr.bf16.mxu1 %v7631_v5 }
 0x6da   :  { %7748 = vmatpush1.bf16.msra.mxu1 %v7630_v58 }
 0x6db   :  { %7749 = vmatprep.subr.bf16.mxu1 %v7633_v6 }
 0x6de   :  { %7750 = vmatpush1.bf16.msra.mxu1 %v7632_v31 }
 0x6df   :  { %7751 = vmatprep.subr.bf16.mxu1 %v7635_v62 }
 0x6e2   :  { %7752 = vmatpush1.bf16.msra.mxu1 %v7634_v41 }
 0x6e3   :  { %7753 = vmatprep.subr.bf16.mxu1 %v7637_v43 }
 0x6e6   :  { %7754 = vmatpush1.bf16.msra.mxu1 %v7636_v8 }
 0x6e9   :  { %7756 = vmatmul.mubr.bf16.vlgmr.msra.gmra.mrb[104].mxu1 %v7560_v10 }
 0x6ea   :  { %7765 = vmatprep.mubr.bf16.mxu1 %v7565_v11 }
 0x6f1   :  { %7766 = vmatmul.mubr.bf16.gmra.mrb[108].mxu1 %v7564_v15 }
 0x6f2   :  { %7775 = vmatprep.mubr.bf16.mxu1 %v7569_v16 }
 0x6f9   :  { %7776 = vmatmul.mubr.bf16.gmra.mrb[112].mxu1 %v7568_v21 }
 0x6fa   :  { %7785 = vmatprep.mubr.bf16.mxu1 %v7573_v23 }
 0x701   :  { %7786 = vmatmul.mubr.bf16.gmra.mrb[116].mxu1 %v7572_v18 }
 0x7bc   :  { %v7757_v24 = vpop.f32.mrb[104].mxu1 }
 0x7bd   :  { %v11783_v29 = vadd.f32 %v7757_v24, %v7643_v61  ;;  %v7759_v14 = vpop.f32.mrb[105].mxu1 }
 0x7be   :  { %v11785_v30 = vadd.f32 %v7759_v14, %v7647_v22  ;;  %v7761_v33 = vpop.f32.mrb[106].mxu1 }
 0x7bf   :  { %v11788_v35 = vmul.f32 0.2, %v11783_v29  ;;  %v11790_v39 = vadd.f32 %v7761_v33, %v7643_v61  ;;  %v7763_v12 = vpop.f32.mrb[107].mxu1 }
 0x7c0   :  { %v7797_v40 = vmul.f32 0.2, %v11785_v30  ;;  %v9233_v17 = vadd.f32 %v7763_v12, %v7647_v22 }
 0x7c1   :  { %v7812_v45 = vmax.f32 %v11783_v29, %v11788_v35  ;;  %v11796_v46 = vmul.f32 0.2, %v11790_v39 }
 0x7c2   :  { %v7813_v0 = vmax.f32 %v11785_v30, %v7797_v40  ;;  %v7799_v47 = vmul.f32 0.2, %v9233_v17 }
 0x7c3   :  { %v7814_v34 = vmax.f32 %v11790_v39, %v11796_v46 }
 0x7c4   :  { %v7815_v20 = vmax.f32 %v9233_v17, %v7799_v47  ;;  %v7767_v48 = vpop.f32.mrb[108].mxu1 }
 0x7c5   :  { %v11801_v19 = vadd.f32 %v7767_v48, %v7643_v61  ;;  %v7769_v49 = vpop.f32.mrb[109].mxu1 }
 0x7c6   :  { %v11803_v42 = vadd.f32 %v7769_v49, %v7647_v22  ;;  %v7771_v50 = vpop.f32.mrb[110].mxu1 }
 0x7c7   :  { %v11806_v51 = vmul.f32 0.2, %v11801_v19  ;;  %v11808_v13 = vadd.f32 %v7771_v50, %v7643_v61  ;;  %v7773_v53 = vpop.f32.mrb[111].mxu1 }
 0x7c8   :  { %v11811_v54 = vmul.f32 0.2, %v11803_v42  ;;  %v11813_v32 = vadd.f32 %v7773_v53, %v7647_v22 }
 0x7c9   :  { %v7816_v55 = vmax.f32 %v11801_v19, %v11806_v51  ;;  %v11818_v57 = vmul.f32 0.2, %v11808_v13 }
 0x7ca   :  { %v7817_v59 = vmax.f32 %v11803_v42, %v11811_v54  ;;  %v11823_v28 = vmul.f32 0.2, %v11813_v32 }
 0x7cb   :  { %v7818_v36 = vmax.f32 %v11808_v13, %v11818_v57 }
 0x7cc   :  { %v7819_v60 = vmax.f32 %v11813_v32, %v11823_v28  ;;  %v7777_v63 = vpop.f32.mrb[112].mxu1 }
 0x7cd   :  { %v11829_v1 = vadd.f32 %v7777_v63, %v7643_v61  ;;  %v7779_v2 = vpop.f32.mrb[113].mxu1 }
 0x7ce   :  { %v11831_v3 = vadd.f32 %v7779_v2, %v7647_v22  ;;  %v7781_v52 = vpop.f32.mrb[114].mxu1 }
 0x7cf   :  { %v11834_v37 = vmul.f32 0.2, %v11829_v1  ;;  %v11836_v4 = vadd.f32 %v7781_v52, %v7643_v61  ;;  %v7783_v56 = vpop.f32.mrb[115].mxu1 }
 0x7d0   :  { %v11839_v44 = vmul.f32 0.2, %v11831_v3  ;;  %v11841_v38 = vadd.f32 %v7783_v56, %v7647_v22 }
 0x7d1   :  { %v7820_v5 = vmax.f32 %v11829_v1, %v11834_v37  ;;  %v11846_v58 = vmul.f32 0.2, %v11836_v4 }
 0x7d2   :  { %v7821_v6 = vmax.f32 %v11831_v3, %v11839_v44  ;;  %v11851_v31 = vmul.f32 0.2, %v11841_v38 }
 0x7d3   :  { %v7822_v62 = vmax.f32 %v11836_v4, %v11846_v58 }
 0x7d4   :  { %v7823_v41 = vmax.f32 %v11841_v38, %v11851_v31  ;;  %v7787_v43 = vpop.f32.mrb[116].mxu1 }
 0x7d5   :  { %v11857_v8 = vadd.f32 %v7787_v43, %v7643_v61  ;;  %v7789_v10 = vpop.f32.mrb[117].mxu1 }
 0x7d6   :  { %v11859_v11 = vadd.f32 %v7789_v10, %v7647_v22  ;;  %v7791_v15 = vpop.f32.mrb[118].mxu1 }
 0x7d7   :  { %v11862_v16 = vmul.f32 0.2, %v11857_v8  ;;  %v11864_v21 = vadd.f32 %v7791_v15, %v7643_v61  ;;  %v7793_v23 = vpop.f32.mrb[119].mxu1 }
 0x7d8   :  { %v11867_v18 = vmul.f32 0.2, %v11859_v11  ;;  %v11869_v7 = vadd.f32 %v7793_v23, %v7647_v22 }
 0x7d9   :  { %v7824_v9 = vmax.f32 %v11857_v8, %v11862_v16  ;;  %v11874_v24 = vmul.f32 0.2, %v11864_v21 }
 0x7da   :  { %v7825_v14 = vmax.f32 %v11859_v11, %v11867_v18  ;;  %v11879_v30 = vmul.f32 0.2, %v11869_v7 }
 0x7db   :  { %v7826_v61 = vmax.f32 %v11864_v21, %v11874_v24 }
 0x7dc   :  { %v7827_v33 = vmax.f32 %v11869_v7, %v11879_v30 }
 0x7dd   :  { %9412 = dma.done.wait [#allocation11 + $0x1], 32768 }
 0x7de   :  { %9413 = vsyncadd [#allocation11 + $0x1], 4294934528  ;;  %v7865_v22 = vpack.c.bf16 %v7815_v20, %v7813_v0  ;;  %v7873_v12 = vld [vmem:[#allocation10 + $0x8] sm:$0xff]  ;;  %v7875_v40 = vld [vmem:[#allocation10 + $0x18] sm:$0xff] }
 0x7df   :  { %v7872_v17 = vld [vmem:[#allocation10] sm:$0xff]  ;;  %8150 = vmatprep.subr.bf16.mxu0 %v7873_v12  ;;  %8322 = vmatprep.subr.bf16.mxu1 %v7875_v40  ;;  %v7874_v47 = vld [vmem:[#allocation10 + $0x10] sm:$0xff]  ;;  %v7877_v48 = vld [vmem:[#allocation10 + $0x28] sm:$0xff] }
 0x7e0   :  { %8182 = vmatprep.mubr.bf16.mxu0 %v7865_v22  ;;  %8354 = vmatprep.mubr.bf16.mxu1 %v7865_v22  ;;  %v7879_v49 = vld [vmem:[#allocation10 + $0x38] sm:$0xff]  ;;  %v7876_v50 = vld [vmem:[#allocation10 + $0x20] sm:$0xff]  ;;  %v7878_v53 = vld [vmem:[#allocation10 + $0x30] sm:$0xff] }
 0x7e1   :  { %8151 = vmatpush1.bf16.msra.mxu0 %v7872_v17  ;;  %8323 = vmatpush1.bf16.msra.mxu1 %v7874_v47  ;;  %v7881_v63 = vld [vmem:[#allocation10 + $0x48] sm:$0xff]  ;;  %v7883_v2 = vld [vmem:[#allocation10 + $0x58] sm:$0xff]  ;;  %v7880_v0 = vld [vmem:[#allocation10 + $0x40] sm:$0xff] }
 0x7e2   :  { %8152 = vmatprep.subr.bf16.mxu0 %v7877_v48  ;;  %8324 = vmatprep.subr.bf16.mxu1 %v7879_v49  ;;  %v7882_v20 = vld [vmem:[#allocation10 + $0x50] sm:$0xff]  ;;  %v7885_v52 = vld [vmem:[#allocation10 + $0x68] sm:$0xff]  ;;  %v7887_v56 = vld [vmem:[#allocation10 + $0x78] sm:$0xff] }
 0x7e3   :  { %v7884_v43 = vld [vmem:[#allocation10 + $0x60] sm:$0xff]  ;;  %v7886_v10 = vld [vmem:[#allocation10 + $0x70] sm:$0xff]  ;;  %v7889_v15 = vld [vmem:[#allocation10 + $0x88] sm:$0xff] }
 0x7e4   :  { %v7891_v23 = vld [vmem:[#allocation10 + $0x98] sm:$0xff]  ;;  %v7888_v22 = vld [vmem:[#allocation10 + $0x80] sm:$0xff]  ;;  %v7890_v12 = vld [vmem:[#allocation10 + $0x90] sm:$0xff] }
 0x7e5   :  { %8153 = vmatpush1.bf16.msra.mxu0 %v7876_v50  ;;  %8325 = vmatpush1.bf16.msra.mxu1 %v7878_v53  ;;  %v7893_v40 = vld [vmem:[#allocation10 + $0xa8] sm:$0xff]  ;;  %v7895_v17 = vld [vmem:[#allocation10 + $0xb8] sm:$0xff]  ;;  %v7892_v47 = vld [vmem:[#allocation10 + $0xa0] sm:$0xff] }
 0x7e6   :  { %8154 = vmatprep.subr.bf16.mxu0 %v7881_v63  ;;  %8326 = vmatprep.subr.bf16.mxu1 %v7883_v2  ;;  %v7894_v48 = vld [vmem:[#allocation10 + $0xb0] sm:$0xff]  ;;  %v7897_v49 = vld [vmem:[#allocation10 + $0xc8] sm:$0xff]  ;;  %v7899_v50 = vld [vmem:[#allocation10 + $0xd8] sm:$0xff] }
 0x7e7   :  { %v7896_v53 = vld [vmem:[#allocation10 + $0xc0] sm:$0xff]  ;;  %v7898_v63 = vld [vmem:[#allocation10 + $0xd0] sm:$0xff]  ;;  %v7901_v2 = vld [vmem:[#allocation10 + $0xe8] sm:$0xff] }
 0x7e8   :  { %v7940_v29 = vld [vmem:[#allocation10 + $0x220] sm:$0xff]  ;;  %v7942_v35 = vld [vmem:[#allocation10 + $0x230] sm:$0xff]  ;;  %v7945_v39 = vld [vmem:[#allocation10 + $0x248] sm:$0xff] }
 0x7e9   :  { %8155 = vmatpush1.bf16.msra.mxu0 %v7880_v0  ;;  %8327 = vmatpush1.bf16.msra.mxu1 %v7882_v20  ;;  %v7903_v0 = vld [vmem:[#allocation10 + $0xf8] sm:$0xff]  ;;  %v7900_v20 = vld [vmem:[#allocation10 + $0xe0] sm:$0xff]  ;;  %v7949_v42 = vld [vmem:[#allocation10 + $0x268] sm:$0xff] }
 0x7ea   :  { %8156 = vmatprep.subr.bf16.mxu0 %v7885_v52  ;;  %8328 = vmatprep.subr.bf16.mxu1 %v7887_v56  ;;  %v7902_v52 = vld [vmem:[#allocation10 + $0xf0] sm:$0xff]  ;;  %v7905_v56 = vld [vmem:[#allocation10 + $0x108] sm:$0xff]  ;;  %v7944_v46 = vld [vmem:[#allocation10 + $0x240] sm:$0xff] }
 0x7eb   :  { %v7951_v54 = vld [vmem:[#allocation10 + $0x278] sm:$0xff]  ;;  %v7948_v32 = vld [vmem:[#allocation10 + $0x260] sm:$0xff]  ;;  %v7953_v28 = vld [vmem:[#allocation10 + $0x288] sm:$0xff] }
 0x7ec   :  { %v8004_v19 = vld [vmem:[#allocation10 + $0x420] sm:$0xff]  ;;  %v8006_v51 = vld [vmem:[#allocation10 + $0x430] sm:$0xff]  ;;  %v8009_v13 = vld [vmem:[#allocation10 + $0x448] sm:$0xff] }
 0x7ed   :  { %8157 = vmatpush1.bf16.msra.mxu0 %v7884_v43  ;;  %8329 = vmatpush1.bf16.msra.mxu1 %v7886_v10  ;;  %v7907_v43 = vld [vmem:[#allocation10 + $0x118] sm:$0xff]  ;;  %v7904_v10 = vld [vmem:[#allocation10 + $0x100] sm:$0xff]  ;;  %v8013_v3 = vld [vmem:[#allocation10 + $0x468] sm:$0xff] }
 0x7ee   :  { %8158 = vmatprep.subr.bf16.mxu0 %v7889_v15  ;;  %8330 = vmatprep.subr.bf16.mxu1 %v7891_v23  ;;  %v7906_v15 = vld [vmem:[#allocation10 + $0x110] sm:$0xff]  ;;  %v7909_v23 = vld [vmem:[#allocation10 + $0x128] sm:$0xff]  ;;  %v8008_v57 = vld [vmem:[#allocation10 + $0x440] sm:$0xff] }
 0x7ef   :  { %v8015_v44 = vld [vmem:[#allocation10 + $0x478] sm:$0xff]  ;;  %v8012_v38 = vld [vmem:[#allocation10 + $0x460] sm:$0xff]  ;;  %v8017_v31 = vld [vmem:[#allocation10 + $0x488] sm:$0xff] }
 0x7f0   :  { %v8068_v1 = vld [vmem:[#allocation10 + $0x620] sm:$0xff]  ;;  %v8070_v37 = vld [vmem:[#allocation10 + $0x630] sm:$0xff]  ;;  %v8073_v4 = vld [vmem:[#allocation10 + $0x648] sm:$0xff] }
 0x7f1   :  { %8159 = vmatpush1.bf16.msra.mxu0 %v7888_v22  ;;  %8331 = vmatpush1.bf16.msra.mxu1 %v7890_v12  ;;  %v7911_v22 = vld [vmem:[#allocation10 + $0x138] sm:$0xff]  ;;  %v7908_v12 = vld [vmem:[#allocation10 + $0x120] sm:$0xff]  ;;  %v8077_v11 = vld [vmem:[#allocation10 + $0x668] sm:$0xff] }
 0x7f2   :  { %8160 = vmatprep.subr.bf16.mxu0 %v7893_v40  ;;  %8332 = vmatprep.subr.bf16.mxu1 %v7895_v17  ;;  %v7910_v40 = vld [vmem:[#allocation10 + $0x130] sm:$0xff]  ;;  %v7913_v17 = vld [vmem:[#allocation10 + $0x148] sm:$0xff]  ;;  %v8072_v58 = vld [vmem:[#allocation10 + $0x640] sm:$0xff] }
 0x7f3   :  { %v8079_v18 = vld [vmem:[#allocation10 + $0x678] sm:$0xff]  ;;  %v8076_v7 = vld [vmem:[#allocation10 + $0x660] sm:$0xff]  ;;  %v8081_v30 = vld [vmem:[#allocation10 + $0x688] sm:$0xff] }
 0x7f5   :  { %8161 = vmatpush1.bf16.msra.mxu0 %v7892_v47  ;;  %8333 = vmatpush1.bf16.msra.mxu1 %v7894_v48  ;;  %v7915_v47 = vld [vmem:[#allocation10 + $0x158] sm:$0xff]  ;;  %v7912_v48 = vld [vmem:[#allocation10 + $0x140] sm:$0xff] }
 0x7f6   :  { %8162 = vmatprep.subr.bf16.mxu0 %v7897_v49  ;;  %8334 = vmatprep.subr.bf16.mxu1 %v7899_v50  ;;  %v7914_v49 = vld [vmem:[#allocation10 + $0x150] sm:$0xff]  ;;  %v7917_v50 = vld [vmem:[#allocation10 + $0x168] sm:$0xff] }
 0x7f9   :  { %8163 = vmatpush1.bf16.msra.mxu0 %v7896_v53  ;;  %8335 = vmatpush1.bf16.msra.mxu1 %v7898_v63  ;;  %v7919_v53 = vld [vmem:[#allocation10 + $0x178] sm:$0xff]  ;;  %v7916_v63 = vld [vmem:[#allocation10 + $0x160] sm:$0xff] }
 0x7fa   :  { %8164 = vmatprep.subr.bf16.mxu0 %v7901_v2  ;;  %8336 = vmatprep.subr.bf16.mxu1 %v7903_v0  ;;  %v7918_v2 = vld [vmem:[#allocation10 + $0x170] sm:$0xff]  ;;  %v7921_v0 = vld [vmem:[#allocation10 + $0x188] sm:$0xff] }
 0x7fd   :  { %8165 = vmatpush1.bf16.msra.mxu0 %v7900_v20  ;;  %8337 = vmatpush1.bf16.msra.mxu1 %v7902_v52  ;;  %v7923_v20 = vld [vmem:[#allocation10 + $0x198] sm:$0xff]  ;;  %v7920_v52 = vld [vmem:[#allocation10 + $0x180] sm:$0xff] }
 0x7fe   :  { %8166 = vmatprep.subr.bf16.mxu0 %v7905_v56  ;;  %8338 = vmatprep.subr.bf16.mxu1 %v7907_v43  ;;  %v7922_v56 = vld [vmem:[#allocation10 + $0x190] sm:$0xff]  ;;  %v7925_v43 = vld [vmem:[#allocation10 + $0x1a8] sm:$0xff] }
 0x801   :  { %8167 = vmatpush1.bf16.msra.mxu0 %v7904_v10  ;;  %8339 = vmatpush1.bf16.msra.mxu1 %v7906_v15  ;;  %v7927_v10 = vld [vmem:[#allocation10 + $0x1b8] sm:$0xff]  ;;  %v7924_v15 = vld [vmem:[#allocation10 + $0x1a0] sm:$0xff] }
 0x802   :  { %8168 = vmatprep.subr.bf16.mxu0 %v7909_v23  ;;  %8340 = vmatprep.subr.bf16.mxu1 %v7911_v22  ;;  %v7926_v23 = vld [vmem:[#allocation10 + $0x1b0] sm:$0xff]  ;;  %v7929_v22 = vld [vmem:[#allocation10 + $0x1c8] sm:$0xff] }
 0x805   :  { %8169 = vmatpush1.bf16.msra.mxu0 %v7908_v12  ;;  %8341 = vmatpush1.bf16.msra.mxu1 %v7910_v40  ;;  %v7931_v12 = vld [vmem:[#allocation10 + $0x1d8] sm:$0xff]  ;;  %v7928_v40 = vld [vmem:[#allocation10 + $0x1c0] sm:$0xff] }
 0x806   :  { %8170 = vmatprep.subr.bf16.mxu0 %v7913_v17  ;;  %8342 = vmatprep.subr.bf16.mxu1 %v7915_v47  ;;  %v7930_v17 = vld [vmem:[#allocation10 + $0x1d0] sm:$0xff]  ;;  %v7933_v47 = vld [vmem:[#allocation10 + $0x1e8] sm:$0xff] }
 0x809   :  { %8171 = vmatpush1.bf16.msra.mxu0 %v7912_v48  ;;  %8343 = vmatpush1.bf16.msra.mxu1 %v7914_v49  ;;  %v7935_v48 = vld [vmem:[#allocation10 + $0x1f8] sm:$0xff]  ;;  %v7932_v49 = vld [vmem:[#allocation10 + $0x1e0] sm:$0xff] }
 0x80a   :  { %8172 = vmatprep.subr.bf16.mxu0 %v7917_v50  ;;  %8344 = vmatprep.subr.bf16.mxu1 %v7919_v53  ;;  %v7934_v50 = vld [vmem:[#allocation10 + $0x1f0] sm:$0xff]  ;;  %v7937_v53 = vld [vmem:[#allocation10 + $0x208] sm:$0xff] }
 0x80d   :  { %8173 = vmatpush1.bf16.msra.mxu0 %v7916_v63  ;;  %8345 = vmatpush1.bf16.msra.mxu1 %v7918_v2  ;;  %v7939_v63 = vld [vmem:[#allocation10 + $0x218] sm:$0xff]  ;;  %v7864_v2 = vpack.c.bf16 %v7814_v34, %v7812_v45  ;;  %v7946_v34 = vld [vmem:[#allocation10 + $0x250] sm:$0xff] }
 0x80e   :  { %8174 = vmatprep.subr.bf16.mxu0 %v7921_v0  ;;  %8346 = vmatprep.subr.bf16.mxu1 %v7923_v20  ;;  %v7936_v0 = vld [vmem:[#allocation10 + $0x200] sm:$0xff]  ;;  %v7938_v20 = vld [vmem:[#allocation10 + $0x210] sm:$0xff]  ;;  %v7947_v45 = vld [vmem:[#allocation10 + $0x258] sm:$0xff] }
 0x811   :  { %8175 = vmatpush1.bf16.msra.mxu0 %v7920_v52  ;;  %8347 = vmatpush1.bf16.msra.mxu1 %v7922_v56  ;;  %v7941_v52 = vld [vmem:[#allocation10 + $0x228] sm:$0xff]  ;;  %v7943_v56 = vld [vmem:[#allocation10 + $0x238] sm:$0xff] }
 0x812   :  { %8176 = vmatprep.subr.bf16.mxu0 %v7925_v43  ;;  %8348 = vmatprep.subr.bf16.mxu1 %v7927_v10  ;;  %v7867_v43 = vpack.c.bf16 %v7819_v60, %v7817_v59  ;;  %v7950_v59 = vld [vmem:[#allocation10 + $0x270] sm:$0xff]  ;;  %v7955_v60 = vld [vmem:[#allocation10 + $0x298] sm:$0xff]  ;;  %v7952_v10 = vld [vmem:[#allocation10 + $0x280] sm:$0xff] }
 0x815   :  { %8177 = vmatpush1.bf16.msra.mxu0 %v7924_v15  ;;  %8349 = vmatpush1.bf16.msra.mxu1 %v7926_v23  ;;  %v7954_v15 = vld [vmem:[#allocation10 + $0x290] sm:$0xff]  ;;  %v7957_v23 = vld [vmem:[#allocation10 + $0x2a8] sm:$0xff] }
 0x816   :  { %8178 = vmatprep.subr.bf16.mxu0 %v7929_v22  ;;  %8350 = vmatprep.subr.bf16.mxu1 %v7931_v12  ;;  %v7959_v22 = vld [vmem:[#allocation10 + $0x2b8] sm:$0xff]  ;;  %v7956_v12 = vld [vmem:[#allocation10 + $0x2a0] sm:$0xff] }
 0x819   :  { %8179 = vmatpush1.bf16.msra.mxu0 %v7928_v40  ;;  %8351 = vmatpush1.bf16.msra.mxu1 %v7930_v17  ;;  %v7958_v40 = vld [vmem:[#allocation10 + $0x2b0] sm:$0xff]  ;;  %v7961_v17 = vld [vmem:[#allocation10 + $0x2c8] sm:$0xff] }
 0x81a   :  { %8180 = vmatprep.subr.bf16.mxu0 %v7933_v47  ;;  %8352 = vmatprep.subr.bf16.mxu1 %v7935_v48  ;;  %v7963_v47 = vld [vmem:[#allocation10 + $0x2d8] sm:$0xff]  ;;  %v7960_v48 = vld [vmem:[#allocation10 + $0x2c0] sm:$0xff] }
 0x81d   :  { %8181 = vmatpush1.bf16.msra.mxu0 %v7932_v49  ;;  %8353 = vmatpush1.bf16.msra.mxu1 %v7934_v50  ;;  %v7962_v49 = vld [vmem:[#allocation10 + $0x2d0] sm:$0xff]  ;;  %v7965_v50 = vld [vmem:[#allocation10 + $0x2e8] sm:$0xff] }
 0x81e   :  { %8193 = vmatprep.subr.bf16.mxu0 %v7937_v53  ;;  %8365 = vmatprep.subr.bf16.mxu1 %v7939_v63  ;;  %v7967_v53 = vld [vmem:[#allocation10 + $0x2f8] sm:$0xff]  ;;  %v7964_v63 = vld [vmem:[#allocation10 + $0x2e0] sm:$0xff] }
 0x820   :  { %8183 = vmatmul.mubr.bf16.vlgmr.msra.gmra.mrb[136].mxu0 %v7864_v2  ;;  %8355 = vmatmul.mubr.bf16.vlgmr.msra.gmra.mrb[120].mxu1 %v7864_v2  ;;  %v7966_v2 = vld [vmem:[#allocation10 + $0x2f0] sm:$0xff] }
 0x821   :  { %8194 = vmatpush1.bf16.msra.mxu0 %v7936_v0  ;;  %8366 = vmatpush1.bf16.msra.mxu1 %v7938_v20  ;;  %v7969_v0 = vld [vmem:[#allocation10 + $0x308] sm:$0xff]  ;;  %v7971_v20 = vld [vmem:[#allocation10 + $0x318] sm:$0xff] }
 0x822   :  { %8195 = vmatprep.subr.bf16.mxu0 %v7941_v52  ;;  %8367 = vmatprep.subr.bf16.mxu1 %v7943_v56  ;;  %v7968_v52 = vld [vmem:[#allocation10 + $0x300] sm:$0xff]  ;;  %v7970_v56 = vld [vmem:[#allocation10 + $0x310] sm:$0xff] }
 0x823   :  { %8225 = vmatprep.mubr.bf16.mxu0 %v7867_v43  ;;  %8397 = vmatprep.mubr.bf16.mxu1 %v7867_v43  ;;  %v7973_v43 = vld [vmem:[#allocation10 + $0x328] sm:$0xff] }
 0x825   :  { %8196 = vmatpush1.bf16.msra.mxu0 %v7940_v29  ;;  %8368 = vmatpush1.bf16.msra.mxu1 %v7942_v35  ;;  %v7975_v29 = vld [vmem:[#allocation10 + $0x338] sm:$0xff]  ;;  %v7972_v35 = vld [vmem:[#allocation10 + $0x320] sm:$0xff] }
 0x826   :  { %8197 = vmatprep.subr.bf16.mxu0 %v7945_v39  ;;  %8369 = vmatprep.subr.bf16.mxu1 %v7947_v45  ;;  %v7974_v39 = vld [vmem:[#allocation10 + $0x330] sm:$0xff]  ;;  %v7977_v45 = vld [vmem:[#allocation10 + $0x348] sm:$0xff] }
 0x829   :  { %8198 = vmatpush1.bf16.msra.mxu0 %v7944_v46  ;;  %8370 = vmatpush1.bf16.msra.mxu1 %v7946_v34  ;;  %v7979_v46 = vld [vmem:[#allocation10 + $0x358] sm:$0xff]  ;;  %v7976_v34 = vld [vmem:[#allocation10 + $0x340] sm:$0xff] }
 0x82a   :  { %8199 = vmatprep.subr.bf16.mxu0 %v7949_v42  ;;  %8371 = vmatprep.subr.bf16.mxu1 %v7951_v54  ;;  %v7978_v42 = vld [vmem:[#allocation10 + $0x350] sm:$0xff]  ;;  %v7981_v54 = vld [vmem:[#allocation10 + $0x368] sm:$0xff] }
 0x82d   :  { %8200 = vmatpush1.bf16.msra.mxu0 %v7948_v32  ;;  %8372 = vmatpush1.bf16.msra.mxu1 %v7950_v59  ;;  %v7983_v32 = vld [vmem:[#allocation10 + $0x378] sm:$0xff]  ;;  %v7980_v59 = vld [vmem:[#allocation10 + $0x360] sm:$0xff] }
 0x82e   :  { %8201 = vmatprep.subr.bf16.mxu0 %v7953_v28  ;;  %8373 = vmatprep.subr.bf16.mxu1 %v7955_v60  ;;  %v7982_v28 = vld [vmem:[#allocation10 + $0x370] sm:$0xff]  ;;  %v7985_v60 = vld [vmem:[#allocation10 + $0x388] sm:$0xff] }
 0x831   :  { %8202 = vmatpush1.bf16.msra.mxu0 %v7952_v10  ;;  %8374 = vmatpush1.bf16.msra.mxu1 %v7954_v15  ;;  %v7987_v10 = vld [vmem:[#allocation10 + $0x398] sm:$0xff]  ;;  %v7984_v15 = vld [vmem:[#allocation10 + $0x380] sm:$0xff] }
 0x832   :  { %8203 = vmatprep.subr.bf16.mxu0 %v7957_v23  ;;  %8375 = vmatprep.subr.bf16.mxu1 %v7959_v22  ;;  %v7986_v23 = vld [vmem:[#allocation10 + $0x390] sm:$0xff]  ;;  %v7989_v22 = vld [vmem:[#allocation10 + $0x3a8] sm:$0xff] }
 0x835   :  { %8204 = vmatpush1.bf16.msra.mxu0 %v7956_v12  ;;  %8376 = vmatpush1.bf16.msra.mxu1 %v7958_v40  ;;  %v7991_v12 = vld [vmem:[#allocation10 + $0x3b8] sm:$0xff]  ;;  %v7988_v40 = vld [vmem:[#allocation10 + $0x3a0] sm:$0xff] }
 0x836   :  { %8205 = vmatprep.subr.bf16.mxu0 %v7961_v17  ;;  %8377 = vmatprep.subr.bf16.mxu1 %v7963_v47  ;;  %v7990_v17 = vld [vmem:[#allocation10 + $0x3b0] sm:$0xff]  ;;  %v7993_v47 = vld [vmem:[#allocation10 + $0x3c8] sm:$0xff] }
 0x839   :  { %8206 = vmatpush1.bf16.msra.mxu0 %v7960_v48  ;;  %8378 = vmatpush1.bf16.msra.mxu1 %v7962_v49  ;;  %v7995_v48 = vld [vmem:[#allocation10 + $0x3d8] sm:$0xff]  ;;  %v7992_v49 = vld [vmem:[#allocation10 + $0x3c0] sm:$0xff] }
 0x83a   :  { %8207 = vmatprep.subr.bf16.mxu0 %v7965_v50  ;;  %8379 = vmatprep.subr.bf16.mxu1 %v7967_v53  ;;  %v7994_v50 = vld [vmem:[#allocation10 + $0x3d0] sm:$0xff]  ;;  %v7997_v53 = vld [vmem:[#allocation10 + $0x3e8] sm:$0xff] }
 0x83d   :  { %8208 = vmatpush1.bf16.msra.mxu0 %v7964_v63  ;;  %8380 = vmatpush1.bf16.msra.mxu1 %v7966_v2  ;;  %v7999_v63 = vld [vmem:[#allocation10 + $0x3f8] sm:$0xff]  ;;  %v7996_v2 = vld [vmem:[#allocation10 + $0x3e0] sm:$0xff] }
 0x83e   :  { %8209 = vmatprep.subr.bf16.mxu0 %v7969_v0  ;;  %8381 = vmatprep.subr.bf16.mxu1 %v7971_v20  ;;  %v7998_v0 = vld [vmem:[#allocation10 + $0x3f0] sm:$0xff]  ;;  %v8001_v20 = vld [vmem:[#allocation10 + $0x408] sm:$0xff] }
 0x841   :  { %8210 = vmatpush1.bf16.msra.mxu0 %v7968_v52  ;;  %8382 = vmatpush1.bf16.msra.mxu1 %v7970_v56  ;;  %v8003_v52 = vld [vmem:[#allocation10 + $0x418] sm:$0xff]  ;;  %v7866_v56 = vpack.c.bf16 %v7818_v36, %v7816_v55  ;;  %v8010_v36 = vld [vmem:[#allocation10 + $0x450] sm:$0xff] }
 0x842   :  { %8211 = vmatprep.subr.bf16.mxu0 %v7973_v43  ;;  %8383 = vmatprep.subr.bf16.mxu1 %v7975_v29  ;;  %v8000_v43 = vld [vmem:[#allocation10 + $0x400] sm:$0xff]  ;;  %v8002_v29 = vld [vmem:[#allocation10 + $0x410] sm:$0xff]  ;;  %v8011_v55 = vld [vmem:[#allocation10 + $0x458] sm:$0xff] }
 0x845   :  { %8212 = vmatpush1.bf16.msra.mxu0 %v7972_v35  ;;  %8384 = vmatpush1.bf16.msra.mxu1 %v7974_v39  ;;  %v8005_v35 = vld [vmem:[#allocation10 + $0x428] sm:$0xff]  ;;  %v8007_v39 = vld [vmem:[#allocation10 + $0x438] sm:$0xff] }
 0x846   :  { %8213 = vmatprep.subr.bf16.mxu0 %v7977_v45  ;;  %8385 = vmatprep.subr.bf16.mxu1 %v7979_v46  ;;  %v7869_v45 = vpack.c.bf16 %v7823_v41, %v7821_v6  ;;  %v8014_v6 = vld [vmem:[#allocation10 + $0x470] sm:$0xff]  ;;  %v8019_v41 = vld [vmem:[#allocation10 + $0x498] sm:$0xff]  ;;  %v8016_v46 = vld [vmem:[#allocation10 + $0x480] sm:$0xff] }
 0x849   :  { %8214 = vmatpush1.bf16.msra.mxu0 %v7976_v34  ;;  %8386 = vmatpush1.bf16.msra.mxu1 %v7978_v42  ;;  %v8018_v34 = vld [vmem:[#allocation10 + $0x490] sm:$0xff]  ;;  %v8021_v42 = vld [vmem:[#allocation10 + $0x4a8] sm:$0xff] }
 0x84a   :  { %8215 = vmatprep.subr.bf16.mxu0 %v7981_v54  ;;  %8387 = vmatprep.subr.bf16.mxu1 %v7983_v32  ;;  %v8023_v54 = vld [vmem:[#allocation10 + $0x4b8] sm:$0xff]  ;;  %v8020_v32 = vld [vmem:[#allocation10 + $0x4a0] sm:$0xff] }
 0x84d   :  { %8216 = vmatpush1.bf16.msra.mxu0 %v7980_v59  ;;  %8388 = vmatpush1.bf16.msra.mxu1 %v7982_v28  ;;  %v8022_v59 = vld [vmem:[#allocation10 + $0x4b0] sm:$0xff]  ;;  %v8025_v28 = vld [vmem:[#allocation10 + $0x4c8] sm:$0xff] }
 0x84e   :  { %8217 = vmatprep.subr.bf16.mxu0 %v7985_v60  ;;  %8389 = vmatprep.subr.bf16.mxu1 %v7987_v10  ;;  %v8027_v60 = vld [vmem:[#allocation10 + $0x4d8] sm:$0xff]  ;;  %v8024_v10 = vld [vmem:[#allocation10 + $0x4c0] sm:$0xff] }
 0x851   :  { %8218 = vmatpush1.bf16.msra.mxu0 %v7984_v15  ;;  %8390 = vmatpush1.bf16.msra.mxu1 %v7986_v23  ;;  %v8026_v15 = vld [vmem:[#allocation10 + $0x4d0] sm:$0xff]  ;;  %v8029_v23 = vld [vmem:[#allocation10 + $0x4e8] sm:$0xff] }
 0x852   :  { %8219 = vmatprep.subr.bf16.mxu0 %v7989_v22  ;;  %8391 = vmatprep.subr.bf16.mxu1 %v7991_v12  ;;  %v8031_v22 = vld [vmem:[#allocation10 + $0x4f8] sm:$0xff]  ;;  %v8028_v12 = vld [vmem:[#allocation10 + $0x4e0] sm:$0xff] }
 0x855   :  { %8220 = vmatpush1.bf16.msra.mxu0 %v7988_v40  ;;  %8392 = vmatpush1.bf16.msra.mxu1 %v7990_v17  ;;  %v8030_v40 = vld [vmem:[#allocation10 + $0x4f0] sm:$0xff]  ;;  %v8033_v17 = vld [vmem:[#allocation10 + $0x508] sm:$0xff] }
 0x856   :  { %8221 = vmatprep.subr.bf16.mxu0 %v7993_v47  ;;  %8393 = vmatprep.subr.bf16.mxu1 %v7995_v48  ;;  %v8035_v47 = vld [vmem:[#allocation10 + $0x518] sm:$0xff]  ;;  %v8032_v48 = vld [vmem:[#allocation10 + $0x500] sm:$0xff] }
 0x859   :  { %8222 = vmatpush1.bf16.msra.mxu0 %v7992_v49  ;;  %8394 = vmatpush1.bf16.msra.mxu1 %v7994_v50  ;;  %v8034_v49 = vld [vmem:[#allocation10 + $0x510] sm:$0xff]  ;;  %v8037_v50 = vld [vmem:[#allocation10 + $0x528] sm:$0xff] }
 0x85a   :  { %8223 = vmatprep.subr.bf16.mxu0 %v7997_v53  ;;  %8395 = vmatprep.subr.bf16.mxu1 %v7999_v63  ;;  %v8039_v53 = vld [vmem:[#allocation10 + $0x538] sm:$0xff]  ;;  %v8036_v63 = vld [vmem:[#allocation10 + $0x520] sm:$0xff] }
 0x85d   :  { %8224 = vmatpush1.bf16.msra.mxu0 %v7996_v2  ;;  %8396 = vmatpush1.bf16.msra.mxu1 %v7998_v0  ;;  %v8038_v2 = vld [vmem:[#allocation10 + $0x530] sm:$0xff]  ;;  %v8041_v0 = vld [vmem:[#allocation10 + $0x548] sm:$0xff] }
 0x85e   :  { %8236 = vmatprep.subr.bf16.mxu0 %v8001_v20  ;;  %8408 = vmatprep.subr.bf16.mxu1 %v8003_v52  ;;  %v8043_v20 = vld [vmem:[#allocation10 + $0x558] sm:$0xff]  ;;  %v8040_v52 = vld [vmem:[#allocation10 + $0x540] sm:$0xff] }
 0x860   :  { %8226 = vmatmul.mubr.bf16.vlgmr.msra.gmra.mrb[136].mxu0 %v7866_v56  ;;  %8398 = vmatmul.mubr.bf16.vlgmr.msra.gmra.mrb[120].mxu1 %v7866_v56  ;;  %v8042_v56 = vld [vmem:[#allocation10 + $0x550] sm:$0xff] }
 0x861   :  { %8237 = vmatpush1.bf16.msra.mxu0 %v8000_v43  ;;  %8409 = vmatpush1.bf16.msra.mxu1 %v8002_v29  ;;  %v8045_v43 = vld [vmem:[#allocation10 + $0x568] sm:$0xff]  ;;  %v8047_v29 = vld [vmem:[#allocation10 + $0x578] sm:$0xff] }
 0x862   :  { %8238 = vmatprep.subr.bf16.mxu0 %v8005_v35  ;;  %8410 = vmatprep.subr.bf16.mxu1 %v8007_v39  ;;  %v8044_v35 = vld [vmem:[#allocation10 + $0x560] sm:$0xff]  ;;  %v8046_v39 = vld [vmem:[#allocation10 + $0x570] sm:$0xff] }
 0x863   :  { %8268 = vmatprep.mubr.bf16.mxu0 %v7869_v45  ;;  %8440 = vmatprep.mubr.bf16.mxu1 %v7869_v45  ;;  %v8049_v45 = vld [vmem:[#allocation10 + $0x588] sm:$0xff] }
 0x865   :  { %8239 = vmatpush1.bf16.msra.mxu0 %v8004_v19  ;;  %8411 = vmatpush1.bf16.msra.mxu1 %v8006_v51  ;;  %v8051_v19 = vld [vmem:[#allocation10 + $0x598] sm:$0xff]  ;;  %v8048_v51 = vld [vmem:[#allocation10 + $0x580] sm:$0xff] }
 0x866   :  { %8240 = vmatprep.subr.bf16.mxu0 %v8009_v13  ;;  %8412 = vmatprep.subr.bf16.mxu1 %v8011_v55  ;;  %v8050_v13 = vld [vmem:[#allocation10 + $0x590] sm:$0xff]  ;;  %v8053_v55 = vld [vmem:[#allocation10 + $0x5a8] sm:$0xff] }
 0x869   :  { %8241 = vmatpush1.bf16.msra.mxu0 %v8008_v57  ;;  %8413 = vmatpush1.bf16.msra.mxu1 %v8010_v36  ;;  %v8055_v57 = vld [vmem:[#allocation10 + $0x5b8] sm:$0xff]  ;;  %v8052_v36 = vld [vmem:[#allocation10 + $0x5a0] sm:$0xff] }
 0x86a   :  { %8242 = vmatprep.subr.bf16.mxu0 %v8013_v3  ;;  %8414 = vmatprep.subr.bf16.mxu1 %v8015_v44  ;;  %v8054_v3 = vld [vmem:[#allocation10 + $0x5b0] sm:$0xff]  ;;  %v8057_v44 = vld [vmem:[#allocation10 + $0x5c8] sm:$0xff] }
 0x86d   :  { %8243 = vmatpush1.bf16.msra.mxu0 %v8012_v38  ;;  %8415 = vmatpush1.bf16.msra.mxu1 %v8014_v6  ;;  %v8059_v38 = vld [vmem:[#allocation10 + $0x5d8] sm:$0xff]  ;;  %v8056_v6 = vld [vmem:[#allocation10 + $0x5c0] sm:$0xff] }
 0x86e   :  { %8244 = vmatprep.subr.bf16.mxu0 %v8017_v31  ;;  %8416 = vmatprep.subr.bf16.mxu1 %v8019_v41  ;;  %v8058_v31 = vld [vmem:[#allocation10 + $0x5d0] sm:$0xff]  ;;  %v8061_v41 = vld [vmem:[#allocation10 + $0x5e8] sm:$0xff] }
 0x871   :  { %8245 = vmatpush1.bf16.msra.mxu0 %v8016_v46  ;;  %8417 = vmatpush1.bf16.msra.mxu1 %v8018_v34  ;;  %v8063_v46 = vld [vmem:[#allocation10 + $0x5f8] sm:$0xff]  ;;  %v8060_v34 = vld [vmem:[#allocation10 + $0x5e0] sm:$0xff] }
 0x872   :  { %8246 = vmatprep.subr.bf16.mxu0 %v8021_v42  ;;  %8418 = vmatprep.subr.bf16.mxu1 %v8023_v54  ;;  %v8062_v42 = vld [vmem:[#allocation10 + $0x5f0] sm:$0xff]  ;;  %v8065_v54 = vld [vmem:[#allocation10 + $0x608] sm:$0xff] }
 0x875   :  { %8247 = vmatpush1.bf16.msra.mxu0 %v8020_v32  ;;  %8419 = vmatpush1.bf16.msra.mxu1 %v8022_v59  ;;  %v8067_v32 = vld [vmem:[#allocation10 + $0x618] sm:$0xff]  ;;  %v7868_v59 = vpack.c.bf16 %v7822_v62, %v7820_v5  ;;  %v8074_v62 = vld [vmem:[#allocation10 + $0x650] sm:$0xff] }
 0x876   :  { %8248 = vmatprep.subr.bf16.mxu0 %v8025_v28  ;;  %8420 = vmatprep.subr.bf16.mxu1 %v8027_v60  ;;  %v8064_v28 = vld [vmem:[#allocation10 + $0x600] sm:$0xff]  ;;  %v8066_v60 = vld [vmem:[#allocation10 + $0x610] sm:$0xff]  ;;  %v8075_v5 = vld [vmem:[#allocation10 + $0x658] sm:$0xff] }
 0x879   :  { %8249 = vmatpush1.bf16.msra.mxu0 %v8024_v10  ;;  %8421 = vmatpush1.bf16.msra.mxu1 %v8026_v15  ;;  %v8069_v10 = vld [vmem:[#allocation10 + $0x628] sm:$0xff]  ;;  %v8071_v15 = vld [vmem:[#allocation10 + $0x638] sm:$0xff] }
 0x87a   :  { %8250 = vmatprep.subr.bf16.mxu0 %v8029_v23  ;;  %8422 = vmatprep.subr.bf16.mxu1 %v8031_v22  ;;  %v7871_v23 = vpack.c.bf16 %v7827_v33, %v7825_v14  ;;  %v8078_v14 = vld [vmem:[#allocation10 + $0x670] sm:$0xff]  ;;  %v8083_v33 = vld [vmem:[#allocation10 + $0x698] sm:$0xff]  ;;  %v8080_v22 = vld [vmem:[#allocation10 + $0x680] sm:$0xff] }
 0x87d   :  { %8251 = vmatpush1.bf16.msra.mxu0 %v8028_v12  ;;  %8423 = vmatpush1.bf16.msra.mxu1 %v8030_v40  ;;  %v8082_v12 = vld [vmem:[#allocation10 + $0x690] sm:$0xff]  ;;  %v8085_v40 = vld [vmem:[#allocation10 + $0x6a8] sm:$0xff] }
 0x87e   :  { %8252 = vmatprep.subr.bf16.mxu0 %v8033_v17  ;;  %8424 = vmatprep.subr.bf16.mxu1 %v8035_v47  ;;  %v8087_v17 = vld [vmem:[#allocation10 + $0x6b8] sm:$0xff]  ;;  %v8084_v47 = vld [vmem:[#allocation10 + $0x6a0] sm:$0xff] }
 0x881   :  { %8253 = vmatpush1.bf16.msra.mxu0 %v8032_v48  ;;  %8425 = vmatpush1.bf16.msra.mxu1 %v8034_v49  ;;  %v8086_v48 = vld [vmem:[#allocation10 + $0x6b0] sm:$0xff]  ;;  %v8089_v49 = vld [vmem:[#allocation10 + $0x6c8] sm:$0xff] }
 0x882   :  { %8254 = vmatprep.subr.bf16.mxu0 %v8037_v50  ;;  %8426 = vmatprep.subr.bf16.mxu1 %v8039_v53  ;;  %v8091_v50 = vld [vmem:[#allocation10 + $0x6d8] sm:$0xff]  ;;  %v8088_v53 = vld [vmem:[#allocation10 + $0x6c0] sm:$0xff] }
 0x885   :  { %8255 = vmatpush1.bf16.msra.mxu0 %v8036_v63  ;;  %8427 = vmatpush1.bf16.msra.mxu1 %v8038_v2  ;;  %v8090_v63 = vld [vmem:[#allocation10 + $0x6d0] sm:$0xff]  ;;  %v8093_v2 = vld [vmem:[#allocation10 + $0x6e8] sm:$0xff] }
 0x886   :  { %8256 = vmatprep.subr.bf16.mxu0 %v8041_v0  ;;  %8428 = vmatprep.subr.bf16.mxu1 %v8043_v20  ;;  %v8095_v0 = vld [vmem:[#allocation10 + $0x6f8] sm:$0xff]  ;;  %v8092_v20 = vld [vmem:[#allocation10 + $0x6e0] sm:$0xff] }
 0x889   :  { %8257 = vmatpush1.bf16.msra.mxu0 %v8040_v52  ;;  %8429 = vmatpush1.bf16.msra.mxu1 %v8042_v56  ;;  %v8094_v52 = vld [vmem:[#allocation10 + $0x6f0] sm:$0xff]  ;;  %v8097_v56 = vld [vmem:[#allocation10 + $0x708] sm:$0xff] }
 0x88a   :  { %8258 = vmatprep.subr.bf16.mxu0 %v8045_v43  ;;  %8430 = vmatprep.subr.bf16.mxu1 %v8047_v29  ;;  %v8099_v43 = vld [vmem:[#allocation10 + $0x718] sm:$0xff]  ;;  %v8096_v29 = vld [vmem:[#allocation10 + $0x700] sm:$0xff] }
 0x88d   :  { %8259 = vmatpush1.bf16.msra.mxu0 %v8044_v35  ;;  %8431 = vmatpush1.bf16.msra.mxu1 %v8046_v39  ;;  %v8098_v35 = vld [vmem:[#allocation10 + $0x710] sm:$0xff]  ;;  %v8101_v39 = vld [vmem:[#allocation10 + $0x728] sm:$0xff] }
 0x88e   :  { %8260 = vmatprep.subr.bf16.mxu0 %v8049_v45  ;;  %8432 = vmatprep.subr.bf16.mxu1 %v8051_v19  ;;  %v8103_v45 = vld [vmem:[#allocation10 + $0x738] sm:$0xff]  ;;  %v8100_v19 = vld [vmem:[#allocation10 + $0x720] sm:$0xff] }
 0x891   :  { %8261 = vmatpush1.bf16.msra.mxu0 %v8048_v51  ;;  %8433 = vmatpush1.bf16.msra.mxu1 %v8050_v13  ;;  %v8102_v51 = vld [vmem:[#allocation10 + $0x730] sm:$0xff]  ;;  %v8105_v13 = vld [vmem:[#allocation10 + $0x748] sm:$0xff] }
 0x892   :  { %8262 = vmatprep.subr.bf16.mxu0 %v8053_v55  ;;  %8434 = vmatprep.subr.bf16.mxu1 %v8055_v57  ;;  %v8107_v55 = vld [vmem:[#allocation10 + $0x758] sm:$0xff]  ;;  %v8104_v57 = vld [vmem:[#allocation10 + $0x740] sm:$0xff] }
 0x895   :  { %8263 = vmatpush1.bf16.msra.mxu0 %v8052_v36  ;;  %8435 = vmatpush1.bf16.msra.mxu1 %v8054_v3  ;;  %v8106_v36 = vld [vmem:[#allocation10 + $0x750] sm:$0xff]  ;;  %v8109_v3 = vld [vmem:[#allocation10 + $0x768] sm:$0xff] }
 0x896   :  { %8264 = vmatprep.subr.bf16.mxu0 %v8057_v44  ;;  %8436 = vmatprep.subr.bf16.mxu1 %v8059_v38  ;;  %v8111_v44 = vld [vmem:[#allocation10 + $0x778] sm:$0xff]  ;;  %v8108_v38 = vld [vmem:[#allocation10 + $0x760] sm:$0xff] }
 0x899   :  { %8265 = vmatpush1.bf16.msra.mxu0 %v8056_v6  ;;  %8437 = vmatpush1.bf16.msra.mxu1 %v8058_v31  ;;  %v8110_v6 = vld [vmem:[#allocation10 + $0x770] sm:$0xff]  ;;  %v8113_v31 = vld [vmem:[#allocation10 + $0x788] sm:$0xff] }
 0x89a   :  { %8266 = vmatprep.subr.bf16.mxu0 %v8061_v41  ;;  %8438 = vmatprep.subr.bf16.mxu1 %v8063_v46  ;;  %v8115_v41 = vld [vmem:[#allocation10 + $0x798] sm:$0xff]  ;;  %v8112_v46 = vld [vmem:[#allocation10 + $0x780] sm:$0xff] }
 0x89d   :  { %8267 = vmatpush1.bf16.msra.mxu0 %v8060_v34  ;;  %8439 = vmatpush1.bf16.msra.mxu1 %v8062_v42  ;;  %v8114_v34 = vld [vmem:[#allocation10 + $0x790] sm:$0xff]  ;;  %v8117_v42 = vld [vmem:[#allocation10 + $0x7a8] sm:$0xff] }
 0x89e   :  { %8279 = vmatprep.subr.bf16.mxu0 %v8065_v54  ;;  %8451 = vmatprep.subr.bf16.mxu1 %v8067_v32  ;;  %v8119_v54 = vld [vmem:[#allocation10 + $0x7b8] sm:$0xff]  ;;  %v8116_v32 = vld [vmem:[#allocation10 + $0x7a0] sm:$0xff] }
 0x8a0   :  { %8269 = vmatmul.mubr.bf16.vlgmr.msra.gmra.mrb[136].mxu0 %v7868_v59  ;;  %8441 = vmatmul.mubr.bf16.vlgmr.msra.gmra.mrb[120].mxu1 %v7868_v59  ;;  %v8118_v59 = vld [vmem:[#allocation10 + $0x7b0] sm:$0xff] }
 0x8a1   :  { %8280 = vmatpush1.bf16.msra.mxu0 %v8064_v28  ;;  %8452 = vmatpush1.bf16.msra.mxu1 %v8066_v60  ;;  %v8121_v28 = vld [vmem:[#allocation10 + $0x7c8] sm:$0xff]  ;;  %v8123_v60 = vld [vmem:[#allocation10 + $0x7d8] sm:$0xff] }
 0x8a2   :  { %8281 = vmatprep.subr.bf16.mxu0 %v8069_v10  ;;  %8453 = vmatprep.subr.bf16.mxu1 %v8071_v15  ;;  %v8120_v10 = vld [vmem:[#allocation10 + $0x7c0] sm:$0xff]  ;;  %v8122_v15 = vld [vmem:[#allocation10 + $0x7d0] sm:$0xff] }
 0x8a3   :  { %8311 = vmatprep.mubr.bf16.mxu0 %v7871_v23  ;;  %8483 = vmatprep.mubr.bf16.mxu1 %v7871_v23  ;;  %v8125_v23 = vld [vmem:[#allocation10 + $0x7e8] sm:$0xff] }
 0x8a5   :  { %8282 = vmatpush1.bf16.msra.mxu0 %v8068_v1  ;;  %8454 = vmatpush1.bf16.msra.mxu1 %v8070_v37  ;;  %v8127_v1 = vld [vmem:[#allocation10 + $0x7f8] sm:$0xff]  ;;  %v8124_v37 = vld [vmem:[#allocation10 + $0x7e0] sm:$0xff] }
 0x8a6   :  { %8283 = vmatprep.subr.bf16.mxu0 %v8073_v4  ;;  %8455 = vmatprep.subr.bf16.mxu1 %v8075_v5  ;;  %v8126_v4 = vld [vmem:[#allocation10 + $0x7f0] sm:$0xff]  ;;  %v7870_v5 = vpack.c.bf16 %v7826_v61, %v7824_v9 }
 0x8a9   :  { %8284 = vmatpush1.bf16.msra.mxu0 %v8072_v58  ;;  %8456 = vmatpush1.bf16.msra.mxu1 %v8074_v62  ;;  %v8140_v58 = vsub.s32 2, %v11772_v25  ;;  %v8128_v62 = vld [vmem:[%s11962_s14] sm:$0xf]  ;;  %s9417_s14 = smov [#allocation12]  }
 0x8aa   :  { %8285 = vmatprep.subr.bf16.mxu0 %v8077_v11  ;;  %8457 = vmatprep.subr.bf16.mxu1 %v8079_v18  ;;  %v8144_v11 = vsub.s32 3, %v11772_v25  ;;  %v8133_v18 = vrot.slane %v8128_v62, %v7642_v26  ;;  %v8137_v16 = vrot.slane %v8128_v62, %v7646_v27  ;;  %s8523_s23 = sshll.u32 %s9417_s14, 4  ;;  %s8524_s23 = int_to_ptr.vmem [resolvable:$true] %s8523_s23 }
 0x8ab   :  { %v8141_v8 = vrot.slane %v8128_v62, %v8140_v58  ;;  %s9388_s8 = scalar_lea.vmem %s8524_s23, 1024  ;;  %p9393_p1 = scmp.lt.s32.totalorder %s8524_s23, %s8524_s23 }
 0x8ac   :  { %v8145_v21 = vrot.slane %v8128_v62, %v8144_v11  ;;  %p9389_p0 = scmp.ne.s32.totalorder %s8524_s23, %s9388_s8  ;;  %p9394_p2 = scmp.lt.s32.totalorder %s9388_s8, %s9388_s8 }
 0x8ad   :  { %8286 = vmatpush1.bf16.msra.mxu0 %v8076_v7  ;;  %8458 = vmatpush1.bf16.msra.mxu1 %v8078_v14 }
 0x8ae   :  { %8287 = vmatprep.subr.bf16.mxu0 %v8081_v30  ;;  %8459 = vmatprep.subr.bf16.mxu1 %v8083_v33  ;;  %p9395_p3 = por %p9394_p2, %p9393_p1 }
 0x8b0   :  { %p9396_p4 = pnand %p9395_p3, %p9389_p0 }
 0x8b1   :  { %8288 = vmatpush1.bf16.msra.mxu0 %v8080_v22  ;;  %8460 = vmatpush1.bf16.msra.mxu1 %v8082_v12 }
 0x8b2   :  { %8289 = vmatprep.subr.bf16.mxu0 %v8085_v40  ;;  %8461 = vmatprep.subr.bf16.mxu1 %v8087_v17 }
 0x8b5   :  { %8290 = vmatpush1.bf16.msra.mxu0 %v8084_v47  ;;  %8462 = vmatpush1.bf16.msra.mxu1 %v8086_v48 }
 0x8b6   :  { %8291 = vmatprep.subr.bf16.mxu0 %v8089_v49  ;;  %8463 = vmatprep.subr.bf16.mxu1 %v8091_v50 }
 0x8b9   :  { %8292 = vmatpush1.bf16.msra.mxu0 %v8088_v53  ;;  %8464 = vmatpush1.bf16.msra.mxu1 %v8090_v63 }
 0x8ba   :  { %8293 = vmatprep.subr.bf16.mxu0 %v8093_v2  ;;  %8465 = vmatprep.subr.bf16.mxu1 %v8095_v0 }
 0x8bd   :  { %8294 = vmatpush1.bf16.msra.mxu0 %v8092_v20  ;;  %8466 = vmatpush1.bf16.msra.mxu1 %v8094_v52 }
 0x8be   :  { %8295 = vmatprep.subr.bf16.mxu0 %v8097_v56  ;;  %8467 = vmatprep.subr.bf16.mxu1 %v8099_v43 }
 0x8c1   :  { %8296 = vmatpush1.bf16.msra.mxu0 %v8096_v29  ;;  %8468 = vmatpush1.bf16.msra.mxu1 %v8098_v35 }
 0x8c2   :  { %8297 = vmatprep.subr.bf16.mxu0 %v8101_v39  ;;  %8469 = vmatprep.subr.bf16.mxu1 %v8103_v45 }
 0x8c5   :  { %8298 = vmatpush1.bf16.msra.mxu0 %v8100_v19  ;;  %8470 = vmatpush1.bf16.msra.mxu1 %v8102_v51 }
 0x8c6   :  { %8299 = vmatprep.subr.bf16.mxu0 %v8105_v13  ;;  %8471 = vmatprep.subr.bf16.mxu1 %v8107_v55 }
 0x8c9   :  { %8300 = vmatpush1.bf16.msra.mxu0 %v8104_v57  ;;  %8472 = vmatpush1.bf16.msra.mxu1 %v8106_v36 }
 0x8ca   :  { %8301 = vmatprep.subr.bf16.mxu0 %v8109_v3  ;;  %8473 = vmatprep.subr.bf16.mxu1 %v8111_v44 }
 0x8cd   :  { %8302 = vmatpush1.bf16.msra.mxu0 %v8108_v38  ;;  %8474 = vmatpush1.bf16.msra.mxu1 %v8110_v6 }
 0x8ce   :  { %8303 = vmatprep.subr.bf16.mxu0 %v8113_v31  ;;  %8475 = vmatprep.subr.bf16.mxu1 %v8115_v41 }
 0x8d1   :  { %8304 = vmatpush1.bf16.msra.mxu0 %v8112_v46  ;;  %8476 = vmatpush1.bf16.msra.mxu1 %v8114_v34 }
 0x8d2   :  { %8305 = vmatprep.subr.bf16.mxu0 %v8117_v42  ;;  %8477 = vmatprep.subr.bf16.mxu1 %v8119_v54 }
 0x8d5   :  { %8306 = vmatpush1.bf16.msra.mxu0 %v8116_v32  ;;  %8478 = vmatpush1.bf16.msra.mxu1 %v8118_v59 }
 0x8d6   :  { %8307 = vmatprep.subr.bf16.mxu0 %v8121_v28  ;;  %8479 = vmatprep.subr.bf16.mxu1 %v8123_v60 }
 0x8d9   :  { %8308 = vmatpush1.bf16.msra.mxu0 %v8120_v10  ;;  %8480 = vmatpush1.bf16.msra.mxu1 %v8122_v15 }
 0x8da   :  { %8309 = vmatprep.subr.bf16.mxu0 %v8125_v23  ;;  %8481 = vmatprep.subr.bf16.mxu1 %v8127_v1 }
 0x8dd   :  { %8310 = vmatpush1.bf16.msra.mxu0 %v8124_v37  ;;  %8482 = vmatpush1.bf16.msra.mxu1 %v8126_v4 }
 0x8e0   :  { %8312 = vmatmul.mubr.bf16.vlgmr.msra.gmra.mrb[136].mxu0 %v7870_v5  ;;  %8484 = vmatmul.mubr.bf16.vlgmr.msra.gmra.mrb[120].mxu1 %v7870_v5 }
 0x9b3   :  { %v8313_v9 = vpop.f32.mrb[136].mxu0  ;;  %v8485_v24 = vpop.f32.mrb[120].mxu1 }
 0x9b4   :  { %v9246_v61 = vadd.f32 %v8313_v9, %v8133_v18  ;;  %v9250_v7 = vadd.f32 %v8485_v24, %v8141_v8  ;;  %v8315_v14 = vpop.f32.mrb[137].mxu0  ;;  %v8487_v30 = vpop.f32.mrb[121].mxu1 }
 0x9b5   :  { %v9247_v33 = vadd.f32 %v8315_v14, %v8137_v16  ;;  %v9251_v22 = vadd.f32 %v8487_v30, %v8145_v21  ;;  %v8317_v12 = vpop.f32.mrb[138].mxu0  ;;  %v8489_v40 = vpop.f32.mrb[122].mxu1 }
 0x9b6   :  { %v8494_v17 = vmul.f32 0.2, %v9246_v61  ;;  %v8496_v47 = vmul.f32 0.2, %v9250_v7  ;;  %v9248_v48 = vadd.f32 %v8317_v12, %v8133_v18  ;;  %v9252_v49 = vadd.f32 %v8489_v40, %v8141_v8  ;;  %v8319_v26 = vpop.f32.mrb[139].mxu0  ;;  %v8491_v50 = vpop.f32.mrb[123].mxu1 }
 0x9b7   :  { %v8495_v53 = vmul.f32 0.2, %v9247_v33  ;;  %v8497_v25 = vmul.f32 0.2, %v9251_v22  ;;  %v9249_v27 = vadd.f32 %v8319_v26, %v8137_v16  ;;  %v9253_v63 = vadd.f32 %v8491_v50, %v8145_v21 }
 0x9b8   :  { %v8502_v2 = vmax.f32 %v9246_v61, %v8494_v17  ;;  %v8504_v0 = vmax.f32 %v9250_v7, %v8496_v47  ;;  %v8498_v20 = vmul.f32 0.2, %v9248_v48  ;;  %v8500_v52 = vmul.f32 0.2, %v9252_v49 }
 0x9b9   :  { %v8503_v56 = vmax.f32 %v9247_v33, %v8495_v53  ;;  %v8505_v43 = vmax.f32 %v9251_v22, %v8497_v25  ;;  %v8499_v29 = vmul.f32 0.2, %v9249_v27  ;;  %v8501_v35 = vmul.f32 0.2, %v9253_v63 }
 0x9ba   :  { %8510 = vst [vmem:[#allocation12] sm:$0xff] %v8502_v2  ;;  %8512 = vst [vmem:[#allocation12 + $0x10] sm:$0xff] %v8504_v0  ;;  %v8506_v39 = vmax.f32 %v9248_v48, %v8498_v20  ;;  %v8508_v45 = vmax.f32 %v9252_v49, %v8500_v52 }
 0x9bb   :  { %8511 = vst [vmem:[#allocation12 + $0x8] sm:$0xff] %v8503_v56  ;;  %8513 = vst [vmem:[#allocation12 + $0x18] sm:$0xff] %v8505_v43  ;;  %v8507_v19 = vmax.f32 %v9249_v27, %v8499_v29  ;;  %v8509_v51 = vmax.f32 %v9253_v63, %v8501_v35 }
 0x9bc   :  { %8514 = vst [vmem:[#allocation12 + $0x20] sm:$0xff] %v8506_v39  ;;  %8516 = vst [vmem:[#allocation12 + $0x30] sm:$0xff] %v8508_v45 }
 0x9bd   :  { %8515 = vst [vmem:[#allocation12 + $0x28] sm:$0xff] %v8507_v19  ;;  %8517 = vst [vmem:[#allocation12 + $0x38] sm:$0xff] %v8509_v51 }
 0x9be   :  { %9399 = shalt.err (!%p9396_p4)
}
 0x9bf   :  { %s9400_s6 = scalar_lea.hbm %s11963_s15, 1024 }
 0x9c0   :  { %p9401_p5 = scmp.ne.s32.totalorder %s11963_s15, %s9400_s6  ;;  %p9404_p6 = scmp.lt.u32.totalorder %s9400_s6, %s11963_s15 }
 0x9c2   :  { %p9406_p7 = pnand %p9404_p6, %p9401_p5 }
 0x9c4   :  { %9409 = shalt.err (!%p9406_p7)
}
 0x9c5   :  { %s9418_s28 = smov 512   ;;  %s9419_s10 = smov 32  }
 0x9c6   :  { %8529 = dma.vmem_to_hbm [thread:$0]  %s8524_s23, 1024, %s11963_s15, [#allocation13], %s9418_s28, %s9418_s28, %s9419_s10  }
 0x9c7   :  { %9414 = dma.done.wait [#allocation13], 1024  }
 0x9c8   :  { %9415 = vsyncadd [#allocation13], 4294966272 }
 0x9c9   :  { %8533 = vsyncpa [#allocation13], 1 }
 0x9ca   :  { %8534 = vsyncmov [#allocation11] }
 0x9cd   :  { %s8535_s0 = vpop.sfrf %8534 }
 0x9ce   :  { %p8745_p8 = scmp.ne.s32.totalorder %s8535_s0, 0 }
 0x9d0   :  { %8539 = shalt.err (%p8745_p8)  }
 0x9d1   :  { %8541 = vsyncmov [#allocation11 + $0x1] }
 0x9d4   :  { %s8542_s3 = vpop.sfrf %8541 }
 0x9d5   :  { %p8746_p9 = scmp.ne.s32.totalorder %s8542_s3, 0 }
 0x9d7   :  { %8546 = shalt.err (%p8746_p9)  }

</bundles_post_ra>
